<compile_context>
chip_gen: v7x
topology: tpu7x:2x2x1
jax: 0.10.0
libtpu: 0.0.40
codegen_flags: <defaults>
</compile_context>

<pallas_src>
import jax
import jax.numpy as jnp
from jax import lax
from jax.experimental import pallas as pl
from jax.experimental.pallas import tpu as pltpu

# -------- scaled-down configuration (module defaults: 840/1024/8 layers) ----
B, S = 2, 8
IN_FEATURE = 128          # stands in for in_feature = 840 (== d_model)
D_MODEL = 128             # stands in for d_model = 840
EMB_SIZE = 256            # stands in for decoder_embedding_size = 1024
GRU_LAYERS = 2            # stands in for num_layers = 8 (stacked GRU depth)
BLOCK_NUMBER = 4
LN_EPS = 1e-5


# ---------------------------------------------------------------------------
# Fused kernel: whole batch per grid step, everything VMEM-resident.
# ---------------------------------------------------------------------------
def _decoder_kernel(x_ref, mask_ref,
                    fcw_ref, fcb_ref, lng_ref, lnb_ref,
                    wih_ref, whh_ref, bih_ref, bhh_ref,
                    fc1w_ref, fc1b_ref,
                    o_ref,
                    seq_ref):
    BB, SS, Fin = x_ref.shape
    D = fcw_ref.shape[1]
    E = fc1w_ref.shape[1]

    emb = x_ref[...]                                     # (BB, S, Fin) f32
    emb_bf = emb.astype(jnp.bfloat16)                    # attention query
    add_mask = mask_ref[...]                             # (BB, S, S) row+col additive mask

    # ---- fc -> ReLU -> (dropout = id, eval) -> LayerNorm, all BB*S rows -----
    x2 = emb.reshape(BB * SS, Fin).astype(jnp.bfloat16)
    h = jnp.dot(x2, fcw_ref[...], preferred_element_type=jnp.float32) + fcb_ref[...]
    h = jnp.maximum(h, 0.0)
    mu = jnp.mean(h, axis=-1, keepdims=True)
    var = jnp.mean((h - mu) ** 2, axis=-1, keepdims=True)
    ln = (h - mu) * lax.rsqrt(var + LN_EPS) * lng_ref[...] + lnb_ref[...]
    out = ln.reshape(BB, SS, D)                          # (BB, S, D) f32

    for blk in range(BLOCK_NUMBER):
        residual = out
        seq_ref[...] = out                               # GRU layer-0 input

        # ---- stacked GRU (batch_first, h0 = 0, inter-layer dropout = id) ----
        # Bounded fori_loop over layers with dynamic weight indexing; only the
        # short time loop is unrolled.
        def gru_layer(layer, carry, blk=blk):
            idx = blk * GRU_LAYERS + layer               # (block, layer) weight slot
            wi = wih_ref[idx]                            # (D, 3D) bf16
            wh = whh_ref[idx]                            # (D, 3D) bf16
            bi = bih_ref[idx]                            # (1, 3D) f32
            bh = bhh_ref[idx]                            # (1, 3D) f32

            # Input projection hoisted out of the recurrence: one big-LHS MXU
            # matmul over all BB*S rows of this layer's input.
            seq = seq_ref[...]                           # (BB, S, D)
            gx_all = (jnp.dot(seq.reshape(BB * SS, D).astype(jnp.bfloat16), wi,
                              preferred_element_type=jnp.float32)
                      + bi).reshape(BB, SS, 3 * D)

            # Serial recurrence, batched over BB sublanes / MXU rows.
            # (A further step would hold `wh` stationary in the MXU across the
            # S steps via pltpu.matmul_push_rhs/acc_lhs/pop; left to Mosaic
            # here since the RHS of these back-to-back dots is identical.)
            hstate = jnp.zeros((BB, D), jnp.float32)
            for t in range(SS):                          # fully unrolled time loop
                gh = jnp.dot(hstate.astype(jnp.bfloat16), wh,
                             preferred_element_type=jnp.float32) + bh   # (BB, 3D)
                gx = gx_all[:, t, :]                                    # (BB, 3D)
                r = jax.nn.sigmoid(gx[:, :D] + gh[:, :D])
                z = jax.nn.sigmoid(gx[:, D:2 * D] + gh[:, D:2 * D])
                n = jnp.tanh(gx[:, 2 * D:] + r * gh[:, 2 * D:])
                hstate = (1.0 - z) * n + z * hstate                     # f32 state
                seq_ref[:, t, :] = hstate                # write in place (no concat)
            return carry

        lax.fori_loop(0, GRU_LAYERS, gru_layer, 0)
        out = seq_ref[...]                               # last layer's sequence

        # ---- masked residual fusion attention (blocks 1 and 2 only) ---------
        if blk in (1, 2):
            # scores: raw input embeddings (query) x pre-GRU residual (key)
            s = jnp.einsum('bqd,bkd->bqk', emb_bf, residual.astype(jnp.bfloat16),
                           preferred_element_type=jnp.float32)          # (BB, S, S)
            s = jnp.maximum(s, 0.0) + add_mask           # ReLU, then row+col mask
            m = jnp.max(s, axis=-1, keepdims=True)
            e = jnp.exp(s - m)
            p = e / jnp.sum(e, axis=-1, keepdims=True)   # exact softmax (torch parity)
            fd = jnp.einsum('bqk,bkd->bqd', p.astype(jnp.bfloat16),
                            out.astype(jnp.bfloat16),
                            preferred_element_type=jnp.float32)         # (BB, S, D)
            out = jnp.maximum(fd, 0.0) + out

    # ---- fc1 ----------------------------------------------------------------
    o = jnp.dot(out.reshape(BB * SS, D).astype(jnp.bfloat16), fc1w_ref[...],
                preferred_element_type=jnp.float32) + fc1b_ref[...]
    o_ref[...] = o.reshape(BB, SS, E)


def _cost_estimate(bc, sc, fin):
    d, e, l, nb = D_MODEL, EMB_SIZE, GRU_LAYERS, BLOCK_NUMBER
    flops = (2 * bc * sc * fin * d                                   # fc
             + nb * l * 4 * bc * sc * d * 3 * d                      # GRU gx + gh
             + 2 * (2 * bc * sc * sc * fin + 2 * bc * sc * sc * d)   # 2x fusion attn
             + 2 * bc * sc * d * e)                                  # fc1
    trans = nb * l * bc * sc * 3 * d + 2 * bc * sc * sc
    bytes_acc = (bc * sc * fin * 4 + bc * sc * sc * 4                          # x, mask
                 + (fin * d + 2 * nb * l * d * 3 * d + d * e) * 2              # bf16 W
                 + (3 * d + 2 * nb * l * 3 * d + e) * 4                        # f32 biases
                 + bc * sc * e * 4)                                            # output
    return pl.CostEstimate(flops=flops, transcendentals=trans, bytes_accessed=bytes_acc)


@jax.jit
def decoder_forward(params, input_embeddings_batch, input_masks_batch,
                    input_masks_invert=None, target_ids_batch_converted=None):
    # input_masks_invert / target_ids are only consumed by the external
    # pretrained LM head, which is not translated (see TODO at bottom).
    del input_masks_invert, target_ids_batch_converted
    Bc, Sc, Fin = input_embeddings_batch.shape
    D, E, L, NB = D_MODEL, EMB_SIZE, GRU_LAYERS, BLOCK_NUMBER

    # Pre-combined additive attention mask: (1-m)*-1e4 on key (cols) + query
    # (rows), added after ReLU(scores) and before softmax — exactly the
    # attention_mask + attention_mask_ broadcast of the PyTorch module.
    neg = (1.0 - input_masks_batch.astype(jnp.float32)) * -10000.0
    add_mask = neg[:, None, :] + neg[:, :, None]                      # (B, S, S)

    # bf16 matmul operands; accumulation stays f32 inside the kernel.  GRU
    # weights/biases are flattened to one (block*layer) leading axis so the
    # kernel can index them dynamically from the layer fori_loop.
    fcw = params["fc_w"].astype(jnp.bfloat16)
    fc1w = params["fc1_w"].astype(jnp.bfloat16)
    wih = params["gru_wih"].reshape(NB * L, D, 3 * D).astype(jnp.bfloat16)
    whh = params["gru_whh"].reshape(NB * L, D, 3 * D).astype(jnp.bfloat16)
    bih = params["gru_bih"].reshape(NB * L, 1, 3 * D)
    bhh = params["gru_bhh"].reshape(NB * L, 1, 3 * D)

    # Whole batch per grid step: fills vreg sublanes and MXU rows (the serial
    # GRU recurrence then runs as (Bc, D) @ (D, 3D) instead of 1-row LHS).
    # For large batches, tile into >=8-row batch blocks over this "parallel"
    # axis so both v7x TensorCores get work.
    bblk = Bc
    grid = (pl.cdiv(Bc, bblk),)

    def full(*shape):
        return pl.BlockSpec(shape, lambda b, _n=len(shape): (0,) * _n)

    # NOTE: at the real 840/2520/8-layer config the GRU weights (~270 MB bf16)
    # must be streamed per (block, layer) (grid axis or pltpu.emit_pipeline
    # with manual double-buffering), weight specs kept single-buffered, and
    # the VMEM budget re-derived per generation (v7x's 64 MiB is binding).
    return pl.pallas_call(
        _decoder_kernel,
        out_shape=jax.ShapeDtypeStruct((Bc, Sc, E), jnp.float32),
        grid=grid,
        in_specs=[
            pl.BlockSpec((bblk, Sc, Fin), lambda b: (b, 0, 0)),        # x
            pl.BlockSpec((bblk, Sc, Sc), lambda b: (b, 0, 0)),         # combined mask
            full(Fin, D), full(1, D), full(1, D), full(1, D),          # fc / layernorm
            full(NB * L, D, 3 * D), full(NB * L, D, 3 * D),            # W_ih, W_hh
            full(NB * L, 1, 3 * D), full(NB * L, 1, 3 * D),            # b_ih, b_hh
            full(D, E), full(1, E),                                    # fc1
        ],
        out_specs=pl.BlockSpec((bblk, Sc, E), lambda b: (b, 0, 0)),
        scratch_shapes=[pltpu.VMEM((bblk, Sc, D), jnp.float32)],       # GRU sequence
        compiler_params=pltpu.CompilerParams(
            dimension_semantics=("parallel",)),
        cost_estimate=_cost_estimate(Bc, Sc, Fin),
    )(input_embeddings_batch, add_mask,
      fcw, params["fc_b"], params["ln_g"], params["ln_b"],
      wih, whh, bih, bhh,
      fc1w, params["fc1_b"])


# ---------------------------------------------------------------------------
# Parameters (deterministic synthetic init; weights stored pre-transposed as
# (in, out) so kernels can do x @ W directly; GRU gate order is [r | z | n]).
# ---------------------------------------------------------------------------
def init_params(key):
    scale = 1.0 / jnp.sqrt(jnp.float32(D_MODEL))
    ks = jax.random.split(key, 8)

    def u(k, shape):
        return jax.random.uniform(k, shape, jnp.float32, -scale, scale)

    return {
        "fc_w": u(ks[0], (IN_FEATURE, D_MODEL)),
        "fc_b": u(ks[1], (1, D_MODEL)),
        "ln_g": jnp.ones((1, D_MODEL), jnp.float32),
        "ln_b": jnp.zeros((1, D_MODEL), jnp.float32),
        "gru_wih": u(ks[2], (BLOCK_NUMBER, GRU_LAYERS, D_MODEL, 3 * D_MODEL)),
        "gru_whh": u(ks[3], (BLOCK_NUMBER, GRU_LAYERS, D_MODEL, 3 * D_MODEL)),
        "gru_bih": u(ks[4], (BLOCK_NUMBER, GRU_LAYERS, 1, 3 * D_MODEL)),
        "gru_bhh": u(ks[5], (BLOCK_NUMBER, GRU_LAYERS, 1, 3 * D_MODEL)),
        "fc1_w": u(ks[6], (D_MODEL, EMB_SIZE)),
        "fc1_b": u(ks[7], (1, EMB_SIZE)),
    }


if __name__ == "__main__":
    key = jax.random.PRNGKey(0)
    pkey, ekey = jax.random.split(key, 2)
    params = init_params(pkey)

    input_embeddings_batch = jax.random.normal(ekey, (B, S, IN_FEATURE), jnp.float32)
    input_masks_batch = jnp.ones((B, S), jnp.float32).at[:, S - 2:].set(0.0)
    input_masks_invert = 1.0 - input_masks_batch
    target_ids_batch_converted = jnp.zeros((B, S), jnp.int32)

    out = decoder_forward(params, input_embeddings_batch, input_masks_batch,
                          input_masks_invert, target_ids_batch_converted)
    jax.block_until_ready(out)
    assert out.shape == (B, S, EMB_SIZE) and out.dtype == jnp.float32
    # TODO(synk): the external `pretrained` seq2seq LM (e.g. BART) call has no
    # Pallas equivalent; the encoded embeddings fed to it are returned instead.
    print("KERNEL_OK")
</pallas_src>

<mosaic_0001>
module attributes {stable_mosaic.version = 11 : i64} {
  func.func @_decoder_kernel(%arg0: i32, %arg1: memref<2x8x128xf32, #tpu.memory_space<vmem>>, %arg2: memref<2x8x8xf32, #tpu.memory_space<vmem>>, %arg3: memref<128x128xbf16, #tpu.memory_space<vmem>>, %arg4: memref<1x128xf32, #tpu.memory_space<vmem>>, %arg5: memref<1x128xf32, #tpu.memory_space<vmem>>, %arg6: memref<1x128xf32, #tpu.memory_space<vmem>>, %arg7: memref<8x128x384xbf16, #tpu.memory_space<vmem>>, %arg8: memref<8x128x384xbf16, #tpu.memory_space<vmem>>, %arg9: memref<8x1x384xf32, #tpu.memory_space<vmem>>, %arg10: memref<8x1x384xf32, #tpu.memory_space<vmem>>, %arg11: memref<128x256xbf16, #tpu.memory_space<vmem>>, %arg12: memref<1x256xf32, #tpu.memory_space<vmem>>, %arg13: memref<2x8x256xf32, #tpu.memory_space<vmem>>, %arg14: memref<2x8x128xf32, #tpu.memory_space<vmem>>) attributes {dimension_semantics = [#tpu.dimension_semantics<parallel>], iteration_bounds = array<i64: 1>, scalar_prefetch = 0 : i64, scratch_operands = 1 : i64, tpu.core_type = #tpu.core_type<tc>, window_params = [{transform_indices = @transform_0, window_bounds = array<i64: 2, 8, 128>}, {transform_indices = @transform_1, window_bounds = array<i64: 2, 8, 8>}, {pipeline_mode = #tpu.pipeline_mode<synchronous>, transform_indices = @transform_2, window_bounds = array<i64: 128, 128>}, {pipeline_mode = #tpu.pipeline_mode<synchronous>, transform_indices = @transform_3, window_bounds = array<i64: 1, 128>}, {pipeline_mode = #tpu.pipeline_mode<synchronous>, transform_indices = @transform_4, window_bounds = array<i64: 1, 128>}, {pipeline_mode = #tpu.pipeline_mode<synchronous>, transform_indices = @transform_5, window_bounds = array<i64: 1, 128>}, {pipeline_mode = #tpu.pipeline_mode<synchronous>, transform_indices = @transform_6, window_bounds = array<i64: 8, 128, 384>}, {pipeline_mode = #tpu.pipeline_mode<synchronous>, transform_indices = @transform_7, window_bounds = array<i64: 8, 128, 384>}, {pipeline_mode = #tpu.pipeline_mode<synchronous>, transform_indices = @transform_8, window_bounds = array<i64: 8, 1, 384>}, {pipeline_mode = #tpu.pipeline_mode<synchronous>, transform_indices = @transform_9, window_bounds = array<i64: 8, 1, 384>}, {pipeline_mode = #tpu.pipeline_mode<synchronous>, transform_indices = @transform_10, window_bounds = array<i64: 128, 256>}, {pipeline_mode = #tpu.pipeline_mode<synchronous>, transform_indices = @transform_11, window_bounds = array<i64: 1, 256>}, {transform_indices = @transform_12, window_bounds = array<i64: 2, 8, 256>}]} {
    %c0 = arith.constant 0 : index
    %c0_0 = arith.constant 0 : index
    %c0_1 = arith.constant 0 : index
    %0 = vector.load %arg1[%c0, %c0_0, %c0_1] : memref<2x8x128xf32, #tpu.memory_space<vmem>>, vector<2x8x128xf32>
    %1 = arith.truncf %0 : vector<2x8x128xf32> to vector<2x8x128xbf16>
    %c0_2 = arith.constant 0 : index
    %c0_3 = arith.constant 0 : index
    %c0_4 = arith.constant 0 : index
    %2 = vector.load %arg2[%c0_2, %c0_3, %c0_4] : memref<2x8x8xf32, #tpu.memory_space<vmem>>, vector<2x8x8xf32>
    %3 = vector.shape_cast %0 : vector<2x8x128xf32> to vector<16x128xf32>
    %4 = arith.truncf %3 : vector<16x128xf32> to vector<16x128xbf16>
    %c0_5 = arith.constant 0 : index
    %c0_6 = arith.constant 0 : index
    %5 = vector.load %arg3[%c0_5, %c0_6] : memref<128x128xbf16, #tpu.memory_space<vmem>>, vector<128x128xbf16>
    %cst = arith.constant dense<0.000000e+00> : vector<16x128xf32>
    %6 = tpu.matmul %4, %5, %cst {dimension_numbers = #tpu.dot_dimension_numbers<[1], [0], [0], [1], [0, 0, 1, 1], [], []>} : vector<16x128xbf16>, vector<128x128xbf16>, vector<16x128xf32> -> vector<16x128xf32>
    %c0_7 = arith.constant 0 : index
    %c0_8 = arith.constant 0 : index
    %7 = vector.load %arg4[%c0_7, %c0_8] : memref<1x128xf32, #tpu.memory_space<vmem>>, vector<1x128xf32>
    %8 = vector.broadcast %7 : vector<1x128xf32> to vector<16x128xf32>
    %9 = arith.addf %6, %8 : vector<16x128xf32>
    %cst_9 = arith.constant 0.000000e+00 : f32
    %10 = vector.broadcast %cst_9 : f32 to vector<16x128xf32>
    %11 = arith.maximumf %9, %10 : vector<16x128xf32>
    %cst_10 = arith.constant dense<0.000000e+00> : vector<16xf32>
    %12 = vector.multi_reduction <add>, %11, %cst_10 [1] : vector<16x128xf32> to vector<16xf32>
    %13 = vector.shape_cast %12 : vector<16xf32> to vector<16x1xf32>
    %cst_11 = arith.constant 1.280000e+02 : f32
    %14 = vector.broadcast %cst_11 : f32 to vector<16x1xf32>
    %15 = arith.divf %13, %14 : vector<16x1xf32>
    %16 = vector.broadcast %15 : vector<16x1xf32> to vector<16x128xf32>
    %17 = arith.subf %11, %16 : vector<16x128xf32>
    %18 = arith.mulf %17, %17 : vector<16x128xf32>
    %cst_12 = arith.constant dense<0.000000e+00> : vector<16xf32>
    %19 = vector.multi_reduction <add>, %18, %cst_12 [1] : vector<16x128xf32> to vector<16xf32>
    %20 = vector.shape_cast %19 : vector<16xf32> to vector<16x1xf32>
    %cst_13 = arith.constant 1.280000e+02 : f32
    %21 = vector.broadcast %cst_13 : f32 to vector<16x1xf32>
    %22 = arith.divf %20, %21 : vector<16x1xf32>
    %23 = vector.broadcast %15 : vector<16x1xf32> to vector<16x128xf32>
    %24 = arith.subf %11, %23 : vector<16x128xf32>
    %cst_14 = arith.constant 9.99999974E-6 : f32
    %25 = vector.broadcast %cst_14 : f32 to vector<16x1xf32>
    %26 = arith.addf %22, %25 : vector<16x1xf32>
    %27 = math.rsqrt %26 : vector<16x1xf32>
    %28 = vector.broadcast %27 : vector<16x1xf32> to vector<16x128xf32>
    %29 = arith.mulf %24, %28 : vector<16x128xf32>
    %c0_15 = arith.constant 0 : index
    %c0_16 = arith.constant 0 : index
    %30 = vector.load %arg5[%c0_15, %c0_16] : memref<1x128xf32, #tpu.memory_space<vmem>>, vector<1x128xf32>
    %31 = vector.broadcast %30 : vector<1x128xf32> to vector<16x128xf32>
    %32 = arith.mulf %29, %31 : vector<16x128xf32>
    %c0_17 = arith.constant 0 : index
    %c0_18 = arith.constant 0 : index
    %33 = vector.load %arg6[%c0_17, %c0_18] : memref<1x128xf32, #tpu.memory_space<vmem>>, vector<1x128xf32>
    %34 = vector.broadcast %33 : vector<1x128xf32> to vector<16x128xf32>
    %35 = arith.addf %32, %34 : vector<16x128xf32>
    %36 = vector.shape_cast %35 : vector<16x128xf32> to vector<2x8x128xf32>
    %c0_19 = arith.constant 0 : index
    %c0_20 = arith.constant 0 : index
    %c0_21 = arith.constant 0 : index
    %37 = vector.load %arg14[%c0_19, %c0_20, %c0_21] : memref<2x8x128xf32, #tpu.memory_space<vmem>>, vector<2x8x128xf32>
    tpu.vector_store %arg14[%c0_19, %c0_20, %c0_21], %36 {strides = array<i32>} : memref<2x8x128xf32, #tpu.memory_space<vmem>>, vector<2x8x128xf32>,
    %c0_i32 = arith.constant 0 : i32
    %c2_i32 = arith.constant 2 : i32
    %38 = arith.addi %c0_i32, %c2_i32 : i32
    %c1_i32 = arith.constant 1 : i32
    scf.for %arg15 = %c0_i32 to %38 step %c1_i32  : i32 {
      %c0_i32_76 = arith.constant 0 : i32
      %98 = arith.addi %c0_i32_76, %arg15 : i32
      %99 = arith.index_cast %98 : i32 to index
      %c0_77 = arith.constant 0 : index
      %c0_78 = arith.constant 0 : index
      %100 = vector.load %arg7[%99, %c0_77, %c0_78] : memref<8x128x384xbf16, #tpu.memory_space<vmem>>, vector<1x128x384xbf16>
      %101 = vector.shape_cast %100 : vector<1x128x384xbf16> to vector<128x384xbf16>
      %102 = arith.index_cast %98 : i32 to index
      %c0_79 = arith.constant 0 : index
      %c0_80 = arith.constant 0 : index
      %103 = vector.load %arg8[%102, %c0_79, %c0_80] : memref<8x128x384xbf16, #tpu.memory_space<vmem>>, vector<1x128x384xbf16>
      %104 = vector.shape_cast %103 : vector<1x128x384xbf16> to vector<128x384xbf16>
      %105 = arith.index_cast %98 : i32 to index
      %c0_81 = arith.constant 0 : index
      %c0_82 = arith.constant 0 : index
      %106 = vector.load %arg9[%105, %c0_81, %c0_82] : memref<8x1x384xf32, #tpu.memory_space<vmem>>, vector<1x1x384xf32>
      %107 = vector.shape_cast %106 : vector<1x1x384xf32> to vector<1x384xf32>
      %108 = arith.index_cast %98 : i32 to index
      %c0_83 = arith.constant 0 : index
      %c0_84 = arith.constant 0 : index
      %109 = vector.load %arg10[%108, %c0_83, %c0_84] : memref<8x1x384xf32, #tpu.memory_space<vmem>>, vector<1x1x384xf32>
      %110 = vector.shape_cast %109 : vector<1x1x384xf32> to vector<1x384xf32>
      %c0_85 = arith.constant 0 : index
      %c0_86 = arith.constant 0 : index
      %c0_87 = arith.constant 0 : index
      %111 = vector.load %arg14[%c0_85, %c0_86, %c0_87] : memref<2x8x128xf32, #tpu.memory_space<vmem>>, vector<2x8x128xf32>
      %112 = vector.shape_cast %111 : vector<2x8x128xf32> to vector<16x128xf32>
      %113 = arith.truncf %112 : vector<16x128xf32> to vector<16x128xbf16>
      %cst_88 = arith.constant dense<0.000000e+00> : vector<16x384xf32>
      %114 = tpu.matmul %113, %101, %cst_88 {dimension_numbers = #tpu.dot_dimension_numbers<[1], [0], [0], [1], [0, 0, 1, 1], [], []>} : vector<16x128xbf16>, vector<128x384xbf16>, vector<16x384xf32> -> vector<16x384xf32>
      %115 = vector.broadcast %107 : vector<1x384xf32> to vector<16x384xf32>
      %116 = arith.addf %114, %115 : vector<16x384xf32>
      %117 = vector.shape_cast %116 : vector<16x384xf32> to vector<2x8x384xf32>
      %cst_89 = arith.constant 0.000000e+00 : f32
      %118 = vector.broadcast %cst_89 : f32 to vector<2x128xf32>
      %119 = arith.truncf %118 : vector<2x128xf32> to vector<2x128xbf16>
      %cst_90 = arith.constant dense<0.000000e+00> : vector<2x384xf32>
      %120 = tpu.matmul %119, %104, %cst_90 {dimension_numbers = #tpu.dot_dimension_numbers<[1], [0], [0], [1], [0, 0, 1, 1], [], []>} : vector<2x128xbf16>, vector<128x384xbf16>, vector<2x384xf32> -> vector<2x384xf32>
      %121 = vector.broadcast %110 : vector<1x384xf32> to vector<2x384xf32>
      %122 = arith.addf %120, %121 : vector<2x384xf32>
      %123 = vector.extract_strided_slice %117 {offsets = [0, 0, 0], sizes = [2, 1, 384], strides = [1, 1, 1]} : vector<2x8x384xf32> to vector<2x1x384xf32>
      %124 = vector.shape_cast %123 : vector<2x1x384xf32> to vector<2x384xf32>
      %125 = vector.extract_strided_slice %124 {offsets = [0, 0], sizes = [2, 128], strides = [1, 1]} : vector<2x384xf32> to vector<2x128xf32>
      %126 = vector.extract_strided_slice %122 {offsets = [0, 0], sizes = [2, 128], strides = [1, 1]} : vector<2x384xf32> to vector<2x128xf32>
      %127 = arith.addf %125, %126 : vector<2x128xf32>
      %128 = arith.negf %127 : vector<2x128xf32>
      %129 = math.exp %128 : vector<2x128xf32>
      %cst_91 = arith.constant 1.000000e+00 : f32
      %130 = vector.broadcast %cst_91 : f32 to vector<2x128xf32>
      %131 = arith.addf %130, %129 : vector<2x128xf32>
      %132 = arith.divf %130, %131 : vector<2x128xf32>
      %133 = vector.extract_strided_slice %124 {offsets = [0, 128], sizes = [2, 128], strides = [1, 1]} : vector<2x384xf32> to vector<2x128xf32>
      %134 = vector.extract_strided_slice %122 {offsets = [0, 128], sizes = [2, 128], strides = [1, 1]} : vector<2x384xf32> to vector<2x128xf32>
      %135 = arith.addf %133, %134 : vector<2x128xf32>
      %136 = arith.negf %135 : vector<2x128xf32>
      %137 = math.exp %136 : vector<2x128xf32>
      %cst_92 = arith.constant 1.000000e+00 : f32
      %138 = vector.broadcast %cst_92 : f32 to vector<2x128xf32>
      %139 = arith.addf %138, %137 : vector<2x128xf32>
      %140 = arith.divf %138, %139 : vector<2x128xf32>
      %141 = vector.extract_strided_slice %124 {offsets = [0, 256], sizes = [2, 128], strides = [1, 1]} : vector<2x384xf32> to vector<2x128xf32>
      %142 = vector.extract_strided_slice %122 {offsets = [0, 256], sizes = [2, 128], strides = [1, 1]} : vector<2x384xf32> to vector<2x128xf32>
      %143 = arith.mulf %132, %142 : vector<2x128xf32>
      %144 = arith.addf %141, %143 : vector<2x128xf32>
      %145 = math.tanh %144 : vector<2x128xf32>
      %cst_93 = arith.constant 1.000000e+00 : f32
      %146 = vector.broadcast %cst_93 : f32 to vector<2x128xf32>
      %147 = arith.subf %146, %140 : vector<2x128xf32>
      %148 = arith.mulf %147, %145 : vector<2x128xf32>
      %149 = arith.mulf %140, %118 : vector<2x128xf32>
      %150 = arith.addf %148, %149 : vector<2x128xf32>
      %c0_94 = arith.constant 0 : index
      %c0_95 = arith.constant 0 : index
      %c0_96 = arith.constant 0 : index
      %151 = vector.load %arg14[%c0_94, %c0_95, %c0_96] : memref<2x8x128xf32, #tpu.memory_space<vmem>>, vector<2x1x128xf32>
      %152 = vector.shape_cast %151 : vector<2x1x128xf32> to vector<2x128xf32>
      %153 = vector.shape_cast %150 : vector<2x128xf32> to vector<2x1x128xf32>
      tpu.vector_store %arg14[%c0_94, %c0_95, %c0_96], %153 {strides = array<i32>} : memref<2x8x128xf32, #tpu.memory_space<vmem>>, vector<2x1x128xf32>,
      %154 = arith.truncf %150 : vector<2x128xf32> to vector<2x128xbf16>
      %cst_97 = arith.constant dense<0.000000e+00> : vector<2x384xf32>
      %155 = tpu.matmul %154, %104, %cst_97 {dimension_numbers = #tpu.dot_dimension_numbers<[1], [0], [0], [1], [0, 0, 1, 1], [], []>} : vector<2x128xbf16>, vector<128x384xbf16>, vector<2x384xf32> -> vector<2x384xf32>
      %156 = vector.broadcast %110 : vector<1x384xf32> to vector<2x384xf32>
      %157 = arith.addf %155, %156 : vector<2x384xf32>
      %158 = vector.extract_strided_slice %117 {offsets = [0, 1, 0], sizes = [2, 1, 384], strides = [1, 1, 1]} : vector<2x8x384xf32> to vector<2x1x384xf32>
      %159 = vector.shape_cast %158 : vector<2x1x384xf32> to vector<2x384xf32>
      %160 = vector.extract_strided_slice %159 {offsets = [0, 0], sizes = [2, 128], strides = [1, 1]} : vector<2x384xf32> to vector<2x128xf32>
      %161 = vector.extract_strided_slice %157 {offsets = [0, 0], sizes = [2, 128], strides = [1, 1]} : vector<2x384xf32> to vector<2x128xf32>
      %162 = arith.addf %160, %161 : vector<2x128xf32>
      %163 = arith.negf %162 : vector<2x128xf32>
      %164 = math.exp %163 : vector<2x128xf32>
      %cst_98 = arith.constant 1.000000e+00 : f32
      %165 = vector.broadcast %cst_98 : f32 to vector<2x128xf32>
      %166 = arith.addf %165, %164 : vector<2x128xf32>
      %167 = arith.divf %165, %166 : vector<2x128xf32>
      %168 = vector.extract_strided_slice %159 {offsets = [0, 128], sizes = [2, 128], strides = [1, 1]} : vector<2x384xf32> to vector<2x128xf32>
      %169 = vector.extract_strided_slice %157 {offsets = [0, 128], sizes = [2, 128], strides = [1, 1]} : vector<2x384xf32> to vector<2x128xf32>
      %170 = arith.addf %168, %169 : vector<2x128xf32>
      %171 = arith.negf %170 : vector<2x128xf32>
      %172 = math.exp %171 : vector<2x128xf32>
      %cst_99 = arith.constant 1.000000e+00 : f32
      %173 = vector.broadcast %cst_99 : f32 to vector<2x128xf32>
      %174 = arith.addf %173, %172 : vector<2x128xf32>
      %175 = arith.divf %173, %174 : vector<2x128xf32>
      %176 = vector.extract_strided_slice %159 {offsets = [0, 256], sizes = [2, 128], strides = [1, 1]} : vector<2x384xf32> to vector<2x128xf32>
      %177 = vector.extract_strided_slice %157 {offsets = [0, 256], sizes = [2, 128], strides = [1, 1]} : vector<2x384xf32> to vector<2x128xf32>
      %178 = arith.mulf %167, %177 : vector<2x128xf32>
      %179 = arith.addf %176, %178 : vector<2x128xf32>
      %180 = math.tanh %179 : vector<2x128xf32>
      %cst_100 = arith.constant 1.000000e+00 : f32
      %181 = vector.broadcast %cst_100 : f32 to vector<2x128xf32>
      %182 = arith.subf %181, %175 : vector<2x128xf32>
      %183 = arith.mulf %182, %180 : vector<2x128xf32>
      %184 = arith.mulf %175, %150 : vector<2x128xf32>
      %185 = arith.addf %183, %184 : vector<2x128xf32>
      %c0_101 = arith.constant 0 : index
      %c1 = arith.constant 1 : index
      %c0_102 = arith.constant 0 : index
      %186 = vector.load %arg14[%c0_101, %c1, %c0_102] : memref<2x8x128xf32, #tpu.memory_space<vmem>>, vector<2x1x128xf32>
      %187 = vector.shape_cast %186 : vector<2x1x128xf32> to vector<2x128xf32>
      %188 = vector.shape_cast %185 : vector<2x128xf32> to vector<2x1x128xf32>
      tpu.vector_store %arg14[%c0_101, %c1, %c0_102], %188 {strides = array<i32>} : memref<2x8x128xf32, #tpu.memory_space<vmem>>, vector<2x1x128xf32>,
      %189 = arith.truncf %185 : vector<2x128xf32> to vector<2x128xbf16>
      %cst_103 = arith.constant dense<0.000000e+00> : vector<2x384xf32>
      %190 = tpu.matmul %189, %104, %cst_103 {dimension_numbers = #tpu.dot_dimension_numbers<[1], [0], [0], [1], [0, 0, 1, 1], [], []>} : vector<2x128xbf16>, vector<128x384xbf16>, vector<2x384xf32> -> vector<2x384xf32>
      %191 = vector.broadcast %110 : vector<1x384xf32> to vector<2x384xf32>
      %192 = arith.addf %190, %191 : vector<2x384xf32>
      %193 = vector.extract_strided_slice %117 {offsets = [0, 2, 0], sizes = [2, 1, 384], strides = [1, 1, 1]} : vector<2x8x384xf32> to vector<2x1x384xf32>
      %194 = vector.shape_cast %193 : vector<2x1x384xf32> to vector<2x384xf32>
      %195 = vector.extract_strided_slice %194 {offsets = [0, 0], sizes = [2, 128], strides = [1, 1]} : vector<2x384xf32> to vector<2x128xf32>
      %196 = vector.extract_strided_slice %192 {offsets = [0, 0], sizes = [2, 128], strides = [1, 1]} : vector<2x384xf32> to vector<2x128xf32>
      %197 = arith.addf %195, %196 : vector<2x128xf32>
      %198 = arith.negf %197 : vector<2x128xf32>
      %199 = math.exp %198 : vector<2x128xf32>
      %cst_104 = arith.constant 1.000000e+00 : f32
      %200 = vector.broadcast %cst_104 : f32 to vector<2x128xf32>
      %201 = arith.addf %200, %199 : vector<2x128xf32>
      %202 = arith.divf %200, %201 : vector<2x128xf32>
      %203 = vector.extract_strided_slice %194 {offsets = [0, 128], sizes = [2, 128], strides = [1, 1]} : vector<2x384xf32> to vector<2x128xf32>
      %204 = vector.extract_strided_slice %192 {offsets = [0, 128], sizes = [2, 128], strides = [1, 1]} : vector<2x384xf32> to vector<2x128xf32>
      %205 = arith.addf %203, %204 : vector<2x128xf32>
      %206 = arith.negf %205 : vector<2x128xf32>
      %207 = math.exp %206 : vector<2x128xf32>
      %cst_105 = arith.constant 1.000000e+00 : f32
      %208 = vector.broadcast %cst_105 : f32 to vector<2x128xf32>
      %209 = arith.addf %208, %207 : vector<2x128xf32>
      %210 = arith.divf %208, %209 : vector<2x128xf32>
      %211 = vector.extract_strided_slice %194 {offsets = [0, 256], sizes = [2, 128], strides = [1, 1]} : vector<2x384xf32> to vector<2x128xf32>
      %212 = vector.extract_strided_slice %192 {offsets = [0, 256], sizes = [2, 128], strides = [1, 1]} : vector<2x384xf32> to vector<2x128xf32>
      %213 = arith.mulf %202, %212 : vector<2x128xf32>
      %214 = arith.addf %211, %213 : vector<2x128xf32>
      %215 = math.tanh %214 : vector<2x128xf32>
      %cst_106 = arith.constant 1.000000e+00 : f32
      %216 = vector.broadcast %cst_106 : f32 to vector<2x128xf32>
      %217 = arith.subf %216, %210 : vector<2x128xf32>
      %218 = arith.mulf %217, %215 : vector<2x128xf32>
      %219 = arith.mulf %210, %185 : vector<2x128xf32>
      %220 = arith.addf %218, %219 : vector<2x128xf32>
      %c0_107 = arith.constant 0 : index
      %c2 = arith.constant 2 : index
      %c0_108 = arith.constant 0 : index
      %221 = vector.load %arg14[%c0_107, %c2, %c0_108] : memref<2x8x128xf32, #tpu.memory_space<vmem>>, vector<2x1x128xf32>
      %222 = vector.shape_cast %221 : vector<2x1x128xf32> to vector<2x128xf32>
      %223 = vector.shape_cast %220 : vector<2x128xf32> to vector<2x1x128xf32>
      tpu.vector_store %arg14[%c0_107, %c2, %c0_108], %223 {strides = array<i32>} : memref<2x8x128xf32, #tpu.memory_space<vmem>>, vector<2x1x128xf32>,
      %224 = arith.truncf %220 : vector<2x128xf32> to vector<2x128xbf16>
      %cst_109 = arith.constant dense<0.000000e+00> : vector<2x384xf32>
      %225 = tpu.matmul %224, %104, %cst_109 {dimension_numbers = #tpu.dot_dimension_numbers<[1], [0], [0], [1], [0, 0, 1, 1], [], []>} : vector<2x128xbf16>, vector<128x384xbf16>, vector<2x384xf32> -> vector<2x384xf32>
      %226 = vector.broadcast %110 : vector<1x384xf32> to vector<2x384xf32>
      %227 = arith.addf %225, %226 : vector<2x384xf32>
      %228 = vector.extract_strided_slice %117 {offsets = [0, 3, 0], sizes = [2, 1, 384], strides = [1, 1, 1]} : vector<2x8x384xf32> to vector<2x1x384xf32>
      %229 = vector.shape_cast %228 : vector<2x1x384xf32> to vector<2x384xf32>
      %230 = vector.extract_strided_slice %229 {offsets = [0, 0], sizes = [2, 128], strides = [1, 1]} : vector<2x384xf32> to vector<2x128xf32>
      %231 = vector.extract_strided_slice %227 {offsets = [0, 0], sizes = [2, 128], strides = [1, 1]} : vector<2x384xf32> to vector<2x128xf32>
      %232 = arith.addf %230, %231 : vector<2x128xf32>
      %233 = arith.negf %232 : vector<2x128xf32>
      %234 = math.exp %233 : vector<2x128xf32>
      %cst_110 = arith.constant 1.000000e+00 : f32
      %235 = vector.broadcast %cst_110 : f32 to vector<2x128xf32>
      %236 = arith.addf %235, %234 : vector<2x128xf32>
      %237 = arith.divf %235, %236 : vector<2x128xf32>
      %238 = vector.extract_strided_slice %229 {offsets = [0, 128], sizes = [2, 128], strides = [1, 1]} : vector<2x384xf32> to vector<2x128xf32>
      %239 = vector.extract_strided_slice %227 {offsets = [0, 128], sizes = [2, 128], strides = [1, 1]} : vector<2x384xf32> to vector<2x128xf32>
      %240 = arith.addf %238, %239 : vector<2x128xf32>
      %241 = arith.negf %240 : vector<2x128xf32>
      %242 = math.exp %241 : vector<2x128xf32>
      %cst_111 = arith.constant 1.000000e+00 : f32
      %243 = vector.broadcast %cst_111 : f32 to vector<2x128xf32>
      %244 = arith.addf %243, %242 : vector<2x128xf32>
      %245 = arith.divf %243, %244 : vector<2x128xf32>
      %246 = vector.extract_strided_slice %229 {offsets = [0, 256], sizes = [2, 128], strides = [1, 1]} : vector<2x384xf32> to vector<2x128xf32>
      %247 = vector.extract_strided_slice %227 {offsets = [0, 256], sizes = [2, 128], strides = [1, 1]} : vector<2x384xf32> to vector<2x128xf32>
      %248 = arith.mulf %237, %247 : vector<2x128xf32>
      %249 = arith.addf %246, %248 : vector<2x128xf32>
      %250 = math.tanh %249 : vector<2x128xf32>
      %cst_112 = arith.constant 1.000000e+00 : f32
      %251 = vector.broadcast %cst_112 : f32 to vector<2x128xf32>
      %252 = arith.subf %251, %245 : vector<2x128xf32>
      %253 = arith.mulf %252, %250 : vector<2x128xf32>
      %254 = arith.mulf %245, %220 : vector<2x128xf32>
      %255 = arith.addf %253, %254 : vector<2x128xf32>
      %c0_113 = arith.constant 0 : index
      %c3 = arith.constant 3 : index
      %c0_114 = arith.constant 0 : index
      %256 = vector.load %arg14[%c0_113, %c3, %c0_114] : memref<2x8x128xf32, #tpu.memory_space<vmem>>, vector<2x1x128xf32>
      %257 = vector.shape_cast %256 : vector<2x1x128xf32> to vector<2x128xf32>
      %258 = vector.shape_cast %255 : vector<2x128xf32> to vector<2x1x128xf32>
      tpu.vector_store %arg14[%c0_113, %c3, %c0_114], %258 {strides = array<i32>} : memref<2x8x128xf32, #tpu.memory_space<vmem>>, vector<2x1x128xf32>,
      %259 = arith.truncf %255 : vector<2x128xf32> to vector<2x128xbf16>
      %cst_115 = arith.constant dense<0.000000e+00> : vector<2x384xf32>
      %260 = tpu.matmul %259, %104, %cst_115 {dimension_numbers = #tpu.dot_dimension_numbers<[1], [0], [0], [1], [0, 0, 1, 1], [], []>} : vector<2x128xbf16>, vector<128x384xbf16>, vector<2x384xf32> -> vector<2x384xf32>
      %261 = vector.broadcast %110 : vector<1x384xf32> to vector<2x384xf32>
      %262 = arith.addf %260, %261 : vector<2x384xf32>
      %263 = vector.extract_strided_slice %117 {offsets = [0, 4, 0], sizes = [2, 1, 384], strides = [1, 1, 1]} : vector<2x8x384xf32> to vector<2x1x384xf32>
      %264 = vector.shape_cast %263 : vector<2x1x384xf32> to vector<2x384xf32>
      %265 = vector.extract_strided_slice %264 {offsets = [0, 0], sizes = [2, 128], strides = [1, 1]} : vector<2x384xf32> to vector<2x128xf32>
      %266 = vector.extract_strided_slice %262 {offsets = [0, 0], sizes = [2, 128], strides = [1, 1]} : vector<2x384xf32> to vector<2x128xf32>
      %267 = arith.addf %265, %266 : vector<2x128xf32>
      %268 = arith.negf %267 : vector<2x128xf32>
      %269 = math.exp %268 : vector<2x128xf32>
      %cst_116 = arith.constant 1.000000e+00 : f32
      %270 = vector.broadcast %cst_116 : f32 to vector<2x128xf32>
      %271 = arith.addf %270, %269 : vector<2x128xf32>
      %272 = arith.divf %270, %271 : vector<2x128xf32>
      %273 = vector.extract_strided_slice %264 {offsets = [0, 128], sizes = [2, 128], strides = [1, 1]} : vector<2x384xf32> to vector<2x128xf32>
      %274 = vector.extract_strided_slice %262 {offsets = [0, 128], sizes = [2, 128], strides = [1, 1]} : vector<2x384xf32> to vector<2x128xf32>
      %275 = arith.addf %273, %274 : vector<2x128xf32>
      %276 = arith.negf %275 : vector<2x128xf32>
      %277 = math.exp %276 : vector<2x128xf32>
      %cst_117 = arith.constant 1.000000e+00 : f32
      %278 = vector.broadcast %cst_117 : f32 to vector<2x128xf32>
      %279 = arith.addf %278, %277 : vector<2x128xf32>
      %280 = arith.divf %278, %279 : vector<2x128xf32>
      %281 = vector.extract_strided_slice %264 {offsets = [0, 256], sizes = [2, 128], strides = [1, 1]} : vector<2x384xf32> to vector<2x128xf32>
      %282 = vector.extract_strided_slice %262 {offsets = [0, 256], sizes = [2, 128], strides = [1, 1]} : vector<2x384xf32> to vector<2x128xf32>
      %283 = arith.mulf %272, %282 : vector<2x128xf32>
      %284 = arith.addf %281, %283 : vector<2x128xf32>
      %285 = math.tanh %284 : vector<2x128xf32>
      %cst_118 = arith.constant 1.000000e+00 : f32
      %286 = vector.broadcast %cst_118 : f32 to vector<2x128xf32>
      %287 = arith.subf %286, %280 : vector<2x128xf32>
      %288 = arith.mulf %287, %285 : vector<2x128xf32>
      %289 = arith.mulf %280, %255 : vector<2x128xf32>
      %290 = arith.addf %288, %289 : vector<2x128xf32>
      %c0_119 = arith.constant 0 : index
      %c4 = arith.constant 4 : index
      %c0_120 = arith.constant 0 : index
      %291 = vector.load %arg14[%c0_119, %c4, %c0_120] : memref<2x8x128xf32, #tpu.memory_space<vmem>>, vector<2x1x128xf32>
      %292 = vector.shape_cast %291 : vector<2x1x128xf32> to vector<2x128xf32>
      %293 = vector.shape_cast %290 : vector<2x128xf32> to vector<2x1x128xf32>
      tpu.vector_store %arg14[%c0_119, %c4, %c0_120], %293 {strides = array<i32>} : memref<2x8x128xf32, #tpu.memory_space<vmem>>, vector<2x1x128xf32>,
      %294 = arith.truncf %290 : vector<2x128xf32> to vector<2x128xbf16>
      %cst_121 = arith.constant dense<0.000000e+00> : vector<2x384xf32>
      %295 = tpu.matmul %294, %104, %cst_121 {dimension_numbers = #tpu.dot_dimension_numbers<[1], [0], [0], [1], [0, 0, 1, 1], [], []>} : vector<2x128xbf16>, vector<128x384xbf16>, vector<2x384xf32> -> vector<2x384xf32>
      %296 = vector.broadcast %110 : vector<1x384xf32> to vector<2x384xf32>
      %297 = arith.addf %295, %296 : vector<2x384xf32>
      %298 = vector.extract_strided_slice %117 {offsets = [0, 5, 0], sizes = [2, 1, 384], strides = [1, 1, 1]} : vector<2x8x384xf32> to vector<2x1x384xf32>
      %299 = vector.shape_cast %298 : vector<2x1x384xf32> to vector<2x384xf32>
      %300 = vector.extract_strided_slice %299 {offsets = [0, 0], sizes = [2, 128], strides = [1, 1]} : vector<2x384xf32> to vector<2x128xf32>
      %301 = vector.extract_strided_slice %297 {offsets = [0, 0], sizes = [2, 128], strides = [1, 1]} : vector<2x384xf32> to vector<2x128xf32>
      %302 = arith.addf %300, %301 : vector<2x128xf32>
      %303 = arith.negf %302 : vector<2x128xf32>
      %304 = math.exp %303 : vector<2x128xf32>
      %cst_122 = arith.constant 1.000000e+00 : f32
      %305 = vector.broadcast %cst_122 : f32 to vector<2x128xf32>
      %306 = arith.addf %305, %304 : vector<2x128xf32>
      %307 = arith.divf %305, %306 : vector<2x128xf32>
      %308 = vector.extract_strided_slice %299 {offsets = [0, 128], sizes = [2, 128], strides = [1, 1]} : vector<2x384xf32> to vector<2x128xf32>
      %309 = vector.extract_strided_slice %297 {offsets = [0, 128], sizes = [2, 128], strides = [1, 1]} : vector<2x384xf32> to vector<2x128xf32>
      %310 = arith.addf %308, %309 : vector<2x128xf32>
      %311 = arith.negf %310 : vector<2x128xf32>
      %312 = math.exp %311 : vector<2x128xf32>
      %cst_123 = arith.constant 1.000000e+00 : f32
      %313 = vector.broadcast %cst_123 : f32 to vector<2x128xf32>
      %314 = arith.addf %313, %312 : vector<2x128xf32>
      %315 = arith.divf %313, %314 : vector<2x128xf32>
      %316 = vector.extract_strided_slice %299 {offsets = [0, 256], sizes = [2, 128], strides = [1, 1]} : vector<2x384xf32> to vector<2x128xf32>
      %317 = vector.extract_strided_slice %297 {offsets = [0, 256], sizes = [2, 128], strides = [1, 1]} : vector<2x384xf32> to vector<2x128xf32>
      %318 = arith.mulf %307, %317 : vector<2x128xf32>
      %319 = arith.addf %316, %318 : vector<2x128xf32>
      %320 = math.tanh %319 : vector<2x128xf32>
      %cst_124 = arith.constant 1.000000e+00 : f32
      %321 = vector.broadcast %cst_124 : f32 to vector<2x128xf32>
      %322 = arith.subf %321, %315 : vector<2x128xf32>
      %323 = arith.mulf %322, %320 : vector<2x128xf32>
      %324 = arith.mulf %315, %290 : vector<2x128xf32>
      %325 = arith.addf %323, %324 : vector<2x128xf32>
      %c0_125 = arith.constant 0 : index
      %c5 = arith.constant 5 : index
      %c0_126 = arith.constant 0 : index
      %326 = vector.load %arg14[%c0_125, %c5, %c0_126] : memref<2x8x128xf32, #tpu.memory_space<vmem>>, vector<2x1x128xf32>
      %327 = vector.shape_cast %326 : vector<2x1x128xf32> to vector<2x128xf32>
      %328 = vector.shape_cast %325 : vector<2x128xf32> to vector<2x1x128xf32>
      tpu.vector_store %arg14[%c0_125, %c5, %c0_126], %328 {strides = array<i32>} : memref<2x8x128xf32, #tpu.memory_space<vmem>>, vector<2x1x128xf32>,
      %329 = arith.truncf %325 : vector<2x128xf32> to vector<2x128xbf16>
      %cst_127 = arith.constant dense<0.000000e+00> : vector<2x384xf32>
      %330 = tpu.matmul %329, %104, %cst_127 {dimension_numbers = #tpu.dot_dimension_numbers<[1], [0], [0], [1], [0, 0, 1, 1], [], []>} : vector<2x128xbf16>, vector<128x384xbf16>, vector<2x384xf32> -> vector<2x384xf32>
      %331 = vector.broadcast %110 : vector<1x384xf32> to vector<2x384xf32>
      %332 = arith.addf %330, %331 : vector<2x384xf32>
      %333 = vector.extract_strided_slice %117 {offsets = [0, 6, 0], sizes = [2, 1, 384], strides = [1, 1, 1]} : vector<2x8x384xf32> to vector<2x1x384xf32>
      %334 = vector.shape_cast %333 : vector<2x1x384xf32> to vector<2x384xf32>
      %335 = vector.extract_strided_slice %334 {offsets = [0, 0], sizes = [2, 128], strides = [1, 1]} : vector<2x384xf32> to vector<2x128xf32>
      %336 = vector.extract_strided_slice %332 {offsets = [0, 0], sizes = [2, 128], strides = [1, 1]} : vector<2x384xf32> to vector<2x128xf32>
      %337 = arith.addf %335, %336 : vector<2x128xf32>
      %338 = arith.negf %337 : vector<2x128xf32>
      %339 = math.exp %338 : vector<2x128xf32>
      %cst_128 = arith.constant 1.000000e+00 : f32
      %340 = vector.broadcast %cst_128 : f32 to vector<2x128xf32>
      %341 = arith.addf %340, %339 : vector<2x128xf32>
      %342 = arith.divf %340, %341 : vector<2x128xf32>
      %343 = vector.extract_strided_slice %334 {offsets = [0, 128], sizes = [2, 128], strides = [1, 1]} : vector<2x384xf32> to vector<2x128xf32>
      %344 = vector.extract_strided_slice %332 {offsets = [0, 128], sizes = [2, 128], strides = [1, 1]} : vector<2x384xf32> to vector<2x128xf32>
      %345 = arith.addf %343, %344 : vector<2x128xf32>
      %346 = arith.negf %345 : vector<2x128xf32>
      %347 = math.exp %346 : vector<2x128xf32>
      %cst_129 = arith.constant 1.000000e+00 : f32
      %348 = vector.broadcast %cst_129 : f32 to vector<2x128xf32>
      %349 = arith.addf %348, %347 : vector<2x128xf32>
      %350 = arith.divf %348, %349 : vector<2x128xf32>
      %351 = vector.extract_strided_slice %334 {offsets = [0, 256], sizes = [2, 128], strides = [1, 1]} : vector<2x384xf32> to vector<2x128xf32>
      %352 = vector.extract_strided_slice %332 {offsets = [0, 256], sizes = [2, 128], strides = [1, 1]} : vector<2x384xf32> to vector<2x128xf32>
      %353 = arith.mulf %342, %352 : vector<2x128xf32>
      %354 = arith.addf %351, %353 : vector<2x128xf32>
      %355 = math.tanh %354 : vector<2x128xf32>
      %cst_130 = arith.constant 1.000000e+00 : f32
      %356 = vector.broadcast %cst_130 : f32 to vector<2x128xf32>
      %357 = arith.subf %356, %350 : vector<2x128xf32>
      %358 = arith.mulf %357, %355 : vector<2x128xf32>
      %359 = arith.mulf %350, %325 : vector<2x128xf32>
      %360 = arith.addf %358, %359 : vector<2x128xf32>
      %c0_131 = arith.constant 0 : index
      %c6 = arith.constant 6 : index
      %c0_132 = arith.constant 0 : index
      %361 = vector.load %arg14[%c0_131, %c6, %c0_132] : memref<2x8x128xf32, #tpu.memory_space<vmem>>, vector<2x1x128xf32>
      %362 = vector.shape_cast %361 : vector<2x1x128xf32> to vector<2x128xf32>
      %363 = vector.shape_cast %360 : vector<2x128xf32> to vector<2x1x128xf32>
      tpu.vector_store %arg14[%c0_131, %c6, %c0_132], %363 {strides = array<i32>} : memref<2x8x128xf32, #tpu.memory_space<vmem>>, vector<2x1x128xf32>,
      %364 = arith.truncf %360 : vector<2x128xf32> to vector<2x128xbf16>
      %cst_133 = arith.constant dense<0.000000e+00> : vector<2x384xf32>
      %365 = tpu.matmul %364, %104, %cst_133 {dimension_numbers = #tpu.dot_dimension_numbers<[1], [0], [0], [1], [0, 0, 1, 1], [], []>} : vector<2x128xbf16>, vector<128x384xbf16>, vector<2x384xf32> -> vector<2x384xf32>
      %366 = vector.broadcast %110 : vector<1x384xf32> to vector<2x384xf32>
      %367 = arith.addf %365, %366 : vector<2x384xf32>
      %368 = vector.extract_strided_slice %117 {offsets = [0, 7, 0], sizes = [2, 1, 384], strides = [1, 1, 1]} : vector<2x8x384xf32> to vector<2x1x384xf32>
      %369 = vector.shape_cast %368 : vector<2x1x384xf32> to vector<2x384xf32>
      %370 = vector.extract_strided_slice %369 {offsets = [0, 0], sizes = [2, 128], strides = [1, 1]} : vector<2x384xf32> to vector<2x128xf32>
      %371 = vector.extract_strided_slice %367 {offsets = [0, 0], sizes = [2, 128], strides = [1, 1]} : vector<2x384xf32> to vector<2x128xf32>
      %372 = arith.addf %370, %371 : vector<2x128xf32>
      %373 = arith.negf %372 : vector<2x128xf32>
      %374 = math.exp %373 : vector<2x128xf32>
      %cst_134 = arith.constant 1.000000e+00 : f32
      %375 = vector.broadcast %cst_134 : f32 to vector<2x128xf32>
      %376 = arith.addf %375, %374 : vector<2x128xf32>
      %377 = arith.divf %375, %376 : vector<2x128xf32>
      %378 = vector.extract_strided_slice %369 {offsets = [0, 128], sizes = [2, 128], strides = [1, 1]} : vector<2x384xf32> to vector<2x128xf32>
      %379 = vector.extract_strided_slice %367 {offsets = [0, 128], sizes = [2, 128], strides = [1, 1]} : vector<2x384xf32> to vector<2x128xf32>
      %380 = arith.addf %378, %379 : vector<2x128xf32>
      %381 = arith.negf %380 : vector<2x128xf32>
      %382 = math.exp %381 : vector<2x128xf32>
      %cst_135 = arith.constant 1.000000e+00 : f32
      %383 = vector.broadcast %cst_135 : f32 to vector<2x128xf32>
      %384 = arith.addf %383, %382 : vector<2x128xf32>
      %385 = arith.divf %383, %384 : vector<2x128xf32>
      %386 = vector.extract_strided_slice %369 {offsets = [0, 256], sizes = [2, 128], strides = [1, 1]} : vector<2x384xf32> to vector<2x128xf32>
      %387 = vector.extract_strided_slice %367 {offsets = [0, 256], sizes = [2, 128], strides = [1, 1]} : vector<2x384xf32> to vector<2x128xf32>
      %388 = arith.mulf %377, %387 : vector<2x128xf32>
      %389 = arith.addf %386, %388 : vector<2x128xf32>
      %390 = math.tanh %389 : vector<2x128xf32>
      %cst_136 = arith.constant 1.000000e+00 : f32
      %391 = vector.broadcast %cst_136 : f32 to vector<2x128xf32>
      %392 = arith.subf %391, %385 : vector<2x128xf32>
      %393 = arith.mulf %392, %390 : vector<2x128xf32>
      %394 = arith.mulf %385, %360 : vector<2x128xf32>
      %395 = arith.addf %393, %394 : vector<2x128xf32>
      %c0_137 = arith.constant 0 : index
      %c7 = arith.constant 7 : index
      %c0_138 = arith.constant 0 : index
      %396 = vector.load %arg14[%c0_137, %c7, %c0_138] : memref<2x8x128xf32, #tpu.memory_space<vmem>>, vector<2x1x128xf32>
      %397 = vector.shape_cast %396 : vector<2x1x128xf32> to vector<2x128xf32>
      %398 = vector.shape_cast %395 : vector<2x128xf32> to vector<2x1x128xf32>
      tpu.vector_store %arg14[%c0_137, %c7, %c0_138], %398 {strides = array<i32>} : memref<2x8x128xf32, #tpu.memory_space<vmem>>, vector<2x1x128xf32>,
    }
    %c2_i32_22 = arith.constant 2 : i32
    %c0_23 = arith.constant 0 : index
    %c0_24 = arith.constant 0 : index
    %c0_25 = arith.constant 0 : index
    %39 = vector.load %arg14[%c0_23, %c0_24, %c0_25] : memref<2x8x128xf32, #tpu.memory_space<vmem>>, vector<2x8x128xf32>
    %c0_26 = arith.constant 0 : index
    %c0_27 = arith.constant 0 : index
    %c0_28 = arith.constant 0 : index
    %40 = vector.load %arg14[%c0_26, %c0_27, %c0_28] : memref<2x8x128xf32, #tpu.memory_space<vmem>>, vector<2x8x128xf32>
    tpu.vector_store %arg14[%c0_26, %c0_27, %c0_28], %39 {strides = array<i32>} : memref<2x8x128xf32, #tpu.memory_space<vmem>>, vector<2x8x128xf32>,
    %c0_i32_29 = arith.constant 0 : i32
    %c2_i32_30 = arith.constant 2 : i32
    %41 = arith.addi %c0_i32_29, %c2_i32_30 : i32
    %c1_i32_31 = arith.constant 1 : i32
    scf.for %arg15 = %c0_i32_29 to %41 step %c1_i32_31  : i32 {
      %c2_i32_76 = arith.constant 2 : i32
      %98 = arith.addi %c2_i32_76, %arg15 : i32
      %99 = arith.index_cast %98 : i32 to index
      %c0_77 = arith.constant 0 : index
      %c0_78 = arith.constant 0 : index
      %100 = vector.load %arg7[%99, %c0_77, %c0_78] : memref<8x128x384xbf16, #tpu.memory_space<vmem>>, vector<1x128x384xbf16>
      %101 = vector.shape_cast %100 : vector<1x128x384xbf16> to vector<128x384xbf16>
      %102 = arith.index_cast %98 : i32 to index
      %c0_79 = arith.constant 0 : index
      %c0_80 = arith.constant 0 : index
      %103 = vector.load %arg8[%102, %c0_79, %c0_80] : memref<8x128x384xbf16, #tpu.memory_space<vmem>>, vector<1x128x384xbf16>
      %104 = vector.shape_cast %103 : vector<1x128x384xbf16> to vector<128x384xbf16>
      %105 = arith.index_cast %98 : i32 to index
      %c0_81 = arith.constant 0 : index
      %c0_82 = arith.constant 0 : index
      %106 = vector.load %arg9[%105, %c0_81, %c0_82] : memref<8x1x384xf32, #tpu.memory_space<vmem>>, vector<1x1x384xf32>
      %107 = vector.shape_cast %106 : vector<1x1x384xf32> to vector<1x384xf32>
      %108 = arith.index_cast %98 : i32 to index
      %c0_83 = arith.constant 0 : index
      %c0_84 = arith.constant 0 : index
      %109 = vector.load %arg10[%108, %c0_83, %c0_84] : memref<8x1x384xf32, #tpu.memory_space<vmem>>, vector<1x1x384xf32>
      %110 = vector.shape_cast %109 : vector<1x1x384xf32> to vector<1x384xf32>
      %c0_85 = arith.constant 0 : index
      %c0_86 = arith.constant 0 : index
      %c0_87 = arith.constant 0 : index
      %111 = vector.load %arg14[%c0_85, %c0_86, %c0_87] : memref<2x8x128xf32, #tpu.memory_space<vmem>>, vector<2x8x128xf32>
      %112 = vector.shape_cast %111 : vector<2x8x128xf32> to vector<16x128xf32>
      %113 = arith.truncf %112 : vector<16x128xf32> to vector<16x128xbf16>
      %cst_88 = arith.constant dense<0.000000e+00> : vector<16x384xf32>
      %114 = tpu.matmul %113, %101, %cst_88 {dimension_numbers = #tpu.dot_dimension_numbers<[1], [0], [0], [1], [0, 0, 1, 1], [], []>} : vector<16x128xbf16>, vector<128x384xbf16>, vector<16x384xf32> -> vector<16x384xf32>
      %115 = vector.broadcast %107 : vector<1x384xf32> to vector<16x384xf32>
      %116 = arith.addf %114, %115 : vector<16x384xf32>
      %117 = vector.shape_cast %116 : vector<16x384xf32> to vector<2x8x384xf32>
      %cst_89 = arith.constant 0.000000e+00 : f32
      %118 = vector.broadcast %cst_89 : f32 to vector<2x128xf32>
      %119 = arith.truncf %118 : vector<2x128xf32> to vector<2x128xbf16>
      %cst_90 = arith.constant dense<0.000000e+00> : vector<2x384xf32>
      %120 = tpu.matmul %119, %104, %cst_90 {dimension_numbers = #tpu.dot_dimension_numbers<[1], [0], [0], [1], [0, 0, 1, 1], [], []>} : vector<2x128xbf16>, vector<128x384xbf16>, vector<2x384xf32> -> vector<2x384xf32>
      %121 = vector.broadcast %110 : vector<1x384xf32> to vector<2x384xf32>
      %122 = arith.addf %120, %121 : vector<2x384xf32>
      %123 = vector.extract_strided_slice %117 {offsets = [0, 0, 0], sizes = [2, 1, 384], strides = [1, 1, 1]} : vector<2x8x384xf32> to vector<2x1x384xf32>
      %124 = vector.shape_cast %123 : vector<2x1x384xf32> to vector<2x384xf32>
      %125 = vector.extract_strided_slice %124 {offsets = [0, 0], sizes = [2, 128], strides = [1, 1]} : vector<2x384xf32> to vector<2x128xf32>
      %126 = vector.extract_strided_slice %122 {offsets = [0, 0], sizes = [2, 128], strides = [1, 1]} : vector<2x384xf32> to vector<2x128xf32>
      %127 = arith.addf %125, %126 : vector<2x128xf32>
      %128 = arith.negf %127 : vector<2x128xf32>
      %129 = math.exp %128 : vector<2x128xf32>
      %cst_91 = arith.constant 1.000000e+00 : f32
      %130 = vector.broadcast %cst_91 : f32 to vector<2x128xf32>
      %131 = arith.addf %130, %129 : vector<2x128xf32>
      %132 = arith.divf %130, %131 : vector<2x128xf32>
      %133 = vector.extract_strided_slice %124 {offsets = [0, 128], sizes = [2, 128], strides = [1, 1]} : vector<2x384xf32> to vector<2x128xf32>
      %134 = vector.extract_strided_slice %122 {offsets = [0, 128], sizes = [2, 128], strides = [1, 1]} : vector<2x384xf32> to vector<2x128xf32>
      %135 = arith.addf %133, %134 : vector<2x128xf32>
      %136 = arith.negf %135 : vector<2x128xf32>
      %137 = math.exp %136 : vector<2x128xf32>
      %cst_92 = arith.constant 1.000000e+00 : f32
      %138 = vector.broadcast %cst_92 : f32 to vector<2x128xf32>
      %139 = arith.addf %138, %137 : vector<2x128xf32>
      %140 = arith.divf %138, %139 : vector<2x128xf32>
      %141 = vector.extract_strided_slice %124 {offsets = [0, 256], sizes = [2, 128], strides = [1, 1]} : vector<2x384xf32> to vector<2x128xf32>
      %142 = vector.extract_strided_slice %122 {offsets = [0, 256], sizes = [2, 128], strides = [1, 1]} : vector<2x384xf32> to vector<2x128xf32>
      %143 = arith.mulf %132, %142 : vector<2x128xf32>
      %144 = arith.addf %141, %143 : vector<2x128xf32>
      %145 = math.tanh %144 : vector<2x128xf32>
      %cst_93 = arith.constant 1.000000e+00 : f32
      %146 = vector.broadcast %cst_93 : f32 to vector<2x128xf32>
      %147 = arith.subf %146, %140 : vector<2x128xf32>
      %148 = arith.mulf %147, %145 : vector<2x128xf32>
      %149 = arith.mulf %140, %118 : vector<2x128xf32>
      %150 = arith.addf %148, %149 : vector<2x128xf32>
      %c0_94 = arith.constant 0 : index
      %c0_95 = arith.constant 0 : index
      %c0_96 = arith.constant 0 : index
      %151 = vector.load %arg14[%c0_94, %c0_95, %c0_96] : memref<2x8x128xf32, #tpu.memory_space<vmem>>, vector<2x1x128xf32>
      %152 = vector.shape_cast %151 : vector<2x1x128xf32> to vector<2x128xf32>
      %153 = vector.shape_cast %150 : vector<2x128xf32> to vector<2x1x128xf32>
      tpu.vector_store %arg14[%c0_94, %c0_95, %c0_96], %153 {strides = array<i32>} : memref<2x8x128xf32, #tpu.memory_space<vmem>>, vector<2x1x128xf32>,
      %154 = arith.truncf %150 : vector<2x128xf32> to vector<2x128xbf16>
      %cst_97 = arith.constant dense<0.000000e+00> : vector<2x384xf32>
      %155 = tpu.matmul %154, %104, %cst_97 {dimension_numbers = #tpu.dot_dimension_numbers<[1], [0], [0], [1], [0, 0, 1, 1], [], []>} : vector<2x128xbf16>, vector<128x384xbf16>, vector<2x384xf32> -> vector<2x384xf32>
      %156 = vector.broadcast %110 : vector<1x384xf32> to vector<2x384xf32>
      %157 = arith.addf %155, %156 : vector<2x384xf32>
      %158 = vector.extract_strided_slice %117 {offsets = [0, 1, 0], sizes = [2, 1, 384], strides = [1, 1, 1]} : vector<2x8x384xf32> to vector<2x1x384xf32>
      %159 = vector.shape_cast %158 : vector<2x1x384xf32> to vector<2x384xf32>
      %160 = vector.extract_strided_slice %159 {offsets = [0, 0], sizes = [2, 128], strides = [1, 1]} : vector<2x384xf32> to vector<2x128xf32>
      %161 = vector.extract_strided_slice %157 {offsets = [0, 0], sizes = [2, 128], strides = [1, 1]} : vector<2x384xf32> to vector<2x128xf32>
      %162 = arith.addf %160, %161 : vector<2x128xf32>
      %163 = arith.negf %162 : vector<2x128xf32>
      %164 = math.exp %163 : vector<2x128xf32>
      %cst_98 = arith.constant 1.000000e+00 : f32
      %165 = vector.broadcast %cst_98 : f32 to vector<2x128xf32>
      %166 = arith.addf %165, %164 : vector<2x128xf32>
      %167 = arith.divf %165, %166 : vector<2x128xf32>
      %168 = vector.extract_strided_slice %159 {offsets = [0, 128], sizes = [2, 128], strides = [1, 1]} : vector<2x384xf32> to vector<2x128xf32>
      %169 = vector.extract_strided_slice %157 {offsets = [0, 128], sizes = [2, 128], strides = [1, 1]} : vector<2x384xf32> to vector<2x128xf32>
      %170 = arith.addf %168, %169 : vector<2x128xf32>
      %171 = arith.negf %170 : vector<2x128xf32>
      %172 = math.exp %171 : vector<2x128xf32>
      %cst_99 = arith.constant 1.000000e+00 : f32
      %173 = vector.broadcast %cst_99 : f32 to vector<2x128xf32>
      %174 = arith.addf %173, %172 : vector<2x128xf32>
      %175 = arith.divf %173, %174 : vector<2x128xf32>
      %176 = vector.extract_strided_slice %159 {offsets = [0, 256], sizes = [2, 128], strides = [1, 1]} : vector<2x384xf32> to vector<2x128xf32>
      %177 = vector.extract_strided_slice %157 {offsets = [0, 256], sizes = [2, 128], strides = [1, 1]} : vector<2x384xf32> to vector<2x128xf32>
      %178 = arith.mulf %167, %177 : vector<2x128xf32>
      %179 = arith.addf %176, %178 : vector<2x128xf32>
      %180 = math.tanh %179 : vector<2x128xf32>
      %cst_100 = arith.constant 1.000000e+00 : f32
      %181 = vector.broadcast %cst_100 : f32 to vector<2x128xf32>
      %182 = arith.subf %181, %175 : vector<2x128xf32>
      %183 = arith.mulf %182, %180 : vector<2x128xf32>
      %184 = arith.mulf %175, %150 : vector<2x128xf32>
      %185 = arith.addf %183, %184 : vector<2x128xf32>
      %c0_101 = arith.constant 0 : index
      %c1 = arith.constant 1 : index
      %c0_102 = arith.constant 0 : index
      %186 = vector.load %arg14[%c0_101, %c1, %c0_102] : memref<2x8x128xf32, #tpu.memory_space<vmem>>, vector<2x1x128xf32>
      %187 = vector.shape_cast %186 : vector<2x1x128xf32> to vector<2x128xf32>
      %188 = vector.shape_cast %185 : vector<2x128xf32> to vector<2x1x128xf32>
      tpu.vector_store %arg14[%c0_101, %c1, %c0_102], %188 {strides = array<i32>} : memref<2x8x128xf32, #tpu.memory_space<vmem>>, vector<2x1x128xf32>,
      %189 = arith.truncf %185 : vector<2x128xf32> to vector<2x128xbf16>
      %cst_103 = arith.constant dense<0.000000e+00> : vector<2x384xf32>
      %190 = tpu.matmul %189, %104, %cst_103 {dimension_numbers = #tpu.dot_dimension_numbers<[1], [0], [0], [1], [0, 0, 1, 1], [], []>} : vector<2x128xbf16>, vector<128x384xbf16>, vector<2x384xf32> -> vector<2x384xf32>
      %191 = vector.broadcast %110 : vector<1x384xf32> to vector<2x384xf32>
      %192 = arith.addf %190, %191 : vector<2x384xf32>
      %193 = vector.extract_strided_slice %117 {offsets = [0, 2, 0], sizes = [2, 1, 384], strides = [1, 1, 1]} : vector<2x8x384xf32> to vector<2x1x384xf32>
      %194 = vector.shape_cast %193 : vector<2x1x384xf32> to vector<2x384xf32>
      %195 = vector.extract_strided_slice %194 {offsets = [0, 0], sizes = [2, 128], strides = [1, 1]} : vector<2x384xf32> to vector<2x128xf32>
      %196 = vector.extract_strided_slice %192 {offsets = [0, 0], sizes = [2, 128], strides = [1, 1]} : vector<2x384xf32> to vector<2x128xf32>
      %197 = arith.addf %195, %196 : vector<2x128xf32>
      %198 = arith.negf %197 : vector<2x128xf32>
      %199 = math.exp %198 : vector<2x128xf32>
      %cst_104 = arith.constant 1.000000e+00 : f32
      %200 = vector.broadcast %cst_104 : f32 to vector<2x128xf32>
      %201 = arith.addf %200, %199 : vector<2x128xf32>
      %202 = arith.divf %200, %201 : vector<2x128xf32>
      %203 = vector.extract_strided_slice %194 {offsets = [0, 128], sizes = [2, 128], strides = [1, 1]} : vector<2x384xf32> to vector<2x128xf32>
      %204 = vector.extract_strided_slice %192 {offsets = [0, 128], sizes = [2, 128], strides = [1, 1]} : vector<2x384xf32> to vector<2x128xf32>
      %205 = arith.addf %203, %204 : vector<2x128xf32>
      %206 = arith.negf %205 : vector<2x128xf32>
      %207 = math.exp %206 : vector<2x128xf32>
      %cst_105 = arith.constant 1.000000e+00 : f32
      %208 = vector.broadcast %cst_105 : f32 to vector<2x128xf32>
      %209 = arith.addf %208, %207 : vector<2x128xf32>
      %210 = arith.divf %208, %209 : vector<2x128xf32>
      %211 = vector.extract_strided_slice %194 {offsets = [0, 256], sizes = [2, 128], strides = [1, 1]} : vector<2x384xf32> to vector<2x128xf32>
      %212 = vector.extract_strided_slice %192 {offsets = [0, 256], sizes = [2, 128], strides = [1, 1]} : vector<2x384xf32> to vector<2x128xf32>
      %213 = arith.mulf %202, %212 : vector<2x128xf32>
      %214 = arith.addf %211, %213 : vector<2x128xf32>
      %215 = math.tanh %214 : vector<2x128xf32>
      %cst_106 = arith.constant 1.000000e+00 : f32
      %216 = vector.broadcast %cst_106 : f32 to vector<2x128xf32>
      %217 = arith.subf %216, %210 : vector<2x128xf32>
      %218 = arith.mulf %217, %215 : vector<2x128xf32>
      %219 = arith.mulf %210, %185 : vector<2x128xf32>
      %220 = arith.addf %218, %219 : vector<2x128xf32>
      %c0_107 = arith.constant 0 : index
      %c2 = arith.constant 2 : index
      %c0_108 = arith.constant 0 : index
      %221 = vector.load %arg14[%c0_107, %c2, %c0_108] : memref<2x8x128xf32, #tpu.memory_space<vmem>>, vector<2x1x128xf32>
      %222 = vector.shape_cast %221 : vector<2x1x128xf32> to vector<2x128xf32>
      %223 = vector.shape_cast %220 : vector<2x128xf32> to vector<2x1x128xf32>
      tpu.vector_store %arg14[%c0_107, %c2, %c0_108], %223 {strides = array<i32>} : memref<2x8x128xf32, #tpu.memory_space<vmem>>, vector<2x1x128xf32>,
      %224 = arith.truncf %220 : vector<2x128xf32> to vector<2x128xbf16>
      %cst_109 = arith.constant dense<0.000000e+00> : vector<2x384xf32>
      %225 = tpu.matmul %224, %104, %cst_109 {dimension_numbers = #tpu.dot_dimension_numbers<[1], [0], [0], [1], [0, 0, 1, 1], [], []>} : vector<2x128xbf16>, vector<128x384xbf16>, vector<2x384xf32> -> vector<2x384xf32>
      %226 = vector.broadcast %110 : vector<1x384xf32> to vector<2x384xf32>
      %227 = arith.addf %225, %226 : vector<2x384xf32>
      %228 = vector.extract_strided_slice %117 {offsets = [0, 3, 0], sizes = [2, 1, 384], strides = [1, 1, 1]} : vector<2x8x384xf32> to vector<2x1x384xf32>
      %229 = vector.shape_cast %228 : vector<2x1x384xf32> to vector<2x384xf32>
      %230 = vector.extract_strided_slice %229 {offsets = [0, 0], sizes = [2, 128], strides = [1, 1]} : vector<2x384xf32> to vector<2x128xf32>
      %231 = vector.extract_strided_slice %227 {offsets = [0, 0], sizes = [2, 128], strides = [1, 1]} : vector<2x384xf32> to vector<2x128xf32>
      %232 = arith.addf %230, %231 : vector<2x128xf32>
      %233 = arith.negf %232 : vector<2x128xf32>
      %234 = math.exp %233 : vector<2x128xf32>
      %cst_110 = arith.constant 1.000000e+00 : f32
      %235 = vector.broadcast %cst_110 : f32 to vector<2x128xf32>
      %236 = arith.addf %235, %234 : vector<2x128xf32>
      %237 = arith.divf %235, %236 : vector<2x128xf32>
      %238 = vector.extract_strided_slice %229 {offsets = [0, 128], sizes = [2, 128], strides = [1, 1]} : vector<2x384xf32> to vector<2x128xf32>
      %239 = vector.extract_strided_slice %227 {offsets = [0, 128], sizes = [2, 128], strides = [1, 1]} : vector<2x384xf32> to vector<2x128xf32>
      %240 = arith.addf %238, %239 : vector<2x128xf32>
      %241 = arith.negf %240 : vector<2x128xf32>
      %242 = math.exp %241 : vector<2x128xf32>
      %cst_111 = arith.constant 1.000000e+00 : f32
      %243 = vector.broadcast %cst_111 : f32 to vector<2x128xf32>
      %244 = arith.addf %243, %242 : vector<2x128xf32>
      %245 = arith.divf %243, %244 : vector<2x128xf32>
      %246 = vector.extract_strided_slice %229 {offsets = [0, 256], sizes = [2, 128], strides = [1, 1]} : vector<2x384xf32> to vector<2x128xf32>
      %247 = vector.extract_strided_slice %227 {offsets = [0, 256], sizes = [2, 128], strides = [1, 1]} : vector<2x384xf32> to vector<2x128xf32>
      %248 = arith.mulf %237, %247 : vector<2x128xf32>
      %249 = arith.addf %246, %248 : vector<2x128xf32>
      %250 = math.tanh %249 : vector<2x128xf32>
      %cst_112 = arith.constant 1.000000e+00 : f32
      %251 = vector.broadcast %cst_112 : f32 to vector<2x128xf32>
      %252 = arith.subf %251, %245 : vector<2x128xf32>
      %253 = arith.mulf %252, %250 : vector<2x128xf32>
      %254 = arith.mulf %245, %220 : vector<2x128xf32>
      %255 = arith.addf %253, %254 : vector<2x128xf32>
      %c0_113 = arith.constant 0 : index
      %c3 = arith.constant 3 : index
      %c0_114 = arith.constant 0 : index
      %256 = vector.load %arg14[%c0_113, %c3, %c0_114] : memref<2x8x128xf32, #tpu.memory_space<vmem>>, vector<2x1x128xf32>
      %257 = vector.shape_cast %256 : vector<2x1x128xf32> to vector<2x128xf32>
      %258 = vector.shape_cast %255 : vector<2x128xf32> to vector<2x1x128xf32>
      tpu.vector_store %arg14[%c0_113, %c3, %c0_114], %258 {strides = array<i32>} : memref<2x8x128xf32, #tpu.memory_space<vmem>>, vector<2x1x128xf32>,
      %259 = arith.truncf %255 : vector<2x128xf32> to vector<2x128xbf16>
      %cst_115 = arith.constant dense<0.000000e+00> : vector<2x384xf32>
      %260 = tpu.matmul %259, %104, %cst_115 {dimension_numbers = #tpu.dot_dimension_numbers<[1], [0], [0], [1], [0, 0, 1, 1], [], []>} : vector<2x128xbf16>, vector<128x384xbf16>, vector<2x384xf32> -> vector<2x384xf32>
      %261 = vector.broadcast %110 : vector<1x384xf32> to vector<2x384xf32>
      %262 = arith.addf %260, %261 : vector<2x384xf32>
      %263 = vector.extract_strided_slice %117 {offsets = [0, 4, 0], sizes = [2, 1, 384], strides = [1, 1, 1]} : vector<2x8x384xf32> to vector<2x1x384xf32>
      %264 = vector.shape_cast %263 : vector<2x1x384xf32> to vector<2x384xf32>
      %265 = vector.extract_strided_slice %264 {offsets = [0, 0], sizes = [2, 128], strides = [1, 1]} : vector<2x384xf32> to vector<2x128xf32>
      %266 = vector.extract_strided_slice %262 {offsets = [0, 0], sizes = [2, 128], strides = [1, 1]} : vector<2x384xf32> to vector<2x128xf32>
      %267 = arith.addf %265, %266 : vector<2x128xf32>
      %268 = arith.negf %267 : vector<2x128xf32>
      %269 = math.exp %268 : vector<2x128xf32>
      %cst_116 = arith.constant 1.000000e+00 : f32
      %270 = vector.broadcast %cst_116 : f32 to vector<2x128xf32>
      %271 = arith.addf %270, %269 : vector<2x128xf32>
      %272 = arith.divf %270, %271 : vector<2x128xf32>
      %273 = vector.extract_strided_slice %264 {offsets = [0, 128], sizes = [2, 128], strides = [1, 1]} : vector<2x384xf32> to vector<2x128xf32>
      %274 = vector.extract_strided_slice %262 {offsets = [0, 128], sizes = [2, 128], strides = [1, 1]} : vector<2x384xf32> to vector<2x128xf32>
      %275 = arith.addf %273, %274 : vector<2x128xf32>
      %276 = arith.negf %275 : vector<2x128xf32>
      %277 = math.exp %276 : vector<2x128xf32>
      %cst_117 = arith.constant 1.000000e+00 : f32
      %278 = vector.broadcast %cst_117 : f32 to vector<2x128xf32>
      %279 = arith.addf %278, %277 : vector<2x128xf32>
      %280 = arith.divf %278, %279 : vector<2x128xf32>
      %281 = vector.extract_strided_slice %264 {offsets = [0, 256], sizes = [2, 128], strides = [1, 1]} : vector<2x384xf32> to vector<2x128xf32>
      %282 = vector.extract_strided_slice %262 {offsets = [0, 256], sizes = [2, 128], strides = [1, 1]} : vector<2x384xf32> to vector<2x128xf32>
      %283 = arith.mulf %272, %282 : vector<2x128xf32>
      %284 = arith.addf %281, %283 : vector<2x128xf32>
      %285 = math.tanh %284 : vector<2x128xf32>
      %cst_118 = arith.constant 1.000000e+00 : f32
      %286 = vector.broadcast %cst_118 : f32 to vector<2x128xf32>
      %287 = arith.subf %286, %280 : vector<2x128xf32>
      %288 = arith.mulf %287, %285 : vector<2x128xf32>
      %289 = arith.mulf %280, %255 : vector<2x128xf32>
      %290 = arith.addf %288, %289 : vector<2x128xf32>
      %c0_119 = arith.constant 0 : index
      %c4 = arith.constant 4 : index
      %c0_120 = arith.constant 0 : index
      %291 = vector.load %arg14[%c0_119, %c4, %c0_120] : memref<2x8x128xf32, #tpu.memory_space<vmem>>, vector<2x1x128xf32>
      %292 = vector.shape_cast %291 : vector<2x1x128xf32> to vector<2x128xf32>
      %293 = vector.shape_cast %290 : vector<2x128xf32> to vector<2x1x128xf32>
      tpu.vector_store %arg14[%c0_119, %c4, %c0_120], %293 {strides = array<i32>} : memref<2x8x128xf32, #tpu.memory_space<vmem>>, vector<2x1x128xf32>,
      %294 = arith.truncf %290 : vector<2x128xf32> to vector<2x128xbf16>
      %cst_121 = arith.constant dense<0.000000e+00> : vector<2x384xf32>
      %295 = tpu.matmul %294, %104, %cst_121 {dimension_numbers = #tpu.dot_dimension_numbers<[1], [0], [0], [1], [0, 0, 1, 1], [], []>} : vector<2x128xbf16>, vector<128x384xbf16>, vector<2x384xf32> -> vector<2x384xf32>
      %296 = vector.broadcast %110 : vector<1x384xf32> to vector<2x384xf32>
      %297 = arith.addf %295, %296 : vector<2x384xf32>
      %298 = vector.extract_strided_slice %117 {offsets = [0, 5, 0], sizes = [2, 1, 384], strides = [1, 1, 1]} : vector<2x8x384xf32> to vector<2x1x384xf32>
      %299 = vector.shape_cast %298 : vector<2x1x384xf32> to vector<2x384xf32>
      %300 = vector.extract_strided_slice %299 {offsets = [0, 0], sizes = [2, 128], strides = [1, 1]} : vector<2x384xf32> to vector<2x128xf32>
      %301 = vector.extract_strided_slice %297 {offsets = [0, 0], sizes = [2, 128], strides = [1, 1]} : vector<2x384xf32> to vector<2x128xf32>
      %302 = arith.addf %300, %301 : vector<2x128xf32>
      %303 = arith.negf %302 : vector<2x128xf32>
      %304 = math.exp %303 : vector<2x128xf32>
      %cst_122 = arith.constant 1.000000e+00 : f32
      %305 = vector.broadcast %cst_122 : f32 to vector<2x128xf32>
      %306 = arith.addf %305, %304 : vector<2x128xf32>
      %307 = arith.divf %305, %306 : vector<2x128xf32>
      %308 = vector.extract_strided_slice %299 {offsets = [0, 128], sizes = [2, 128], strides = [1, 1]} : vector<2x384xf32> to vector<2x128xf32>
      %309 = vector.extract_strided_slice %297 {offsets = [0, 128], sizes = [2, 128], strides = [1, 1]} : vector<2x384xf32> to vector<2x128xf32>
      %310 = arith.addf %308, %309 : vector<2x128xf32>
      %311 = arith.negf %310 : vector<2x128xf32>
      %312 = math.exp %311 : vector<2x128xf32>
      %cst_123 = arith.constant 1.000000e+00 : f32
      %313 = vector.broadcast %cst_123 : f32 to vector<2x128xf32>
      %314 = arith.addf %313, %312 : vector<2x128xf32>
      %315 = arith.divf %313, %314 : vector<2x128xf32>
      %316 = vector.extract_strided_slice %299 {offsets = [0, 256], sizes = [2, 128], strides = [1, 1]} : vector<2x384xf32> to vector<2x128xf32>
      %317 = vector.extract_strided_slice %297 {offsets = [0, 256], sizes = [2, 128], strides = [1, 1]} : vector<2x384xf32> to vector<2x128xf32>
      %318 = arith.mulf %307, %317 : vector<2x128xf32>
      %319 = arith.addf %316, %318 : vector<2x128xf32>
      %320 = math.tanh %319 : vector<2x128xf32>
      %cst_124 = arith.constant 1.000000e+00 : f32
      %321 = vector.broadcast %cst_124 : f32 to vector<2x128xf32>
      %322 = arith.subf %321, %315 : vector<2x128xf32>
      %323 = arith.mulf %322, %320 : vector<2x128xf32>
      %324 = arith.mulf %315, %290 : vector<2x128xf32>
      %325 = arith.addf %323, %324 : vector<2x128xf32>
      %c0_125 = arith.constant 0 : index
      %c5 = arith.constant 5 : index
      %c0_126 = arith.constant 0 : index
      %326 = vector.load %arg14[%c0_125, %c5, %c0_126] : memref<2x8x128xf32, #tpu.memory_space<vmem>>, vector<2x1x128xf32>
      %327 = vector.shape_cast %326 : vector<2x1x128xf32> to vector<2x128xf32>
      %328 = vector.shape_cast %325 : vector<2x128xf32> to vector<2x1x128xf32>
      tpu.vector_store %arg14[%c0_125, %c5, %c0_126], %328 {strides = array<i32>} : memref<2x8x128xf32, #tpu.memory_space<vmem>>, vector<2x1x128xf32>,
      %329 = arith.truncf %325 : vector<2x128xf32> to vector<2x128xbf16>
      %cst_127 = arith.constant dense<0.000000e+00> : vector<2x384xf32>
      %330 = tpu.matmul %329, %104, %cst_127 {dimension_numbers = #tpu.dot_dimension_numbers<[1], [0], [0], [1], [0, 0, 1, 1], [], []>} : vector<2x128xbf16>, vector<128x384xbf16>, vector<2x384xf32> -> vector<2x384xf32>
      %331 = vector.broadcast %110 : vector<1x384xf32> to vector<2x384xf32>
      %332 = arith.addf %330, %331 : vector<2x384xf32>
      %333 = vector.extract_strided_slice %117 {offsets = [0, 6, 0], sizes = [2, 1, 384], strides = [1, 1, 1]} : vector<2x8x384xf32> to vector<2x1x384xf32>
      %334 = vector.shape_cast %333 : vector<2x1x384xf32> to vector<2x384xf32>
      %335 = vector.extract_strided_slice %334 {offsets = [0, 0], sizes = [2, 128], strides = [1, 1]} : vector<2x384xf32> to vector<2x128xf32>
      %336 = vector.extract_strided_slice %332 {offsets = [0, 0], sizes = [2, 128], strides = [1, 1]} : vector<2x384xf32> to vector<2x128xf32>
      %337 = arith.addf %335, %336 : vector<2x128xf32>
      %338 = arith.negf %337 : vector<2x128xf32>
      %339 = math.exp %338 : vector<2x128xf32>
      %cst_128 = arith.constant 1.000000e+00 : f32
      %340 = vector.broadcast %cst_128 : f32 to vector<2x128xf32>
      %341 = arith.addf %340, %339 : vector<2x128xf32>
      %342 = arith.divf %340, %341 : vector<2x128xf32>
      %343 = vector.extract_strided_slice %334 {offsets = [0, 128], sizes = [2, 128], strides = [1, 1]} : vector<2x384xf32> to vector<2x128xf32>
      %344 = vector.extract_strided_slice %332 {offsets = [0, 128], sizes = [2, 128], strides = [1, 1]} : vector<2x384xf32> to vector<2x128xf32>
      %345 = arith.addf %343, %344 : vector<2x128xf32>
      %346 = arith.negf %345 : vector<2x128xf32>
      %347 = math.exp %346 : vector<2x128xf32>
      %cst_129 = arith.constant 1.000000e+00 : f32
      %348 = vector.broadcast %cst_129 : f32 to vector<2x128xf32>
      %349 = arith.addf %348, %347 : vector<2x128xf32>
      %350 = arith.divf %348, %349 : vector<2x128xf32>
      %351 = vector.extract_strided_slice %334 {offsets = [0, 256], sizes = [2, 128], strides = [1, 1]} : vector<2x384xf32> to vector<2x128xf32>
      %352 = vector.extract_strided_slice %332 {offsets = [0, 256], sizes = [2, 128], strides = [1, 1]} : vector<2x384xf32> to vector<2x128xf32>
      %353 = arith.mulf %342, %352 : vector<2x128xf32>
      %354 = arith.addf %351, %353 : vector<2x128xf32>
      %355 = math.tanh %354 : vector<2x128xf32>
      %cst_130 = arith.constant 1.000000e+00 : f32
      %356 = vector.broadcast %cst_130 : f32 to vector<2x128xf32>
      %357 = arith.subf %356, %350 : vector<2x128xf32>
      %358 = arith.mulf %357, %355 : vector<2x128xf32>
      %359 = arith.mulf %350, %325 : vector<2x128xf32>
      %360 = arith.addf %358, %359 : vector<2x128xf32>
      %c0_131 = arith.constant 0 : index
      %c6 = arith.constant 6 : index
      %c0_132 = arith.constant 0 : index
      %361 = vector.load %arg14[%c0_131, %c6, %c0_132] : memref<2x8x128xf32, #tpu.memory_space<vmem>>, vector<2x1x128xf32>
      %362 = vector.shape_cast %361 : vector<2x1x128xf32> to vector<2x128xf32>
      %363 = vector.shape_cast %360 : vector<2x128xf32> to vector<2x1x128xf32>
      tpu.vector_store %arg14[%c0_131, %c6, %c0_132], %363 {strides = array<i32>} : memref<2x8x128xf32, #tpu.memory_space<vmem>>, vector<2x1x128xf32>,
      %364 = arith.truncf %360 : vector<2x128xf32> to vector<2x128xbf16>
      %cst_133 = arith.constant dense<0.000000e+00> : vector<2x384xf32>
      %365 = tpu.matmul %364, %104, %cst_133 {dimension_numbers = #tpu.dot_dimension_numbers<[1], [0], [0], [1], [0, 0, 1, 1], [], []>} : vector<2x128xbf16>, vector<128x384xbf16>, vector<2x384xf32> -> vector<2x384xf32>
      %366 = vector.broadcast %110 : vector<1x384xf32> to vector<2x384xf32>
      %367 = arith.addf %365, %366 : vector<2x384xf32>
      %368 = vector.extract_strided_slice %117 {offsets = [0, 7, 0], sizes = [2, 1, 384], strides = [1, 1, 1]} : vector<2x8x384xf32> to vector<2x1x384xf32>
      %369 = vector.shape_cast %368 : vector<2x1x384xf32> to vector<2x384xf32>
      %370 = vector.extract_strided_slice %369 {offsets = [0, 0], sizes = [2, 128], strides = [1, 1]} : vector<2x384xf32> to vector<2x128xf32>
      %371 = vector.extract_strided_slice %367 {offsets = [0, 0], sizes = [2, 128], strides = [1, 1]} : vector<2x384xf32> to vector<2x128xf32>
      %372 = arith.addf %370, %371 : vector<2x128xf32>
      %373 = arith.negf %372 : vector<2x128xf32>
      %374 = math.exp %373 : vector<2x128xf32>
      %cst_134 = arith.constant 1.000000e+00 : f32
      %375 = vector.broadcast %cst_134 : f32 to vector<2x128xf32>
      %376 = arith.addf %375, %374 : vector<2x128xf32>
      %377 = arith.divf %375, %376 : vector<2x128xf32>
      %378 = vector.extract_strided_slice %369 {offsets = [0, 128], sizes = [2, 128], strides = [1, 1]} : vector<2x384xf32> to vector<2x128xf32>
      %379 = vector.extract_strided_slice %367 {offsets = [0, 128], sizes = [2, 128], strides = [1, 1]} : vector<2x384xf32> to vector<2x128xf32>
      %380 = arith.addf %378, %379 : vector<2x128xf32>
      %381 = arith.negf %380 : vector<2x128xf32>
      %382 = math.exp %381 : vector<2x128xf32>
      %cst_135 = arith.constant 1.000000e+00 : f32
      %383 = vector.broadcast %cst_135 : f32 to vector<2x128xf32>
      %384 = arith.addf %383, %382 : vector<2x128xf32>
      %385 = arith.divf %383, %384 : vector<2x128xf32>
      %386 = vector.extract_strided_slice %369 {offsets = [0, 256], sizes = [2, 128], strides = [1, 1]} : vector<2x384xf32> to vector<2x128xf32>
      %387 = vector.extract_strided_slice %367 {offsets = [0, 256], sizes = [2, 128], strides = [1, 1]} : vector<2x384xf32> to vector<2x128xf32>
      %388 = arith.mulf %377, %387 : vector<2x128xf32>
      %389 = arith.addf %386, %388 : vector<2x128xf32>
      %390 = math.tanh %389 : vector<2x128xf32>
      %cst_136 = arith.constant 1.000000e+00 : f32
      %391 = vector.broadcast %cst_136 : f32 to vector<2x128xf32>
      %392 = arith.subf %391, %385 : vector<2x128xf32>
      %393 = arith.mulf %392, %390 : vector<2x128xf32>
      %394 = arith.mulf %385, %360 : vector<2x128xf32>
      %395 = arith.addf %393, %394 : vector<2x128xf32>
      %c0_137 = arith.constant 0 : index
      %c7 = arith.constant 7 : index
      %c0_138 = arith.constant 0 : index
      %396 = vector.load %arg14[%c0_137, %c7, %c0_138] : memref<2x8x128xf32, #tpu.memory_space<vmem>>, vector<2x1x128xf32>
      %397 = vector.shape_cast %396 : vector<2x1x128xf32> to vector<2x128xf32>
      %398 = vector.shape_cast %395 : vector<2x128xf32> to vector<2x1x128xf32>
      tpu.vector_store %arg14[%c0_137, %c7, %c0_138], %398 {strides = array<i32>} : memref<2x8x128xf32, #tpu.memory_space<vmem>>, vector<2x1x128xf32>,
    }
    %c2_i32_32 = arith.constant 2 : i32
    %c0_33 = arith.constant 0 : index
    %c0_34 = arith.constant 0 : index
    %c0_35 = arith.constant 0 : index
    %42 = vector.load %arg14[%c0_33, %c0_34, %c0_35] : memref<2x8x128xf32, #tpu.memory_space<vmem>>, vector<2x8x128xf32>
    %43 = arith.truncf %39 : vector<2x8x128xf32> to vector<2x8x128xbf16>
    "tpu.trace_start"() <{level = 10 : i32, message = "bqd,bkd->bqk"}> : () -> ()
    %cst_36 = arith.constant dense<0.000000e+00> : vector<2x8x8xf32>
    %44 = tpu.matmul %1, %43, %cst_36 {dimension_numbers = #tpu.dot_dimension_numbers<[2], [2], [1], [1], [0, 0, 0, 1, 1, 1], [0], [0]>} : vector<2x8x128xbf16>, vector<2x8x128xbf16>, vector<2x8x8xf32> -> vector<2x8x8xf32>
    "tpu.trace_stop"() : () -> ()
    %cst_37 = arith.constant 0.000000e+00 : f32
    %45 = vector.broadcast %cst_37 : f32 to vector<2x8x8xf32>
    %46 = arith.maximumf %44, %45 : vector<2x8x8xf32>
    %47 = arith.addf %46, %2 : vector<2x8x8xf32>
    %cst_38 = arith.constant dense<0xFF800000> : vector<2x8xf32>
    %48 = vector.multi_reduction <maximumf>, %47, %cst_38 [2] : vector<2x8x8xf32> to vector<2x8xf32>
    %49 = vector.shape_cast %48 : vector<2x8xf32> to vector<2x8x1xf32>
    %50 = vector.broadcast %49 : vector<2x8x1xf32> to vector<2x8x8xf32>
    %51 = arith.subf %47, %50 : vector<2x8x8xf32>
    %52 = math.exp %51 : vector<2x8x8xf32>
    %cst_39 = arith.constant dense<0.000000e+00> : vector<2x8xf32>
    %53 = vector.multi_reduction <add>, %52, %cst_39 [2] : vector<2x8x8xf32> to vector<2x8xf32>
    %54 = vector.shape_cast %53 : vector<2x8xf32> to vector<2x8x1xf32>
    %55 = vector.broadcast %54 : vector<2x8x1xf32> to vector<2x8x8xf32>
    %56 = arith.divf %52, %55 : vector<2x8x8xf32>
    %57 = arith.truncf %56 : vector<2x8x8xf32> to vector<2x8x8xbf16>
    %58 = arith.truncf %42 : vector<2x8x128xf32> to vector<2x8x128xbf16>
    "tpu.trace_start"() <{level = 10 : i32, message = "bqk,bkd->bqd"}> : () -> ()
    %cst_40 = arith.constant dense<0.000000e+00> : vector<2x8x128xf32>
    %59 = tpu.matmul %57, %58, %cst_40 {dimension_numbers = #tpu.dot_dimension_numbers<[2], [1], [1], [2], [0, 0, 0, 1, 1, 2], [0], [0]>} : vector<2x8x8xbf16>, vector<2x8x128xbf16>, vector<2x8x128xf32> -> vector<2x8x128xf32>
    "tpu.trace_stop"() : () -> ()
    %cst_41 = arith.constant 0.000000e+00 : f32
    %60 = vector.broadcast %cst_41 : f32 to vector<2x8x128xf32>
    %61 = arith.maximumf %59, %60 : vector<2x8x128xf32>
    %62 = arith.addf %61, %42 : vector<2x8x128xf32>
    %c0_42 = arith.constant 0 : index
    %c0_43 = arith.constant 0 : index
    %c0_44 = arith.constant 0 : index
    %63 = vector.load %arg14[%c0_42, %c0_43, %c0_44] : memref<2x8x128xf32, #tpu.memory_space<vmem>>, vector<2x8x128xf32>
    tpu.vector_store %arg14[%c0_42, %c0_43, %c0_44], %62 {strides = array<i32>} : memref<2x8x128xf32, #tpu.memory_space<vmem>>, vector<2x8x128xf32>,
    %c0_i32_45 = arith.constant 0 : i32
    %c2_i32_46 = arith.constant 2 : i32
    %64 = arith.addi %c0_i32_45, %c2_i32_46 : i32
    %c1_i32_47 = arith.constant 1 : i32
    scf.for %arg15 = %c0_i32_45 to %64 step %c1_i32_47  : i32 {
      %c4_i32 = arith.constant 4 : i32
      %98 = arith.addi %c4_i32, %arg15 : i32
      %99 = arith.index_cast %98 : i32 to index
      %c0_76 = arith.constant 0 : index
      %c0_77 = arith.constant 0 : index
      %100 = vector.load %arg7[%99, %c0_76, %c0_77] : memref<8x128x384xbf16, #tpu.memory_space<vmem>>, vector<1x128x384xbf16>
      %101 = vector.shape_cast %100 : vector<1x128x384xbf16> to vector<128x384xbf16>
      %102 = arith.index_cast %98 : i32 to index
      %c0_78 = arith.constant 0 : index
      %c0_79 = arith.constant 0 : index
      %103 = vector.load %arg8[%102, %c0_78, %c0_79] : memref<8x128x384xbf16, #tpu.memory_space<vmem>>, vector<1x128x384xbf16>
      %104 = vector.shape_cast %103 : vector<1x128x384xbf16> to vector<128x384xbf16>
      %105 = arith.index_cast %98 : i32 to index
      %c0_80 = arith.constant 0 : index
      %c0_81 = arith.constant 0 : index
      %106 = vector.load %arg9[%105, %c0_80, %c0_81] : memref<8x1x384xf32, #tpu.memory_space<vmem>>, vector<1x1x384xf32>
      %107 = vector.shape_cast %106 : vector<1x1x384xf32> to vector<1x384xf32>
      %108 = arith.index_cast %98 : i32 to index
      %c0_82 = arith.constant 0 : index
      %c0_83 = arith.constant 0 : index
      %109 = vector.load %arg10[%108, %c0_82, %c0_83] : memref<8x1x384xf32, #tpu.memory_space<vmem>>, vector<1x1x384xf32>
      %110 = vector.shape_cast %109 : vector<1x1x384xf32> to vector<1x384xf32>
      %c0_84 = arith.constant 0 : index
      %c0_85 = arith.constant 0 : index
      %c0_86 = arith.constant 0 : index
      %111 = vector.load %arg14[%c0_84, %c0_85, %c0_86] : memref<2x8x128xf32, #tpu.memory_space<vmem>>, vector<2x8x128xf32>
      %112 = vector.shape_cast %111 : vector<2x8x128xf32> to vector<16x128xf32>
      %113 = arith.truncf %112 : vector<16x128xf32> to vector<16x128xbf16>
      %cst_87 = arith.constant dense<0.000000e+00> : vector<16x384xf32>
      %114 = tpu.matmul %113, %101, %cst_87 {dimension_numbers = #tpu.dot_dimension_numbers<[1], [0], [0], [1], [0, 0, 1, 1], [], []>} : vector<16x128xbf16>, vector<128x384xbf16>, vector<16x384xf32> -> vector<16x384xf32>
      %115 = vector.broadcast %107 : vector<1x384xf32> to vector<16x384xf32>
      %116 = arith.addf %114, %115 : vector<16x384xf32>
      %117 = vector.shape_cast %116 : vector<16x384xf32> to vector<2x8x384xf32>
      %cst_88 = arith.constant 0.000000e+00 : f32
      %118 = vector.broadcast %cst_88 : f32 to vector<2x128xf32>
      %119 = arith.truncf %118 : vector<2x128xf32> to vector<2x128xbf16>
      %cst_89 = arith.constant dense<0.000000e+00> : vector<2x384xf32>
      %120 = tpu.matmul %119, %104, %cst_89 {dimension_numbers = #tpu.dot_dimension_numbers<[1], [0], [0], [1], [0, 0, 1, 1], [], []>} : vector<2x128xbf16>, vector<128x384xbf16>, vector<2x384xf32> -> vector<2x384xf32>
      %121 = vector.broadcast %110 : vector<1x384xf32> to vector<2x384xf32>
      %122 = arith.addf %120, %121 : vector<2x384xf32>
      %123 = vector.extract_strided_slice %117 {offsets = [0, 0, 0], sizes = [2, 1, 384], strides = [1, 1, 1]} : vector<2x8x384xf32> to vector<2x1x384xf32>
      %124 = vector.shape_cast %123 : vector<2x1x384xf32> to vector<2x384xf32>
      %125 = vector.extract_strided_slice %124 {offsets = [0, 0], sizes = [2, 128], strides = [1, 1]} : vector<2x384xf32> to vector<2x128xf32>
      %126 = vector.extract_strided_slice %122 {offsets = [0, 0], sizes = [2, 128], strides = [1, 1]} : vector<2x384xf32> to vector<2x128xf32>
      %127 = arith.addf %125, %126 : vector<2x128xf32>
      %128 = arith.negf %127 : vector<2x128xf32>
      %129 = math.exp %128 : vector<2x128xf32>
      %cst_90 = arith.constant 1.000000e+00 : f32
      %130 = vector.broadcast %cst_90 : f32 to vector<2x128xf32>
      %131 = arith.addf %130, %129 : vector<2x128xf32>
      %132 = arith.divf %130, %131 : vector<2x128xf32>
      %133 = vector.extract_strided_slice %124 {offsets = [0, 128], sizes = [2, 128], strides = [1, 1]} : vector<2x384xf32> to vector<2x128xf32>
      %134 = vector.extract_strided_slice %122 {offsets = [0, 128], sizes = [2, 128], strides = [1, 1]} : vector<2x384xf32> to vector<2x128xf32>
      %135 = arith.addf %133, %134 : vector<2x128xf32>
      %136 = arith.negf %135 : vector<2x128xf32>
      %137 = math.exp %136 : vector<2x128xf32>
      %cst_91 = arith.constant 1.000000e+00 : f32
      %138 = vector.broadcast %cst_91 : f32 to vector<2x128xf32>
      %139 = arith.addf %138, %137 : vector<2x128xf32>
      %140 = arith.divf %138, %139 : vector<2x128xf32>
      %141 = vector.extract_strided_slice %124 {offsets = [0, 256], sizes = [2, 128], strides = [1, 1]} : vector<2x384xf32> to vector<2x128xf32>
      %142 = vector.extract_strided_slice %122 {offsets = [0, 256], sizes = [2, 128], strides = [1, 1]} : vector<2x384xf32> to vector<2x128xf32>
      %143 = arith.mulf %132, %142 : vector<2x128xf32>
      %144 = arith.addf %141, %143 : vector<2x128xf32>
      %145 = math.tanh %144 : vector<2x128xf32>
      %cst_92 = arith.constant 1.000000e+00 : f32
      %146 = vector.broadcast %cst_92 : f32 to vector<2x128xf32>
      %147 = arith.subf %146, %140 : vector<2x128xf32>
      %148 = arith.mulf %147, %145 : vector<2x128xf32>
      %149 = arith.mulf %140, %118 : vector<2x128xf32>
      %150 = arith.addf %148, %149 : vector<2x128xf32>
      %c0_93 = arith.constant 0 : index
      %c0_94 = arith.constant 0 : index
      %c0_95 = arith.constant 0 : index
      %151 = vector.load %arg14[%c0_93, %c0_94, %c0_95] : memref<2x8x128xf32, #tpu.memory_space<vmem>>, vector<2x1x128xf32>
      %152 = vector.shape_cast %151 : vector<2x1x128xf32> to vector<2x128xf32>
      %153 = vector.shape_cast %150 : vector<2x128xf32> to vector<2x1x128xf32>
      tpu.vector_store %arg14[%c0_93, %c0_94, %c0_95], %153 {strides = array<i32>} : memref<2x8x128xf32, #tpu.memory_space<vmem>>, vector<2x1x128xf32>,
      %154 = arith.truncf %150 : vector<2x128xf32> to vector<2x128xbf16>
      %cst_96 = arith.constant dense<0.000000e+00> : vector<2x384xf32>
      %155 = tpu.matmul %154, %104, %cst_96 {dimension_numbers = #tpu.dot_dimension_numbers<[1], [0], [0], [1], [0, 0, 1, 1], [], []>} : vector<2x128xbf16>, vector<128x384xbf16>, vector<2x384xf32> -> vector<2x384xf32>
      %156 = vector.broadcast %110 : vector<1x384xf32> to vector<2x384xf32>
      %157 = arith.addf %155, %156 : vector<2x384xf32>
      %158 = vector.extract_strided_slice %117 {offsets = [0, 1, 0], sizes = [2, 1, 384], strides = [1, 1, 1]} : vector<2x8x384xf32> to vector<2x1x384xf32>
      %159 = vector.shape_cast %158 : vector<2x1x384xf32> to vector<2x384xf32>
      %160 = vector.extract_strided_slice %159 {offsets = [0, 0], sizes = [2, 128], strides = [1, 1]} : vector<2x384xf32> to vector<2x128xf32>
      %161 = vector.extract_strided_slice %157 {offsets = [0, 0], sizes = [2, 128], strides = [1, 1]} : vector<2x384xf32> to vector<2x128xf32>
      %162 = arith.addf %160, %161 : vector<2x128xf32>
      %163 = arith.negf %162 : vector<2x128xf32>
      %164 = math.exp %163 : vector<2x128xf32>
      %cst_97 = arith.constant 1.000000e+00 : f32
      %165 = vector.broadcast %cst_97 : f32 to vector<2x128xf32>
      %166 = arith.addf %165, %164 : vector<2x128xf32>
      %167 = arith.divf %165, %166 : vector<2x128xf32>
      %168 = vector.extract_strided_slice %159 {offsets = [0, 128], sizes = [2, 128], strides = [1, 1]} : vector<2x384xf32> to vector<2x128xf32>
      %169 = vector.extract_strided_slice %157 {offsets = [0, 128], sizes = [2, 128], strides = [1, 1]} : vector<2x384xf32> to vector<2x128xf32>
      %170 = arith.addf %168, %169 : vector<2x128xf32>
      %171 = arith.negf %170 : vector<2x128xf32>
      %172 = math.exp %171 : vector<2x128xf32>
      %cst_98 = arith.constant 1.000000e+00 : f32
      %173 = vector.broadcast %cst_98 : f32 to vector<2x128xf32>
      %174 = arith.addf %173, %172 : vector<2x128xf32>
      %175 = arith.divf %173, %174 : vector<2x128xf32>
      %176 = vector.extract_strided_slice %159 {offsets = [0, 256], sizes = [2, 128], strides = [1, 1]} : vector<2x384xf32> to vector<2x128xf32>
      %177 = vector.extract_strided_slice %157 {offsets = [0, 256], sizes = [2, 128], strides = [1, 1]} : vector<2x384xf32> to vector<2x128xf32>
      %178 = arith.mulf %167, %177 : vector<2x128xf32>
      %179 = arith.addf %176, %178 : vector<2x128xf32>
      %180 = math.tanh %179 : vector<2x128xf32>
      %cst_99 = arith.constant 1.000000e+00 : f32
      %181 = vector.broadcast %cst_99 : f32 to vector<2x128xf32>
      %182 = arith.subf %181, %175 : vector<2x128xf32>
      %183 = arith.mulf %182, %180 : vector<2x128xf32>
      %184 = arith.mulf %175, %150 : vector<2x128xf32>
      %185 = arith.addf %183, %184 : vector<2x128xf32>
      %c0_100 = arith.constant 0 : index
      %c1 = arith.constant 1 : index
      %c0_101 = arith.constant 0 : index
      %186 = vector.load %arg14[%c0_100, %c1, %c0_101] : memref<2x8x128xf32, #tpu.memory_space<vmem>>, vector<2x1x128xf32>
      %187 = vector.shape_cast %186 : vector<2x1x128xf32> to vector<2x128xf32>
      %188 = vector.shape_cast %185 : vector<2x128xf32> to vector<2x1x128xf32>
      tpu.vector_store %arg14[%c0_100, %c1, %c0_101], %188 {strides = array<i32>} : memref<2x8x128xf32, #tpu.memory_space<vmem>>, vector<2x1x128xf32>,
      %189 = arith.truncf %185 : vector<2x128xf32> to vector<2x128xbf16>
      %cst_102 = arith.constant dense<0.000000e+00> : vector<2x384xf32>
      %190 = tpu.matmul %189, %104, %cst_102 {dimension_numbers = #tpu.dot_dimension_numbers<[1], [0], [0], [1], [0, 0, 1, 1], [], []>} : vector<2x128xbf16>, vector<128x384xbf16>, vector<2x384xf32> -> vector<2x384xf32>
      %191 = vector.broadcast %110 : vector<1x384xf32> to vector<2x384xf32>
      %192 = arith.addf %190, %191 : vector<2x384xf32>
      %193 = vector.extract_strided_slice %117 {offsets = [0, 2, 0], sizes = [2, 1, 384], strides = [1, 1, 1]} : vector<2x8x384xf32> to vector<2x1x384xf32>
      %194 = vector.shape_cast %193 : vector<2x1x384xf32> to vector<2x384xf32>
      %195 = vector.extract_strided_slice %194 {offsets = [0, 0], sizes = [2, 128], strides = [1, 1]} : vector<2x384xf32> to vector<2x128xf32>
      %196 = vector.extract_strided_slice %192 {offsets = [0, 0], sizes = [2, 128], strides = [1, 1]} : vector<2x384xf32> to vector<2x128xf32>
      %197 = arith.addf %195, %196 : vector<2x128xf32>
      %198 = arith.negf %197 : vector<2x128xf32>
      %199 = math.exp %198 : vector<2x128xf32>
      %cst_103 = arith.constant 1.000000e+00 : f32
      %200 = vector.broadcast %cst_103 : f32 to vector<2x128xf32>
      %201 = arith.addf %200, %199 : vector<2x128xf32>
      %202 = arith.divf %200, %201 : vector<2x128xf32>
      %203 = vector.extract_strided_slice %194 {offsets = [0, 128], sizes = [2, 128], strides = [1, 1]} : vector<2x384xf32> to vector<2x128xf32>
      %204 = vector.extract_strided_slice %192 {offsets = [0, 128], sizes = [2, 128], strides = [1, 1]} : vector<2x384xf32> to vector<2x128xf32>
      %205 = arith.addf %203, %204 : vector<2x128xf32>
      %206 = arith.negf %205 : vector<2x128xf32>
      %207 = math.exp %206 : vector<2x128xf32>
      %cst_104 = arith.constant 1.000000e+00 : f32
      %208 = vector.broadcast %cst_104 : f32 to vector<2x128xf32>
      %209 = arith.addf %208, %207 : vector<2x128xf32>
      %210 = arith.divf %208, %209 : vector<2x128xf32>
      %211 = vector.extract_strided_slice %194 {offsets = [0, 256], sizes = [2, 128], strides = [1, 1]} : vector<2x384xf32> to vector<2x128xf32>
      %212 = vector.extract_strided_slice %192 {offsets = [0, 256], sizes = [2, 128], strides = [1, 1]} : vector<2x384xf32> to vector<2x128xf32>
      %213 = arith.mulf %202, %212 : vector<2x128xf32>
      %214 = arith.addf %211, %213 : vector<2x128xf32>
      %215 = math.tanh %214 : vector<2x128xf32>
      %cst_105 = arith.constant 1.000000e+00 : f32
      %216 = vector.broadcast %cst_105 : f32 to vector<2x128xf32>
      %217 = arith.subf %216, %210 : vector<2x128xf32>
      %218 = arith.mulf %217, %215 : vector<2x128xf32>
      %219 = arith.mulf %210, %185 : vector<2x128xf32>
      %220 = arith.addf %218, %219 : vector<2x128xf32>
      %c0_106 = arith.constant 0 : index
      %c2 = arith.constant 2 : index
      %c0_107 = arith.constant 0 : index
      %221 = vector.load %arg14[%c0_106, %c2, %c0_107] : memref<2x8x128xf32, #tpu.memory_space<vmem>>, vector<2x1x128xf32>
      %222 = vector.shape_cast %221 : vector<2x1x128xf32> to vector<2x128xf32>
      %223 = vector.shape_cast %220 : vector<2x128xf32> to vector<2x1x128xf32>
      tpu.vector_store %arg14[%c0_106, %c2, %c0_107], %223 {strides = array<i32>} : memref<2x8x128xf32, #tpu.memory_space<vmem>>, vector<2x1x128xf32>,
      %224 = arith.truncf %220 : vector<2x128xf32> to vector<2x128xbf16>
      %cst_108 = arith.constant dense<0.000000e+00> : vector<2x384xf32>
      %225 = tpu.matmul %224, %104, %cst_108 {dimension_numbers = #tpu.dot_dimension_numbers<[1], [0], [0], [1], [0, 0, 1, 1], [], []>} : vector<2x128xbf16>, vector<128x384xbf16>, vector<2x384xf32> -> vector<2x384xf32>
      %226 = vector.broadcast %110 : vector<1x384xf32> to vector<2x384xf32>
      %227 = arith.addf %225, %226 : vector<2x384xf32>
      %228 = vector.extract_strided_slice %117 {offsets = [0, 3, 0], sizes = [2, 1, 384], strides = [1, 1, 1]} : vector<2x8x384xf32> to vector<2x1x384xf32>
      %229 = vector.shape_cast %228 : vector<2x1x384xf32> to vector<2x384xf32>
      %230 = vector.extract_strided_slice %229 {offsets = [0, 0], sizes = [2, 128], strides = [1, 1]} : vector<2x384xf32> to vector<2x128xf32>
      %231 = vector.extract_strided_slice %227 {offsets = [0, 0], sizes = [2, 128], strides = [1, 1]} : vector<2x384xf32> to vector<2x128xf32>
      %232 = arith.addf %230, %231 : vector<2x128xf32>
      %233 = arith.negf %232 : vector<2x128xf32>
      %234 = math.exp %233 : vector<2x128xf32>
      %cst_109 = arith.constant 1.000000e+00 : f32
      %235 = vector.broadcast %cst_109 : f32 to vector<2x128xf32>
      %236 = arith.addf %235, %234 : vector<2x128xf32>
      %237 = arith.divf %235, %236 : vector<2x128xf32>
      %238 = vector.extract_strided_slice %229 {offsets = [0, 128], sizes = [2, 128], strides = [1, 1]} : vector<2x384xf32> to vector<2x128xf32>
      %239 = vector.extract_strided_slice %227 {offsets = [0, 128], sizes = [2, 128], strides = [1, 1]} : vector<2x384xf32> to vector<2x128xf32>
      %240 = arith.addf %238, %239 : vector<2x128xf32>
      %241 = arith.negf %240 : vector<2x128xf32>
      %242 = math.exp %241 : vector<2x128xf32>
      %cst_110 = arith.constant 1.000000e+00 : f32
      %243 = vector.broadcast %cst_110 : f32 to vector<2x128xf32>
      %244 = arith.addf %243, %242 : vector<2x128xf32>
      %245 = arith.divf %243, %244 : vector<2x128xf32>
      %246 = vector.extract_strided_slice %229 {offsets = [0, 256], sizes = [2, 128], strides = [1, 1]} : vector<2x384xf32> to vector<2x128xf32>
      %247 = vector.extract_strided_slice %227 {offsets = [0, 256], sizes = [2, 128], strides = [1, 1]} : vector<2x384xf32> to vector<2x128xf32>
      %248 = arith.mulf %237, %247 : vector<2x128xf32>
      %249 = arith.addf %246, %248 : vector<2x128xf32>
      %250 = math.tanh %249 : vector<2x128xf32>
      %cst_111 = arith.constant 1.000000e+00 : f32
      %251 = vector.broadcast %cst_111 : f32 to vector<2x128xf32>
      %252 = arith.subf %251, %245 : vector<2x128xf32>
      %253 = arith.mulf %252, %250 : vector<2x128xf32>
      %254 = arith.mulf %245, %220 : vector<2x128xf32>
      %255 = arith.addf %253, %254 : vector<2x128xf32>
      %c0_112 = arith.constant 0 : index
      %c3 = arith.constant 3 : index
      %c0_113 = arith.constant 0 : index
      %256 = vector.load %arg14[%c0_112, %c3, %c0_113] : memref<2x8x128xf32, #tpu.memory_space<vmem>>, vector<2x1x128xf32>
      %257 = vector.shape_cast %256 : vector<2x1x128xf32> to vector<2x128xf32>
      %258 = vector.shape_cast %255 : vector<2x128xf32> to vector<2x1x128xf32>
      tpu.vector_store %arg14[%c0_112, %c3, %c0_113], %258 {strides = array<i32>} : memref<2x8x128xf32, #tpu.memory_space<vmem>>, vector<2x1x128xf32>,
      %259 = arith.truncf %255 : vector<2x128xf32> to vector<2x128xbf16>
      %cst_114 = arith.constant dense<0.000000e+00> : vector<2x384xf32>
      %260 = tpu.matmul %259, %104, %cst_114 {dimension_numbers = #tpu.dot_dimension_numbers<[1], [0], [0], [1], [0, 0, 1, 1], [], []>} : vector<2x128xbf16>, vector<128x384xbf16>, vector<2x384xf32> -> vector<2x384xf32>
      %261 = vector.broadcast %110 : vector<1x384xf32> to vector<2x384xf32>
      %262 = arith.addf %260, %261 : vector<2x384xf32>
      %263 = vector.extract_strided_slice %117 {offsets = [0, 4, 0], sizes = [2, 1, 384], strides = [1, 1, 1]} : vector<2x8x384xf32> to vector<2x1x384xf32>
      %264 = vector.shape_cast %263 : vector<2x1x384xf32> to vector<2x384xf32>
      %265 = vector.extract_strided_slice %264 {offsets = [0, 0], sizes = [2, 128], strides = [1, 1]} : vector<2x384xf32> to vector<2x128xf32>
      %266 = vector.extract_strided_slice %262 {offsets = [0, 0], sizes = [2, 128], strides = [1, 1]} : vector<2x384xf32> to vector<2x128xf32>
      %267 = arith.addf %265, %266 : vector<2x128xf32>
      %268 = arith.negf %267 : vector<2x128xf32>
      %269 = math.exp %268 : vector<2x128xf32>
      %cst_115 = arith.constant 1.000000e+00 : f32
      %270 = vector.broadcast %cst_115 : f32 to vector<2x128xf32>
      %271 = arith.addf %270, %269 : vector<2x128xf32>
      %272 = arith.divf %270, %271 : vector<2x128xf32>
      %273 = vector.extract_strided_slice %264 {offsets = [0, 128], sizes = [2, 128], strides = [1, 1]} : vector<2x384xf32> to vector<2x128xf32>
      %274 = vector.extract_strided_slice %262 {offsets = [0, 128], sizes = [2, 128], strides = [1, 1]} : vector<2x384xf32> to vector<2x128xf32>
      %275 = arith.addf %273, %274 : vector<2x128xf32>
      %276 = arith.negf %275 : vector<2x128xf32>
      %277 = math.exp %276 : vector<2x128xf32>
      %cst_116 = arith.constant 1.000000e+00 : f32
      %278 = vector.broadcast %cst_116 : f32 to vector<2x128xf32>
      %279 = arith.addf %278, %277 : vector<2x128xf32>
      %280 = arith.divf %278, %279 : vector<2x128xf32>
      %281 = vector.extract_strided_slice %264 {offsets = [0, 256], sizes = [2, 128], strides = [1, 1]} : vector<2x384xf32> to vector<2x128xf32>
      %282 = vector.extract_strided_slice %262 {offsets = [0, 256], sizes = [2, 128], strides = [1, 1]} : vector<2x384xf32> to vector<2x128xf32>
      %283 = arith.mulf %272, %282 : vector<2x128xf32>
      %284 = arith.addf %281, %283 : vector<2x128xf32>
      %285 = math.tanh %284 : vector<2x128xf32>
      %cst_117 = arith.constant 1.000000e+00 : f32
      %286 = vector.broadcast %cst_117 : f32 to vector<2x128xf32>
      %287 = arith.subf %286, %280 : vector<2x128xf32>
      %288 = arith.mulf %287, %285 : vector<2x128xf32>
      %289 = arith.mulf %280, %255 : vector<2x128xf32>
      %290 = arith.addf %288, %289 : vector<2x128xf32>
      %c0_118 = arith.constant 0 : index
      %c4 = arith.constant 4 : index
      %c0_119 = arith.constant 0 : index
      %291 = vector.load %arg14[%c0_118, %c4, %c0_119] : memref<2x8x128xf32, #tpu.memory_space<vmem>>, vector<2x1x128xf32>
      %292 = vector.shape_cast %291 : vector<2x1x128xf32> to vector<2x128xf32>
      %293 = vector.shape_cast %290 : vector<2x128xf32> to vector<2x1x128xf32>
      tpu.vector_store %arg14[%c0_118, %c4, %c0_119], %293 {strides = array<i32>} : memref<2x8x128xf32, #tpu.memory_space<vmem>>, vector<2x1x128xf32>,
      %294 = arith.truncf %290 : vector<2x128xf32> to vector<2x128xbf16>
      %cst_120 = arith.constant dense<0.000000e+00> : vector<2x384xf32>
      %295 = tpu.matmul %294, %104, %cst_120 {dimension_numbers = #tpu.dot_dimension_numbers<[1], [0], [0], [1], [0, 0, 1, 1], [], []>} : vector<2x128xbf16>, vector<128x384xbf16>, vector<2x384xf32> -> vector<2x384xf32>
      %296 = vector.broadcast %110 : vector<1x384xf32> to vector<2x384xf32>
      %297 = arith.addf %295, %296 : vector<2x384xf32>
      %298 = vector.extract_strided_slice %117 {offsets = [0, 5, 0], sizes = [2, 1, 384], strides = [1, 1, 1]} : vector<2x8x384xf32> to vector<2x1x384xf32>
      %299 = vector.shape_cast %298 : vector<2x1x384xf32> to vector<2x384xf32>
      %300 = vector.extract_strided_slice %299 {offsets = [0, 0], sizes = [2, 128], strides = [1, 1]} : vector<2x384xf32> to vector<2x128xf32>
      %301 = vector.extract_strided_slice %297 {offsets = [0, 0], sizes = [2, 128], strides = [1, 1]} : vector<2x384xf32> to vector<2x128xf32>
      %302 = arith.addf %300, %301 : vector<2x128xf32>
      %303 = arith.negf %302 : vector<2x128xf32>
      %304 = math.exp %303 : vector<2x128xf32>
      %cst_121 = arith.constant 1.000000e+00 : f32
      %305 = vector.broadcast %cst_121 : f32 to vector<2x128xf32>
      %306 = arith.addf %305, %304 : vector<2x128xf32>
      %307 = arith.divf %305, %306 : vector<2x128xf32>
      %308 = vector.extract_strided_slice %299 {offsets = [0, 128], sizes = [2, 128], strides = [1, 1]} : vector<2x384xf32> to vector<2x128xf32>
      %309 = vector.extract_strided_slice %297 {offsets = [0, 128], sizes = [2, 128], strides = [1, 1]} : vector<2x384xf32> to vector<2x128xf32>
      %310 = arith.addf %308, %309 : vector<2x128xf32>
      %311 = arith.negf %310 : vector<2x128xf32>
      %312 = math.exp %311 : vector<2x128xf32>
      %cst_122 = arith.constant 1.000000e+00 : f32
      %313 = vector.broadcast %cst_122 : f32 to vector<2x128xf32>
      %314 = arith.addf %313, %312 : vector<2x128xf32>
      %315 = arith.divf %313, %314 : vector<2x128xf32>
      %316 = vector.extract_strided_slice %299 {offsets = [0, 256], sizes = [2, 128], strides = [1, 1]} : vector<2x384xf32> to vector<2x128xf32>
      %317 = vector.extract_strided_slice %297 {offsets = [0, 256], sizes = [2, 128], strides = [1, 1]} : vector<2x384xf32> to vector<2x128xf32>
      %318 = arith.mulf %307, %317 : vector<2x128xf32>
      %319 = arith.addf %316, %318 : vector<2x128xf32>
      %320 = math.tanh %319 : vector<2x128xf32>
      %cst_123 = arith.constant 1.000000e+00 : f32
      %321 = vector.broadcast %cst_123 : f32 to vector<2x128xf32>
      %322 = arith.subf %321, %315 : vector<2x128xf32>
      %323 = arith.mulf %322, %320 : vector<2x128xf32>
      %324 = arith.mulf %315, %290 : vector<2x128xf32>
      %325 = arith.addf %323, %324 : vector<2x128xf32>
      %c0_124 = arith.constant 0 : index
      %c5 = arith.constant 5 : index
      %c0_125 = arith.constant 0 : index
      %326 = vector.load %arg14[%c0_124, %c5, %c0_125] : memref<2x8x128xf32, #tpu.memory_space<vmem>>, vector<2x1x128xf32>
      %327 = vector.shape_cast %326 : vector<2x1x128xf32> to vector<2x128xf32>
      %328 = vector.shape_cast %325 : vector<2x128xf32> to vector<2x1x128xf32>
      tpu.vector_store %arg14[%c0_124, %c5, %c0_125], %328 {strides = array<i32>} : memref<2x8x128xf32, #tpu.memory_space<vmem>>, vector<2x1x128xf32>,
      %329 = arith.truncf %325 : vector<2x128xf32> to vector<2x128xbf16>
      %cst_126 = arith.constant dense<0.000000e+00> : vector<2x384xf32>
      %330 = tpu.matmul %329, %104, %cst_126 {dimension_numbers = #tpu.dot_dimension_numbers<[1], [0], [0], [1], [0, 0, 1, 1], [], []>} : vector<2x128xbf16>, vector<128x384xbf16>, vector<2x384xf32> -> vector<2x384xf32>
      %331 = vector.broadcast %110 : vector<1x384xf32> to vector<2x384xf32>
      %332 = arith.addf %330, %331 : vector<2x384xf32>
      %333 = vector.extract_strided_slice %117 {offsets = [0, 6, 0], sizes = [2, 1, 384], strides = [1, 1, 1]} : vector<2x8x384xf32> to vector<2x1x384xf32>
      %334 = vector.shape_cast %333 : vector<2x1x384xf32> to vector<2x384xf32>
      %335 = vector.extract_strided_slice %334 {offsets = [0, 0], sizes = [2, 128], strides = [1, 1]} : vector<2x384xf32> to vector<2x128xf32>
      %336 = vector.extract_strided_slice %332 {offsets = [0, 0], sizes = [2, 128], strides = [1, 1]} : vector<2x384xf32> to vector<2x128xf32>
      %337 = arith.addf %335, %336 : vector<2x128xf32>
      %338 = arith.negf %337 : vector<2x128xf32>
      %339 = math.exp %338 : vector<2x128xf32>
      %cst_127 = arith.constant 1.000000e+00 : f32
      %340 = vector.broadcast %cst_127 : f32 to vector<2x128xf32>
      %341 = arith.addf %340, %339 : vector<2x128xf32>
      %342 = arith.divf %340, %341 : vector<2x128xf32>
      %343 = vector.extract_strided_slice %334 {offsets = [0, 128], sizes = [2, 128], strides = [1, 1]} : vector<2x384xf32> to vector<2x128xf32>
      %344 = vector.extract_strided_slice %332 {offsets = [0, 128], sizes = [2, 128], strides = [1, 1]} : vector<2x384xf32> to vector<2x128xf32>
      %345 = arith.addf %343, %344 : vector<2x128xf32>
      %346 = arith.negf %345 : vector<2x128xf32>
      %347 = math.exp %346 : vector<2x128xf32>
      %cst_128 = arith.constant 1.000000e+00 : f32
      %348 = vector.broadcast %cst_128 : f32 to vector<2x128xf32>
      %349 = arith.addf %348, %347 : vector<2x128xf32>
      %350 = arith.divf %348, %349 : vector<2x128xf32>
      %351 = vector.extract_strided_slice %334 {offsets = [0, 256], sizes = [2, 128], strides = [1, 1]} : vector<2x384xf32> to vector<2x128xf32>
      %352 = vector.extract_strided_slice %332 {offsets = [0, 256], sizes = [2, 128], strides = [1, 1]} : vector<2x384xf32> to vector<2x128xf32>
      %353 = arith.mulf %342, %352 : vector<2x128xf32>
      %354 = arith.addf %351, %353 : vector<2x128xf32>
      %355 = math.tanh %354 : vector<2x128xf32>
      %cst_129 = arith.constant 1.000000e+00 : f32
      %356 = vector.broadcast %cst_129 : f32 to vector<2x128xf32>
      %357 = arith.subf %356, %350 : vector<2x128xf32>
      %358 = arith.mulf %357, %355 : vector<2x128xf32>
      %359 = arith.mulf %350, %325 : vector<2x128xf32>
      %360 = arith.addf %358, %359 : vector<2x128xf32>
      %c0_130 = arith.constant 0 : index
      %c6 = arith.constant 6 : index
      %c0_131 = arith.constant 0 : index
      %361 = vector.load %arg14[%c0_130, %c6, %c0_131] : memref<2x8x128xf32, #tpu.memory_space<vmem>>, vector<2x1x128xf32>
      %362 = vector.shape_cast %361 : vector<2x1x128xf32> to vector<2x128xf32>
      %363 = vector.shape_cast %360 : vector<2x128xf32> to vector<2x1x128xf32>
      tpu.vector_store %arg14[%c0_130, %c6, %c0_131], %363 {strides = array<i32>} : memref<2x8x128xf32, #tpu.memory_space<vmem>>, vector<2x1x128xf32>,
      %364 = arith.truncf %360 : vector<2x128xf32> to vector<2x128xbf16>
      %cst_132 = arith.constant dense<0.000000e+00> : vector<2x384xf32>
      %365 = tpu.matmul %364, %104, %cst_132 {dimension_numbers = #tpu.dot_dimension_numbers<[1], [0], [0], [1], [0, 0, 1, 1], [], []>} : vector<2x128xbf16>, vector<128x384xbf16>, vector<2x384xf32> -> vector<2x384xf32>
      %366 = vector.broadcast %110 : vector<1x384xf32> to vector<2x384xf32>
      %367 = arith.addf %365, %366 : vector<2x384xf32>
      %368 = vector.extract_strided_slice %117 {offsets = [0, 7, 0], sizes = [2, 1, 384], strides = [1, 1, 1]} : vector<2x8x384xf32> to vector<2x1x384xf32>
      %369 = vector.shape_cast %368 : vector<2x1x384xf32> to vector<2x384xf32>
      %370 = vector.extract_strided_slice %369 {offsets = [0, 0], sizes = [2, 128], strides = [1, 1]} : vector<2x384xf32> to vector<2x128xf32>
      %371 = vector.extract_strided_slice %367 {offsets = [0, 0], sizes = [2, 128], strides = [1, 1]} : vector<2x384xf32> to vector<2x128xf32>
      %372 = arith.addf %370, %371 : vector<2x128xf32>
      %373 = arith.negf %372 : vector<2x128xf32>
      %374 = math.exp %373 : vector<2x128xf32>
      %cst_133 = arith.constant 1.000000e+00 : f32
      %375 = vector.broadcast %cst_133 : f32 to vector<2x128xf32>
      %376 = arith.addf %375, %374 : vector<2x128xf32>
      %377 = arith.divf %375, %376 : vector<2x128xf32>
      %378 = vector.extract_strided_slice %369 {offsets = [0, 128], sizes = [2, 128], strides = [1, 1]} : vector<2x384xf32> to vector<2x128xf32>
      %379 = vector.extract_strided_slice %367 {offsets = [0, 128], sizes = [2, 128], strides = [1, 1]} : vector<2x384xf32> to vector<2x128xf32>
      %380 = arith.addf %378, %379 : vector<2x128xf32>
      %381 = arith.negf %380 : vector<2x128xf32>
      %382 = math.exp %381 : vector<2x128xf32>
      %cst_134 = arith.constant 1.000000e+00 : f32
      %383 = vector.broadcast %cst_134 : f32 to vector<2x128xf32>
      %384 = arith.addf %383, %382 : vector<2x128xf32>
      %385 = arith.divf %383, %384 : vector<2x128xf32>
      %386 = vector.extract_strided_slice %369 {offsets = [0, 256], sizes = [2, 128], strides = [1, 1]} : vector<2x384xf32> to vector<2x128xf32>
      %387 = vector.extract_strided_slice %367 {offsets = [0, 256], sizes = [2, 128], strides = [1, 1]} : vector<2x384xf32> to vector<2x128xf32>
      %388 = arith.mulf %377, %387 : vector<2x128xf32>
      %389 = arith.addf %386, %388 : vector<2x128xf32>
      %390 = math.tanh %389 : vector<2x128xf32>
      %cst_135 = arith.constant 1.000000e+00 : f32
      %391 = vector.broadcast %cst_135 : f32 to vector<2x128xf32>
      %392 = arith.subf %391, %385 : vector<2x128xf32>
      %393 = arith.mulf %392, %390 : vector<2x128xf32>
      %394 = arith.mulf %385, %360 : vector<2x128xf32>
      %395 = arith.addf %393, %394 : vector<2x128xf32>
      %c0_136 = arith.constant 0 : index
      %c7 = arith.constant 7 : index
      %c0_137 = arith.constant 0 : index
      %396 = vector.load %arg14[%c0_136, %c7, %c0_137] : memref<2x8x128xf32, #tpu.memory_space<vmem>>, vector<2x1x128xf32>
      %397 = vector.shape_cast %396 : vector<2x1x128xf32> to vector<2x128xf32>
      %398 = vector.shape_cast %395 : vector<2x128xf32> to vector<2x1x128xf32>
      tpu.vector_store %arg14[%c0_136, %c7, %c0_137], %398 {strides = array<i32>} : memref<2x8x128xf32, #tpu.memory_space<vmem>>, vector<2x1x128xf32>,
    }
    %c2_i32_48 = arith.constant 2 : i32
    %c0_49 = arith.constant 0 : index
    %c0_50 = arith.constant 0 : index
    %c0_51 = arith.constant 0 : index
    %65 = vector.load %arg14[%c0_49, %c0_50, %c0_51] : memref<2x8x128xf32, #tpu.memory_space<vmem>>, vector<2x8x128xf32>
    %66 = arith.truncf %62 : vector<2x8x128xf32> to vector<2x8x128xbf16>
    "tpu.trace_start"() <{level = 10 : i32, message = "bqd,bkd->bqk"}> : () -> ()
    %cst_52 = arith.constant dense<0.000000e+00> : vector<2x8x8xf32>
    %67 = tpu.matmul %1, %66, %cst_52 {dimension_numbers = #tpu.dot_dimension_numbers<[2], [2], [1], [1], [0, 0, 0, 1, 1, 1], [0], [0]>} : vector<2x8x128xbf16>, vector<2x8x128xbf16>, vector<2x8x8xf32> -> vector<2x8x8xf32>
    "tpu.trace_stop"() : () -> ()
    %cst_53 = arith.constant 0.000000e+00 : f32
    %68 = vector.broadcast %cst_53 : f32 to vector<2x8x8xf32>
    %69 = arith.maximumf %67, %68 : vector<2x8x8xf32>
    %70 = arith.addf %69, %2 : vector<2x8x8xf32>
    %cst_54 = arith.constant dense<0xFF800000> : vector<2x8xf32>
    %71 = vector.multi_reduction <maximumf>, %70, %cst_54 [2] : vector<2x8x8xf32> to vector<2x8xf32>
    %72 = vector.shape_cast %71 : vector<2x8xf32> to vector<2x8x1xf32>
    %73 = vector.broadcast %72 : vector<2x8x1xf32> to vector<2x8x8xf32>
    %74 = arith.subf %70, %73 : vector<2x8x8xf32>
    %75 = math.exp %74 : vector<2x8x8xf32>
    %cst_55 = arith.constant dense<0.000000e+00> : vector<2x8xf32>
    %76 = vector.multi_reduction <add>, %75, %cst_55 [2] : vector<2x8x8xf32> to vector<2x8xf32>
    %77 = vector.shape_cast %76 : vector<2x8xf32> to vector<2x8x1xf32>
    %78 = vector.broadcast %77 : vector<2x8x1xf32> to vector<2x8x8xf32>
    %79 = arith.divf %75, %78 : vector<2x8x8xf32>
    %80 = arith.truncf %79 : vector<2x8x8xf32> to vector<2x8x8xbf16>
    %81 = arith.truncf %65 : vector<2x8x128xf32> to vector<2x8x128xbf16>
    "tpu.trace_start"() <{level = 10 : i32, message = "bqk,bkd->bqd"}> : () -> ()
    %cst_56 = arith.constant dense<0.000000e+00> : vector<2x8x128xf32>
    %82 = tpu.matmul %80, %81, %cst_56 {dimension_numbers = #tpu.dot_dimension_numbers<[2], [1], [1], [2], [0, 0, 0, 1, 1, 2], [0], [0]>} : vector<2x8x8xbf16>, vector<2x8x128xbf16>, vector<2x8x128xf32> -> vector<2x8x128xf32>
    "tpu.trace_stop"() : () -> ()
    %cst_57 = arith.constant 0.000000e+00 : f32
    %83 = vector.broadcast %cst_57 : f32 to vector<2x8x128xf32>
    %84 = arith.maximumf %82, %83 : vector<2x8x128xf32>
    %85 = arith.addf %84, %65 : vector<2x8x128xf32>
    %c0_58 = arith.constant 0 : index
    %c0_59 = arith.constant 0 : index
    %c0_60 = arith.constant 0 : index
    %86 = vector.load %arg14[%c0_58, %c0_59, %c0_60] : memref<2x8x128xf32, #tpu.memory_space<vmem>>, vector<2x8x128xf32>
    tpu.vector_store %arg14[%c0_58, %c0_59, %c0_60], %85 {strides = array<i32>} : memref<2x8x128xf32, #tpu.memory_space<vmem>>, vector<2x8x128xf32>,
    %c0_i32_61 = arith.constant 0 : i32
    %c2_i32_62 = arith.constant 2 : i32
    %87 = arith.addi %c0_i32_61, %c2_i32_62 : i32
    %c1_i32_63 = arith.constant 1 : i32
    scf.for %arg15 = %c0_i32_61 to %87 step %c1_i32_63  : i32 {
      %c6_i32 = arith.constant 6 : i32
      %98 = arith.addi %c6_i32, %arg15 : i32
      %99 = arith.index_cast %98 : i32 to index
      %c0_76 = arith.constant 0 : index
      %c0_77 = arith.constant 0 : index
      %100 = vector.load %arg7[%99, %c0_76, %c0_77] : memref<8x128x384xbf16, #tpu.memory_space<vmem>>, vector<1x128x384xbf16>
      %101 = vector.shape_cast %100 : vector<1x128x384xbf16> to vector<128x384xbf16>
      %102 = arith.index_cast %98 : i32 to index
      %c0_78 = arith.constant 0 : index
      %c0_79 = arith.constant 0 : index
      %103 = vector.load %arg8[%102, %c0_78, %c0_79] : memref<8x128x384xbf16, #tpu.memory_space<vmem>>, vector<1x128x384xbf16>
      %104 = vector.shape_cast %103 : vector<1x128x384xbf16> to vector<128x384xbf16>
      %105 = arith.index_cast %98 : i32 to index
      %c0_80 = arith.constant 0 : index
      %c0_81 = arith.constant 0 : index
      %106 = vector.load %arg9[%105, %c0_80, %c0_81] : memref<8x1x384xf32, #tpu.memory_space<vmem>>, vector<1x1x384xf32>
      %107 = vector.shape_cast %106 : vector<1x1x384xf32> to vector<1x384xf32>
      %108 = arith.index_cast %98 : i32 to index
      %c0_82 = arith.constant 0 : index
      %c0_83 = arith.constant 0 : index
      %109 = vector.load %arg10[%108, %c0_82, %c0_83] : memref<8x1x384xf32, #tpu.memory_space<vmem>>, vector<1x1x384xf32>
      %110 = vector.shape_cast %109 : vector<1x1x384xf32> to vector<1x384xf32>
      %c0_84 = arith.constant 0 : index
      %c0_85 = arith.constant 0 : index
      %c0_86 = arith.constant 0 : index
      %111 = vector.load %arg14[%c0_84, %c0_85, %c0_86] : memref<2x8x128xf32, #tpu.memory_space<vmem>>, vector<2x8x128xf32>
      %112 = vector.shape_cast %111 : vector<2x8x128xf32> to vector<16x128xf32>
      %113 = arith.truncf %112 : vector<16x128xf32> to vector<16x128xbf16>
      %cst_87 = arith.constant dense<0.000000e+00> : vector<16x384xf32>
      %114 = tpu.matmul %113, %101, %cst_87 {dimension_numbers = #tpu.dot_dimension_numbers<[1], [0], [0], [1], [0, 0, 1, 1], [], []>} : vector<16x128xbf16>, vector<128x384xbf16>, vector<16x384xf32> -> vector<16x384xf32>
      %115 = vector.broadcast %107 : vector<1x384xf32> to vector<16x384xf32>
      %116 = arith.addf %114, %115 : vector<16x384xf32>
      %117 = vector.shape_cast %116 : vector<16x384xf32> to vector<2x8x384xf32>
      %cst_88 = arith.constant 0.000000e+00 : f32
      %118 = vector.broadcast %cst_88 : f32 to vector<2x128xf32>
      %119 = arith.truncf %118 : vector<2x128xf32> to vector<2x128xbf16>
      %cst_89 = arith.constant dense<0.000000e+00> : vector<2x384xf32>
      %120 = tpu.matmul %119, %104, %cst_89 {dimension_numbers = #tpu.dot_dimension_numbers<[1], [0], [0], [1], [0, 0, 1, 1], [], []>} : vector<2x128xbf16>, vector<128x384xbf16>, vector<2x384xf32> -> vector<2x384xf32>
      %121 = vector.broadcast %110 : vector<1x384xf32> to vector<2x384xf32>
      %122 = arith.addf %120, %121 : vector<2x384xf32>
      %123 = vector.extract_strided_slice %117 {offsets = [0, 0, 0], sizes = [2, 1, 384], strides = [1, 1, 1]} : vector<2x8x384xf32> to vector<2x1x384xf32>
      %124 = vector.shape_cast %123 : vector<2x1x384xf32> to vector<2x384xf32>
      %125 = vector.extract_strided_slice %124 {offsets = [0, 0], sizes = [2, 128], strides = [1, 1]} : vector<2x384xf32> to vector<2x128xf32>
      %126 = vector.extract_strided_slice %122 {offsets = [0, 0], sizes = [2, 128], strides = [1, 1]} : vector<2x384xf32> to vector<2x128xf32>
      %127 = arith.addf %125, %126 : vector<2x128xf32>
      %128 = arith.negf %127 : vector<2x128xf32>
      %129 = math.exp %128 : vector<2x128xf32>
      %cst_90 = arith.constant 1.000000e+00 : f32
      %130 = vector.broadcast %cst_90 : f32 to vector<2x128xf32>
      %131 = arith.addf %130, %129 : vector<2x128xf32>
      %132 = arith.divf %130, %131 : vector<2x128xf32>
      %133 = vector.extract_strided_slice %124 {offsets = [0, 128], sizes = [2, 128], strides = [1, 1]} : vector<2x384xf32> to vector<2x128xf32>
      %134 = vector.extract_strided_slice %122 {offsets = [0, 128], sizes = [2, 128], strides = [1, 1]} : vector<2x384xf32> to vector<2x128xf32>
      %135 = arith.addf %133, %134 : vector<2x128xf32>
      %136 = arith.negf %135 : vector<2x128xf32>
      %137 = math.exp %136 : vector<2x128xf32>
      %cst_91 = arith.constant 1.000000e+00 : f32
      %138 = vector.broadcast %cst_91 : f32 to vector<2x128xf32>
      %139 = arith.addf %138, %137 : vector<2x128xf32>
      %140 = arith.divf %138, %139 : vector<2x128xf32>
      %141 = vector.extract_strided_slice %124 {offsets = [0, 256], sizes = [2, 128], strides = [1, 1]} : vector<2x384xf32> to vector<2x128xf32>
      %142 = vector.extract_strided_slice %122 {offsets = [0, 256], sizes = [2, 128], strides = [1, 1]} : vector<2x384xf32> to vector<2x128xf32>
      %143 = arith.mulf %132, %142 : vector<2x128xf32>
      %144 = arith.addf %141, %143 : vector<2x128xf32>
      %145 = math.tanh %144 : vector<2x128xf32>
      %cst_92 = arith.constant 1.000000e+00 : f32
      %146 = vector.broadcast %cst_92 : f32 to vector<2x128xf32>
      %147 = arith.subf %146, %140 : vector<2x128xf32>
      %148 = arith.mulf %147, %145 : vector<2x128xf32>
      %149 = arith.mulf %140, %118 : vector<2x128xf32>
      %150 = arith.addf %148, %149 : vector<2x128xf32>
      %c0_93 = arith.constant 0 : index
      %c0_94 = arith.constant 0 : index
      %c0_95 = arith.constant 0 : index
      %151 = vector.load %arg14[%c0_93, %c0_94, %c0_95] : memref<2x8x128xf32, #tpu.memory_space<vmem>>, vector<2x1x128xf32>
      %152 = vector.shape_cast %151 : vector<2x1x128xf32> to vector<2x128xf32>
      %153 = vector.shape_cast %150 : vector<2x128xf32> to vector<2x1x128xf32>
      tpu.vector_store %arg14[%c0_93, %c0_94, %c0_95], %153 {strides = array<i32>} : memref<2x8x128xf32, #tpu.memory_space<vmem>>, vector<2x1x128xf32>,
      %154 = arith.truncf %150 : vector<2x128xf32> to vector<2x128xbf16>
      %cst_96 = arith.constant dense<0.000000e+00> : vector<2x384xf32>
      %155 = tpu.matmul %154, %104, %cst_96 {dimension_numbers = #tpu.dot_dimension_numbers<[1], [0], [0], [1], [0, 0, 1, 1], [], []>} : vector<2x128xbf16>, vector<128x384xbf16>, vector<2x384xf32> -> vector<2x384xf32>
      %156 = vector.broadcast %110 : vector<1x384xf32> to vector<2x384xf32>
      %157 = arith.addf %155, %156 : vector<2x384xf32>
      %158 = vector.extract_strided_slice %117 {offsets = [0, 1, 0], sizes = [2, 1, 384], strides = [1, 1, 1]} : vector<2x8x384xf32> to vector<2x1x384xf32>
      %159 = vector.shape_cast %158 : vector<2x1x384xf32> to vector<2x384xf32>
      %160 = vector.extract_strided_slice %159 {offsets = [0, 0], sizes = [2, 128], strides = [1, 1]} : vector<2x384xf32> to vector<2x128xf32>
      %161 = vector.extract_strided_slice %157 {offsets = [0, 0], sizes = [2, 128], strides = [1, 1]} : vector<2x384xf32> to vector<2x128xf32>
      %162 = arith.addf %160, %161 : vector<2x128xf32>
      %163 = arith.negf %162 : vector<2x128xf32>
      %164 = math.exp %163 : vector<2x128xf32>
      %cst_97 = arith.constant 1.000000e+00 : f32
      %165 = vector.broadcast %cst_97 : f32 to vector<2x128xf32>
      %166 = arith.addf %165, %164 : vector<2x128xf32>
      %167 = arith.divf %165, %166 : vector<2x128xf32>
      %168 = vector.extract_strided_slice %159 {offsets = [0, 128], sizes = [2, 128], strides = [1, 1]} : vector<2x384xf32> to vector<2x128xf32>
      %169 = vector.extract_strided_slice %157 {offsets = [0, 128], sizes = [2, 128], strides = [1, 1]} : vector<2x384xf32> to vector<2x128xf32>
      %170 = arith.addf %168, %169 : vector<2x128xf32>
      %171 = arith.negf %170 : vector<2x128xf32>
      %172 = math.exp %171 : vector<2x128xf32>
      %cst_98 = arith.constant 1.000000e+00 : f32
      %173 = vector.broadcast %cst_98 : f32 to vector<2x128xf32>
      %174 = arith.addf %173, %172 : vector<2x128xf32>
      %175 = arith.divf %173, %174 : vector<2x128xf32>
      %176 = vector.extract_strided_slice %159 {offsets = [0, 256], sizes = [2, 128], strides = [1, 1]} : vector<2x384xf32> to vector<2x128xf32>
      %177 = vector.extract_strided_slice %157 {offsets = [0, 256], sizes = [2, 128], strides = [1, 1]} : vector<2x384xf32> to vector<2x128xf32>
      %178 = arith.mulf %167, %177 : vector<2x128xf32>
      %179 = arith.addf %176, %178 : vector<2x128xf32>
      %180 = math.tanh %179 : vector<2x128xf32>
      %cst_99 = arith.constant 1.000000e+00 : f32
      %181 = vector.broadcast %cst_99 : f32 to vector<2x128xf32>
      %182 = arith.subf %181, %175 : vector<2x128xf32>
      %183 = arith.mulf %182, %180 : vector<2x128xf32>
      %184 = arith.mulf %175, %150 : vector<2x128xf32>
      %185 = arith.addf %183, %184 : vector<2x128xf32>
      %c0_100 = arith.constant 0 : index
      %c1 = arith.constant 1 : index
      %c0_101 = arith.constant 0 : index
      %186 = vector.load %arg14[%c0_100, %c1, %c0_101] : memref<2x8x128xf32, #tpu.memory_space<vmem>>, vector<2x1x128xf32>
      %187 = vector.shape_cast %186 : vector<2x1x128xf32> to vector<2x128xf32>
      %188 = vector.shape_cast %185 : vector<2x128xf32> to vector<2x1x128xf32>
      tpu.vector_store %arg14[%c0_100, %c1, %c0_101], %188 {strides = array<i32>} : memref<2x8x128xf32, #tpu.memory_space<vmem>>, vector<2x1x128xf32>,
      %189 = arith.truncf %185 : vector<2x128xf32> to vector<2x128xbf16>
      %cst_102 = arith.constant dense<0.000000e+00> : vector<2x384xf32>
      %190 = tpu.matmul %189, %104, %cst_102 {dimension_numbers = #tpu.dot_dimension_numbers<[1], [0], [0], [1], [0, 0, 1, 1], [], []>} : vector<2x128xbf16>, vector<128x384xbf16>, vector<2x384xf32> -> vector<2x384xf32>
      %191 = vector.broadcast %110 : vector<1x384xf32> to vector<2x384xf32>
      %192 = arith.addf %190, %191 : vector<2x384xf32>
      %193 = vector.extract_strided_slice %117 {offsets = [0, 2, 0], sizes = [2, 1, 384], strides = [1, 1, 1]} : vector<2x8x384xf32> to vector<2x1x384xf32>
      %194 = vector.shape_cast %193 : vector<2x1x384xf32> to vector<2x384xf32>
      %195 = vector.extract_strided_slice %194 {offsets = [0, 0], sizes = [2, 128], strides = [1, 1]} : vector<2x384xf32> to vector<2x128xf32>
      %196 = vector.extract_strided_slice %192 {offsets = [0, 0], sizes = [2, 128], strides = [1, 1]} : vector<2x384xf32> to vector<2x128xf32>
      %197 = arith.addf %195, %196 : vector<2x128xf32>
      %198 = arith.negf %197 : vector<2x128xf32>
      %199 = math.exp %198 : vector<2x128xf32>
      %cst_103 = arith.constant 1.000000e+00 : f32
      %200 = vector.broadcast %cst_103 : f32 to vector<2x128xf32>
      %201 = arith.addf %200, %199 : vector<2x128xf32>
      %202 = arith.divf %200, %201 : vector<2x128xf32>
      %203 = vector.extract_strided_slice %194 {offsets = [0, 128], sizes = [2, 128], strides = [1, 1]} : vector<2x384xf32> to vector<2x128xf32>
      %204 = vector.extract_strided_slice %192 {offsets = [0, 128], sizes = [2, 128], strides = [1, 1]} : vector<2x384xf32> to vector<2x128xf32>
      %205 = arith.addf %203, %204 : vector<2x128xf32>
      %206 = arith.negf %205 : vector<2x128xf32>
      %207 = math.exp %206 : vector<2x128xf32>
      %cst_104 = arith.constant 1.000000e+00 : f32
      %208 = vector.broadcast %cst_104 : f32 to vector<2x128xf32>
      %209 = arith.addf %208, %207 : vector<2x128xf32>
      %210 = arith.divf %208, %209 : vector<2x128xf32>
      %211 = vector.extract_strided_slice %194 {offsets = [0, 256], sizes = [2, 128], strides = [1, 1]} : vector<2x384xf32> to vector<2x128xf32>
      %212 = vector.extract_strided_slice %192 {offsets = [0, 256], sizes = [2, 128], strides = [1, 1]} : vector<2x384xf32> to vector<2x128xf32>
      %213 = arith.mulf %202, %212 : vector<2x128xf32>
      %214 = arith.addf %211, %213 : vector<2x128xf32>
      %215 = math.tanh %214 : vector<2x128xf32>
      %cst_105 = arith.constant 1.000000e+00 : f32
      %216 = vector.broadcast %cst_105 : f32 to vector<2x128xf32>
      %217 = arith.subf %216, %210 : vector<2x128xf32>
      %218 = arith.mulf %217, %215 : vector<2x128xf32>
      %219 = arith.mulf %210, %185 : vector<2x128xf32>
      %220 = arith.addf %218, %219 : vector<2x128xf32>
      %c0_106 = arith.constant 0 : index
      %c2 = arith.constant 2 : index
      %c0_107 = arith.constant 0 : index
      %221 = vector.load %arg14[%c0_106, %c2, %c0_107] : memref<2x8x128xf32, #tpu.memory_space<vmem>>, vector<2x1x128xf32>
      %222 = vector.shape_cast %221 : vector<2x1x128xf32> to vector<2x128xf32>
      %223 = vector.shape_cast %220 : vector<2x128xf32> to vector<2x1x128xf32>
      tpu.vector_store %arg14[%c0_106, %c2, %c0_107], %223 {strides = array<i32>} : memref<2x8x128xf32, #tpu.memory_space<vmem>>, vector<2x1x128xf32>,
      %224 = arith.truncf %220 : vector<2x128xf32> to vector<2x128xbf16>
      %cst_108 = arith.constant dense<0.000000e+00> : vector<2x384xf32>
      %225 = tpu.matmul %224, %104, %cst_108 {dimension_numbers = #tpu.dot_dimension_numbers<[1], [0], [0], [1], [0, 0, 1, 1], [], []>} : vector<2x128xbf16>, vector<128x384xbf16>, vector<2x384xf32> -> vector<2x384xf32>
      %226 = vector.broadcast %110 : vector<1x384xf32> to vector<2x384xf32>
      %227 = arith.addf %225, %226 : vector<2x384xf32>
      %228 = vector.extract_strided_slice %117 {offsets = [0, 3, 0], sizes = [2, 1, 384], strides = [1, 1, 1]} : vector<2x8x384xf32> to vector<2x1x384xf32>
      %229 = vector.shape_cast %228 : vector<2x1x384xf32> to vector<2x384xf32>
      %230 = vector.extract_strided_slice %229 {offsets = [0, 0], sizes = [2, 128], strides = [1, 1]} : vector<2x384xf32> to vector<2x128xf32>
      %231 = vector.extract_strided_slice %227 {offsets = [0, 0], sizes = [2, 128], strides = [1, 1]} : vector<2x384xf32> to vector<2x128xf32>
      %232 = arith.addf %230, %231 : vector<2x128xf32>
      %233 = arith.negf %232 : vector<2x128xf32>
      %234 = math.exp %233 : vector<2x128xf32>
      %cst_109 = arith.constant 1.000000e+00 : f32
      %235 = vector.broadcast %cst_109 : f32 to vector<2x128xf32>
      %236 = arith.addf %235, %234 : vector<2x128xf32>
      %237 = arith.divf %235, %236 : vector<2x128xf32>
      %238 = vector.extract_strided_slice %229 {offsets = [0, 128], sizes = [2, 128], strides = [1, 1]} : vector<2x384xf32> to vector<2x128xf32>
      %239 = vector.extract_strided_slice %227 {offsets = [0, 128], sizes = [2, 128], strides = [1, 1]} : vector<2x384xf32> to vector<2x128xf32>
      %240 = arith.addf %238, %239 : vector<2x128xf32>
      %241 = arith.negf %240 : vector<2x128xf32>
      %242 = math.exp %241 : vector<2x128xf32>
      %cst_110 = arith.constant 1.000000e+00 : f32
      %243 = vector.broadcast %cst_110 : f32 to vector<2x128xf32>
      %244 = arith.addf %243, %242 : vector<2x128xf32>
      %245 = arith.divf %243, %244 : vector<2x128xf32>
      %246 = vector.extract_strided_slice %229 {offsets = [0, 256], sizes = [2, 128], strides = [1, 1]} : vector<2x384xf32> to vector<2x128xf32>
      %247 = vector.extract_strided_slice %227 {offsets = [0, 256], sizes = [2, 128], strides = [1, 1]} : vector<2x384xf32> to vector<2x128xf32>
      %248 = arith.mulf %237, %247 : vector<2x128xf32>
      %249 = arith.addf %246, %248 : vector<2x128xf32>
      %250 = math.tanh %249 : vector<2x128xf32>
      %cst_111 = arith.constant 1.000000e+00 : f32
      %251 = vector.broadcast %cst_111 : f32 to vector<2x128xf32>
      %252 = arith.subf %251, %245 : vector<2x128xf32>
      %253 = arith.mulf %252, %250 : vector<2x128xf32>
      %254 = arith.mulf %245, %220 : vector<2x128xf32>
      %255 = arith.addf %253, %254 : vector<2x128xf32>
      %c0_112 = arith.constant 0 : index
      %c3 = arith.constant 3 : index
      %c0_113 = arith.constant 0 : index
      %256 = vector.load %arg14[%c0_112, %c3, %c0_113] : memref<2x8x128xf32, #tpu.memory_space<vmem>>, vector<2x1x128xf32>
      %257 = vector.shape_cast %256 : vector<2x1x128xf32> to vector<2x128xf32>
      %258 = vector.shape_cast %255 : vector<2x128xf32> to vector<2x1x128xf32>
      tpu.vector_store %arg14[%c0_112, %c3, %c0_113], %258 {strides = array<i32>} : memref<2x8x128xf32, #tpu.memory_space<vmem>>, vector<2x1x128xf32>,
      %259 = arith.truncf %255 : vector<2x128xf32> to vector<2x128xbf16>
      %cst_114 = arith.constant dense<0.000000e+00> : vector<2x384xf32>
      %260 = tpu.matmul %259, %104, %cst_114 {dimension_numbers = #tpu.dot_dimension_numbers<[1], [0], [0], [1], [0, 0, 1, 1], [], []>} : vector<2x128xbf16>, vector<128x384xbf16>, vector<2x384xf32> -> vector<2x384xf32>
      %261 = vector.broadcast %110 : vector<1x384xf32> to vector<2x384xf32>
      %262 = arith.addf %260, %261 : vector<2x384xf32>
      %263 = vector.extract_strided_slice %117 {offsets = [0, 4, 0], sizes = [2, 1, 384], strides = [1, 1, 1]} : vector<2x8x384xf32> to vector<2x1x384xf32>
      %264 = vector.shape_cast %263 : vector<2x1x384xf32> to vector<2x384xf32>
      %265 = vector.extract_strided_slice %264 {offsets = [0, 0], sizes = [2, 128], strides = [1, 1]} : vector<2x384xf32> to vector<2x128xf32>
      %266 = vector.extract_strided_slice %262 {offsets = [0, 0], sizes = [2, 128], strides = [1, 1]} : vector<2x384xf32> to vector<2x128xf32>
      %267 = arith.addf %265, %266 : vector<2x128xf32>
      %268 = arith.negf %267 : vector<2x128xf32>
      %269 = math.exp %268 : vector<2x128xf32>
      %cst_115 = arith.constant 1.000000e+00 : f32
      %270 = vector.broadcast %cst_115 : f32 to vector<2x128xf32>
      %271 = arith.addf %270, %269 : vector<2x128xf32>
      %272 = arith.divf %270, %271 : vector<2x128xf32>
      %273 = vector.extract_strided_slice %264 {offsets = [0, 128], sizes = [2, 128], strides = [1, 1]} : vector<2x384xf32> to vector<2x128xf32>
      %274 = vector.extract_strided_slice %262 {offsets = [0, 128], sizes = [2, 128], strides = [1, 1]} : vector<2x384xf32> to vector<2x128xf32>
      %275 = arith.addf %273, %274 : vector<2x128xf32>
      %276 = arith.negf %275 : vector<2x128xf32>
      %277 = math.exp %276 : vector<2x128xf32>
      %cst_116 = arith.constant 1.000000e+00 : f32
      %278 = vector.broadcast %cst_116 : f32 to vector<2x128xf32>
      %279 = arith.addf %278, %277 : vector<2x128xf32>
      %280 = arith.divf %278, %279 : vector<2x128xf32>
      %281 = vector.extract_strided_slice %264 {offsets = [0, 256], sizes = [2, 128], strides = [1, 1]} : vector<2x384xf32> to vector<2x128xf32>
      %282 = vector.extract_strided_slice %262 {offsets = [0, 256], sizes = [2, 128], strides = [1, 1]} : vector<2x384xf32> to vector<2x128xf32>
      %283 = arith.mulf %272, %282 : vector<2x128xf32>
      %284 = arith.addf %281, %283 : vector<2x128xf32>
      %285 = math.tanh %284 : vector<2x128xf32>
      %cst_117 = arith.constant 1.000000e+00 : f32
      %286 = vector.broadcast %cst_117 : f32 to vector<2x128xf32>
      %287 = arith.subf %286, %280 : vector<2x128xf32>
      %288 = arith.mulf %287, %285 : vector<2x128xf32>
      %289 = arith.mulf %280, %255 : vector<2x128xf32>
      %290 = arith.addf %288, %289 : vector<2x128xf32>
      %c0_118 = arith.constant 0 : index
      %c4 = arith.constant 4 : index
      %c0_119 = arith.constant 0 : index
      %291 = vector.load %arg14[%c0_118, %c4, %c0_119] : memref<2x8x128xf32, #tpu.memory_space<vmem>>, vector<2x1x128xf32>
      %292 = vector.shape_cast %291 : vector<2x1x128xf32> to vector<2x128xf32>
      %293 = vector.shape_cast %290 : vector<2x128xf32> to vector<2x1x128xf32>
      tpu.vector_store %arg14[%c0_118, %c4, %c0_119], %293 {strides = array<i32>} : memref<2x8x128xf32, #tpu.memory_space<vmem>>, vector<2x1x128xf32>,
      %294 = arith.truncf %290 : vector<2x128xf32> to vector<2x128xbf16>
      %cst_120 = arith.constant dense<0.000000e+00> : vector<2x384xf32>
      %295 = tpu.matmul %294, %104, %cst_120 {dimension_numbers = #tpu.dot_dimension_numbers<[1], [0], [0], [1], [0, 0, 1, 1], [], []>} : vector<2x128xbf16>, vector<128x384xbf16>, vector<2x384xf32> -> vector<2x384xf32>
      %296 = vector.broadcast %110 : vector<1x384xf32> to vector<2x384xf32>
      %297 = arith.addf %295, %296 : vector<2x384xf32>
      %298 = vector.extract_strided_slice %117 {offsets = [0, 5, 0], sizes = [2, 1, 384], strides = [1, 1, 1]} : vector<2x8x384xf32> to vector<2x1x384xf32>
      %299 = vector.shape_cast %298 : vector<2x1x384xf32> to vector<2x384xf32>
      %300 = vector.extract_strided_slice %299 {offsets = [0, 0], sizes = [2, 128], strides = [1, 1]} : vector<2x384xf32> to vector<2x128xf32>
      %301 = vector.extract_strided_slice %297 {offsets = [0, 0], sizes = [2, 128], strides = [1, 1]} : vector<2x384xf32> to vector<2x128xf32>
      %302 = arith.addf %300, %301 : vector<2x128xf32>
      %303 = arith.negf %302 : vector<2x128xf32>
      %304 = math.exp %303 : vector<2x128xf32>
      %cst_121 = arith.constant 1.000000e+00 : f32
      %305 = vector.broadcast %cst_121 : f32 to vector<2x128xf32>
      %306 = arith.addf %305, %304 : vector<2x128xf32>
      %307 = arith.divf %305, %306 : vector<2x128xf32>
      %308 = vector.extract_strided_slice %299 {offsets = [0, 128], sizes = [2, 128], strides = [1, 1]} : vector<2x384xf32> to vector<2x128xf32>
      %309 = vector.extract_strided_slice %297 {offsets = [0, 128], sizes = [2, 128], strides = [1, 1]} : vector<2x384xf32> to vector<2x128xf32>
      %310 = arith.addf %308, %309 : vector<2x128xf32>
      %311 = arith.negf %310 : vector<2x128xf32>
      %312 = math.exp %311 : vector<2x128xf32>
      %cst_122 = arith.constant 1.000000e+00 : f32
      %313 = vector.broadcast %cst_122 : f32 to vector<2x128xf32>
      %314 = arith.addf %313, %312 : vector<2x128xf32>
      %315 = arith.divf %313, %314 : vector<2x128xf32>
      %316 = vector.extract_strided_slice %299 {offsets = [0, 256], sizes = [2, 128], strides = [1, 1]} : vector<2x384xf32> to vector<2x128xf32>
      %317 = vector.extract_strided_slice %297 {offsets = [0, 256], sizes = [2, 128], strides = [1, 1]} : vector<2x384xf32> to vector<2x128xf32>
      %318 = arith.mulf %307, %317 : vector<2x128xf32>
      %319 = arith.addf %316, %318 : vector<2x128xf32>
      %320 = math.tanh %319 : vector<2x128xf32>
      %cst_123 = arith.constant 1.000000e+00 : f32
      %321 = vector.broadcast %cst_123 : f32 to vector<2x128xf32>
      %322 = arith.subf %321, %315 : vector<2x128xf32>
      %323 = arith.mulf %322, %320 : vector<2x128xf32>
      %324 = arith.mulf %315, %290 : vector<2x128xf32>
      %325 = arith.addf %323, %324 : vector<2x128xf32>
      %c0_124 = arith.constant 0 : index
      %c5 = arith.constant 5 : index
      %c0_125 = arith.constant 0 : index
      %326 = vector.load %arg14[%c0_124, %c5, %c0_125] : memref<2x8x128xf32, #tpu.memory_space<vmem>>, vector<2x1x128xf32>
      %327 = vector.shape_cast %326 : vector<2x1x128xf32> to vector<2x128xf32>
      %328 = vector.shape_cast %325 : vector<2x128xf32> to vector<2x1x128xf32>
      tpu.vector_store %arg14[%c0_124, %c5, %c0_125], %328 {strides = array<i32>} : memref<2x8x128xf32, #tpu.memory_space<vmem>>, vector<2x1x128xf32>,
      %329 = arith.truncf %325 : vector<2x128xf32> to vector<2x128xbf16>
      %cst_126 = arith.constant dense<0.000000e+00> : vector<2x384xf32>
      %330 = tpu.matmul %329, %104, %cst_126 {dimension_numbers = #tpu.dot_dimension_numbers<[1], [0], [0], [1], [0, 0, 1, 1], [], []>} : vector<2x128xbf16>, vector<128x384xbf16>, vector<2x384xf32> -> vector<2x384xf32>
      %331 = vector.broadcast %110 : vector<1x384xf32> to vector<2x384xf32>
      %332 = arith.addf %330, %331 : vector<2x384xf32>
      %333 = vector.extract_strided_slice %117 {offsets = [0, 6, 0], sizes = [2, 1, 384], strides = [1, 1, 1]} : vector<2x8x384xf32> to vector<2x1x384xf32>
      %334 = vector.shape_cast %333 : vector<2x1x384xf32> to vector<2x384xf32>
      %335 = vector.extract_strided_slice %334 {offsets = [0, 0], sizes = [2, 128], strides = [1, 1]} : vector<2x384xf32> to vector<2x128xf32>
      %336 = vector.extract_strided_slice %332 {offsets = [0, 0], sizes = [2, 128], strides = [1, 1]} : vector<2x384xf32> to vector<2x128xf32>
      %337 = arith.addf %335, %336 : vector<2x128xf32>
      %338 = arith.negf %337 : vector<2x128xf32>
      %339 = math.exp %338 : vector<2x128xf32>
      %cst_127 = arith.constant 1.000000e+00 : f32
      %340 = vector.broadcast %cst_127 : f32 to vector<2x128xf32>
      %341 = arith.addf %340, %339 : vector<2x128xf32>
      %342 = arith.divf %340, %341 : vector<2x128xf32>
      %343 = vector.extract_strided_slice %334 {offsets = [0, 128], sizes = [2, 128], strides = [1, 1]} : vector<2x384xf32> to vector<2x128xf32>
      %344 = vector.extract_strided_slice %332 {offsets = [0, 128], sizes = [2, 128], strides = [1, 1]} : vector<2x384xf32> to vector<2x128xf32>
      %345 = arith.addf %343, %344 : vector<2x128xf32>
      %346 = arith.negf %345 : vector<2x128xf32>
      %347 = math.exp %346 : vector<2x128xf32>
      %cst_128 = arith.constant 1.000000e+00 : f32
      %348 = vector.broadcast %cst_128 : f32 to vector<2x128xf32>
      %349 = arith.addf %348, %347 : vector<2x128xf32>
      %350 = arith.divf %348, %349 : vector<2x128xf32>
      %351 = vector.extract_strided_slice %334 {offsets = [0, 256], sizes = [2, 128], strides = [1, 1]} : vector<2x384xf32> to vector<2x128xf32>
      %352 = vector.extract_strided_slice %332 {offsets = [0, 256], sizes = [2, 128], strides = [1, 1]} : vector<2x384xf32> to vector<2x128xf32>
      %353 = arith.mulf %342, %352 : vector<2x128xf32>
      %354 = arith.addf %351, %353 : vector<2x128xf32>
      %355 = math.tanh %354 : vector<2x128xf32>
      %cst_129 = arith.constant 1.000000e+00 : f32
      %356 = vector.broadcast %cst_129 : f32 to vector<2x128xf32>
      %357 = arith.subf %356, %350 : vector<2x128xf32>
      %358 = arith.mulf %357, %355 : vector<2x128xf32>
      %359 = arith.mulf %350, %325 : vector<2x128xf32>
      %360 = arith.addf %358, %359 : vector<2x128xf32>
      %c0_130 = arith.constant 0 : index
      %c6 = arith.constant 6 : index
      %c0_131 = arith.constant 0 : index
      %361 = vector.load %arg14[%c0_130, %c6, %c0_131] : memref<2x8x128xf32, #tpu.memory_space<vmem>>, vector<2x1x128xf32>
      %362 = vector.shape_cast %361 : vector<2x1x128xf32> to vector<2x128xf32>
      %363 = vector.shape_cast %360 : vector<2x128xf32> to vector<2x1x128xf32>
      tpu.vector_store %arg14[%c0_130, %c6, %c0_131], %363 {strides = array<i32>} : memref<2x8x128xf32, #tpu.memory_space<vmem>>, vector<2x1x128xf32>,
      %364 = arith.truncf %360 : vector<2x128xf32> to vector<2x128xbf16>
      %cst_132 = arith.constant dense<0.000000e+00> : vector<2x384xf32>
      %365 = tpu.matmul %364, %104, %cst_132 {dimension_numbers = #tpu.dot_dimension_numbers<[1], [0], [0], [1], [0, 0, 1, 1], [], []>} : vector<2x128xbf16>, vector<128x384xbf16>, vector<2x384xf32> -> vector<2x384xf32>
      %366 = vector.broadcast %110 : vector<1x384xf32> to vector<2x384xf32>
      %367 = arith.addf %365, %366 : vector<2x384xf32>
      %368 = vector.extract_strided_slice %117 {offsets = [0, 7, 0], sizes = [2, 1, 384], strides = [1, 1, 1]} : vector<2x8x384xf32> to vector<2x1x384xf32>
      %369 = vector.shape_cast %368 : vector<2x1x384xf32> to vector<2x384xf32>
      %370 = vector.extract_strided_slice %369 {offsets = [0, 0], sizes = [2, 128], strides = [1, 1]} : vector<2x384xf32> to vector<2x128xf32>
      %371 = vector.extract_strided_slice %367 {offsets = [0, 0], sizes = [2, 128], strides = [1, 1]} : vector<2x384xf32> to vector<2x128xf32>
      %372 = arith.addf %370, %371 : vector<2x128xf32>
      %373 = arith.negf %372 : vector<2x128xf32>
      %374 = math.exp %373 : vector<2x128xf32>
      %cst_133 = arith.constant 1.000000e+00 : f32
      %375 = vector.broadcast %cst_133 : f32 to vector<2x128xf32>
      %376 = arith.addf %375, %374 : vector<2x128xf32>
      %377 = arith.divf %375, %376 : vector<2x128xf32>
      %378 = vector.extract_strided_slice %369 {offsets = [0, 128], sizes = [2, 128], strides = [1, 1]} : vector<2x384xf32> to vector<2x128xf32>
      %379 = vector.extract_strided_slice %367 {offsets = [0, 128], sizes = [2, 128], strides = [1, 1]} : vector<2x384xf32> to vector<2x128xf32>
      %380 = arith.addf %378, %379 : vector<2x128xf32>
      %381 = arith.negf %380 : vector<2x128xf32>
      %382 = math.exp %381 : vector<2x128xf32>
      %cst_134 = arith.constant 1.000000e+00 : f32
      %383 = vector.broadcast %cst_134 : f32 to vector<2x128xf32>
      %384 = arith.addf %383, %382 : vector<2x128xf32>
      %385 = arith.divf %383, %384 : vector<2x128xf32>
      %386 = vector.extract_strided_slice %369 {offsets = [0, 256], sizes = [2, 128], strides = [1, 1]} : vector<2x384xf32> to vector<2x128xf32>
      %387 = vector.extract_strided_slice %367 {offsets = [0, 256], sizes = [2, 128], strides = [1, 1]} : vector<2x384xf32> to vector<2x128xf32>
      %388 = arith.mulf %377, %387 : vector<2x128xf32>
      %389 = arith.addf %386, %388 : vector<2x128xf32>
      %390 = math.tanh %389 : vector<2x128xf32>
      %cst_135 = arith.constant 1.000000e+00 : f32
      %391 = vector.broadcast %cst_135 : f32 to vector<2x128xf32>
      %392 = arith.subf %391, %385 : vector<2x128xf32>
      %393 = arith.mulf %392, %390 : vector<2x128xf32>
      %394 = arith.mulf %385, %360 : vector<2x128xf32>
      %395 = arith.addf %393, %394 : vector<2x128xf32>
      %c0_136 = arith.constant 0 : index
      %c7 = arith.constant 7 : index
      %c0_137 = arith.constant 0 : index
      %396 = vector.load %arg14[%c0_136, %c7, %c0_137] : memref<2x8x128xf32, #tpu.memory_space<vmem>>, vector<2x1x128xf32>
      %397 = vector.shape_cast %396 : vector<2x1x128xf32> to vector<2x128xf32>
      %398 = vector.shape_cast %395 : vector<2x128xf32> to vector<2x1x128xf32>
      tpu.vector_store %arg14[%c0_136, %c7, %c0_137], %398 {strides = array<i32>} : memref<2x8x128xf32, #tpu.memory_space<vmem>>, vector<2x1x128xf32>,
    }
    %c2_i32_64 = arith.constant 2 : i32
    %c0_65 = arith.constant 0 : index
    %c0_66 = arith.constant 0 : index
    %c0_67 = arith.constant 0 : index
    %88 = vector.load %arg14[%c0_65, %c0_66, %c0_67] : memref<2x8x128xf32, #tpu.memory_space<vmem>>, vector<2x8x128xf32>
    %89 = vector.shape_cast %88 : vector<2x8x128xf32> to vector<16x128xf32>
    %90 = arith.truncf %89 : vector<16x128xf32> to vector<16x128xbf16>
    %c0_68 = arith.constant 0 : index
    %c0_69 = arith.constant 0 : index
    %91 = vector.load %arg11[%c0_68, %c0_69] : memref<128x256xbf16, #tpu.memory_space<vmem>>, vector<128x256xbf16>
    %cst_70 = arith.constant dense<0.000000e+00> : vector<16x256xf32>
    %92 = tpu.matmul %90, %91, %cst_70 {dimension_numbers = #tpu.dot_dimension_numbers<[1], [0], [0], [1], [0, 0, 1, 1], [], []>} : vector<16x128xbf16>, vector<128x256xbf16>, vector<16x256xf32> -> vector<16x256xf32>
    %c0_71 = arith.constant 0 : index
    %c0_72 = arith.constant 0 : index
    %93 = vector.load %arg12[%c0_71, %c0_72] : memref<1x256xf32, #tpu.memory_space<vmem>>, vector<1x256xf32>
    %94 = vector.broadcast %93 : vector<1x256xf32> to vector<16x256xf32>
    %95 = arith.addf %92, %94 : vector<16x256xf32>
    %96 = vector.shape_cast %95 : vector<16x256xf32> to vector<2x8x256xf32>
    %c0_73 = arith.constant 0 : index
    %c0_74 = arith.constant 0 : index
    %c0_75 = arith.constant 0 : index
    %97 = vector.load %arg13[%c0_73, %c0_74, %c0_75] : memref<2x8x256xf32, #tpu.memory_space<vmem>>, vector<2x8x256xf32>
    tpu.vector_store %arg13[%c0_73, %c0_74, %c0_75], %96 {strides = array<i32>} : memref<2x8x256xf32, #tpu.memory_space<vmem>>, vector<2x8x256xf32>,
    return
  }
  func.func @transform_0(%arg0: i32) -> (i32, i32, i32) {
    %c0_i32 = arith.constant 0 : i32
    %c0_i32_0 = arith.constant 0 : i32
    %c0_i32_1 = arith.constant 0 : i32
    return %arg0, %c0_i32, %c0_i32_0 : i32, i32, i32
  }
  func.func @transform_1(%arg0: i32) -> (i32, i32, i32) {
    %c0_i32 = arith.constant 0 : i32
    %c0_i32_0 = arith.constant 0 : i32
    %c0_i32_1 = arith.constant 0 : i32
    return %arg0, %c0_i32, %c0_i32_0 : i32, i32, i32
  }
  func.func @transform_2(%arg0: i32) -> (i32, i32) {
    %c0_i32 = arith.constant 0 : i32
    %c0_i32_0 = arith.constant 0 : i32
    %c0_i32_1 = arith.constant 0 : i32
    return %c0_i32, %c0_i32_0 : i32, i32
  }
  func.func @transform_3(%arg0: i32) -> (i32, i32) {
    %c0_i32 = arith.constant 0 : i32
    %c0_i32_0 = arith.constant 0 : i32
    %c0_i32_1 = arith.constant 0 : i32
    return %c0_i32, %c0_i32_0 : i32, i32
  }
  func.func @transform_4(%arg0: i32) -> (i32, i32) {
    %c0_i32 = arith.constant 0 : i32
    %c0_i32_0 = arith.constant 0 : i32
    %c0_i32_1 = arith.constant 0 : i32
    return %c0_i32, %c0_i32_0 : i32, i32
  }
  func.func @transform_5(%arg0: i32) -> (i32, i32) {
    %c0_i32 = arith.constant 0 : i32
    %c0_i32_0 = arith.constant 0 : i32
    %c0_i32_1 = arith.constant 0 : i32
    return %c0_i32, %c0_i32_0 : i32, i32
  }
  func.func @transform_6(%arg0: i32) -> (i32, i32, i32) {
    %c0_i32 = arith.constant 0 : i32
    %c0_i32_0 = arith.constant 0 : i32
    %c0_i32_1 = arith.constant 0 : i32
    %c0_i32_2 = arith.constant 0 : i32
    return %c0_i32, %c0_i32_0, %c0_i32_1 : i32, i32, i32
  }
  func.func @transform_7(%arg0: i32) -> (i32, i32, i32) {
    %c0_i32 = arith.constant 0 : i32
    %c0_i32_0 = arith.constant 0 : i32
    %c0_i32_1 = arith.constant 0 : i32
    %c0_i32_2 = arith.constant 0 : i32
    return %c0_i32, %c0_i32_0, %c0_i32_1 : i32, i32, i32
  }
  func.func @transform_8(%arg0: i32) -> (i32, i32, i32) {
    %c0_i32 = arith.constant 0 : i32
    %c0_i32_0 = arith.constant 0 : i32
    %c0_i32_1 = arith.constant 0 : i32
    %c0_i32_2 = arith.constant 0 : i32
    return %c0_i32, %c0_i32_0, %c0_i32_1 : i32, i32, i32
  }
  func.func @transform_9(%arg0: i32) -> (i32, i32, i32) {
    %c0_i32 = arith.constant 0 : i32
    %c0_i32_0 = arith.constant 0 : i32
    %c0_i32_1 = arith.constant 0 : i32
    %c0_i32_2 = arith.constant 0 : i32
    return %c0_i32, %c0_i32_0, %c0_i32_1 : i32, i32, i32
  }
  func.func @transform_10(%arg0: i32) -> (i32, i32) {
    %c0_i32 = arith.constant 0 : i32
    %c0_i32_0 = arith.constant 0 : i32
    %c0_i32_1 = arith.constant 0 : i32
    return %c0_i32, %c0_i32_0 : i32, i32
  }
  func.func @transform_11(%arg0: i32) -> (i32, i32) {
    %c0_i32 = arith.constant 0 : i32
    %c0_i32_0 = arith.constant 0 : i32
    %c0_i32_1 = arith.constant 0 : i32
    return %c0_i32, %c0_i32_0 : i32, i32
  }
  func.func @transform_12(%arg0: i32) -> (i32, i32, i32) {
    %c0_i32 = arith.constant 0 : i32
    %c0_i32_0 = arith.constant 0 : i32
    %c0_i32_1 = arith.constant 0 : i32
    return %arg0, %c0_i32, %c0_i32_0 : i32, i32, i32
  }
}

</mosaic_0001>

<bundles_post_ra>
// kernel: decoder_forward.1
= control target key start
LH: loop header
LB: loop body
LE: loop exit
PB: predicated region body
PF: predicated region fallthrough
CT: control target
= control target key end

     0   :  { %17 = vsyncpa [#allocation4], 0  ;;  %v13458_v2 = vmov 0.0   ;;  %vm10467_vm0 = vmmov 0   ;;  %s13445_s0 = inlined_call_operand.vmem [shape: f32[2,8,128], index: 0, kind: input, shape index: {}]   ;;  %s13446_s1 = inlined_call_operand.vmem [shape: f32[2,8,8], index: 1, kind: input, shape index: {}]   ;;  %s13447_s2 = inlined_call_operand.vmem [shape: bf16[128,128], index: 2, kind: input, shape index: {}]   ;;  %s13448_s3 = inlined_call_operand.vmem [shape: f32[1,128], index: 3, kind: input, shape index: {}]   ;;  %s13449_s4 = inlined_call_operand.vmem [shape: f32[1,128], index: 4, kind: input, shape index: {}]   ;;  %s13450_s5 = inlined_call_operand.vmem [shape: f32[1,128], index: 5, kind: input, shape index: {}]   ;;  %s13451_s6 = inlined_call_operand.vmem [shape: bf16[8,128,384], index: 6, kind: input, shape index: {}]   ;;  %s13452_s7 = inlined_call_operand.vmem [shape: bf16[8,128,384], index: 7, kind: input, shape index: {}]   ;;  %s13453_s8 = inlined_call_operand.vmem [shape: f32[8,1,384], index: 8, kind: input, shape index: {}]   ;;  %s13454_s9 = inlined_call_operand.vmem [shape: f32[8,1,384], index: 9, kind: input, shape index: {}]   ;;  %s13455_s10 = inlined_call_operand.vmem [shape: bf16[128,256], index: 10, kind: input, shape index: {}]   ;;  %s13456_s11 = inlined_call_operand.vmem [shape: f32[1,256], index: 11, kind: input, shape index: {}]   ;;  %s13457_s12 = inlined_call_operand.hbm [shape: f32[2,8,256], index: 12, kind: output, shape index: {}]  }
   0x1   :  { %v10552_v0 = vld [vmem:[%s13446_s1] sm:$0xff]  ;;  %v10557_v1 = vld [vmem:[%s13446_s1 + $0x8] sm:$0xff]  ;;  %8528 = vmatprep.subr.bf16.mxu0 %v13458_v2  ;;  %8544 = vmatprep.mubr.msk.bf16.mxu0 %vm10467_vm0, %v13458_v2  ;;  %v9368_v5 = vld [vmem:[%s13447_s2 + $0x10] sm:$0xff]   ;;  %s10612_s1 = smov 0  }
   0x2   :  { %v9366_v3 = vld [vmem:[%s13447_s2] sm:$0xff]   ;;  %v9367_v4 = vld [vmem:[%s13447_s2 + $0x8] sm:$0xff]   ;;  %v9369_v10 = vld [vmem:[%s13447_s2 + $0x18] sm:$0xff]  }
   0x3   :  { %8529 = vmatpush3.bf16.msra.mxu0 %v9366_v3  ;;  %v43_v6 = vld [vmem:[%s13445_s0] sm:$0xff]  ;;  %v44_v7 = vld [vmem:[%s13445_s0 + $0x8] sm:$0xff]  ;;  %v9372_v13 = vld [vmem:[%s13447_s2 + $0x30] sm:$0xff]  }
   0x4   :  { %8530 = vmatprep.subr.bf16.mxu0 %v13458_v2  ;;  %v10579_v8 = vpack.c.bf16 %v43_v6, %v43_v6  ;;  %v10581_v9 = vpack.c.bf16 %v44_v7, %v44_v7  ;;  %v9370_v11 = vld [vmem:[%s13447_s2 + $0x20] sm:$0xff]   ;;  %v9371_v12 = vld [vmem:[%s13447_s2 + $0x28] sm:$0xff]   ;;  %v9373_v14 = vld [vmem:[%s13447_s2 + $0x38] sm:$0xff]   ;;  %v49_v15 = vpack.c.bf16 %v44_v7, %v43_v6 }
   0x5   :  { %v7626_v16 = vld [vmem:[%s13448_s3] ss:$0 sm:$0xff] }
   0x6   :  { %v7635_v40 = vld [vmem:[%s13449_s4] ss:$0 sm:$0xff] }
   0x7   :  { %8531 = vmatpush3.bf16.msra.mxu0 %v9367_v4  ;;  %v7636_v42 = vld [vmem:[%s13450_s5] ss:$0 sm:$0xff] }
   0x8   :  { %8532 = vmatprep.subr.bf16.mxu0 %v13458_v2 }
   0xb   :  { %8533 = vmatpush3.bf16.msra.mxu0 %v9368_v5 }
   0xc   :  { %8534 = vmatprep.subr.bf16.mxu0 %v13458_v2 }
   0xf   :  { %8535 = vmatpush3.bf16.msra.mxu0 %v9369_v10 }
  0x10   :  { %8536 = vmatprep.subr.bf16.mxu0 %v13458_v2 }
  0x13   :  { %8537 = vmatpush3.bf16.msra.mxu0 %v9370_v11 }
  0x14   :  { %8538 = vmatprep.subr.bf16.mxu0 %v13458_v2 }
  0x17   :  { %8539 = vmatpush3.bf16.msra.mxu0 %v9371_v12 }
  0x18   :  { %8540 = vmatprep.subr.bf16.mxu0 %v13458_v2 }
  0x1b   :  { %8541 = vmatpush3.bf16.msra.mxu0 %v9372_v13 }
  0x1c   :  { %8542 = vmatprep.subr.bf16.mxu0 %v13458_v2 }
  0x1f   :  { %8543 = vmatpush3.bf16.msra.mxu0 %v9373_v14 }
  0x22   :  { %8545 = vmatmul.mubr.bf16.vlgmr.msra.gmra.mrb[0].mxu0 %v49_v15 }
  0xf5   :  { %v155_v17 = vpop.f32.mrb[0].mxu0 }
  0xf6   :  { %v156_v18 = vadd.f32 %v7626_v16, %v155_v17  ;;  %v8546_v19 = vpop.f32.mrb[1].mxu0 }
  0xf7   :  { %v158_v20 = vpop.f32.mrb[2].mxu0 }
  0xf8   :  { %v162_v21 = vmax.f32 %v156_v18, 0.0  ;;  %v159_v22 = vadd.f32 %v7626_v16, %v158_v20  ;;  %v8547_v23 = vpop.f32.mrb[3].mxu0 }
  0xfa   :  { %164 = vadd.xlane.f32.xlu0 %v162_v21  ;;  %v163_v24 = vmax.f32 %v159_v22, 0.0 }
  0xfe   :  { %166 = vadd.xlane.f32.xlu0 %v163_v24 }
 0x187   :  { %v165_v25 = vpop.xlane.xlu0 %164 }
 0x188   :  { %v169_v26 = vmul.f32 0.0078125, %v165_v25 }
 0x18a   :  { %v171_v27 = vsub.f32 %v162_v21, %v169_v26 }
 0x18b   :  { %v167_v28 = vpop.xlane.xlu0 %166 }
 0x18c   :  { %v170_v29 = vmul.f32 0.0078125, %v167_v28  ;;  %v173_v30 = vmul.f32 %v171_v27, %v171_v27 }
 0x18e   :  { %v172_v31 = vsub.f32 %v163_v24, %v170_v29  ;;  %175 = vadd.xlane.f32.xlu1 %v173_v30 }
 0x190   :  { %v174_v32 = vmul.f32 %v172_v31, %v172_v31 }
 0x192   :  { %177 = vadd.xlane.f32.xlu1 %v174_v32 }
 0x21b   :  { %v176_v33 = vpop.xlane.xlu1 %175 }
 0x21c   :  { %v179_v34 = vmul.f32 0.0078125, %v176_v33 }
 0x21e   :  { %v181_v35 = vadd.f32 1e-05, %v179_v34 }
 0x21f   :  { %v178_v36 = vpop.xlane.xlu1 %177 }
 0x220   :  { %9374 = vrsqrt.f32 %v181_v35  ;;  %v180_v37 = vmul.f32 0.0078125, %v178_v36 }
 0x222   :  { %v182_v38 = vadd.f32 1e-05, %v180_v37 }
 0x224   :  { %9376 = vrsqrt.f32 %v182_v38 }
 0x22a   :  { %v9375_v39 = vpop.eup %9374 }
 0x22b   :  { %v185_v41 = vmul.f32 %v9375_v39, %v171_v27 }
 0x22d   :  { %v194_v43 = vmul.f32 %v7635_v40, %v185_v41 }
 0x22e   :  { %v9377_v44 = vpop.eup %9376 }
 0x22f   :  { %v203_v45 = vadd.f32 %v7636_v42, %v194_v43  ;;  %v186_v46 = vmul.f32 %v9377_v44, %v172_v31 }
 0x231   :  { %205 = vst [vmem:[#allocation2] sm:$0xff] %v203_v45  ;;  %v195_v47 = vmul.f32 %v7635_v40, %v186_v46 }
 0x233   :  { %v204_v48 = vadd.f32 %v7636_v42, %v195_v47 }
 0x235   :  { %206 = vst [vmem:[#allocation2 + $0x8] sm:$0xff] %v204_v48 }
 0x236 LB: > { %v10468_v49 = vmov 0.0   ;;  %v10469_v50 = vmov 0   ;;  %s8177_s4 = smul.u32 192, %s10452_s1  ;;  %vm10470_vm1 = vmmov 0   ;;  %v291_v43 = vlaneseq  ;;  %s10452_s1 = sphi %s10612_s1, %s212_s1  }
 0x237   : > { %8548 = vmatprep.subr.bf16.mxu1 %v10468_v49  ;;  %466 = vmatprep.mubr.bf16.mxu0 %v10469_v50  ;;  %s282_s16 = smul.u32 3, %s10452_s1  ;;  %vm806_vm2 = vcmask 1041409   ;;  %s212_s1 = sadd.s32 1, %s10452_s1  }
 0x238   : > { %8564 = vmatprep.mubr.msk.bf16.mxu1 %vm10470_vm1, %v10468_v49  ;;  %s10625_s30 = scalar_lea.vmem %s13451_s6, %s8177_s4  ;;  %s10638_s15 = scalar_lea.vmem %s13452_s7, %s8177_s4  ;;  %v287_v12 = vld [vmem:[#allocation2] sm:$0xff]  ;;  %v292_v44 = vshrl.u32 %v291_v43, 7 }
 0x239   : > { %v9378_v51 = vld [vmem:[%s10625_s30 + $0x4] ss:$12 sps:$4 sm:$0xff]   ;;  %v9380_v52 = vld [vmem:[%s10625_s30] ss:$12 sps:$4 sm:$0xff]   ;;  %v9381_v53 = vld [vmem:[%s10625_s30 + $0x1c] ss:$12 sps:$4 sm:$0xff]   ;;  %s283_s19 = scalar_lea.vmem %s13453_s8, %s282_s16  ;;  %s285_s21 = scalar_lea.vmem %s13454_s9, %s282_s16 }
 0x23a   : > { %434 = vmatprep.subr.bf16.mxu0 %v9378_v51  ;;  %v9383_v54 = vld [vmem:[%s10625_s30 + $0x18] ss:$12 sps:$4 sm:$0xff]   ;;  %v9384_v55 = vld [vmem:[%s10625_s30 + $0x34] ss:$12 sps:$4 sm:$0xff]   ;;  %v9386_v56 = vld [vmem:[%s10625_s30 + $0x30] ss:$12 sps:$4 sm:$0xff]  }
 0x23b   : > { %435 = vmatpush1.bf16.msra.mxu0 %v9380_v52  ;;  %v9387_v57 = vld [vmem:[%s10625_s30 + $0x4c] ss:$12 sps:$4 sm:$0xff]   ;;  %v9399_v58 = vld [vmem:[%s10625_s30 + $0x8] ss:$12 sps:$4 sm:$0xff]   ;;  %v9390_v60 = vld [vmem:[%s10625_s30 + $0x64] ss:$12 sps:$4 sm:$0xff]  }
 0x23c   : > { %436 = vmatprep.subr.bf16.mxu0 %v9381_v53  ;;  %v9389_v59 = vld [vmem:[%s10625_s30 + $0x48] ss:$12 sps:$4 sm:$0xff]   ;;  %8549 = vmatpush3.bf16.msra.mxu1 %v9399_v58  ;;  %v9403_v61 = vld [vmem:[%s10625_s30 + $0x20] ss:$12 sps:$4 sm:$0xff]   ;;  %v9407_v3 = vld [vmem:[%s10625_s30 + $0x38] ss:$12 sps:$4 sm:$0xff]  }
 0x23d   : > { %8550 = vmatprep.subr.bf16.mxu1 %v10468_v49  ;;  %v9392_v62 = vld [vmem:[%s10625_s30 + $0x60] ss:$12 sps:$4 sm:$0xff]   ;;  %v9393_v63 = vld [vmem:[%s10625_s30 + $0x7c] ss:$12 sps:$4 sm:$0xff]   ;;  %v9395_v4 = vld [vmem:[%s10625_s30 + $0x78] ss:$12 sps:$4 sm:$0xff]  }
 0x23e   : > { %v9396_v5 = vld [vmem:[%s10625_s30 + $0x94] ss:$12 sps:$4 sm:$0xff]   ;;  %v9411_v6 = vld [vmem:[%s10625_s30 + $0x50] ss:$12 sps:$4 sm:$0xff]   ;;  %v9400_v10 = vld [vmem:[%s10625_s30 + $0xac] ss:$12 sps:$4 sm:$0xff]  }
 0x23f   : > { %437 = vmatpush1.bf16.msra.mxu0 %v9383_v54  ;;  %v9398_v7 = vld [vmem:[%s10625_s30 + $0x90] ss:$12 sps:$4 sm:$0xff]   ;;  %v9415_v11 = vld [vmem:[%s10625_s30 + $0x68] ss:$12 sps:$4 sm:$0xff]   ;;  %v9419_v16 = vld [vmem:[%s10625_s30 + $0x80] ss:$12 sps:$4 sm:$0xff]  }
 0x240   : > { %438 = vmatprep.subr.bf16.mxu0 %v9384_v55  ;;  %8551 = vmatpush3.bf16.msra.mxu1 %v9403_v61  ;;  %v288_v13 = vld [vmem:[#allocation2 + $0x8] sm:$0xff]  ;;  %v10658_v15 = vld [vmem:[%s10638_s15 + $0x4] ss:$12 sps:$4 sm:$0xff]   ;;  %v10676_v22 = vld [vmem:[%s10638_s15 + $0x34] ss:$12 sps:$4 sm:$0xff]   ;;  %v10813_v45 = vsub.s32 0, %v292_v44 }
 0x241   : > { %8552 = vmatprep.subr.bf16.mxu1 %v10468_v49  ;;  %v9402_v14 = vld [vmem:[%s10625_s30 + $0xa8] ss:$12 sps:$4 sm:$0xff]   ;;  %v289_v17 = vpack.c.bf16 %v288_v13, %v287_v12  ;;  %v10663_v18 = vld [vmem:[%s10638_s15] ss:$12 sps:$4 sm:$0xff]   ;;  %v9423_v20 = vld [vmem:[%s10625_s30 + $0x98] ss:$12 sps:$4 sm:$0xff]  }
 0x242   : > { %v10666_v19 = vld [vmem:[%s10638_s15 + $0x1c] ss:$12 sps:$4 sm:$0xff]   ;;  %v10672_v21 = vld [vmem:[%s10638_s15 + $0x18] ss:$12 sps:$4 sm:$0xff]   ;;  %v10704_v29 = vld [vmem:[%s10638_s15 + $0x20] ss:$12 sps:$4 sm:$0xff]  }
 0x243   : > { %439 = vmatpush1.bf16.msra.mxu0 %v9386_v56  ;;  %v9427_v23 = vld [vmem:[%s10625_s30 + $0xb0] ss:$12 sps:$4 sm:$0xff]   ;;  %v10688_v25 = vld [vmem:[%s10638_s15 + $0x4c] ss:$12 sps:$4 sm:$0xff]   ;;  %v10691_v26 = vld [vmem:[%s10638_s15 + $0x8] ss:$12 sps:$4 sm:$0xff]  }
 0x244   : > { %440 = vmatprep.subr.bf16.mxu0 %v9387_v57  ;;  %8553 = vmatpush3.bf16.msra.mxu1 %v9407_v3  ;;  %v10684_v24 = vld [vmem:[%s10638_s15 + $0x30] ss:$12 sps:$4 sm:$0xff]   ;;  %v10696_v27 = vld [vmem:[%s10638_s15 + $0x48] ss:$12 sps:$4 sm:$0xff]   ;;  %v10711_v30 = vld [vmem:[%s10638_s15 + $0x60] ss:$12 sps:$4 sm:$0xff]  }
 0x245   : > { %8554 = vmatprep.subr.bf16.mxu1 %v10468_v49  ;;  %v10700_v28 = vld [vmem:[%s10638_s15 + $0x64] ss:$12 sps:$4 sm:$0xff]   ;;  %v10715_v31 = vld [vmem:[%s10638_s15 + $0x7c] ss:$12 sps:$4 sm:$0xff]   ;;  %v10728_v34 = vld [vmem:[%s10638_s15 + $0x94] ss:$12 sps:$4 sm:$0xff]  }
 0x246   : > { %v10719_v32 = vld [vmem:[%s10638_s15 + $0x38] ss:$12 sps:$4 sm:$0xff]   ;;  %v10732_v35 = vld [vmem:[%s10638_s15 + $0x50] ss:$12 sps:$4 sm:$0xff]   ;;  %v10745_v38 = vld [vmem:[%s10638_s15 + $0x68] ss:$12 sps:$4 sm:$0xff]  }
 0x247   : > { %441 = vmatpush1.bf16.msra.mxu0 %v9389_v59  ;;  %v10724_v33 = vld [vmem:[%s10638_s15 + $0x78] ss:$12 sps:$4 sm:$0xff]   ;;  %v10737_v36 = vld [vmem:[%s10638_s15 + $0x90] ss:$12 sps:$4 sm:$0xff]   ;;  %v10750_v39 = vld [vmem:[%s10638_s15 + $0xa8] ss:$12 sps:$4 sm:$0xff]  }
 0x248   : > { %442 = vmatprep.subr.bf16.mxu0 %v9390_v60  ;;  %8555 = vmatpush3.bf16.msra.mxu1 %v9411_v6  ;;  %v10741_v37 = vld [vmem:[%s10638_s15 + $0xac] ss:$12 sps:$4 sm:$0xff]   ;;  %v10770_v42 = vld [vmem:[%s10638_s15 + $0xb0] ss:$12 sps:$4 sm:$0xff]   ;;  %v284_v46 = vld [vmem:[%s283_s19] sm:$0x7] }
 0x249   : > { %8556 = vmatprep.subr.bf16.mxu1 %v10468_v49  ;;  %v10755_v40 = vld [vmem:[%s10638_s15 + $0x80] ss:$12 sps:$4 sm:$0xff]   ;;  %v10761_v41 = vld [vmem:[%s10638_s15 + $0x98] ss:$12 sps:$4 sm:$0xff]   ;;  %v10815_v47 = vsub.s32 1, %v292_v44  ;;  %v294_v48 = vrot.slane %v284_v46, %v10813_v45  ;;  %v10823_v57 = vsub.s32 2, %v292_v44 }
 0x24a   : > { %p209_p0 = scmp.ge.s32.totalorder %s212_s1, 2  }
 0x24b   : > { %443 = vmatpush1.bf16.msra.mxu0 %v9392_v62  ;;  %v298_v51 = vrot.slane %v284_v46, %v10815_v47  ;;  %v302_v61 = vrot.slane %v284_v46, %v10823_v57  ;;  %s11296_s22 = smov (%p209_p0), 0  }
 0x24c   : > { %444 = vmatprep.subr.bf16.mxu0 %v9393_v63  ;;  %8557 = vmatpush3.bf16.msra.mxu1 %v9415_v11 }
 0x24d   : > { %8558 = vmatprep.subr.bf16.mxu1 %v10468_v49 }
 0x24f   : > { %445 = vmatpush1.bf16.msra.mxu0 %v9395_v4 }
 0x250   : > { %446 = vmatprep.subr.bf16.mxu0 %v9396_v5  ;;  %8559 = vmatpush3.bf16.msra.mxu1 %v9419_v16 }
 0x251   : > { %8560 = vmatprep.subr.bf16.mxu1 %v10468_v49 }
 0x253   : > { %447 = vmatpush1.bf16.msra.mxu0 %v9398_v7  ;;  %v286_v7 = vld [vmem:[%s285_s21] sm:$0x7] }
 0x254   : > { %448 = vmatprep.subr.bf16.mxu0 %v9400_v10  ;;  %8561 = vmatpush3.bf16.msra.mxu1 %v9423_v20  ;;  %v10838_v10 = vrot.slane %v286_v7, %v10813_v45  ;;  %v10841_v11 = vrot.slane %v286_v7, %v10815_v47 }
 0x255   : > { %8562 = vmatprep.subr.bf16.mxu1 %v10468_v49 }
 0x257   : > { %449 = vmatpush1.bf16.msra.mxu0 %v9402_v14 }
 0x258   : > { %662 = vmatprep.subr.bf16.mxu0 %v10658_v15  ;;  %8563 = vmatpush3.bf16.msra.mxu1 %v9427_v23 }
 0x259   : > { %8568 = vmatprep.subr.bf16.mxu1 %v10468_v49 }
 0x25a   : > { %467 = vmatmul.mubr.bf16.vlgmr.msra.gmra.mrb[0].mxu0 %v289_v17 }
 0x25b   : > { %663 = vmatpush1.bf16.msra.mxu0 %v10663_v18  ;;  %694 = vmatprep.mubr.bf16.mxu0 %v10469_v50 }
 0x25c   : > { %664 = vmatprep.subr.bf16.mxu0 %v10666_v19  ;;  %8565 = vmatmul.mubr.bf16.vlgmr.msra.gmra.mrb[0].mxu1 %v289_v17 }
 0x25d   : > { %8569 = vmatpush3.bf16.msra.mxu1 %v10691_v26  ;;  %8584 = vmatprep.mubr.msk.bf16.mxu1 %vm10470_vm1, %v10468_v49 }
 0x25e   : > { %8570 = vmatprep.subr.bf16.mxu1 %v10468_v49 }
 0x25f   : > { %665 = vmatpush1.bf16.msra.mxu0 %v10672_v21 }
 0x260   : > { %666 = vmatprep.subr.bf16.mxu0 %v10676_v22 }
 0x261   : > { %8571 = vmatpush3.bf16.msra.mxu1 %v10704_v29 }
 0x262   : > { %8572 = vmatprep.subr.bf16.mxu1 %v10468_v49 }
 0x263   : > { %667 = vmatpush1.bf16.msra.mxu0 %v10684_v24 }
 0x264   : > { %668 = vmatprep.subr.bf16.mxu0 %v10688_v25 }
 0x265   : > { %8573 = vmatpush3.bf16.msra.mxu1 %v10719_v32 }
 0x266   : > { %8574 = vmatprep.subr.bf16.mxu1 %v10468_v49 }
 0x267   : > { %669 = vmatpush1.bf16.msra.mxu0 %v10696_v27 }
 0x268   : > { %670 = vmatprep.subr.bf16.mxu0 %v10700_v28 }
 0x269   : > { %8575 = vmatpush3.bf16.msra.mxu1 %v10732_v35 }
 0x26a   : > { %8576 = vmatprep.subr.bf16.mxu1 %v10468_v49 }
 0x26b   : > { %671 = vmatpush1.bf16.msra.mxu0 %v10711_v30 }
 0x26c   : > { %672 = vmatprep.subr.bf16.mxu0 %v10715_v31 }
 0x26d   : > { %8577 = vmatpush3.bf16.msra.mxu1 %v10745_v38 }
 0x26e   : > { %8578 = vmatprep.subr.bf16.mxu1 %v10468_v49 }
 0x26f   : > { %673 = vmatpush1.bf16.msra.mxu0 %v10724_v33 }
 0x270   : > { %674 = vmatprep.subr.bf16.mxu0 %v10728_v34 }
 0x271   : > { %8579 = vmatpush3.bf16.msra.mxu1 %v10755_v40 }
 0x272   : > { %8580 = vmatprep.subr.bf16.mxu1 %v10468_v49 }
 0x273   : > { %675 = vmatpush1.bf16.msra.mxu0 %v10737_v36 }
 0x274   : > { %676 = vmatprep.subr.bf16.mxu0 %v10741_v37 }
 0x275   : > { %8581 = vmatpush3.bf16.msra.mxu1 %v10761_v41 }
 0x276   : > { %8582 = vmatprep.subr.bf16.mxu1 %v10468_v49 }
 0x277   : > { %677 = vmatpush1.bf16.msra.mxu0 %v10750_v39 }
 0x278   : > { %810 = vmatprep.subr.bf16.mxu0 %v10658_v15 }
 0x279   : > { %8583 = vmatpush3.bf16.msra.mxu1 %v10770_v42 }
 0x27a   : > { %695 = vmatmul.mubr.bf16.vlgmr.msra.gmra.mrb[4].mxu0 %v10469_v50  ;;  %8588 = vmatprep.subr.bf16.mxu1 %v10468_v49 }
 0x27b   : > { %811 = vmatpush1.bf16.msra.mxu0 %v10663_v18  ;;  %842 = vmatprep.mubr.bf16.mxu0 %v10469_v50 }
 0x27c   : > { %812 = vmatprep.subr.bf16.mxu0 %v10666_v19  ;;  %8585 = vmatmul.mubr.bf16.vlgmr.msra.gmra.mrb[4].mxu1 %v10469_v50 }
 0x27d   : > { %8589 = vmatpush3.bf16.msra.mxu1 %v10691_v26  ;;  %8604 = vmatprep.mubr.msk.bf16.mxu1 %vm10470_vm1, %v10468_v49 }
 0x27e   : > { %8590 = vmatprep.subr.bf16.mxu1 %v10468_v49 }
 0x27f   : > { %813 = vmatpush1.bf16.msra.mxu0 %v10672_v21 }
 0x280   : > { %814 = vmatprep.subr.bf16.mxu0 %v10676_v22 }
 0x281   : > { %8591 = vmatpush3.bf16.msra.mxu1 %v10704_v29 }
 0x282   : > { %8592 = vmatprep.subr.bf16.mxu1 %v10468_v49 }
 0x283   : > { %815 = vmatpush1.bf16.msra.mxu0 %v10684_v24 }
 0x284   : > { %816 = vmatprep.subr.bf16.mxu0 %v10688_v25 }
 0x285   : > { %8593 = vmatpush3.bf16.msra.mxu1 %v10719_v32 }
 0x286   : > { %8594 = vmatprep.subr.bf16.mxu1 %v10468_v49 }
 0x287   : > { %817 = vmatpush1.bf16.msra.mxu0 %v10696_v27 }
 0x288   : > { %818 = vmatprep.subr.bf16.mxu0 %v10700_v28 }
 0x289   : > { %8595 = vmatpush3.bf16.msra.mxu1 %v10732_v35 }
 0x28a   : > { %8596 = vmatprep.subr.bf16.mxu1 %v10468_v49 }
 0x28b   : > { %819 = vmatpush1.bf16.msra.mxu0 %v10711_v30 }
 0x28c   : > { %820 = vmatprep.subr.bf16.mxu0 %v10715_v31 }
 0x28d   : > { %8597 = vmatpush3.bf16.msra.mxu1 %v10745_v38 }
 0x28e   : > { %8598 = vmatprep.subr.bf16.mxu1 %v10468_v49 }
 0x28f   : > { %821 = vmatpush1.bf16.msra.mxu0 %v10724_v33 }
 0x290   : > { %822 = vmatprep.subr.bf16.mxu0 %v10728_v34 }
 0x291   : > { %8599 = vmatpush3.bf16.msra.mxu1 %v10755_v40 }
 0x292   : > { %8600 = vmatprep.subr.bf16.mxu1 %v10468_v49 }
 0x293   : > { %823 = vmatpush1.bf16.msra.mxu0 %v10737_v36 }
 0x294   : > { %824 = vmatprep.subr.bf16.mxu0 %v10741_v37 }
 0x295   : > { %8601 = vmatpush3.bf16.msra.mxu1 %v10761_v41 }
 0x296   : > { %8602 = vmatprep.subr.bf16.mxu1 %v10468_v49 }
 0x297   : > { %825 = vmatpush1.bf16.msra.mxu0 %v10750_v39 }
 0x298   : > { %963 = vmatprep.subr.bf16.mxu0 %v10658_v15 }
 0x299   : > { %8603 = vmatpush3.bf16.msra.mxu1 %v10770_v42 }
 0x29a   : > { %8608 = vmatprep.subr.bf16.mxu1 %v10468_v49 }
 0x32d   : > { %v468_v52 = vpop.f32.mrb[0].mxu0 }
 0x32e   : > { %v10819_v53 = vadd.f32 %v468_v52, %v294_v48  ;;  %v470_v54 = vpop.f32.mrb[1].mxu0 }
 0x32f   : > { %v10821_v55 = vadd.f32 %v470_v54, %v298_v51  ;;  %v472_v56 = vpop.f32.mrb[2].mxu0  ;;  %v511_v62 = vpop.f32.mrb[0].mxu1 }
 0x330   : > { %v10825_v58 = vadd.f32 %v472_v56, %v294_v48  ;;  %v474_v59 = vpop.f32.mrb[3].mxu0  ;;  %v10830_v63 = vadd.f32 %v511_v62, %v302_v61  ;;  %v8566_v3 = vpop.f32.mrb[1].mxu1 }
 0x331   : > { %v10827_v60 = vadd.f32 %v474_v59, %v298_v51  ;;  %v514_v4 = vpop.f32.mrb[2].mxu1 }
 0x332   : > { %v10832_v5 = vadd.f32 %v514_v4, %v302_v61  ;;  %v8567_v6 = vpop.f32.mrb[3].mxu1 }
 0x34d   : > { %v696_v12 = vpop.f32.mrb[4].mxu0 }
 0x34e   : > { %v697_v13 = vadd.f32 %v696_v12, %v10838_v10  ;;  %v698_v14 = vpop.f32.mrb[5].mxu0 }
 0x34f   : > { %v699_v16 = vadd.f32 %v698_v14, %v10841_v11  ;;  %v700_v17 = vpop.f32.mrb[6].mxu0  ;;  %v737_v56 = vpop.f32.mrb[4].mxu1 }
 0x350   : > { %v744_v20 = vrot.slane %v697_v13, 1  ;;  %v747_v23 = vadd.f32 %v697_v13, %v10819_v53  ;;  %v701_v43 = vpop.f32.mrb[7].mxu0  ;;  %v8586_v61 = vpop.f32.mrb[5].mxu1 }
 0x351   : > { %v762_v44 = vrot.slane %v699_v16, 1  ;;  %v765_v51 = vadd.f32 %v699_v16, %v10821_v55  ;;  %v740_v62 = vpop.f32.mrb[6].mxu1  ;;  %v10850_v16 = vrot.slane %v286_v7, %v10823_v57 }
 0x352   : > { %v748_v46 = vadd.f32 %v744_v20, %v10825_v58  ;;  %v7687_v48 = vmul.f32 -1.442695, %v747_v23  ;;  %v8587_v4 = vpop.f32.mrb[7].mxu1 }
 0x353   : > { %v766_v54 = vadd.f32 %v762_v44, %v10827_v60  ;;  %v7689_v59 = vmul.f32 -1.442695, %v765_v51  ;;  %v738_v20 = vadd.f32 %v737_v56, %v10850_v16 }
 0x354   : > { %9442 = vpow2.f32 %v7687_v48  ;;  %v7688_v52 = vmul.f32 -1.442695, %v748_v46 }
 0x355   : > { %v7690_v3 = vmul.f32 -1.442695, %v766_v54  ;;  %v780_v46 = vrot.slane %v738_v20, 1 }
 0x356   : > { %9444 = vpow2.f32 %v7688_v52 }
 0x357   : > { %9446 = vpow2.f32 %v7689_v59 }
 0x358   : > { %9448 = vpow2.f32 %v7690_v3 }
 0x35e   : > { %v9443_v6 = vpop.eup %9442 }
 0x35f   : > { %v755_v12 = vadd.f32 1.0, %v9443_v6 }
 0x360   : > { %v9445_v13 = vpop.eup %9444 }
 0x361   : > { %v756_v14 = vadd.f32 1.0, %v9445_v13  ;;  %9450 = vrcp.f32 %v755_v12  ;;  %v9447_v17 = vpop.eup %9446 }
 0x362   : > { %v9449_v23 = vpop.eup %9448  ;;  %v773_v43 = vadd.f32 1.0, %v9447_v17 }
 0x363   : > { %9452 = vrcp.f32 %v756_v14  ;;  %v774_v44 = vadd.f32 1.0, %v9449_v23 }
 0x364   : > { %9454 = vrcp.f32 %v773_v43 }
 0x365   : > { %9456 = vrcp.f32 %v774_v44 }
 0x36b   : > { %v9451_v48 = vpop.eup %9450 }
 0x36c   : > { %v783_v51 = vmul.f32 %v9451_v48, %v738_v20 }
 0x36d   : > { %v9453_v52 = vpop.eup %9452 }
 0x36e   : > { %v784_v54 = vmul.f32 %v9453_v52, %v780_v46  ;;  %v785_v59 = vadd.f32 %v783_v51, %v10830_v63  ;;  %v9455_v7 = vpop.eup %9454 }
 0x36f   : > { %v9457_v62 = vpop.eup %9456  ;;  %v789_v3 = vsub.f32 1.0, %v9455_v7  ;;  %v793_v6 = vmul.f32 0.0, %v9455_v7 }
 0x370   : > { %v786_v61 = vadd.f32 %v784_v54, %v10832_v5  ;;  %9458 = vtanh.f32 %v785_v59  ;;  %v790_v4 = vsub.f32 1.0, %v9457_v62  ;;  %v794_v17 = vmul.f32 0.0, %v9457_v62 }
 0x372   : > { %9460 = vtanh.f32 %v786_v61 }
 0x37a   : > { %v9459_v56 = vpop.eup %9458 }
 0x37b   : > { %v791_v12 = vmul.f32 %v9459_v56, %v789_v3 }
 0x37c   : > { %v9461_v13 = vpop.eup %9460 }
 0x37d   : > { %v792_v14 = vmul.f32 %v9461_v13, %v790_v4  ;;  %v10855_v20 = vadd.f32 %v793_v6, %v791_v12 }
 0x37f   : > { %v10857_v23 = vadd.f32 %v794_v17, %v792_v14  ;;  %797 = vst [vmem:[#allocation2] sm:$0x1] %v10855_v20  ;;  %v799_v43 = vpack.c.bf16 %v10855_v20, %v10855_v20 }
 0x381   : > { %798 = vst [vmem:[#allocation2 + $0x8] sm:$0x1] %v10857_v23  ;;  %v800_v44 = vpack.c.bf16 %v10857_v23, %v10857_v23  ;;  %v803_v48 = vunpack.c.l.b16 %v799_v43 }
 0x383   : > { %v804_v46 = vunpack.c.l.b16 %v800_v44 }
 0x385   : > { %v805_v51 = vrot.slane %v804_v46, 7 }
 0x387   : > { %v807_v52 = vsel %vm806_vm2, %v805_v51, %v803_v48 }
 0x388   : > { %v808_v54 = vpack.c.b16 %v807_v52, %v807_v52 }
 0x38a   : > { %843 = vmatmul.mubr.bf16.vlgmr.msra.gmra.mrb[8].mxu0 %v808_v54  ;;  %8605 = vmatmul.mubr.bf16.vlgmr.msra.gmra.mrb[8].mxu1 %v808_v54 }
 0x38b   : > { %964 = vmatpush1.bf16.msra.mxu0 %v10663_v18  ;;  %8609 = vmatpush3.bf16.msra.mxu1 %v10691_v26 }
 0x38c   : > { %965 = vmatprep.subr.bf16.mxu0 %v10666_v19  ;;  %8610 = vmatprep.subr.bf16.mxu1 %v10468_v49 }
 0x38d   : > { %995 = vmatprep.mubr.bf16.mxu0 %v10469_v50  ;;  %8624 = vmatprep.mubr.msk.bf16.mxu1 %vm10470_vm1, %v10468_v49 }
 0x38f   : > { %966 = vmatpush1.bf16.msra.mxu0 %v10672_v21  ;;  %8611 = vmatpush3.bf16.msra.mxu1 %v10704_v29 }
 0x390   : > { %967 = vmatprep.subr.bf16.mxu0 %v10676_v22  ;;  %8612 = vmatprep.subr.bf16.mxu1 %v10468_v49 }
 0x393   : > { %968 = vmatpush1.bf16.msra.mxu0 %v10684_v24  ;;  %8613 = vmatpush3.bf16.msra.mxu1 %v10719_v32 }
 0x394   : > { %969 = vmatprep.subr.bf16.mxu0 %v10688_v25  ;;  %8614 = vmatprep.subr.bf16.mxu1 %v10468_v49 }
 0x397   : > { %970 = vmatpush1.bf16.msra.mxu0 %v10696_v27  ;;  %8615 = vmatpush3.bf16.msra.mxu1 %v10732_v35 }
 0x398   : > { %971 = vmatprep.subr.bf16.mxu0 %v10700_v28  ;;  %8616 = vmatprep.subr.bf16.mxu1 %v10468_v49 }
 0x39b   : > { %972 = vmatpush1.bf16.msra.mxu0 %v10711_v30  ;;  %8617 = vmatpush3.bf16.msra.mxu1 %v10745_v38 }
 0x39c   : > { %973 = vmatprep.subr.bf16.mxu0 %v10715_v31  ;;  %8618 = vmatprep.subr.bf16.mxu1 %v10468_v49 }
 0x39f   : > { %974 = vmatpush1.bf16.msra.mxu0 %v10724_v33  ;;  %8619 = vmatpush3.bf16.msra.mxu1 %v10755_v40 }
 0x3a0   : > { %975 = vmatprep.subr.bf16.mxu0 %v10728_v34  ;;  %8620 = vmatprep.subr.bf16.mxu1 %v10468_v49 }
 0x3a3   : > { %976 = vmatpush1.bf16.msra.mxu0 %v10737_v36  ;;  %8621 = vmatpush3.bf16.msra.mxu1 %v10761_v41 }
 0x3a4   : > { %977 = vmatprep.subr.bf16.mxu0 %v10741_v37  ;;  %8622 = vmatprep.subr.bf16.mxu1 %v10468_v49 }
 0x3a7   : > { %978 = vmatpush1.bf16.msra.mxu0 %v10750_v39  ;;  %8623 = vmatpush3.bf16.msra.mxu1 %v10770_v42 }
 0x3a8   : > { %1120 = vmatprep.subr.bf16.mxu0 %v10658_v15  ;;  %8628 = vmatprep.subr.bf16.mxu1 %v10468_v49 }
 0x45d   : > { %v844_v59 = vpop.f32.mrb[8].mxu0  ;;  %v885_v61 = vpop.f32.mrb[8].mxu1 }
 0x45e   : > { %v845_v7 = vadd.f32 %v844_v59, %v10838_v10  ;;  %v846_v62 = vpop.f32.mrb[9].mxu0  ;;  %v8606_v3 = vpop.f32.mrb[9].mxu1 }
 0x45f   : > { %v847_v56 = vadd.f32 %v846_v62, %v10841_v11  ;;  %v848_v4 = vpop.f32.mrb[10].mxu0  ;;  %v888_v6 = vpop.f32.mrb[10].mxu1 }
 0x460   : > { %v892_v12 = vrot.slane %v845_v7, 7  ;;  %v896_v13 = vadd.f32 %v845_v7, %v10825_v58  ;;  %v849_v14 = vpop.f32.mrb[11].mxu0  ;;  %v8607_v17 = vpop.f32.mrb[11].mxu1 }
 0x461   : > { %v910_v43 = vrot.slane %v847_v56, 7  ;;  %v914_v44 = vadd.f32 %v847_v56, %v10827_v60 }
 0x462   : > { %v895_v46 = vadd.f32 %v892_v12, %v10819_v53  ;;  %v7692_v48 = vmul.f32 -1.442695, %v896_v13  ;;  %v886_v12 = vadd.f32 %v885_v61, %v10850_v16 }
 0x463   : > { %v913_v51 = vadd.f32 %v910_v43, %v10821_v55  ;;  %v7694_v52 = vmul.f32 -1.442695, %v914_v44  ;;  %v944_v43 = vrot.slane %v10857_v23, 7 }
 0x464   : > { %v7691_v54 = vmul.f32 -1.442695, %v895_v46  ;;  %9462 = vpow2.f32 %v7692_v48  ;;  %v928_v46 = vrot.slane %v886_v12, 7 }
 0x465   : > { %v7693_v59 = vmul.f32 -1.442695, %v913_v51  ;;  %9464 = vpow2.f32 %v7694_v52 }
 0x466   : > { %9466 = vpow2.f32 %v7691_v54  ;;  %v943_v54 = vrot.slane %v10855_v20, 7 }
 0x467   : > { %9468 = vpow2.f32 %v7693_v59 }
 0x46e   : > { %v9463_v62 = vpop.eup %9462 }
 0x46f   : > { %v9465_v3 = vpop.eup %9464  ;;  %v904_v7 = vadd.f32 1.0, %v9463_v62 }
 0x470   : > { %v9467_v4 = vpop.eup %9466  ;;  %v922_v6 = vadd.f32 1.0, %v9465_v3 }
 0x471   : > { %v9469_v14 = vpop.eup %9468  ;;  %v903_v17 = vadd.f32 1.0, %v9467_v4  ;;  %9470 = vrcp.f32 %v904_v7 }
 0x472   : > { %v921_v56 = vadd.f32 1.0, %v9469_v14  ;;  %9472 = vrcp.f32 %v922_v6 }
 0x473   : > { %9474 = vrcp.f32 %v903_v17 }
 0x474   : > { %9476 = vrcp.f32 %v921_v56 }
 0x47b   : > { %v9471_v13 = vpop.eup %9470 }
 0x47c   : > { %v9473_v44 = vpop.eup %9472  ;;  %v932_v48 = vmul.f32 %v9471_v13, %v886_v12 }
 0x47d   : > { %v9475_v51 = vpop.eup %9474  ;;  %v948_v52 = vmul.f32 %v9473_v44, %v944_v43  ;;  %v938_v61 = vsub.f32 1.0, %v9473_v44 }
 0x47e   : > { %v9477_v59 = vpop.eup %9476  ;;  %v931_v62 = vmul.f32 %v9475_v51, %v928_v46  ;;  %v934_v3 = vadd.f32 %v932_v48, %v10832_v5 }
 0x47f   : > { %v947_v7 = vmul.f32 %v9477_v59, %v943_v54  ;;  %v937_v14 = vsub.f32 1.0, %v9477_v59 }
 0x480   : > { %v933_v4 = vadd.f32 %v931_v62, %v10830_v63  ;;  %9478 = vtanh.f32 %v934_v3 }
 0x482   : > { %9480 = vtanh.f32 %v933_v4 }
 0x48a   : > { %v9479_v6 = vpop.eup %9478 }
 0x48b   : > { %v940_v23 = vmul.f32 %v9479_v6, %v938_v61 }
 0x48c   : > { %v9481_v17 = vpop.eup %9480 }
 0x48d   : > { %v939_v56 = vmul.f32 %v9481_v17, %v937_v14  ;;  %v10912_v12 = vadd.f32 %v948_v52, %v940_v23 }
 0x48f   : > { %v10914_v13 = vadd.f32 %v947_v7, %v939_v56  ;;  %952 = vst [vmem:[#allocation2 + $0x8] sm:$0x2] %v10912_v12  ;;  %v954_v43 = vpack.c.bf16 %v10912_v12, %v10912_v12 }
 0x491   : > { %951 = vst [vmem:[#allocation2] sm:$0x2] %v10914_v13  ;;  %v953_v20 = vpack.c.bf16 %v10914_v13, %v10914_v13  ;;  %v958_v46 = vunpack.c.l.b16 %v954_v43 }
 0x493   : > { %v957_v44 = vunpack.c.l.b16 %v953_v20 }
 0x495   : > { %v959_v48 = vrot.slane %v957_v44, 1 }
 0x497   : > { %v960_v51 = vsel %vm806_vm2, %v958_v46, %v959_v48 }
 0x498   : > { %v961_v54 = vpack.c.b16 %v960_v51, %v960_v51 }
 0x49a   : > { %996 = vmatmul.mubr.bf16.vlgmr.msra.gmra.mrb[12].mxu0 %v961_v54  ;;  %8625 = vmatmul.mubr.bf16.vlgmr.msra.gmra.mrb[12].mxu1 %v961_v54 }
 0x49b   : > { %1121 = vmatpush1.bf16.msra.mxu0 %v10663_v18  ;;  %8629 = vmatpush3.bf16.msra.mxu1 %v10691_v26 }
 0x49c   : > { %1122 = vmatprep.subr.bf16.mxu0 %v10666_v19  ;;  %8630 = vmatprep.subr.bf16.mxu1 %v10468_v49 }
 0x49d   : > { %1152 = vmatprep.mubr.bf16.mxu0 %v10469_v50  ;;  %8644 = vmatprep.mubr.msk.bf16.mxu1 %vm10470_vm1, %v10468_v49 }
 0x49f   : > { %1123 = vmatpush1.bf16.msra.mxu0 %v10672_v21  ;;  %8631 = vmatpush3.bf16.msra.mxu1 %v10704_v29 }
 0x4a0   : > { %1124 = vmatprep.subr.bf16.mxu0 %v10676_v22  ;;  %8632 = vmatprep.subr.bf16.mxu1 %v10468_v49 }
 0x4a3   : > { %1125 = vmatpush1.bf16.msra.mxu0 %v10684_v24  ;;  %8633 = vmatpush3.bf16.msra.mxu1 %v10719_v32 }
 0x4a4   : > { %1126 = vmatprep.subr.bf16.mxu0 %v10688_v25  ;;  %8634 = vmatprep.subr.bf16.mxu1 %v10468_v49 }
 0x4a7   : > { %1127 = vmatpush1.bf16.msra.mxu0 %v10696_v27  ;;  %8635 = vmatpush3.bf16.msra.mxu1 %v10732_v35 }
 0x4a8   : > { %1128 = vmatprep.subr.bf16.mxu0 %v10700_v28  ;;  %8636 = vmatprep.subr.bf16.mxu1 %v10468_v49 }
 0x4ab   : > { %1129 = vmatpush1.bf16.msra.mxu0 %v10711_v30  ;;  %8637 = vmatpush3.bf16.msra.mxu1 %v10745_v38 }
 0x4ac   : > { %1130 = vmatprep.subr.bf16.mxu0 %v10715_v31  ;;  %8638 = vmatprep.subr.bf16.mxu1 %v10468_v49 }
 0x4af   : > { %1131 = vmatpush1.bf16.msra.mxu0 %v10724_v33  ;;  %8639 = vmatpush3.bf16.msra.mxu1 %v10755_v40 }
 0x4b0   : > { %1132 = vmatprep.subr.bf16.mxu0 %v10728_v34  ;;  %8640 = vmatprep.subr.bf16.mxu1 %v10468_v49 }
 0x4b3   : > { %1133 = vmatpush1.bf16.msra.mxu0 %v10737_v36  ;;  %8641 = vmatpush3.bf16.msra.mxu1 %v10761_v41 }
 0x4b4   : > { %1134 = vmatprep.subr.bf16.mxu0 %v10741_v37  ;;  %8642 = vmatprep.subr.bf16.mxu1 %v10468_v49 }
 0x4b7   : > { %1135 = vmatpush1.bf16.msra.mxu0 %v10750_v39  ;;  %8643 = vmatpush3.bf16.msra.mxu1 %v10770_v42 }
 0x4b8   : > { %1277 = vmatprep.subr.bf16.mxu0 %v10658_v15  ;;  %8648 = vmatprep.subr.bf16.mxu1 %v10468_v49 }
 0x56d   : > { %v997_v52 = vpop.f32.mrb[12].mxu0  ;;  %v1038_v59 = vpop.f32.mrb[12].mxu1 }
 0x56e   : > { %v998_v62 = vadd.f32 %v997_v52, %v10838_v10  ;;  %v999_v3 = vpop.f32.mrb[13].mxu0  ;;  %v8626_v7 = vpop.f32.mrb[13].mxu1 }
 0x56f   : > { %v1000_v4 = vadd.f32 %v999_v3, %v10841_v11  ;;  %v1001_v61 = vpop.f32.mrb[14].mxu0  ;;  %v1041_v6 = vpop.f32.mrb[14].mxu1 }
 0x570   : > { %v1045_v14 = vrot.slane %v998_v62, 6  ;;  %v1046_v23 = vrot.slane %v998_v62, 7  ;;  %v1002_v17 = vpop.f32.mrb[15].mxu0  ;;  %v8627_v56 = vpop.f32.mrb[15].mxu1 }
 0x571   : > { %v1064_v20 = vrot.slane %v1000_v4, 6  ;;  %v1065_v43 = vrot.slane %v1000_v4, 7 }
 0x572   : > { %v1049_v44 = vadd.f32 %v1045_v14, %v10819_v53  ;;  %v1050_v46 = vadd.f32 %v1046_v23, %v10825_v58 }
 0x573   : > { %v1068_v48 = vadd.f32 %v1064_v20, %v10821_v55  ;;  %v1069_v51 = vadd.f32 %v1065_v43, %v10827_v60  ;;  %v1039_v20 = vadd.f32 %v1038_v59, %v10850_v16 }
 0x574   : > { %v7695_v54 = vmul.f32 -1.442695, %v1049_v44  ;;  %v7696_v52 = vmul.f32 -1.442695, %v1050_v46 }
 0x575   : > { %v7697_v7 = vmul.f32 -1.442695, %v1068_v48  ;;  %v7698_v3 = vmul.f32 -1.442695, %v1069_v51  ;;  %v1083_v43 = vrot.slane %v1039_v20, 6  ;;  %v1084_v46 = vrot.slane %v1039_v20, 7 }
 0x576   : > { %9482 = vpow2.f32 %v7695_v54  ;;  %v1099_v54 = vrot.slane %v10914_v13, 7 }
 0x577   : > { %9484 = vpow2.f32 %v7696_v52 }
 0x578   : > { %9486 = vpow2.f32 %v7697_v7 }
 0x579   : > { %9488 = vpow2.f32 %v7698_v3  ;;  %v1100_v3 = vrot.slane %v10912_v12, 7 }
 0x580   : > { %v9483_v62 = vpop.eup %9482 }
 0x581   : > { %v9485_v61 = vpop.eup %9484  ;;  %v1057_v6 = vadd.f32 1.0, %v9483_v62 }
 0x582   : > { %v9487_v4 = vpop.eup %9486  ;;  %v1058_v17 = vadd.f32 1.0, %v9485_v61 }
 0x583   : > { %v9489_v14 = vpop.eup %9488  ;;  %9490 = vrcp.f32 %v1057_v6  ;;  %v1076_v23 = vadd.f32 1.0, %v9487_v4 }
 0x584   : > { %9492 = vrcp.f32 %v1058_v17  ;;  %v1077_v56 = vadd.f32 1.0, %v9489_v14 }
 0x585   : > { %9494 = vrcp.f32 %v1076_v23 }
 0x586   : > { %9496 = vrcp.f32 %v1077_v56 }
 0x58d   : > { %v9491_v44 = vpop.eup %9490 }
 0x58e   : > { %v9493_v48 = vpop.eup %9492  ;;  %v1087_v51 = vmul.f32 %v9491_v44, %v1083_v43 }
 0x58f   : > { %v9495_v52 = vpop.eup %9494  ;;  %v1088_v7 = vmul.f32 %v9493_v48, %v1084_v46 }
 0x590   : > { %v9497_v62 = vpop.eup %9496  ;;  %v1089_v61 = vadd.f32 %v1087_v51, %v10830_v63  ;;  %v1103_v6 = vmul.f32 %v9495_v52, %v1099_v54  ;;  %v1093_v59 = vsub.f32 1.0, %v9495_v52 }
 0x591   : > { %v1090_v4 = vadd.f32 %v1088_v7, %v10832_v5  ;;  %v1104_v17 = vmul.f32 %v9497_v62, %v1100_v3  ;;  %v1094_v23 = vsub.f32 1.0, %v9497_v62 }
 0x592   : > { %9498 = vtanh.f32 %v1089_v61 }
 0x593   : > { %9500 = vtanh.f32 %v1090_v4 }
 0x59c   : > { %v9499_v14 = vpop.eup %9498 }
 0x59d   : > { %v9501_v56 = vpop.eup %9500  ;;  %v1095_v20 = vmul.f32 %v9499_v14, %v1093_v59 }
 0x59e   : > { %v1096_v43 = vmul.f32 %v9501_v56, %v1094_v23 }
 0x59f   : > { %v10969_v13 = vadd.f32 %v1103_v6, %v1095_v20 }
 0x5a0   : > { %v10971_v44 = vadd.f32 %v1104_v17, %v1096_v43 }
 0x5a1   : > { %1107 = vst [vmem:[#allocation2] sm:$0x4] %v10969_v13  ;;  %v1109_v12 = vpack.c.bf16 %v10969_v13, %v10969_v13 }
 0x5a2   : > { %1108 = vst [vmem:[#allocation2 + $0x8] sm:$0x4] %v10971_v44  ;;  %v1110_v46 = vpack.c.bf16 %v10971_v44, %v10971_v44 }
 0x5a3   : > { %v1113_v48 = vunpack.c.l.b16 %v1109_v12 }
 0x5a4   : > { %v1114_v51 = vunpack.c.l.b16 %v1110_v46 }
 0x5a5   : > { %v1115_v54 = vrot.slane %v1113_v48, 2 }
 0x5a6   : > { %v1116_v52 = vrot.slane %v1114_v51, 1 }
 0x5a8   : > { %v1117_v7 = vsel %vm806_vm2, %v1116_v52, %v1115_v54 }
 0x5a9   : > { %v1118_v3 = vpack.c.b16 %v1117_v7, %v1117_v7 }
 0x5ab   : > { %1153 = vmatmul.mubr.bf16.vlgmr.msra.gmra.mrb[16].mxu0 %v1118_v3  ;;  %8645 = vmatmul.mubr.bf16.vlgmr.msra.gmra.mrb[16].mxu1 %v1118_v3 }
 0x5ac   : > { %1278 = vmatpush1.bf16.msra.mxu0 %v10663_v18  ;;  %8649 = vmatpush3.bf16.msra.mxu1 %v10691_v26 }
 0x5ad   : > { %1279 = vmatprep.subr.bf16.mxu0 %v10666_v19  ;;  %8650 = vmatprep.subr.bf16.mxu1 %v10468_v49 }
 0x5ae   : > { %1309 = vmatprep.mubr.bf16.mxu0 %v10469_v50  ;;  %8664 = vmatprep.mubr.msk.bf16.mxu1 %vm10470_vm1, %v10468_v49 }
 0x5b0   : > { %1280 = vmatpush1.bf16.msra.mxu0 %v10672_v21  ;;  %8651 = vmatpush3.bf16.msra.mxu1 %v10704_v29 }
 0x5b1   : > { %1281 = vmatprep.subr.bf16.mxu0 %v10676_v22  ;;  %8652 = vmatprep.subr.bf16.mxu1 %v10468_v49 }
 0x5b4   : > { %1282 = vmatpush1.bf16.msra.mxu0 %v10684_v24  ;;  %8653 = vmatpush3.bf16.msra.mxu1 %v10719_v32 }
 0x5b5   : > { %1283 = vmatprep.subr.bf16.mxu0 %v10688_v25  ;;  %8654 = vmatprep.subr.bf16.mxu1 %v10468_v49 }
 0x5b8   : > { %1284 = vmatpush1.bf16.msra.mxu0 %v10696_v27  ;;  %8655 = vmatpush3.bf16.msra.mxu1 %v10732_v35 }
 0x5b9   : > { %1285 = vmatprep.subr.bf16.mxu0 %v10700_v28  ;;  %8656 = vmatprep.subr.bf16.mxu1 %v10468_v49 }
 0x5bc   : > { %1286 = vmatpush1.bf16.msra.mxu0 %v10711_v30  ;;  %8657 = vmatpush3.bf16.msra.mxu1 %v10745_v38 }
 0x5bd   : > { %1287 = vmatprep.subr.bf16.mxu0 %v10715_v31  ;;  %8658 = vmatprep.subr.bf16.mxu1 %v10468_v49 }
 0x5c0   : > { %1288 = vmatpush1.bf16.msra.mxu0 %v10724_v33  ;;  %8659 = vmatpush3.bf16.msra.mxu1 %v10755_v40 }
 0x5c1   : > { %1289 = vmatprep.subr.bf16.mxu0 %v10728_v34  ;;  %8660 = vmatprep.subr.bf16.mxu1 %v10468_v49 }
 0x5c4   : > { %1290 = vmatpush1.bf16.msra.mxu0 %v10737_v36  ;;  %8661 = vmatpush3.bf16.msra.mxu1 %v10761_v41 }
 0x5c5   : > { %1291 = vmatprep.subr.bf16.mxu0 %v10741_v37  ;;  %8662 = vmatprep.subr.bf16.mxu1 %v10468_v49 }
 0x5c8   : > { %1292 = vmatpush1.bf16.msra.mxu0 %v10750_v39  ;;  %8663 = vmatpush3.bf16.msra.mxu1 %v10770_v42 }
 0x5c9   : > { %1434 = vmatprep.subr.bf16.mxu0 %v10658_v15  ;;  %8668 = vmatprep.subr.bf16.mxu1 %v10468_v49 }
 0x67e   : > { %v1154_v18 = vpop.f32.mrb[16].mxu0  ;;  %v1195_v19 = vpop.f32.mrb[16].mxu1 }
 0x67f   : > { %v1155_v21 = vadd.f32 %v1154_v18, %v10838_v10  ;;  %v1156_v22 = vpop.f32.mrb[17].mxu0  ;;  %v8646_v24 = vpop.f32.mrb[17].mxu1  ;;  %v1196_v18 = vadd.f32 %v1195_v19, %v10850_v16 }
 0x680   : > { %v1157_v25 = vadd.f32 %v1156_v22, %v10841_v11  ;;  %v1158_v27 = vpop.f32.mrb[18].mxu0  ;;  %v1198_v28 = vpop.f32.mrb[18].mxu1 }
 0x681   : > { %v1202_v30 = vrot.slane %v1155_v21, 5  ;;  %v1203_v31 = vrot.slane %v1155_v21, 6  ;;  %v1159_v62 = vpop.f32.mrb[19].mxu0  ;;  %v8647_v61 = vpop.f32.mrb[19].mxu1  ;;  %v1240_v21 = vrot.slane %v1196_v18, 5  ;;  %v1241_v24 = vrot.slane %v1196_v18, 6 }
 0x682   : > { %v1221_v6 = vrot.slane %v1157_v25, 5  ;;  %v1222_v4 = vrot.slane %v1157_v25, 6  ;;  %v1256_v28 = vrot.slane %v10969_v13, 7  ;;  %v1257_v62 = vrot.slane %v10971_v44, 7  ;;  %v11043_v18 = vld [vmem:[%s10638_s15 + $0x1c] ss:$12 sps:$4 sm:$0xff]  }
 0x683   : > { %v1206_v15 = vadd.f32 %v1202_v30, %v10819_v53  ;;  %v1207_v17 = vadd.f32 %v1203_v31, %v10825_v58 }
 0x684   : > { %v1225_v59 = vadd.f32 %v1221_v6, %v10821_v55  ;;  %v1226_v14 = vadd.f32 %v1222_v4, %v10827_v60 }
 0x685   : > { %v7699_v23 = vmul.f32 -1.442695, %v1206_v15  ;;  %v7700_v56 = vmul.f32 -1.442695, %v1207_v17 }
 0x686   : > { %v7701_v20 = vmul.f32 -1.442695, %v1225_v59  ;;  %v7702_v43 = vmul.f32 -1.442695, %v1226_v14 }
 0x687   : > { %9502 = vpow2.f32 %v7699_v23 }
 0x688   : > { %9504 = vpow2.f32 %v7700_v56 }
 0x689   : > { %9506 = vpow2.f32 %v7701_v20 }
 0x68a   : > { %9508 = vpow2.f32 %v7702_v43 }
 0x691   : > { %v9503_v12 = vpop.eup %9502 }
 0x692   : > { %v9505_v46 = vpop.eup %9504  ;;  %v1214_v48 = vadd.f32 1.0, %v9503_v12 }
 0x693   : > { %v9507_v51 = vpop.eup %9506  ;;  %v1215_v54 = vadd.f32 1.0, %v9505_v46 }
 0x694   : > { %v9509_v52 = vpop.eup %9508  ;;  %9510 = vrcp.f32 %v1214_v48  ;;  %v1233_v7 = vadd.f32 1.0, %v9507_v51 }
 0x695   : > { %9512 = vrcp.f32 %v1215_v54  ;;  %v1234_v3 = vadd.f32 1.0, %v9509_v52 }
 0x696   : > { %9514 = vrcp.f32 %v1233_v7 }
 0x697   : > { %9516 = vrcp.f32 %v1234_v3  ;;  %v11038_v3 = vld [vmem:[%s10638_s15] ss:$12 sps:$4 sm:$0xff]  }
 0x69e   : > { %v9511_v22 = vpop.eup %9510 }
 0x69f   : > { %v9513_v25 = vpop.eup %9512  ;;  %v1244_v27 = vmul.f32 %v9511_v22, %v1240_v21  ;;  %v11051_v21 = vld [vmem:[%s10638_s15 + $0x18] ss:$12 sps:$4 sm:$0xff]   ;;  %v11061_v22 = vld [vmem:[%s10638_s15 + $0x30] ss:$12 sps:$4 sm:$0xff]  }
 0x6a0   : > { %v9515_v30 = vpop.eup %9514  ;;  %v1245_v31 = vmul.f32 %v9513_v25, %v1241_v24  ;;  %v11066_v24 = vld [vmem:[%s10638_s15 + $0x4c] ss:$12 sps:$4 sm:$0xff]   ;;  %v11076_v25 = vld [vmem:[%s10638_s15 + $0x64] ss:$12 sps:$4 sm:$0xff]  }
 0x6a1   : > { %v9517_v61 = vpop.eup %9516  ;;  %v1246_v6 = vadd.f32 %v1244_v27, %v10830_v63  ;;  %v1260_v4 = vmul.f32 %v9515_v30, %v1256_v28  ;;  %v1250_v19 = vsub.f32 1.0, %v9515_v30  ;;  %v11081_v27 = vld [vmem:[%s10638_s15 + $0x60] ss:$12 sps:$4 sm:$0xff]  }
 0x6a2   : > { %v1247_v15 = vadd.f32 %v1245_v31, %v10832_v5  ;;  %v1261_v17 = vmul.f32 %v9517_v61, %v1257_v62  ;;  %v1251_v14 = vsub.f32 1.0, %v9517_v61 }
 0x6a3   : > { %9518 = vtanh.f32 %v1246_v6 }
 0x6a4   : > { %9520 = vtanh.f32 %v1247_v15 }
 0x6ad   : > { %v9519_v59 = vpop.eup %9518 }
 0x6ae   : > { %v9521_v23 = vpop.eup %9520  ;;  %v1252_v56 = vmul.f32 %v9519_v59, %v1250_v19 }
 0x6af   : > { %v1253_v13 = vmul.f32 %v9521_v23, %v1251_v14 }
 0x6b0   : > { %v11026_v20 = vadd.f32 %v1260_v4, %v1252_v56 }
 0x6b1   : > { %v11028_v43 = vadd.f32 %v1261_v17, %v1253_v13 }
 0x6b2   : > { %1264 = vst [vmem:[#allocation2] sm:$0x8] %v11026_v20  ;;  %v1266_v44 = vpack.c.bf16 %v11026_v20, %v11026_v20 }
 0x6b3   : > { %1265 = vst [vmem:[#allocation2 + $0x8] sm:$0x8] %v11028_v43  ;;  %v1267_v12 = vpack.c.bf16 %v11028_v43, %v11028_v43 }
 0x6b4   : > { %v1270_v46 = vunpack.c.l.b16 %v1266_v44 }
 0x6b5   : > { %v1271_v48 = vunpack.c.l.b16 %v1267_v12 }
 0x6b6   : > { %v1272_v51 = vrot.slane %v1270_v46, 3 }
 0x6b7   : > { %v1273_v54 = vrot.slane %v1271_v48, 2 }
 0x6b9   : > { %v1274_v52 = vsel %vm806_vm2, %v1273_v54, %v1272_v51 }
 0x6ba   : > { %v1275_v7 = vpack.c.b16 %v1274_v52, %v1274_v52 }
 0x6bc   : > { %1310 = vmatmul.mubr.bf16.vlgmr.msra.gmra.mrb[20].mxu0 %v1275_v7  ;;  %8665 = vmatmul.mubr.bf16.vlgmr.msra.gmra.mrb[20].mxu1 %v1275_v7 }
 0x6bd   : > { %1435 = vmatpush1.bf16.msra.mxu0 %v11038_v3  ;;  %8669 = vmatpush3.bf16.msra.mxu1 %v10691_v26  ;;  %v11056_v26 = vld [vmem:[%s10638_s15 + $0x34] ss:$12 sps:$4 sm:$0xff]  }
 0x6be   : > { %1436 = vmatprep.subr.bf16.mxu0 %v11043_v18  ;;  %8670 = vmatprep.subr.bf16.mxu1 %v10468_v49 }
 0x6bf   : > { %1466 = vmatprep.mubr.bf16.mxu0 %v10469_v50  ;;  %8684 = vmatprep.mubr.msk.bf16.mxu1 %vm10470_vm1, %v10468_v49 }
 0x6c1   : > { %1437 = vmatpush1.bf16.msra.mxu0 %v11051_v21  ;;  %8671 = vmatpush3.bf16.msra.mxu1 %v10704_v29  ;;  %v11071_v29 = vld [vmem:[%s10638_s15 + $0x48] ss:$12 sps:$4 sm:$0xff]  }
 0x6c2   : > { %1438 = vmatprep.subr.bf16.mxu0 %v11056_v26  ;;  %8672 = vmatprep.subr.bf16.mxu1 %v10468_v49 }
 0x6c5   : > { %1439 = vmatpush1.bf16.msra.mxu0 %v11061_v22  ;;  %8673 = vmatpush3.bf16.msra.mxu1 %v10719_v32  ;;  %v11086_v32 = vld [vmem:[%s10638_s15 + $0x7c] ss:$12 sps:$4 sm:$0xff]  }
 0x6c6   : > { %1440 = vmatprep.subr.bf16.mxu0 %v11066_v24  ;;  %8674 = vmatprep.subr.bf16.mxu1 %v10468_v49 }
 0x6c9   : > { %1441 = vmatpush1.bf16.msra.mxu0 %v11071_v29  ;;  %8675 = vmatpush3.bf16.msra.mxu1 %v10732_v35  ;;  %v11101_v35 = vld [vmem:[%s10638_s15 + $0x4] ss:$12 sps:$4 sm:$0xff]  }
 0x6ca   : > { %1442 = vmatprep.subr.bf16.mxu0 %v11076_v25  ;;  %8676 = vmatprep.subr.bf16.mxu1 %v10468_v49 }
 0x6cd   : > { %1443 = vmatpush1.bf16.msra.mxu0 %v11081_v27  ;;  %8677 = vmatpush3.bf16.msra.mxu1 %v10745_v38 }
 0x6ce   : > { %1444 = vmatprep.subr.bf16.mxu0 %v11086_v32  ;;  %8678 = vmatprep.subr.bf16.mxu1 %v10468_v49 }
 0x6d1   : > { %1445 = vmatpush1.bf16.msra.mxu0 %v10724_v33  ;;  %8679 = vmatpush3.bf16.msra.mxu1 %v10755_v40 }
 0x6d2   : > { %1446 = vmatprep.subr.bf16.mxu0 %v10728_v34  ;;  %8680 = vmatprep.subr.bf16.mxu1 %v10468_v49 }
 0x6d5   : > { %1447 = vmatpush1.bf16.msra.mxu0 %v10737_v36  ;;  %8681 = vmatpush3.bf16.msra.mxu1 %v10761_v41 }
 0x6d6   : > { %1448 = vmatprep.subr.bf16.mxu0 %v10741_v37  ;;  %8682 = vmatprep.subr.bf16.mxu1 %v10468_v49 }
 0x6d9   : > { %1449 = vmatpush1.bf16.msra.mxu0 %v10750_v39  ;;  %8683 = vmatpush3.bf16.msra.mxu1 %v10770_v42 }
 0x6da   : > { %1591 = vmatprep.subr.bf16.mxu0 %v11101_v35  ;;  %8688 = vmatprep.subr.bf16.mxu1 %v10468_v49 }
 0x78f   : > { %v1311_v33 = vpop.f32.mrb[20].mxu0  ;;  %v1352_v34 = vpop.f32.mrb[20].mxu1 }
 0x790   : > { %v1312_v36 = vadd.f32 %v1311_v33, %v10838_v10  ;;  %v1313_v38 = vpop.f32.mrb[21].mxu0  ;;  %v8666_v40 = vpop.f32.mrb[21].mxu1  ;;  %v1353_v52 = vadd.f32 %v1352_v34, %v10850_v16 }
 0x791   : > { %v1314_v37 = vadd.f32 %v1313_v38, %v10841_v11  ;;  %v1315_v41 = vpop.f32.mrb[22].mxu0  ;;  %v1355_v28 = vpop.f32.mrb[22].mxu1 }
 0x792   : > { %v1359_v30 = vrot.slane %v1312_v36, 4  ;;  %v1360_v39 = vrot.slane %v1312_v36, 5  ;;  %v1316_v31 = vpop.f32.mrb[23].mxu0  ;;  %v8667_v42 = vpop.f32.mrb[23].mxu1  ;;  %v1397_v7 = vrot.slane %v1353_v52, 4  ;;  %v1398_v36 = vrot.slane %v1353_v52, 5 }
 0x793   : > { %v1378_v62 = vrot.slane %v1314_v37, 4  ;;  %v1379_v61 = vrot.slane %v1314_v37, 5  ;;  %v1413_v37 = vrot.slane %v11026_v20, 7  ;;  %v11153_v52 = vld [vmem:[%s10638_s15 + $0x50] ss:$12 sps:$4 sm:$0xff]  }
 0x794   : > { %v1363_v6 = vadd.f32 %v1359_v30, %v10819_v53  ;;  %v1364_v4 = vadd.f32 %v1360_v39, %v10825_v58  ;;  %v1414_v30 = vrot.slane %v11028_v43, 7 }
 0x795   : > { %v1382_v15 = vadd.f32 %v1378_v62, %v10821_v55  ;;  %v1383_v17 = vadd.f32 %v1379_v61, %v10827_v60 }
 0x796   : > { %v7703_v19 = vmul.f32 -1.442695, %v1363_v6  ;;  %v7704_v59 = vmul.f32 -1.442695, %v1364_v4 }
 0x797   : > { %v7705_v14 = vmul.f32 -1.442695, %v1382_v15  ;;  %v7706_v23 = vmul.f32 -1.442695, %v1383_v17 }
 0x798   : > { %9522 = vpow2.f32 %v7703_v19 }
 0x799   : > { %9524 = vpow2.f32 %v7704_v59 }
 0x79a   : > { %9526 = vpow2.f32 %v7705_v14 }
 0x79b   : > { %9528 = vpow2.f32 %v7706_v23 }
 0x7a2   : > { %v9523_v56 = vpop.eup %9522 }
 0x7a3   : > { %v9525_v13 = vpop.eup %9524  ;;  %v1371_v44 = vadd.f32 1.0, %v9523_v56 }
 0x7a4   : > { %v9527_v12 = vpop.eup %9526  ;;  %v1372_v46 = vadd.f32 1.0, %v9525_v13 }
 0x7a5   : > { %v9529_v48 = vpop.eup %9528  ;;  %9530 = vrcp.f32 %v1371_v44  ;;  %v1390_v51 = vadd.f32 1.0, %v9527_v12 }
 0x7a6   : > { %9532 = vrcp.f32 %v1372_v46  ;;  %v1391_v54 = vadd.f32 1.0, %v9529_v48  ;;  %v11129_v48 = vld [vmem:[%s10638_s15 + $0x8] ss:$12 sps:$4 sm:$0xff]  }
 0x7a7   : > { %9534 = vrcp.f32 %v1390_v51  ;;  %v11139_v51 = vld [vmem:[%s10638_s15 + $0x20] ss:$12 sps:$4 sm:$0xff]  }
 0x7a8   : > { %9536 = vrcp.f32 %v1391_v54  ;;  %v11146_v54 = vld [vmem:[%s10638_s15 + $0x38] ss:$12 sps:$4 sm:$0xff]  }
 0x7af   : > { %v9531_v33 = vpop.eup %9530 }
 0x7b0   : > { %v9533_v38 = vpop.eup %9532  ;;  %v1401_v40 = vmul.f32 %v9531_v33, %v1397_v7  ;;  %v11160_v7 = vld [vmem:[%s10638_s15 + $0x68] ss:$12 sps:$4 sm:$0xff]   ;;  %v11166_v33 = vld [vmem:[%s10638_s15 + $0x78] ss:$12 sps:$4 sm:$0xff]  }
 0x7b1   : > { %v9535_v41 = vpop.eup %9534  ;;  %v1402_v28 = vmul.f32 %v9533_v38, %v1398_v36  ;;  %v11170_v36 = vld [vmem:[%s10638_s15 + $0x80] ss:$12 sps:$4 sm:$0xff]  }
 0x7b2   : > { %v9537_v39 = vpop.eup %9536  ;;  %v1403_v31 = vadd.f32 %v1401_v40, %v10830_v63  ;;  %v1417_v42 = vmul.f32 %v9535_v41, %v1413_v37  ;;  %v1407_v34 = vsub.f32 1.0, %v9535_v41  ;;  %v11174_v38 = vld [vmem:[%s10638_s15 + $0x94] ss:$12 sps:$4 sm:$0xff]   ;;  %v11179_v40 = vld [vmem:[%s10638_s15 + $0x90] ss:$12 sps:$4 sm:$0xff]  }
 0x7b3   : > { %v1404_v62 = vadd.f32 %v1402_v28, %v10832_v5  ;;  %v1418_v61 = vmul.f32 %v9537_v39, %v1414_v30  ;;  %v1408_v4 = vsub.f32 1.0, %v9537_v39  ;;  %v11183_v37 = vld [vmem:[%s10638_s15 + $0x98] ss:$12 sps:$4 sm:$0xff]   ;;  %v11192_v28 = vld [vmem:[%s10638_s15 + $0xa8] ss:$12 sps:$4 sm:$0xff]  }
 0x7b4   : > { %9538 = vtanh.f32 %v1403_v31  ;;  %v11187_v41 = vld [vmem:[%s10638_s15 + $0xac] ss:$12 sps:$4 sm:$0xff]   ;;  %v11196_v30 = vld [vmem:[%s10638_s15 + $0xb0] ss:$12 sps:$4 sm:$0xff]  }
 0x7b5   : > { %9540 = vtanh.f32 %v1404_v62 }
 0x7be   : > { %v9539_v6 = vpop.eup %9538 }
 0x7bf   : > { %v9541_v15 = vpop.eup %9540  ;;  %v1409_v17 = vmul.f32 %v9539_v6, %v1407_v34 }
 0x7c0   : > { %v1410_v19 = vmul.f32 %v9541_v15, %v1408_v4 }
 0x7c1   : > { %v11116_v20 = vadd.f32 %v1417_v42, %v1409_v17 }
 0x7c2   : > { %v11118_v59 = vadd.f32 %v1418_v61, %v1410_v19 }
 0x7c3   : > { %1421 = vst [vmem:[#allocation2] sm:$0x10] %v11116_v20  ;;  %v1423_v43 = vpack.c.bf16 %v11116_v20, %v11116_v20 }
 0x7c4   : > { %1422 = vst [vmem:[#allocation2 + $0x8] sm:$0x10] %v11118_v59  ;;  %v1424_v14 = vpack.c.bf16 %v11118_v59, %v11118_v59 }
 0x7c5   : > { %v1427_v23 = vunpack.c.l.b16 %v1423_v43 }
 0x7c6   : > { %v1428_v56 = vunpack.c.l.b16 %v1424_v14 }
 0x7c7   : > { %v1429_v13 = vrot.slane %v1427_v23, 4 }
 0x7c8   : > { %v1430_v44 = vrot.slane %v1428_v56, 3 }
 0x7ca   : > { %v1431_v12 = vsel %vm806_vm2, %v1430_v44, %v1429_v13 }
 0x7cb   : > { %v1432_v46 = vpack.c.b16 %v1431_v12, %v1431_v12 }
 0x7cd   : > { %1467 = vmatmul.mubr.bf16.vlgmr.msra.gmra.mrb[24].mxu0 %v1432_v46  ;;  %8685 = vmatmul.mubr.bf16.vlgmr.msra.gmra.mrb[24].mxu1 %v1432_v46 }
 0x7ce   : > { %1592 = vmatpush1.bf16.msra.mxu0 %v11038_v3  ;;  %8689 = vmatpush3.bf16.msra.mxu1 %v11129_v48 }
 0x7cf   : > { %1593 = vmatprep.subr.bf16.mxu0 %v11043_v18  ;;  %8690 = vmatprep.subr.bf16.mxu1 %v10468_v49 }
 0x7d0   : > { %1623 = vmatprep.mubr.bf16.mxu0 %v10469_v50  ;;  %8704 = vmatprep.mubr.msk.bf16.mxu1 %vm10470_vm1, %v10468_v49 }
 0x7d2   : > { %1594 = vmatpush1.bf16.msra.mxu0 %v11051_v21  ;;  %8691 = vmatpush3.bf16.msra.mxu1 %v11139_v51 }
 0x7d3   : > { %1595 = vmatprep.subr.bf16.mxu0 %v11056_v26  ;;  %8692 = vmatprep.subr.bf16.mxu1 %v10468_v49 }
 0x7d6   : > { %1596 = vmatpush1.bf16.msra.mxu0 %v11061_v22  ;;  %8693 = vmatpush3.bf16.msra.mxu1 %v11146_v54 }
 0x7d7   : > { %1597 = vmatprep.subr.bf16.mxu0 %v11066_v24  ;;  %8694 = vmatprep.subr.bf16.mxu1 %v10468_v49 }
 0x7da   : > { %1598 = vmatpush1.bf16.msra.mxu0 %v11071_v29  ;;  %8695 = vmatpush3.bf16.msra.mxu1 %v11153_v52 }
 0x7db   : > { %1599 = vmatprep.subr.bf16.mxu0 %v11076_v25  ;;  %8696 = vmatprep.subr.bf16.mxu1 %v10468_v49 }
 0x7de   : > { %1600 = vmatpush1.bf16.msra.mxu0 %v11081_v27  ;;  %8697 = vmatpush3.bf16.msra.mxu1 %v11160_v7 }
 0x7df   : > { %1601 = vmatprep.subr.bf16.mxu0 %v11086_v32  ;;  %8698 = vmatprep.subr.bf16.mxu1 %v10468_v49 }
 0x7e2   : > { %1602 = vmatpush1.bf16.msra.mxu0 %v11166_v33  ;;  %8699 = vmatpush3.bf16.msra.mxu1 %v11170_v36 }
 0x7e3   : > { %1603 = vmatprep.subr.bf16.mxu0 %v11174_v38  ;;  %8700 = vmatprep.subr.bf16.mxu1 %v10468_v49 }
 0x7e6   : > { %1604 = vmatpush1.bf16.msra.mxu0 %v11179_v40  ;;  %8701 = vmatpush3.bf16.msra.mxu1 %v11183_v37 }
 0x7e7   : > { %1605 = vmatprep.subr.bf16.mxu0 %v11187_v41  ;;  %8702 = vmatprep.subr.bf16.mxu1 %v10468_v49 }
 0x7ea   : > { %1606 = vmatpush1.bf16.msra.mxu0 %v11192_v28  ;;  %8703 = vmatpush3.bf16.msra.mxu1 %v11196_v30 }
 0x7eb   : > { %1748 = vmatprep.subr.bf16.mxu0 %v11101_v35  ;;  %8708 = vmatprep.subr.bf16.mxu1 %v10468_v49 }
 0x8a0   : > { %v1468_v39 = vpop.f32.mrb[24].mxu0  ;;  %v1509_v31 = vpop.f32.mrb[24].mxu1 }
 0x8a1   : > { %v1469_v42 = vadd.f32 %v1468_v39, %v10838_v10  ;;  %v1470_v62 = vpop.f32.mrb[25].mxu0  ;;  %v8686_v61 = vpop.f32.mrb[25].mxu1 }
 0x8a2   : > { %v1471_v34 = vadd.f32 %v1470_v62, %v10841_v11  ;;  %v1472_v6 = vpop.f32.mrb[26].mxu0  ;;  %v1512_v4 = vpop.f32.mrb[26].mxu1 }
 0x8a3   : > { %v1516_v15 = vrot.slane %v1469_v42, 3  ;;  %v1517_v17 = vrot.slane %v1469_v42, 4  ;;  %v1473_v19 = vpop.f32.mrb[27].mxu0  ;;  %v8687_v43 = vpop.f32.mrb[27].mxu1 }
 0x8a4   : > { %v1535_v14 = vrot.slane %v1471_v34, 3  ;;  %v1536_v23 = vrot.slane %v1471_v34, 4  ;;  %v1510_v43 = vadd.f32 %v1509_v31, %v10850_v16 }
 0x8a5   : > { %v1520_v35 = vadd.f32 %v1516_v15, %v10819_v53  ;;  %v1521_v56 = vadd.f32 %v1517_v17, %v10825_v58 }
 0x8a6   : > { %v1539_v13 = vadd.f32 %v1535_v14, %v10821_v55  ;;  %v1540_v44 = vadd.f32 %v1536_v23, %v10827_v60  ;;  %v1554_v14 = vrot.slane %v1510_v43, 3 }
 0x8a7   : > { %v7707_v12 = vmul.f32 -1.442695, %v1520_v35  ;;  %v7708_v46 = vmul.f32 -1.442695, %v1521_v56  ;;  %v1555_v35 = vrot.slane %v1510_v43, 4 }
 0x8a8   : > { %v7709_v39 = vmul.f32 -1.442695, %v1539_v13  ;;  %v7710_v62 = vmul.f32 -1.442695, %v1540_v44  ;;  %v1570_v44 = vrot.slane %v11116_v20, 7 }
 0x8a9   : > { %9542 = vpow2.f32 %v7707_v12 }
 0x8aa   : > { %9544 = vpow2.f32 %v7708_v46 }
 0x8ab   : > { %9546 = vpow2.f32 %v7709_v39  ;;  %v1571_v39 = vrot.slane %v11118_v59, 7 }
 0x8ac   : > { %9548 = vpow2.f32 %v7710_v62 }
 0x8b3   : > { %v9543_v42 = vpop.eup %9542 }
 0x8b4   : > { %v9545_v61 = vpop.eup %9544  ;;  %v1528_v6 = vadd.f32 1.0, %v9543_v42 }
 0x8b5   : > { %v9547_v34 = vpop.eup %9546  ;;  %v1529_v4 = vadd.f32 1.0, %v9545_v61 }
 0x8b6   : > { %v9549_v15 = vpop.eup %9548  ;;  %9550 = vrcp.f32 %v1528_v6  ;;  %v1547_v17 = vadd.f32 1.0, %v9547_v34 }
 0x8b7   : > { %9552 = vrcp.f32 %v1529_v4  ;;  %v1548_v19 = vadd.f32 1.0, %v9549_v15 }
 0x8b8   : > { %9554 = vrcp.f32 %v1547_v17 }
 0x8b9   : > { %9556 = vrcp.f32 %v1548_v19 }
 0x8c0   : > { %v9551_v23 = vpop.eup %9550 }
 0x8c1   : > { %v9553_v56 = vpop.eup %9552  ;;  %v1558_v13 = vmul.f32 %v9551_v23, %v1554_v14 }
 0x8c2   : > { %v9555_v12 = vpop.eup %9554  ;;  %v1559_v46 = vmul.f32 %v9553_v56, %v1555_v35 }
 0x8c3   : > { %v9557_v62 = vpop.eup %9556  ;;  %v1560_v42 = vadd.f32 %v1558_v13, %v10830_v63  ;;  %v1574_v61 = vmul.f32 %v9555_v12, %v1570_v44  ;;  %v1564_v31 = vsub.f32 1.0, %v9555_v12 }
 0x8c4   : > { %v1561_v6 = vadd.f32 %v1559_v46, %v10832_v5  ;;  %v1575_v34 = vmul.f32 %v9557_v62, %v1571_v39  ;;  %v1565_v15 = vsub.f32 1.0, %v9557_v62 }
 0x8c5   : > { %9558 = vtanh.f32 %v1560_v42 }
 0x8c6   : > { %9560 = vtanh.f32 %v1561_v6 }
 0x8cf   : > { %v9559_v4 = vpop.eup %9558 }
 0x8d0   : > { %v9561_v17 = vpop.eup %9560  ;;  %v1566_v19 = vmul.f32 %v9559_v4, %v1564_v31 }
 0x8d1   : > { %v1567_v43 = vmul.f32 %v9561_v17, %v1565_v15 }
 0x8d2   : > { %v11212_v20 = vadd.f32 %v1574_v61, %v1566_v19 }
 0x8d3   : > { %v11214_v14 = vadd.f32 %v1575_v34, %v1567_v43 }
 0x8d4   : > { %1578 = vst [vmem:[#allocation2] sm:$0x20] %v11212_v20  ;;  %v1580_v59 = vpack.c.bf16 %v11212_v20, %v11212_v20  ;;  %v1727_v43 = vrot.slane %v11212_v20, 7 }
 0x8d5   : > { %1579 = vst [vmem:[#allocation2 + $0x8] sm:$0x20] %v11214_v14  ;;  %v1581_v23 = vpack.c.bf16 %v11214_v14, %v11214_v14 }
 0x8d6   : > { %v1584_v35 = vunpack.c.l.b16 %v1580_v59 }
 0x8d7   : > { %v1585_v56 = vunpack.c.l.b16 %v1581_v23 }
 0x8d8   : > { %v1586_v13 = vrot.slane %v1584_v35, 5  ;;  %v1728_v35 = vrot.slane %v11214_v14, 7 }
 0x8d9   : > { %v1587_v44 = vrot.slane %v1585_v56, 4 }
 0x8db   : > { %v1588_v12 = vsel %vm806_vm2, %v1587_v44, %v1586_v13 }
 0x8dc   : > { %v1589_v46 = vpack.c.b16 %v1588_v12, %v1588_v12 }
 0x8de   : > { %1624 = vmatmul.mubr.bf16.vlgmr.msra.gmra.mrb[28].mxu0 %v1589_v46  ;;  %8705 = vmatmul.mubr.bf16.vlgmr.msra.gmra.mrb[28].mxu1 %v1589_v46 }
 0x8df   : > { %1749 = vmatpush1.bf16.msra.mxu0 %v11038_v3  ;;  %8709 = vmatpush3.bf16.msra.mxu1 %v11129_v48 }
 0x8e0   : > { %1750 = vmatprep.subr.bf16.mxu0 %v11043_v18  ;;  %8710 = vmatprep.subr.bf16.mxu1 %v10468_v49 }
 0x8e1   : > { %1780 = vmatprep.mubr.bf16.mxu0 %v10469_v50  ;;  %8724 = vmatprep.mubr.msk.bf16.mxu1 %vm10470_vm1, %v10468_v49 }
 0x8e3   : > { %1751 = vmatpush1.bf16.msra.mxu0 %v11051_v21  ;;  %8711 = vmatpush3.bf16.msra.mxu1 %v11139_v51 }
 0x8e4   : > { %1752 = vmatprep.subr.bf16.mxu0 %v11056_v26  ;;  %8712 = vmatprep.subr.bf16.mxu1 %v10468_v49 }
 0x8e7   : > { %1753 = vmatpush1.bf16.msra.mxu0 %v11061_v22  ;;  %8713 = vmatpush3.bf16.msra.mxu1 %v11146_v54 }
 0x8e8   : > { %1754 = vmatprep.subr.bf16.mxu0 %v11066_v24  ;;  %8714 = vmatprep.subr.bf16.mxu1 %v10468_v49 }
 0x8eb   : > { %1755 = vmatpush1.bf16.msra.mxu0 %v11071_v29  ;;  %8715 = vmatpush3.bf16.msra.mxu1 %v11153_v52 }
 0x8ec   : > { %1756 = vmatprep.subr.bf16.mxu0 %v11076_v25  ;;  %8716 = vmatprep.subr.bf16.mxu1 %v10468_v49 }
 0x8ef   : > { %1757 = vmatpush1.bf16.msra.mxu0 %v11081_v27  ;;  %8717 = vmatpush3.bf16.msra.mxu1 %v11160_v7 }
 0x8f0   : > { %1758 = vmatprep.subr.bf16.mxu0 %v11086_v32  ;;  %8718 = vmatprep.subr.bf16.mxu1 %v10468_v49 }
 0x8f3   : > { %1759 = vmatpush1.bf16.msra.mxu0 %v11166_v33  ;;  %8719 = vmatpush3.bf16.msra.mxu1 %v11170_v36 }
 0x8f4   : > { %1760 = vmatprep.subr.bf16.mxu0 %v11174_v38  ;;  %8720 = vmatprep.subr.bf16.mxu1 %v10468_v49 }
 0x8f7   : > { %1761 = vmatpush1.bf16.msra.mxu0 %v11179_v40  ;;  %8721 = vmatpush3.bf16.msra.mxu1 %v11183_v37 }
 0x8f8   : > { %1762 = vmatprep.subr.bf16.mxu0 %v11187_v41  ;;  %8722 = vmatprep.subr.bf16.mxu1 %v10468_v49 }
 0x8fb   : > { %1763 = vmatpush1.bf16.msra.mxu0 %v11192_v28  ;;  %8723 = vmatpush3.bf16.msra.mxu1 %v11196_v30 }
 0x9b1   : > { %v1625_v50 = vpop.f32.mrb[28].mxu0  ;;  %v1666_v3 = vpop.f32.mrb[28].mxu1 }
 0x9b2   : > { %v1626_v18 = vadd.f32 %v1625_v50, %v10838_v10  ;;  %v1627_v21 = vpop.f32.mrb[29].mxu0  ;;  %v8706_v26 = vpop.f32.mrb[29].mxu1  ;;  %v1667_v34 = vadd.f32 %v1666_v3, %v10850_v16 }
 0x9b3   : > { %v1628_v22 = vadd.f32 %v1627_v21, %v10841_v11  ;;  %v1629_v24 = vpop.f32.mrb[30].mxu0  ;;  %v1669_v29 = vpop.f32.mrb[30].mxu1 }
 0x9b4   : > { %v1673_v25 = vrot.slane %v1626_v18, 2  ;;  %v1674_v27 = vrot.slane %v1626_v18, 3  ;;  %v1630_v32 = vpop.f32.mrb[31].mxu0  ;;  %v8707_v48 = vpop.f32.mrb[31].mxu1  ;;  %v1711_v31 = vrot.slane %v1667_v34, 2  ;;  %v1712_v15 = vrot.slane %v1667_v34, 3 }
 0x9b5   : > { %v1692_v51 = vrot.slane %v1628_v22, 2  ;;  %v1693_v49 = vrot.slane %v1628_v22, 3 }
 0x9b6   : > { %v1677_v54 = vadd.f32 %v1673_v25, %v10819_v53  ;;  %v1678_v52 = vadd.f32 %v1674_v27, %v10825_v58 }
 0x9b7   : > { %v1696_v7 = vadd.f32 %v1692_v51, %v10821_v55  ;;  %v1697_v33 = vadd.f32 %v1693_v49, %v10827_v60 }
 0x9b8   : > { %v7711_v36 = vmul.f32 -1.442695, %v1677_v54  ;;  %v7712_v38 = vmul.f32 -1.442695, %v1678_v52 }
 0x9b9   : > { %v7713_v40 = vmul.f32 -1.442695, %v1696_v7  ;;  %v7714_v37 = vmul.f32 -1.442695, %v1697_v33 }
 0x9ba   : > { %9562 = vpow2.f32 %v7711_v36 }
 0x9bb   : > { %9564 = vpow2.f32 %v7712_v38 }
 0x9bc   : > { %9566 = vpow2.f32 %v7713_v40 }
 0x9bd   : > { %9568 = vpow2.f32 %v7714_v37 }
 0x9c4   : > { %v9563_v41 = vpop.eup %9562 }
 0x9c5   : > { %v9565_v28 = vpop.eup %9564  ;;  %v1685_v30 = vadd.f32 1.0, %v9563_v41 }
 0x9c6   : > { %v9567_v39 = vpop.eup %9566  ;;  %v1686_v62 = vadd.f32 1.0, %v9565_v28 }
 0x9c7   : > { %v9569_v42 = vpop.eup %9568  ;;  %9570 = vrcp.f32 %v1685_v30  ;;  %v1704_v61 = vadd.f32 1.0, %v9567_v39 }
 0x9c8   : > { %9572 = vrcp.f32 %v1686_v62  ;;  %v1705_v6 = vadd.f32 1.0, %v9569_v42 }
 0x9c9   : > { %9574 = vrcp.f32 %v1704_v61 }
 0x9ca   : > { %9576 = vrcp.f32 %v1705_v6 }
 0x9d1   : > { %v9571_v4 = vpop.eup %9570 }
 0x9d2   : > { %v9573_v17 = vpop.eup %9572  ;;  %v1715_v19 = vmul.f32 %v9571_v4, %v1711_v31 }
 0x9d3   : > { %v9575_v59 = vpop.eup %9574  ;;  %v1716_v23 = vmul.f32 %v9573_v17, %v1712_v15 }
 0x9d4   : > { %v9577_v56 = vpop.eup %9576  ;;  %v1717_v13 = vadd.f32 %v1715_v19, %v10830_v63  ;;  %v1731_v44 = vmul.f32 %v9575_v59, %v1727_v43  ;;  %v1721_v50 = vsub.f32 1.0, %v9575_v59 }
 0x9d5   : > { %v1718_v12 = vadd.f32 %v1716_v23, %v10832_v5  ;;  %v1732_v46 = vmul.f32 %v9577_v56, %v1728_v35  ;;  %v1722_v18 = vsub.f32 1.0, %v9577_v56 }
 0x9d6   : > { %9578 = vtanh.f32 %v1717_v13 }
 0x9d7   : > { %9580 = vtanh.f32 %v1718_v12 }
 0x9e0   : > { %v9579_v3 = vpop.eup %9578 }
 0x9e1   : > { %v9581_v21 = vpop.eup %9580  ;;  %v1723_v26 = vmul.f32 %v9579_v3, %v1721_v50 }
 0x9e2   : > { %v1724_v22 = vmul.f32 %v9581_v21, %v1722_v18 }
 0x9e3   : > { %v11267_v20 = vadd.f32 %v1731_v44, %v1723_v26 }
 0x9e4   : > { %v11269_v24 = vadd.f32 %v1732_v46, %v1724_v22 }
 0x9e5   : > { %1735 = vst [vmem:[#allocation2] sm:$0x40] %v11267_v20  ;;  %v1737_v14 = vpack.c.bf16 %v11267_v20, %v11267_v20  ;;  %v1884_v46 = vrot.slane %v11267_v20, 7 }
 0x9e6   : > { %1736 = vst [vmem:[#allocation2 + $0x8] sm:$0x40] %v11269_v24  ;;  %v1738_v29 = vpack.c.bf16 %v11269_v24, %v11269_v24  ;;  %v1885_v18 = vrot.slane %v11269_v24, 7 }
 0x9e7   : > { %v1741_v25 = vunpack.c.l.b16 %v1737_v14 }
 0x9e8   : > { %v1742_v27 = vunpack.c.l.b16 %v1738_v29 }
 0x9e9   : > { %v1743_v32 = vrot.slane %v1741_v25, 6 }
 0x9ea   : > { %v1744_v48 = vrot.slane %v1742_v27, 5 }
 0x9ec   : > { %v1745_v51 = vsel %vm806_vm2, %v1744_v48, %v1743_v32 }
 0x9ed   : > { %v1746_v49 = vpack.c.b16 %v1745_v51, %v1745_v51 }
 0x9ef   : > { %1781 = vmatmul.mubr.bf16.vlgmr.msra.gmra.mrb[32].mxu0 %v1746_v49  ;;  %8725 = vmatmul.mubr.bf16.vlgmr.msra.gmra.mrb[32].mxu1 %v1746_v49 }
 0xac2   : > { %v1782_v54 = vpop.f32.mrb[32].mxu0  ;;  %v1823_v52 = vpop.f32.mrb[32].mxu1 }
 0xac3   : > { %v1783_v7 = vadd.f32 %v1782_v54, %v10838_v10  ;;  %v1784_v33 = vpop.f32.mrb[33].mxu0  ;;  %v8726_v36 = vpop.f32.mrb[33].mxu1 }
 0xac4   : > { %v1785_v38 = vadd.f32 %v1784_v33, %v10841_v11  ;;  %v1786_v40 = vpop.f32.mrb[34].mxu0  ;;  %v1826_v37 = vpop.f32.mrb[34].mxu1 }
 0xac5   : > { %v1830_v41 = vrot.slane %v1783_v7, 1  ;;  %v1831_v28 = vrot.slane %v1783_v7, 2  ;;  %v1787_v30 = vpop.f32.mrb[35].mxu0  ;;  %v8727_v39 = vpop.f32.mrb[35].mxu1 }
 0xac6   : > { %v1849_v62 = vrot.slane %v1785_v38, 1  ;;  %v1850_v42 = vrot.slane %v1785_v38, 2 }
 0xac7   : > { %v1834_v61 = vadd.f32 %v1830_v41, %v10819_v53  ;;  %v1835_v6 = vadd.f32 %v1831_v28, %v10825_v58 }
 0xac8   : > { %v1853_v34 = vadd.f32 %v1849_v62, %v10821_v55  ;;  %v1854_v10 = vadd.f32 %v1850_v42, %v10827_v60  ;;  %v1824_v60 = vadd.f32 %v1823_v52, %v10850_v16 }
 0xac9   : > { %v7715_v31 = vmul.f32 -1.442695, %v1834_v61  ;;  %v7716_v4 = vmul.f32 -1.442695, %v1835_v6 }
 0xaca   : > { %v7717_v15 = vmul.f32 -1.442695, %v1853_v34  ;;  %v7718_v11 = vmul.f32 -1.442695, %v1854_v10  ;;  %v1868_v35 = vrot.slane %v1824_v60, 1  ;;  %v1869_v13 = vrot.slane %v1824_v60, 2 }
 0xacb   : > { %9582 = vpow2.f32 %v7715_v31 }
 0xacc   : > { %9584 = vpow2.f32 %v7716_v4 }
 0xacd   : > { %9586 = vpow2.f32 %v7717_v15 }
 0xace   : > { %9588 = vpow2.f32 %v7718_v11 }
 0xad5   : > { %v9583_v17 = vpop.eup %9582 }
 0xad6   : > { %v9585_v19 = vpop.eup %9584  ;;  %v1842_v43 = vadd.f32 1.0, %v9583_v17 }
 0xad7   : > { %v9587_v59 = vpop.eup %9586  ;;  %v1843_v23 = vadd.f32 1.0, %v9585_v19 }
 0xad8   : > { %v9589_v53 = vpop.eup %9588  ;;  %9590 = vrcp.f32 %v1842_v43  ;;  %v1861_v58 = vadd.f32 1.0, %v9587_v59 }
 0xad9   : > { %9592 = vrcp.f32 %v1843_v23  ;;  %v1862_v55 = vadd.f32 1.0, %v9589_v53 }
 0xada   : > { %9594 = vrcp.f32 %v1861_v58 }
 0xadb   : > { %9596 = vrcp.f32 %v1862_v55 }
 0xae2   : > { %v9591_v56 = vpop.eup %9590 }
 0xae3   : > { %v9593_v44 = vpop.eup %9592  ;;  %v1872_v12 = vmul.f32 %v9591_v56, %v1868_v35 }
 0xae4   : > { %v9595_v50 = vpop.eup %9594  ;;  %v1873_v3 = vmul.f32 %v9593_v44, %v1869_v13 }
 0xae5   : > { %v9597_v21 = vpop.eup %9596  ;;  %v1874_v26 = vadd.f32 %v1872_v12, %v10830_v63  ;;  %v1888_v22 = vmul.f32 %v9595_v50, %v1884_v46  ;;  %v1878_v16 = vsub.f32 1.0, %v9595_v50 }
 0xae6   : > { %v1875_v14 = vadd.f32 %v1873_v3, %v10832_v5  ;;  %v1889_v29 = vmul.f32 %v9597_v21, %v1885_v18  ;;  %v1879_v27 = vsub.f32 1.0, %v9597_v21 }
 0xae7   : > { %9598 = vtanh.f32 %v1874_v26 }
 0xae8   : > { %9600 = vtanh.f32 %v1875_v14 }
 0xaf1   : > { %v9599_v25 = vpop.eup %9598  ;;  %211 = sbr.rel (!%p209_p0) target bundleno = 566 (0x236), region = 112 }
 0xaf2   : > { %v9601_v32 = vpop.eup %9600  ;;  %v1880_v48 = vmul.f32 %v9599_v25, %v1878_v16 }
 0xaf3   : > { %v1881_v51 = vmul.f32 %v9601_v32, %v1879_v27 }
 0xaf4   : > { %v1890_v20 = vadd.f32 %v1888_v22, %v1880_v48 }
 0xaf5   : > { %v1891_v49 = vadd.f32 %v1889_v29, %v1881_v51 }
 0xaf6   : > { %1892 = vst [vmem:[#allocation2] sm:$0x80] %v1890_v20 }
 0xaf7   : > { %1893 = vst [vmem:[#allocation2 + $0x8] sm:$0x80] %v1891_v49 }
 0xafd   :  { %v11292_v63 = vld [vmem:[#allocation2] sm:$0xff] }
 0xafe   :  { %v11294_v5 = vld [vmem:[#allocation2 + $0x8] sm:$0xff] }
 0xaff LB: > { %v13463_v24 = vmov 0.0   ;;  %v13461_v54 = vmov 0   ;;  %s7570_s23 = smul.u32 192, %s10456_s22  ;;  %vm10473_vm3 = vmmov 0   ;;  %v1979_v11 = vld [vmem:[#allocation2] sm:$0xff]  ;;  %v1980_v17 = vld [vmem:[#allocation2 + $0x8] sm:$0xff]  ;;  %s10456_s22 = sphi %s11296_s22, %s1903_s22  }
 0xb00   : > { %8728 = vmatprep.subr.bf16.mxu1 %v13463_v24  ;;  %2158 = vmatprep.mubr.bf16.mxu0 %v13461_v54  ;;  %v1981_v23 = vpack.c.bf16 %v1980_v17, %v1979_v11  ;;  %s7576_s28 = smul.u32 3, %s10456_s22  ;;  %s1903_s22 = sadd.s32 1, %s10456_s22  }
 0xb01   : > { %8744 = vmatprep.mubr.msk.bf16.mxu1 %vm10473_vm3, %v13463_v24  ;;  %s11309_s26 = scalar_lea.vmem %s13451_s6, %s7570_s23  ;;  %s11322_s27 = scalar_lea.vmem %s13452_s7, %s7570_s23 }
 0xb02   : > { %v9626_v52 = vld [vmem:[%s11309_s26 + $0x184] ss:$12 sps:$4 sm:$0xff]   ;;  %v9628_v7 = vld [vmem:[%s11309_s26 + $0x180] ss:$12 sps:$4 sm:$0xff]   ;;  %v9629_v33 = vld [vmem:[%s11309_s26 + $0x19c] ss:$12 sps:$4 sm:$0xff]   ;;  %s7577_s5 = scalar_lea.vmem %s13453_s8, %s7576_s28  ;;  %s7580_s13 = scalar_lea.vmem %s13454_s9, %s7576_s28 }
 0xb03   : > { %2126 = vmatprep.subr.bf16.mxu0 %v9626_v52  ;;  %v9631_v36 = vld [vmem:[%s11309_s26 + $0x198] ss:$12 sps:$4 sm:$0xff]   ;;  %v9632_v38 = vld [vmem:[%s11309_s26 + $0x1b4] ss:$12 sps:$4 sm:$0xff]   ;;  %v9634_v40 = vld [vmem:[%s11309_s26 + $0x1b0] ss:$12 sps:$4 sm:$0xff]  }
 0xb04   : > { %2127 = vmatpush1.bf16.msra.mxu0 %v9628_v7  ;;  %v9635_v37 = vld [vmem:[%s11309_s26 + $0x1cc] ss:$12 sps:$4 sm:$0xff]   ;;  %v9647_v41 = vld [vmem:[%s11309_s26 + $0x188] ss:$12 sps:$4 sm:$0xff]   ;;  %v9638_v30 = vld [vmem:[%s11309_s26 + $0x1e4] ss:$12 sps:$4 sm:$0xff]  }
 0xb05   : > { %2128 = vmatprep.subr.bf16.mxu0 %v9629_v33  ;;  %v9637_v28 = vld [vmem:[%s11309_s26 + $0x1c8] ss:$12 sps:$4 sm:$0xff]   ;;  %8729 = vmatpush3.bf16.msra.mxu1 %v9647_v41  ;;  %v9651_v39 = vld [vmem:[%s11309_s26 + $0x1a0] ss:$12 sps:$4 sm:$0xff]   ;;  %v9655_v61 = vld [vmem:[%s11309_s26 + $0x1b8] ss:$12 sps:$4 sm:$0xff]  }
 0xb06   : > { %8730 = vmatprep.subr.bf16.mxu1 %v13463_v24  ;;  %v9640_v62 = vld [vmem:[%s11309_s26 + $0x1e0] ss:$12 sps:$4 sm:$0xff]   ;;  %v9641_v42 = vld [vmem:[%s11309_s26 + $0x1fc] ss:$12 sps:$4 sm:$0xff]   ;;  %v9643_v6 = vld [vmem:[%s11309_s26 + $0x1f8] ss:$12 sps:$4 sm:$0xff]  }
 0xb07   : > { %v9644_v34 = vld [vmem:[%s11309_s26 + $0x214] ss:$12 sps:$4 sm:$0xff]   ;;  %v9659_v10 = vld [vmem:[%s11309_s26 + $0x1d0] ss:$12 sps:$4 sm:$0xff]   ;;  %v9648_v4 = vld [vmem:[%s11309_s26 + $0x22c] ss:$12 sps:$4 sm:$0xff]  }
 0xb08   : > { %2129 = vmatpush1.bf16.msra.mxu0 %v9631_v36  ;;  %v9646_v31 = vld [vmem:[%s11309_s26 + $0x210] ss:$12 sps:$4 sm:$0xff]   ;;  %v9663_v15 = vld [vmem:[%s11309_s26 + $0x1e8] ss:$12 sps:$4 sm:$0xff]   ;;  %v9667_v59 = vld [vmem:[%s11309_s26 + $0x200] ss:$12 sps:$4 sm:$0xff]  }
 0xb09   : > { %2130 = vmatprep.subr.bf16.mxu0 %v9632_v38  ;;  %8731 = vmatpush3.bf16.msra.mxu1 %v9651_v39  ;;  %v9650_v19 = vld [vmem:[%s11309_s26 + $0x228] ss:$12 sps:$4 sm:$0xff]   ;;  %v11342_v43 = vld [vmem:[%s11322_s27 + $0x184] ss:$12 sps:$4 sm:$0xff]   ;;  %v11347_v53 = vld [vmem:[%s11322_s27 + $0x180] ss:$12 sps:$4 sm:$0xff]  }
 0xb0a   : > { %8732 = vmatprep.subr.bf16.mxu1 %v13463_v24  ;;  %v11350_v58 = vld [vmem:[%s11322_s27 + $0x19c] ss:$12 sps:$4 sm:$0xff]   ;;  %v9671_v55 = vld [vmem:[%s11309_s26 + $0x218] ss:$12 sps:$4 sm:$0xff]   ;;  %v11360_v35 = vld [vmem:[%s11322_s27 + $0x1b4] ss:$12 sps:$4 sm:$0xff]  }
 0xb0b   : > { %v11356_v60 = vld [vmem:[%s11322_s27 + $0x198] ss:$12 sps:$4 sm:$0xff]   ;;  %v9675_v56 = vld [vmem:[%s11309_s26 + $0x230] ss:$12 sps:$4 sm:$0xff]   ;;  %v11375_v12 = vld [vmem:[%s11322_s27 + $0x188] ss:$12 sps:$4 sm:$0xff]  }
 0xb0c   : > { %2131 = vmatpush1.bf16.msra.mxu0 %v9634_v40  ;;  %v11368_v13 = vld [vmem:[%s11322_s27 + $0x1b0] ss:$12 sps:$4 sm:$0xff]   ;;  %v11372_v44 = vld [vmem:[%s11322_s27 + $0x1cc] ss:$12 sps:$4 sm:$0xff]   ;;  %v11380_v46 = vld [vmem:[%s11322_s27 + $0x1c8] ss:$12 sps:$4 sm:$0xff]  }
 0xb0d   : > { %2132 = vmatprep.subr.bf16.mxu0 %v9635_v37  ;;  %8733 = vmatpush3.bf16.msra.mxu1 %v9655_v61  ;;  %v11384_v50 = vld [vmem:[%s11322_s27 + $0x1e4] ss:$12 sps:$4 sm:$0xff]   ;;  %v11388_v3 = vld [vmem:[%s11322_s27 + $0x1a0] ss:$12 sps:$4 sm:$0xff]   ;;  %v11399_v21 = vld [vmem:[%s11322_s27 + $0x1fc] ss:$12 sps:$4 sm:$0xff]  }
 0xb0e   : > { %8734 = vmatprep.subr.bf16.mxu1 %v13463_v24  ;;  %v11395_v18 = vld [vmem:[%s11322_s27 + $0x1e0] ss:$12 sps:$4 sm:$0xff]   ;;  %v11403_v26 = vld [vmem:[%s11322_s27 + $0x1b8] ss:$12 sps:$4 sm:$0xff]   ;;  %v11416_v29 = vld [vmem:[%s11322_s27 + $0x1d0] ss:$12 sps:$4 sm:$0xff]  }
 0xb0f   : > { %v11408_v22 = vld [vmem:[%s11322_s27 + $0x1f8] ss:$12 sps:$4 sm:$0xff]   ;;  %v11412_v14 = vld [vmem:[%s11322_s27 + $0x214] ss:$12 sps:$4 sm:$0xff]   ;;  %v11421_v16 = vld [vmem:[%s11322_s27 + $0x210] ss:$12 sps:$4 sm:$0xff]  }
 0xb10   : > { %2133 = vmatpush1.bf16.msra.mxu0 %v9637_v28  ;;  %v11425_v25 = vld [vmem:[%s11322_s27 + $0x22c] ss:$12 sps:$4 sm:$0xff]   ;;  %v11429_v27 = vld [vmem:[%s11322_s27 + $0x1e8] ss:$12 sps:$4 sm:$0xff]   ;;  %v11454_v20 = vld [vmem:[%s11322_s27 + $0x230] ss:$12 sps:$4 sm:$0xff]  }
 0xb11   : > { %2134 = vmatprep.subr.bf16.mxu0 %v9638_v30  ;;  %8735 = vmatpush3.bf16.msra.mxu1 %v9659_v10  ;;  %v11434_v32 = vld [vmem:[%s11322_s27 + $0x228] ss:$12 sps:$4 sm:$0xff]   ;;  %v11439_v48 = vld [vmem:[%s11322_s27 + $0x200] ss:$12 sps:$4 sm:$0xff]   ;;  %v11445_v51 = vld [vmem:[%s11322_s27 + $0x218] ss:$12 sps:$4 sm:$0xff]  }
 0xb12   : > { %8736 = vmatprep.subr.bf16.mxu1 %v13463_v24  ;;  %v7783_v49 = vld [vmem:[%s7577_s5 + $0x6] sm:$0x7]  ;;  %p1900_p1 = scmp.ge.s32.totalorder %s1903_s22, 2  }
 0xb13   : > { %v1986_v52 = vrot.slane %v7783_v49, %v10813_v45  ;;  %v1990_v7 = vrot.slane %v7783_v49, %v10815_v47  ;;  %v1994_v39 = vrot.slane %v7783_v49, %v10823_v57  ;;  %vm3674_vm4 = vcmask (%p1900_p1), 64512   ;;  %s12004_s14 = smov (%p1900_p1), 0  }
 0xb14   : > { %2135 = vmatpush1.bf16.msra.mxu0 %v9640_v62  ;;  %vm3704_vm5 = vcmask (%p1900_p1), 1043456  }
 0xb15   : > { %2136 = vmatprep.subr.bf16.mxu0 %v9641_v42  ;;  %8737 = vmatpush3.bf16.msra.mxu1 %v9663_v15 }
 0xb16   : > { %8738 = vmatprep.subr.bf16.mxu1 %v13463_v24 }
 0xb18   : > { %2137 = vmatpush1.bf16.msra.mxu0 %v9643_v6 }
 0xb19   : > { %2138 = vmatprep.subr.bf16.mxu0 %v9644_v34  ;;  %8739 = vmatpush3.bf16.msra.mxu1 %v9667_v59 }
 0xb1a   : > { %8740 = vmatprep.subr.bf16.mxu1 %v13463_v24 }
 0xb1c   : > { %2139 = vmatpush1.bf16.msra.mxu0 %v9646_v31  ;;  %v7784_v31 = vld [vmem:[%s7580_s13 + $0x6] sm:$0x7] }
 0xb1d   : > { %2140 = vmatprep.subr.bf16.mxu0 %v9648_v4  ;;  %8741 = vmatpush3.bf16.msra.mxu1 %v9671_v55  ;;  %v11516_v4 = vrot.slane %v7784_v31, %v10813_v45  ;;  %v11519_v15 = vrot.slane %v7784_v31, %v10815_v47 }
 0xb1e   : > { %8742 = vmatprep.subr.bf16.mxu1 %v13463_v24 }
 0xb20   : > { %2141 = vmatpush1.bf16.msra.mxu0 %v9650_v19 }
 0xb21   : > { %2354 = vmatprep.subr.bf16.mxu0 %v11342_v43  ;;  %8743 = vmatpush3.bf16.msra.mxu1 %v9675_v56 }
 0xb22   : > { %8748 = vmatprep.subr.bf16.mxu1 %v13463_v24 }
 0xb23   : > { %2159 = vmatmul.mubr.bf16.vlgmr.msra.gmra.mrb[0].mxu0 %v1981_v23 }
 0xb24   : > { %2355 = vmatpush1.bf16.msra.mxu0 %v11347_v53  ;;  %2386 = vmatprep.mubr.bf16.mxu0 %v13461_v54 }
 0xb25   : > { %2356 = vmatprep.subr.bf16.mxu0 %v11350_v58  ;;  %8745 = vmatmul.mubr.bf16.vlgmr.msra.gmra.mrb[0].mxu1 %v1981_v23 }
 0xb26   : > { %8749 = vmatpush3.bf16.msra.mxu1 %v11375_v12  ;;  %8764 = vmatprep.mubr.msk.bf16.mxu1 %vm10473_vm3, %v13463_v24 }
 0xb27   : > { %8750 = vmatprep.subr.bf16.mxu1 %v13463_v24 }
 0xb28   : > { %2357 = vmatpush1.bf16.msra.mxu0 %v11356_v60 }
 0xb29   : > { %2358 = vmatprep.subr.bf16.mxu0 %v11360_v35 }
 0xb2a   : > { %8751 = vmatpush3.bf16.msra.mxu1 %v11388_v3 }
 0xb2b   : > { %8752 = vmatprep.subr.bf16.mxu1 %v13463_v24 }
 0xb2c   : > { %2359 = vmatpush1.bf16.msra.mxu0 %v11368_v13 }
 0xb2d   : > { %2360 = vmatprep.subr.bf16.mxu0 %v11372_v44 }
 0xb2e   : > { %8753 = vmatpush3.bf16.msra.mxu1 %v11403_v26 }
 0xb2f   : > { %8754 = vmatprep.subr.bf16.mxu1 %v13463_v24 }
 0xb30   : > { %2361 = vmatpush1.bf16.msra.mxu0 %v11380_v46 }
 0xb31   : > { %2362 = vmatprep.subr.bf16.mxu0 %v11384_v50 }
 0xb32   : > { %8755 = vmatpush3.bf16.msra.mxu1 %v11416_v29 }
 0xb33   : > { %8756 = vmatprep.subr.bf16.mxu1 %v13463_v24 }
 0xb34   : > { %2363 = vmatpush1.bf16.msra.mxu0 %v11395_v18 }
 0xb35   : > { %2364 = vmatprep.subr.bf16.mxu0 %v11399_v21 }
 0xb36   : > { %8757 = vmatpush3.bf16.msra.mxu1 %v11429_v27 }
 0xb37   : > { %8758 = vmatprep.subr.bf16.mxu1 %v13463_v24 }
 0xb38   : > { %2365 = vmatpush1.bf16.msra.mxu0 %v11408_v22 }
 0xb39   : > { %2366 = vmatprep.subr.bf16.mxu0 %v11412_v14 }
 0xb3a   : > { %8759 = vmatpush3.bf16.msra.mxu1 %v11439_v48 }
 0xb3b   : > { %8760 = vmatprep.subr.bf16.mxu1 %v13463_v24 }
 0xb3c   : > { %2367 = vmatpush1.bf16.msra.mxu0 %v11421_v16 }
 0xb3d   : > { %2368 = vmatprep.subr.bf16.mxu0 %v11425_v25 }
 0xb3e   : > { %8761 = vmatpush3.bf16.msra.mxu1 %v11445_v51 }
 0xb3f   : > { %8762 = vmatprep.subr.bf16.mxu1 %v13463_v24 }
 0xb40   : > { %2369 = vmatpush1.bf16.msra.mxu0 %v11434_v32 }
 0xb41   : > { %2502 = vmatprep.subr.bf16.mxu0 %v11342_v43 }
 0xb42   : > { %8763 = vmatpush3.bf16.msra.mxu1 %v11454_v20 }
 0xb43   : > { %2387 = vmatmul.mubr.bf16.vlgmr.msra.gmra.mrb[4].mxu0 %v13461_v54  ;;  %8768 = vmatprep.subr.bf16.mxu1 %v13463_v24 }
 0xb44   : > { %2503 = vmatpush1.bf16.msra.mxu0 %v11347_v53  ;;  %2534 = vmatprep.mubr.bf16.mxu0 %v13461_v54 }
 0xb45   : > { %2504 = vmatprep.subr.bf16.mxu0 %v11350_v58  ;;  %8765 = vmatmul.mubr.bf16.vlgmr.msra.gmra.mrb[4].mxu1 %v13461_v54 }
 0xb46   : > { %8769 = vmatpush3.bf16.msra.mxu1 %v11375_v12  ;;  %8784 = vmatprep.mubr.msk.bf16.mxu1 %vm10473_vm3, %v13463_v24 }
 0xb47   : > { %8770 = vmatprep.subr.bf16.mxu1 %v13463_v24 }
 0xb48   : > { %2505 = vmatpush1.bf16.msra.mxu0 %v11356_v60 }
 0xb49   : > { %2506 = vmatprep.subr.bf16.mxu0 %v11360_v35 }
 0xb4a   : > { %8771 = vmatpush3.bf16.msra.mxu1 %v11388_v3 }
 0xb4b   : > { %8772 = vmatprep.subr.bf16.mxu1 %v13463_v24 }
 0xb4c   : > { %2507 = vmatpush1.bf16.msra.mxu0 %v11368_v13 }
 0xb4d   : > { %2508 = vmatprep.subr.bf16.mxu0 %v11372_v44 }
 0xb4e   : > { %8773 = vmatpush3.bf16.msra.mxu1 %v11403_v26 }
 0xb4f   : > { %8774 = vmatprep.subr.bf16.mxu1 %v13463_v24 }
 0xb50   : > { %2509 = vmatpush1.bf16.msra.mxu0 %v11380_v46 }
 0xb51   : > { %2510 = vmatprep.subr.bf16.mxu0 %v11384_v50 }
 0xb52   : > { %8775 = vmatpush3.bf16.msra.mxu1 %v11416_v29 }
 0xb53   : > { %8776 = vmatprep.subr.bf16.mxu1 %v13463_v24 }
 0xb54   : > { %2511 = vmatpush1.bf16.msra.mxu0 %v11395_v18 }
 0xb55   : > { %2512 = vmatprep.subr.bf16.mxu0 %v11399_v21 }
 0xb56   : > { %8777 = vmatpush3.bf16.msra.mxu1 %v11429_v27 }
 0xb57   : > { %8778 = vmatprep.subr.bf16.mxu1 %v13463_v24 }
 0xb58   : > { %2513 = vmatpush1.bf16.msra.mxu0 %v11408_v22 }
 0xb59   : > { %2514 = vmatprep.subr.bf16.mxu0 %v11412_v14 }
 0xb5a   : > { %8779 = vmatpush3.bf16.msra.mxu1 %v11439_v48 }
 0xb5b   : > { %8780 = vmatprep.subr.bf16.mxu1 %v13463_v24 }
 0xb5c   : > { %2515 = vmatpush1.bf16.msra.mxu0 %v11421_v16 }
 0xb5d   : > { %2516 = vmatprep.subr.bf16.mxu0 %v11425_v25 }
 0xb5e   : > { %8781 = vmatpush3.bf16.msra.mxu1 %v11445_v51 }
 0xb5f   : > { %8782 = vmatprep.subr.bf16.mxu1 %v13463_v24 }
 0xb60   : > { %2517 = vmatpush1.bf16.msra.mxu0 %v11434_v32 }
 0xb61   : > { %2655 = vmatprep.subr.bf16.mxu0 %v11342_v43 }
 0xb62   : > { %8783 = vmatpush3.bf16.msra.mxu1 %v11454_v20 }
 0xb63   : > { %8788 = vmatprep.subr.bf16.mxu1 %v13463_v24 }
 0xbf6   : > { %v2160_v33 = vpop.f32.mrb[0].mxu0 }
 0xbf7   : > { %v11499_v36 = vadd.f32 %v2160_v33, %v1986_v52  ;;  %v2162_v38 = vpop.f32.mrb[1].mxu0 }
 0xbf8   : > { %v11501_v40 = vadd.f32 %v2162_v38, %v1990_v7  ;;  %v2164_v37 = vpop.f32.mrb[2].mxu0  ;;  %v2203_v62 = vpop.f32.mrb[0].mxu1 }
 0xbf9   : > { %v11503_v41 = vadd.f32 %v2164_v37, %v1986_v52  ;;  %v2166_v28 = vpop.f32.mrb[3].mxu0  ;;  %v11508_v42 = vadd.f32 %v2203_v62, %v1994_v39  ;;  %v8746_v61 = vpop.f32.mrb[1].mxu1 }
 0xbfa   : > { %v11505_v30 = vadd.f32 %v2166_v28, %v1990_v7  ;;  %v2206_v6 = vpop.f32.mrb[2].mxu1 }
 0xbfb   : > { %v11510_v34 = vadd.f32 %v2206_v6, %v1994_v39  ;;  %v8747_v10 = vpop.f32.mrb[3].mxu1 }
 0xc16   : > { %v2388_v11 = vpop.f32.mrb[4].mxu0 }
 0xc17   : > { %v2389_v17 = vadd.f32 %v2388_v11, %v11516_v4  ;;  %v2390_v19 = vpop.f32.mrb[5].mxu0 }
 0xc18   : > { %v2391_v59 = vadd.f32 %v2390_v19, %v11519_v15  ;;  %v2392_v23 = vpop.f32.mrb[6].mxu0  ;;  %v2429_v39 = vpop.f32.mrb[4].mxu1 }
 0xc19   : > { %v2436_v55 = vrot.slane %v2389_v17, 1  ;;  %v2439_v56 = vadd.f32 %v2389_v17, %v11499_v36  ;;  %v2393_v49 = vpop.f32.mrb[7].mxu0  ;;  %v8766_v61 = vpop.f32.mrb[5].mxu1 }
 0xc1a   : > { %v2454_v52 = vrot.slane %v2391_v59, 1  ;;  %v2457_v38 = vadd.f32 %v2391_v59, %v11501_v40  ;;  %v2432_v6 = vpop.f32.mrb[6].mxu1  ;;  %v11528_v59 = vrot.slane %v7784_v31, %v10823_v57 }
 0xc1b   : > { %v2440_v7 = vadd.f32 %v2436_v55, %v11503_v41  ;;  %v7833_v33 = vmul.f32 -1.442695, %v2439_v56  ;;  %v8767_v11 = vpop.f32.mrb[7].mxu1 }
 0xc1c   : > { %v2458_v28 = vadd.f32 %v2454_v52, %v11505_v30  ;;  %v7835_v62 = vmul.f32 -1.442695, %v2457_v38  ;;  %v2430_v49 = vadd.f32 %v2429_v39, %v11528_v59 }
 0xc1d   : > { %9690 = vpow2.f32 %v7833_v33  ;;  %v7834_v37 = vmul.f32 -1.442695, %v2440_v7 }
 0xc1e   : > { %v7836_v10 = vmul.f32 -1.442695, %v2458_v28  ;;  %v2472_v38 = vrot.slane %v2430_v49, 1 }
 0xc1f   : > { %9692 = vpow2.f32 %v7834_v37 }
 0xc20   : > { %9694 = vpow2.f32 %v7835_v62 }
 0xc21   : > { %9696 = vpow2.f32 %v7836_v10 }
 0xc27   : > { %v9691_v17 = vpop.eup %9690 }
 0xc28   : > { %v2447_v19 = vadd.f32 1.0, %v9691_v17 }
 0xc29   : > { %v9693_v23 = vpop.eup %9692 }
 0xc2a   : > { %v2448_v55 = vadd.f32 1.0, %v9693_v23  ;;  %9698 = vrcp.f32 %v2447_v19  ;;  %v9695_v56 = vpop.eup %9694 }
 0xc2b   : > { %v9697_v52 = vpop.eup %9696  ;;  %v2465_v7 = vadd.f32 1.0, %v9695_v56 }
 0xc2c   : > { %9700 = vrcp.f32 %v2448_v55  ;;  %v2466_v33 = vadd.f32 1.0, %v9697_v52 }
 0xc2d   : > { %9702 = vrcp.f32 %v2465_v7 }
 0xc2e   : > { %9704 = vrcp.f32 %v2466_v33 }
 0xc34   : > { %v9699_v37 = vpop.eup %9698 }
 0xc35   : > { %v2475_v28 = vmul.f32 %v9699_v37, %v2430_v49 }
 0xc36   : > { %v9701_v62 = vpop.eup %9700 }
 0xc37   : > { %v2476_v61 = vmul.f32 %v9701_v62, %v2472_v38  ;;  %v2477_v6 = vadd.f32 %v2475_v28, %v11508_v42  ;;  %v9703_v31 = vpop.eup %9702 }
 0xc38   : > { %v9705_v11 = vpop.eup %9704  ;;  %v2481_v17 = vsub.f32 1.0, %v9703_v31  ;;  %v2485_v55 = vmul.f32 0.0, %v9703_v31 }
 0xc39   : > { %v2478_v10 = vadd.f32 %v2476_v61, %v11510_v34  ;;  %9706 = vtanh.f32 %v2477_v6  ;;  %v2482_v23 = vsub.f32 1.0, %v9705_v11  ;;  %v2486_v7 = vmul.f32 0.0, %v9705_v11 }
 0xc3b   : > { %9708 = vtanh.f32 %v2478_v10 }
 0xc43   : > { %v9707_v39 = vpop.eup %9706 }
 0xc44   : > { %v2483_v19 = vmul.f32 %v9707_v39, %v2481_v17 }
 0xc45   : > { %v9709_v56 = vpop.eup %9708 }
 0xc46   : > { %v2484_v52 = vmul.f32 %v9709_v56, %v2482_v23  ;;  %v11533_v49 = vadd.f32 %v2485_v55, %v2483_v19 }
 0xc48   : > { %v11535_v33 = vadd.f32 %v2486_v7, %v2484_v52  ;;  %2489 = vst [vmem:[#allocation2] sm:$0x1] %v11533_v49  ;;  %v2491_v38 = vpack.c.bf16 %v11533_v49, %v11533_v49 }
 0xc4a   : > { %2490 = vst [vmem:[#allocation2 + $0x8] sm:$0x1] %v11535_v33  ;;  %v2492_v37 = vpack.c.bf16 %v11535_v33, %v11535_v33  ;;  %v2495_v62 = vunpack.c.l.b16 %v2491_v38 }
 0xc4c   : > { %v2496_v28 = vunpack.c.l.b16 %v2492_v37 }
 0xc4e   : > { %v2497_v61 = vrot.slane %v2496_v28, 7 }
 0xc50   : > { %v2499_v6 = vsel %vm806_vm2, %v2497_v61, %v2495_v62 }
 0xc51   : > { %v2500_v10 = vpack.c.b16 %v2499_v6, %v2499_v6 }
 0xc53   : > { %2535 = vmatmul.mubr.bf16.vlgmr.msra.gmra.mrb[8].mxu0 %v2500_v10  ;;  %8785 = vmatmul.mubr.bf16.vlgmr.msra.gmra.mrb[8].mxu1 %v2500_v10 }
 0xc54   : > { %2656 = vmatpush1.bf16.msra.mxu0 %v11347_v53  ;;  %8789 = vmatpush3.bf16.msra.mxu1 %v11375_v12 }
 0xc55   : > { %2657 = vmatprep.subr.bf16.mxu0 %v11350_v58  ;;  %8790 = vmatprep.subr.bf16.mxu1 %v13463_v24 }
 0xc56   : > { %2687 = vmatprep.mubr.bf16.mxu0 %v13461_v54  ;;  %8804 = vmatprep.mubr.msk.bf16.mxu1 %vm10473_vm3, %v13463_v24 }
 0xc58   : > { %2658 = vmatpush1.bf16.msra.mxu0 %v11356_v60  ;;  %8791 = vmatpush3.bf16.msra.mxu1 %v11388_v3 }
 0xc59   : > { %2659 = vmatprep.subr.bf16.mxu0 %v11360_v35  ;;  %8792 = vmatprep.subr.bf16.mxu1 %v13463_v24 }
 0xc5c   : > { %2660 = vmatpush1.bf16.msra.mxu0 %v11368_v13  ;;  %8793 = vmatpush3.bf16.msra.mxu1 %v11403_v26 }
 0xc5d   : > { %2661 = vmatprep.subr.bf16.mxu0 %v11372_v44  ;;  %8794 = vmatprep.subr.bf16.mxu1 %v13463_v24 }
 0xc60   : > { %2662 = vmatpush1.bf16.msra.mxu0 %v11380_v46  ;;  %8795 = vmatpush3.bf16.msra.mxu1 %v11416_v29 }
 0xc61   : > { %2663 = vmatprep.subr.bf16.mxu0 %v11384_v50  ;;  %8796 = vmatprep.subr.bf16.mxu1 %v13463_v24 }
 0xc64   : > { %2664 = vmatpush1.bf16.msra.mxu0 %v11395_v18  ;;  %8797 = vmatpush3.bf16.msra.mxu1 %v11429_v27 }
 0xc65   : > { %2665 = vmatprep.subr.bf16.mxu0 %v11399_v21  ;;  %8798 = vmatprep.subr.bf16.mxu1 %v13463_v24 }
 0xc68   : > { %2666 = vmatpush1.bf16.msra.mxu0 %v11408_v22  ;;  %8799 = vmatpush3.bf16.msra.mxu1 %v11439_v48 }
 0xc69   : > { %2667 = vmatprep.subr.bf16.mxu0 %v11412_v14  ;;  %8800 = vmatprep.subr.bf16.mxu1 %v13463_v24 }
 0xc6c   : > { %2668 = vmatpush1.bf16.msra.mxu0 %v11421_v16  ;;  %8801 = vmatpush3.bf16.msra.mxu1 %v11445_v51 }
 0xc6d   : > { %2669 = vmatprep.subr.bf16.mxu0 %v11425_v25  ;;  %8802 = vmatprep.subr.bf16.mxu1 %v13463_v24 }
 0xc70   : > { %2670 = vmatpush1.bf16.msra.mxu0 %v11434_v32  ;;  %8803 = vmatpush3.bf16.msra.mxu1 %v11454_v20 }
 0xc71   : > { %2812 = vmatprep.subr.bf16.mxu0 %v11342_v43  ;;  %8808 = vmatprep.subr.bf16.mxu1 %v13463_v24 }
 0xd26   : > { %v2536_v31 = vpop.f32.mrb[8].mxu0  ;;  %v2577_v11 = vpop.f32.mrb[8].mxu1 }
 0xd27   : > { %v2537_v17 = vadd.f32 %v2536_v31, %v11516_v4  ;;  %v2538_v39 = vpop.f32.mrb[9].mxu0  ;;  %v8786_v19 = vpop.f32.mrb[9].mxu1 }
 0xd28   : > { %v2539_v23 = vadd.f32 %v2538_v39, %v11519_v15  ;;  %v2540_v55 = vpop.f32.mrb[10].mxu0  ;;  %v2580_v56 = vpop.f32.mrb[10].mxu1 }
 0xd29   : > { %v2584_v52 = vrot.slane %v2537_v17, 7  ;;  %v2588_v7 = vadd.f32 %v2537_v17, %v11503_v41  ;;  %v2541_v38 = vpop.f32.mrb[11].mxu0  ;;  %v8787_v37 = vpop.f32.mrb[11].mxu1 }
 0xd2a   : > { %v2602_v28 = vrot.slane %v2539_v23, 7  ;;  %v2606_v62 = vadd.f32 %v2539_v23, %v11505_v30 }
 0xd2b   : > { %v2587_v61 = vadd.f32 %v2584_v52, %v11499_v36  ;;  %v7838_v6 = vmul.f32 -1.442695, %v2588_v7  ;;  %v2578_v52 = vadd.f32 %v2577_v11, %v11528_v59 }
 0xd2c   : > { %v2605_v10 = vadd.f32 %v2602_v28, %v11501_v40  ;;  %v7840_v31 = vmul.f32 -1.442695, %v2606_v62  ;;  %v2636_v28 = vrot.slane %v11535_v33, 7 }
 0xd2d   : > { %v7837_v2 = vmul.f32 -1.442695, %v2587_v61  ;;  %9710 = vpow2.f32 %v7838_v6 }
 0xd2e   : > { %v7839_v19 = vmul.f32 -1.442695, %v2605_v10  ;;  %9712 = vpow2.f32 %v7840_v31  ;;  %v2635_v10 = vrot.slane %v11533_v49, 7 }
 0xd2f   : > { %9714 = vpow2.f32 %v7837_v2  ;;  %v2620_v2 = vrot.slane %v2578_v52, 7 }
 0xd30   : > { %9716 = vpow2.f32 %v7839_v19 }
 0xd37   : > { %v9711_v39 = vpop.eup %9710 }
 0xd38   : > { %v9713_v55 = vpop.eup %9712  ;;  %v2596_v17 = vadd.f32 1.0, %v9711_v39 }
 0xd39   : > { %v9715_v56 = vpop.eup %9714  ;;  %v2614_v38 = vadd.f32 1.0, %v9713_v55 }
 0xd3a   : > { %v9717_v37 = vpop.eup %9716  ;;  %v2595_v54 = vadd.f32 1.0, %v9715_v56  ;;  %9718 = vrcp.f32 %v2596_v17 }
 0xd3b   : > { %v2613_v23 = vadd.f32 1.0, %v9717_v37  ;;  %9720 = vrcp.f32 %v2614_v38 }
 0xd3c   : > { %9722 = vrcp.f32 %v2595_v54 }
 0xd3d   : > { %9724 = vrcp.f32 %v2613_v23 }
 0xd44   : > { %v9719_v7 = vpop.eup %9718 }
 0xd45   : > { %v9721_v62 = vpop.eup %9720  ;;  %v2624_v61 = vmul.f32 %v9719_v7, %v2578_v52 }
 0xd46   : > { %v9723_v6 = vpop.eup %9722  ;;  %v2640_v31 = vmul.f32 %v9721_v62, %v2636_v28  ;;  %v2630_v11 = vsub.f32 1.0, %v9721_v62 }
 0xd47   : > { %v9725_v19 = vpop.eup %9724  ;;  %v2623_v39 = vmul.f32 %v9723_v6, %v2620_v2  ;;  %v2626_v55 = vadd.f32 %v2624_v61, %v11510_v34 }
 0xd48   : > { %v2639_v17 = vmul.f32 %v9725_v19, %v2635_v10  ;;  %v2629_v38 = vsub.f32 1.0, %v9725_v19 }
 0xd49   : > { %v2625_v54 = vadd.f32 %v2623_v39, %v11508_v42  ;;  %9726 = vtanh.f32 %v2626_v55 }
 0xd4b   : > { %9728 = vtanh.f32 %v2625_v54 }
 0xd53   : > { %v9727_v56 = vpop.eup %9726 }
 0xd54   : > { %v2632_v33 = vmul.f32 %v9727_v56, %v2630_v11 }
 0xd55   : > { %v9729_v37 = vpop.eup %9728 }
 0xd56   : > { %v2631_v23 = vmul.f32 %v9729_v37, %v2629_v38  ;;  %v11590_v52 = vadd.f32 %v2640_v31, %v2632_v33  ;;  %v13469_v31 = vmov 0  }
 0xd58   : > { %v11592_v7 = vadd.f32 %v2639_v17, %v2631_v23  ;;  %2644 = vst [vmem:[#allocation2 + $0x8] sm:$0x2] %v11590_v52  ;;  %v2646_v28 = vpack.c.bf16 %v11590_v52, %v11590_v52 }
 0xd5a   : > { %2643 = vst [vmem:[#allocation2] sm:$0x2] %v11592_v7  ;;  %v2645_v49 = vpack.c.bf16 %v11592_v7, %v11592_v7  ;;  %v2650_v2 = vunpack.c.l.b16 %v2646_v28 }
 0xd5c   : > { %v2649_v62 = vunpack.c.l.b16 %v2645_v49 }
 0xd5e   : > { %v2651_v61 = vrot.slane %v2649_v62, 1 }
 0xd60   : > { %v2652_v6 = vsel %vm806_vm2, %v2650_v2, %v2651_v61 }
 0xd61   : > { %v2653_v10 = vpack.c.b16 %v2652_v6, %v2652_v6 }
 0xd63   : > { %2688 = vmatmul.mubr.bf16.vlgmr.msra.gmra.mrb[12].mxu0 %v2653_v10  ;;  %8805 = vmatmul.mubr.bf16.vlgmr.msra.gmra.mrb[12].mxu1 %v2653_v10 }
 0xd64   : > { %2813 = vmatpush1.bf16.msra.mxu0 %v11347_v53  ;;  %8809 = vmatpush3.bf16.msra.mxu1 %v11375_v12 }
 0xd65   : > { %2814 = vmatprep.subr.bf16.mxu0 %v11350_v58  ;;  %8810 = vmatprep.subr.bf16.mxu1 %v13463_v24 }
 0xd66   : > { %2844 = vmatprep.mubr.bf16.mxu0 %v13469_v31  ;;  %8824 = vmatprep.mubr.msk.bf16.mxu1 %vm10473_vm3, %v13463_v24 }
 0xd68   : > { %2815 = vmatpush1.bf16.msra.mxu0 %v11356_v60  ;;  %8811 = vmatpush3.bf16.msra.mxu1 %v11388_v3 }
 0xd69   : > { %2816 = vmatprep.subr.bf16.mxu0 %v11360_v35  ;;  %8812 = vmatprep.subr.bf16.mxu1 %v13463_v24 }
 0xd6c   : > { %2817 = vmatpush1.bf16.msra.mxu0 %v11368_v13  ;;  %8813 = vmatpush3.bf16.msra.mxu1 %v11403_v26 }
 0xd6d   : > { %2818 = vmatprep.subr.bf16.mxu0 %v11372_v44  ;;  %8814 = vmatprep.subr.bf16.mxu1 %v13463_v24 }
 0xd70   : > { %2819 = vmatpush1.bf16.msra.mxu0 %v11380_v46  ;;  %8815 = vmatpush3.bf16.msra.mxu1 %v11416_v29 }
 0xd71   : > { %2820 = vmatprep.subr.bf16.mxu0 %v11384_v50  ;;  %8816 = vmatprep.subr.bf16.mxu1 %v13463_v24 }
 0xd74   : > { %2821 = vmatpush1.bf16.msra.mxu0 %v11395_v18  ;;  %8817 = vmatpush3.bf16.msra.mxu1 %v11429_v27 }
 0xd75   : > { %2822 = vmatprep.subr.bf16.mxu0 %v11399_v21  ;;  %8818 = vmatprep.subr.bf16.mxu1 %v13463_v24 }
 0xd78   : > { %2823 = vmatpush1.bf16.msra.mxu0 %v11408_v22  ;;  %8819 = vmatpush3.bf16.msra.mxu1 %v11439_v48 }
 0xd79   : > { %2824 = vmatprep.subr.bf16.mxu0 %v11412_v14  ;;  %8820 = vmatprep.subr.bf16.mxu1 %v13463_v24 }
 0xd7c   : > { %2825 = vmatpush1.bf16.msra.mxu0 %v11421_v16  ;;  %8821 = vmatpush3.bf16.msra.mxu1 %v11445_v51 }
 0xd7d   : > { %2826 = vmatprep.subr.bf16.mxu0 %v11425_v25  ;;  %8822 = vmatprep.subr.bf16.mxu1 %v13463_v24 }
 0xd80   : > { %2827 = vmatpush1.bf16.msra.mxu0 %v11434_v32  ;;  %8823 = vmatpush3.bf16.msra.mxu1 %v11454_v20 }
 0xd81   : > { %2969 = vmatprep.subr.bf16.mxu0 %v11342_v43  ;;  %8828 = vmatprep.subr.bf16.mxu1 %v13463_v24 }
 0xe36   : > { %v2689_v19 = vpop.f32.mrb[12].mxu0  ;;  %v2730_v39 = vpop.f32.mrb[12].mxu1 }
 0xe37   : > { %v2690_v55 = vadd.f32 %v2689_v19, %v11516_v4  ;;  %v2691_v17 = vpop.f32.mrb[13].mxu0  ;;  %v8806_v54 = vpop.f32.mrb[13].mxu1 }
 0xe38   : > { %v2692_v11 = vadd.f32 %v2691_v17, %v11519_v15  ;;  %v2693_v56 = vpop.f32.mrb[14].mxu0  ;;  %v2733_v38 = vpop.f32.mrb[14].mxu1 }
 0xe39   : > { %v2737_v33 = vrot.slane %v2690_v55, 6  ;;  %v2738_v37 = vrot.slane %v2690_v55, 7  ;;  %v2694_v23 = vpop.f32.mrb[15].mxu0  ;;  %v8807_v49 = vpop.f32.mrb[15].mxu1 }
 0xe3a   : > { %v2756_v28 = vrot.slane %v2692_v11, 6  ;;  %v2757_v62 = vrot.slane %v2692_v11, 7 }
 0xe3b   : > { %v2741_v2 = vadd.f32 %v2737_v33, %v11499_v36  ;;  %v2742_v61 = vadd.f32 %v2738_v37, %v11503_v41 }
 0xe3c   : > { %v2760_v6 = vadd.f32 %v2756_v28, %v11501_v40  ;;  %v2761_v10 = vadd.f32 %v2757_v62, %v11505_v30  ;;  %v2731_v28 = vadd.f32 %v2730_v39, %v11528_v59 }
 0xe3d   : > { %v7841_v19 = vmul.f32 -1.442695, %v2741_v2  ;;  %v7842_v54 = vmul.f32 -1.442695, %v2742_v61 }
 0xe3e   : > { %v7843_v24 = vmul.f32 -1.442695, %v2760_v6  ;;  %v7844_v17 = vmul.f32 -1.442695, %v2761_v10  ;;  %v2775_v62 = vrot.slane %v2731_v28, 6  ;;  %v2776_v61 = vrot.slane %v2731_v28, 7 }
 0xe3f   : > { %9730 = vpow2.f32 %v7841_v19  ;;  %v2791_v10 = vrot.slane %v11592_v7, 7 }
 0xe40   : > { %9732 = vpow2.f32 %v7842_v54 }
 0xe41   : > { %9734 = vpow2.f32 %v7843_v24 }
 0xe42   : > { %9736 = vpow2.f32 %v7844_v17  ;;  %v2792_v17 = vrot.slane %v11590_v52, 7 }
 0xe49   : > { %v9731_v55 = vpop.eup %9730 }
 0xe4a   : > { %v9733_v56 = vpop.eup %9732  ;;  %v2749_v38 = vadd.f32 1.0, %v9731_v55 }
 0xe4b   : > { %v9735_v11 = vpop.eup %9734  ;;  %v2750_v23 = vadd.f32 1.0, %v9733_v56 }
 0xe4c   : > { %v9737_v33 = vpop.eup %9736  ;;  %9738 = vrcp.f32 %v2749_v38  ;;  %v2768_v37 = vadd.f32 1.0, %v9735_v11 }
 0xe4d   : > { %9740 = vrcp.f32 %v2750_v23  ;;  %v2769_v49 = vadd.f32 1.0, %v9737_v33 }
 0xe4e   : > { %9742 = vrcp.f32 %v2768_v37 }
 0xe4f   : > { %9744 = vrcp.f32 %v2769_v49 }
 0xe56   : > { %v9739_v2 = vpop.eup %9738 }
 0xe57   : > { %v9741_v6 = vpop.eup %9740  ;;  %v2779_v24 = vmul.f32 %v9739_v2, %v2775_v62 }
 0xe58   : > { %v9743_v19 = vpop.eup %9742  ;;  %v2780_v54 = vmul.f32 %v9741_v6, %v2776_v61 }
 0xe59   : > { %v9745_v55 = vpop.eup %9744  ;;  %v2781_v56 = vadd.f32 %v2779_v24, %v11508_v42  ;;  %v2795_v38 = vmul.f32 %v9743_v19, %v2791_v10  ;;  %v2785_v39 = vsub.f32 1.0, %v9743_v19 }
 0xe5a   : > { %v2782_v11 = vadd.f32 %v2780_v54, %v11510_v34  ;;  %v2796_v23 = vmul.f32 %v9745_v55, %v2792_v17  ;;  %v2786_v37 = vsub.f32 1.0, %v9745_v55  ;;  %v13470_v55 = vmov 0.0  }
 0xe5b   : > { %9746 = vtanh.f32 %v2781_v56 }
 0xe5c   : > { %9748 = vtanh.f32 %v2782_v11 }
 0xe65   : > { %v9747_v33 = vpop.eup %9746 }
 0xe66   : > { %v9749_v49 = vpop.eup %9748  ;;  %v2787_v28 = vmul.f32 %v9747_v33, %v2785_v39 }
 0xe67   : > { %v2788_v62 = vmul.f32 %v9749_v49, %v2786_v37 }
 0xe68   : > { %v11647_v7 = vadd.f32 %v2795_v38, %v2787_v28 }
 0xe69   : > { %v11649_v2 = vadd.f32 %v2796_v23, %v2788_v62 }
 0xe6a   : > { %2799 = vst [vmem:[#allocation2] sm:$0x4] %v11647_v7  ;;  %v2801_v52 = vpack.c.bf16 %v11647_v7, %v11647_v7 }
 0xe6b   : > { %2800 = vst [vmem:[#allocation2 + $0x8] sm:$0x4] %v11649_v2  ;;  %v2802_v61 = vpack.c.bf16 %v11649_v2, %v11649_v2 }
 0xe6c   : > { %v2805_v6 = vunpack.c.l.b16 %v2801_v52 }
 0xe6d   : > { %v2806_v24 = vunpack.c.l.b16 %v2802_v61 }
 0xe6e   : > { %v2807_v10 = vrot.slane %v2805_v6, 2 }
 0xe6f   : > { %v2808_v19 = vrot.slane %v2806_v24, 1 }
 0xe71   : > { %v2809_v54 = vsel %vm806_vm2, %v2808_v19, %v2807_v10 }
 0xe72   : > { %v2810_v17 = vpack.c.b16 %v2809_v54, %v2809_v54 }
 0xe74   : > { %2845 = vmatmul.mubr.bf16.vlgmr.msra.gmra.mrb[16].mxu0 %v2810_v17  ;;  %8825 = vmatmul.mubr.bf16.vlgmr.msra.gmra.mrb[16].mxu1 %v2810_v17 }
 0xe75   : > { %2970 = vmatpush1.bf16.msra.mxu0 %v11347_v53  ;;  %8829 = vmatpush3.bf16.msra.mxu1 %v11375_v12 }
 0xe76   : > { %2971 = vmatprep.subr.bf16.mxu0 %v11350_v58  ;;  %8830 = vmatprep.subr.bf16.mxu1 %v13470_v55 }
 0xe77   : > { %3001 = vmatprep.mubr.bf16.mxu0 %v13469_v31  ;;  %8844 = vmatprep.mubr.msk.bf16.mxu1 %vm10473_vm3, %v13470_v55 }
 0xe79   : > { %2972 = vmatpush1.bf16.msra.mxu0 %v11356_v60  ;;  %8831 = vmatpush3.bf16.msra.mxu1 %v11388_v3 }
 0xe7a   : > { %2973 = vmatprep.subr.bf16.mxu0 %v11360_v35  ;;  %8832 = vmatprep.subr.bf16.mxu1 %v13470_v55 }
 0xe7d   : > { %2974 = vmatpush1.bf16.msra.mxu0 %v11368_v13  ;;  %8833 = vmatpush3.bf16.msra.mxu1 %v11403_v26 }
 0xe7e   : > { %2975 = vmatprep.subr.bf16.mxu0 %v11372_v44  ;;  %8834 = vmatprep.subr.bf16.mxu1 %v13470_v55 }
 0xe81   : > { %2976 = vmatpush1.bf16.msra.mxu0 %v11380_v46  ;;  %8835 = vmatpush3.bf16.msra.mxu1 %v11416_v29 }
 0xe82   : > { %2977 = vmatprep.subr.bf16.mxu0 %v11384_v50  ;;  %8836 = vmatprep.subr.bf16.mxu1 %v13470_v55 }
 0xe85   : > { %2978 = vmatpush1.bf16.msra.mxu0 %v11395_v18  ;;  %8837 = vmatpush3.bf16.msra.mxu1 %v11429_v27 }
 0xe86   : > { %2979 = vmatprep.subr.bf16.mxu0 %v11399_v21  ;;  %8838 = vmatprep.subr.bf16.mxu1 %v13470_v55 }
 0xe89   : > { %2980 = vmatpush1.bf16.msra.mxu0 %v11408_v22  ;;  %8839 = vmatpush3.bf16.msra.mxu1 %v11439_v48 }
 0xe8a   : > { %2981 = vmatprep.subr.bf16.mxu0 %v11412_v14  ;;  %8840 = vmatprep.subr.bf16.mxu1 %v13470_v55 }
 0xe8d   : > { %2982 = vmatpush1.bf16.msra.mxu0 %v11421_v16  ;;  %8841 = vmatpush3.bf16.msra.mxu1 %v11445_v51 }
 0xe8e   : > { %2983 = vmatprep.subr.bf16.mxu0 %v11425_v25  ;;  %8842 = vmatprep.subr.bf16.mxu1 %v13470_v55 }
 0xe91   : > { %2984 = vmatpush1.bf16.msra.mxu0 %v11434_v32  ;;  %8843 = vmatpush3.bf16.msra.mxu1 %v11454_v20 }
 0xe92   : > { %3126 = vmatprep.subr.bf16.mxu0 %v11342_v43  ;;  %8848 = vmatprep.subr.bf16.mxu1 %v13470_v55 }
 0xf47   : > { %v2846_v53 = vpop.f32.mrb[16].mxu0  ;;  %v2887_v58 = vpop.f32.mrb[16].mxu1 }
 0xf48   : > { %v2847_v60 = vadd.f32 %v2846_v53, %v11516_v4  ;;  %v2848_v35 = vpop.f32.mrb[17].mxu0  ;;  %v8826_v13 = vpop.f32.mrb[17].mxu1 }
 0xf49   : > { %v2849_v44 = vadd.f32 %v2848_v35, %v11519_v15  ;;  %v2850_v46 = vpop.f32.mrb[18].mxu0  ;;  %v2890_v56 = vpop.f32.mrb[18].mxu1 }
 0xf4a   : > { %v2894_v38 = vrot.slane %v2847_v60, 5  ;;  %v2895_v11 = vrot.slane %v2847_v60, 6  ;;  %v2851_v23 = vpop.f32.mrb[19].mxu0  ;;  %v8827_v39 = vpop.f32.mrb[19].mxu1 }
 0xf4b   : > { %v2913_v33 = vrot.slane %v2849_v44, 5  ;;  %v2914_v37 = vrot.slane %v2849_v44, 6  ;;  %v2888_v44 = vadd.f32 %v2887_v58, %v11528_v59  ;;  %v2948_v39 = vrot.slane %v11647_v7, 7 }
 0xf4c   : > { %v2898_v43 = vadd.f32 %v2894_v38, %v11499_v36  ;;  %v2899_v49 = vadd.f32 %v2895_v11, %v11503_v41 }
 0xf4d   : > { %v2917_v28 = vadd.f32 %v2913_v33, %v11501_v40  ;;  %v2918_v62 = vadd.f32 %v2914_v37, %v11505_v30  ;;  %v2932_v46 = vrot.slane %v2888_v44, 5  ;;  %v2933_v38 = vrot.slane %v2888_v44, 6 }
 0xf4e   : > { %v7845_v52 = vmul.f32 -1.442695, %v2898_v43  ;;  %v7846_v61 = vmul.f32 -1.442695, %v2899_v49  ;;  %v2949_v43 = vrot.slane %v11649_v2, 7 }
 0xf4f   : > { %v7847_v6 = vmul.f32 -1.442695, %v2917_v28  ;;  %v7848_v24 = vmul.f32 -1.442695, %v2918_v62 }
 0xf50   : > { %9750 = vpow2.f32 %v7845_v52 }
 0xf51   : > { %9752 = vpow2.f32 %v7846_v61 }
 0xf52   : > { %9754 = vpow2.f32 %v7847_v6 }
 0xf53   : > { %9756 = vpow2.f32 %v7848_v24 }
 0xf5a   : > { %v9751_v10 = vpop.eup %9750 }
 0xf5b   : > { %v9753_v19 = vpop.eup %9752  ;;  %v2906_v54 = vadd.f32 1.0, %v9751_v10 }
 0xf5c   : > { %v9755_v17 = vpop.eup %9754  ;;  %v2907_v53 = vadd.f32 1.0, %v9753_v19 }
 0xf5d   : > { %v9757_v60 = vpop.eup %9756  ;;  %9758 = vrcp.f32 %v2906_v54  ;;  %v2925_v35 = vadd.f32 1.0, %v9755_v17 }
 0xf5e   : > { %9760 = vrcp.f32 %v2907_v53  ;;  %v2926_v13 = vadd.f32 1.0, %v9757_v60 }
 0xf5f   : > { %9762 = vrcp.f32 %v2925_v35 }
 0xf60   : > { %9764 = vrcp.f32 %v2926_v13 }
 0xf67   : > { %v9759_v56 = vpop.eup %9758 }
 0xf68   : > { %v9761_v11 = vpop.eup %9760  ;;  %v2936_v23 = vmul.f32 %v9759_v56, %v2932_v46 }
 0xf69   : > { %v9763_v33 = vpop.eup %9762  ;;  %v2937_v37 = vmul.f32 %v9761_v11, %v2933_v38  ;;  %v11716_v38 = vld [vmem:[%s11322_s27 + $0x180] ss:$12 sps:$4 sm:$0xff]   ;;  %v11721_v11 = vld [vmem:[%s11322_s27 + $0x19c] ss:$12 sps:$4 sm:$0xff]  }
 0xf6a   : > { %v9765_v49 = vpop.eup %9764  ;;  %v2938_v28 = vadd.f32 %v2936_v23, %v11508_v42  ;;  %v2952_v62 = vmul.f32 %v9763_v33, %v2948_v39  ;;  %v2942_v58 = vsub.f32 1.0, %v9763_v33  ;;  %v11729_v23 = vld [vmem:[%s11322_s27 + $0x198] ss:$12 sps:$4 sm:$0xff]   ;;  %v11734_v39 = vld [vmem:[%s11322_s27 + $0x1b4] ss:$12 sps:$4 sm:$0xff]  }
 0xf6b   : > { %v2939_v52 = vadd.f32 %v2937_v37, %v11510_v34  ;;  %v2953_v61 = vmul.f32 %v9765_v49, %v2949_v43  ;;  %v2943_v24 = vsub.f32 1.0, %v9765_v49  ;;  %v11744_v33 = vld [vmem:[%s11322_s27 + $0x1cc] ss:$12 sps:$4 sm:$0xff]   ;;  %v11749_v37 = vld [vmem:[%s11322_s27 + $0x1c8] ss:$12 sps:$4 sm:$0xff]  }
 0xf6c   : > { %9766 = vtanh.f32 %v2938_v28 }
 0xf6d   : > { %9768 = vtanh.f32 %v2939_v52 }
 0xf76   : > { %v9767_v6 = vpop.eup %9766 }
 0xf77   : > { %v9769_v10 = vpop.eup %9768  ;;  %v2944_v19 = vmul.f32 %v9767_v6, %v2942_v58 }
 0xf78   : > { %v2945_v7 = vmul.f32 %v9769_v10, %v2943_v24 }
 0xf79   : > { %v11704_v54 = vadd.f32 %v2952_v62, %v2944_v19 }
 0xf7a   : > { %v11706_v17 = vadd.f32 %v2953_v61, %v2945_v7 }
 0xf7b   : > { %2956 = vst [vmem:[#allocation2] sm:$0x8] %v11704_v54  ;;  %v2958_v2 = vpack.c.bf16 %v11704_v54, %v11704_v54 }
 0xf7c   : > { %2957 = vst [vmem:[#allocation2 + $0x8] sm:$0x8] %v11706_v17  ;;  %v2959_v53 = vpack.c.bf16 %v11706_v17, %v11706_v17 }
 0xf7d   : > { %v2962_v60 = vunpack.c.l.b16 %v2958_v2 }
 0xf7e   : > { %v2963_v35 = vunpack.c.l.b16 %v2959_v53 }
 0xf7f   : > { %v2964_v13 = vrot.slane %v2962_v60, 3 }
 0xf80   : > { %v2965_v44 = vrot.slane %v2963_v35, 2 }
 0xf82   : > { %v2966_v46 = vsel %vm806_vm2, %v2965_v44, %v2964_v13 }
 0xf83   : > { %v2967_v56 = vpack.c.b16 %v2966_v46, %v2966_v46 }
 0xf85   : > { %3002 = vmatmul.mubr.bf16.vlgmr.msra.gmra.mrb[20].mxu0 %v2967_v56  ;;  %8845 = vmatmul.mubr.bf16.vlgmr.msra.gmra.mrb[20].mxu1 %v2967_v56 }
 0xf86   : > { %3127 = vmatpush1.bf16.msra.mxu0 %v11716_v38  ;;  %8849 = vmatpush3.bf16.msra.mxu1 %v11375_v12  ;;  %v11739_v12 = vld [vmem:[%s11322_s27 + $0x1b0] ss:$12 sps:$4 sm:$0xff]  }
 0xf87   : > { %3128 = vmatprep.subr.bf16.mxu0 %v11721_v11  ;;  %8850 = vmatprep.subr.bf16.mxu1 %v13470_v55 }
 0xf88   : > { %3158 = vmatprep.mubr.bf16.mxu0 %v13469_v31  ;;  %8864 = vmatprep.mubr.msk.bf16.mxu1 %vm10473_vm3, %v13470_v55 }
 0xf8a   : > { %3129 = vmatpush1.bf16.msra.mxu0 %v11729_v23  ;;  %8851 = vmatpush3.bf16.msra.mxu1 %v11388_v3 }
 0xf8b   : > { %3130 = vmatprep.subr.bf16.mxu0 %v11734_v39  ;;  %8852 = vmatprep.subr.bf16.mxu1 %v13470_v55 }
 0xf8e   : > { %3131 = vmatpush1.bf16.msra.mxu0 %v11739_v12  ;;  %8853 = vmatpush3.bf16.msra.mxu1 %v11403_v26 }
 0xf8f   : > { %3132 = vmatprep.subr.bf16.mxu0 %v11744_v33  ;;  %8854 = vmatprep.subr.bf16.mxu1 %v13470_v55 }
 0xf92   : > { %3133 = vmatpush1.bf16.msra.mxu0 %v11749_v37  ;;  %8855 = vmatpush3.bf16.msra.mxu1 %v11416_v29 }
 0xf93   : > { %3134 = vmatprep.subr.bf16.mxu0 %v11384_v50  ;;  %8856 = vmatprep.subr.bf16.mxu1 %v13470_v55  ;;  %v11770_v50 = vld [vmem:[%s11322_s27 + $0x184] ss:$12 sps:$4 sm:$0xff]  }
 0xf96   : > { %3135 = vmatpush1.bf16.msra.mxu0 %v11395_v18  ;;  %8857 = vmatpush3.bf16.msra.mxu1 %v11429_v27 }
 0xf97   : > { %3136 = vmatprep.subr.bf16.mxu0 %v11399_v21  ;;  %8858 = vmatprep.subr.bf16.mxu1 %v13470_v55 }
 0xf9a   : > { %3137 = vmatpush1.bf16.msra.mxu0 %v11408_v22  ;;  %8859 = vmatpush3.bf16.msra.mxu1 %v11439_v48 }
 0xf9b   : > { %3138 = vmatprep.subr.bf16.mxu0 %v11412_v14  ;;  %8860 = vmatprep.subr.bf16.mxu1 %v13470_v55 }
 0xf9e   : > { %3139 = vmatpush1.bf16.msra.mxu0 %v11421_v16  ;;  %8861 = vmatpush3.bf16.msra.mxu1 %v11445_v51 }
 0xf9f   : > { %3140 = vmatprep.subr.bf16.mxu0 %v11425_v25  ;;  %8862 = vmatprep.subr.bf16.mxu1 %v13470_v55 }
 0xfa2   : > { %3141 = vmatpush1.bf16.msra.mxu0 %v11434_v32  ;;  %8863 = vmatpush3.bf16.msra.mxu1 %v11454_v20 }
 0xfa3   : > { %3283 = vmatprep.subr.bf16.mxu0 %v11770_v50  ;;  %8868 = vmatprep.subr.bf16.mxu1 %v13470_v55 }
0x1058   : > { %v3003_v3 = vpop.f32.mrb[20].mxu0  ;;  %v3044_v18 = vpop.f32.mrb[20].mxu1 }
0x1059   : > { %v3004_v21 = vadd.f32 %v3003_v3, %v11516_v4  ;;  %v3005_v26 = vpop.f32.mrb[21].mxu0  ;;  %v8846_v22 = vpop.f32.mrb[21].mxu1  ;;  %v3045_v13 = vadd.f32 %v3044_v18, %v11528_v59 }
0x105a   : > { %v3006_v14 = vadd.f32 %v3005_v26, %v11519_v15  ;;  %v3007_v29 = vpop.f32.mrb[22].mxu0  ;;  %v3047_v16 = vpop.f32.mrb[22].mxu1  ;;  %v3105_v26 = vrot.slane %v11704_v54, 7 }
0x105b   : > { %v3051_v25 = vrot.slane %v3004_v21, 4  ;;  %v3052_v27 = vrot.slane %v3004_v21, 5  ;;  %v3008_v32 = vpop.f32.mrb[23].mxu0  ;;  %v8847_v48 = vpop.f32.mrb[23].mxu1  ;;  %v3089_v44 = vrot.slane %v3045_v13, 4  ;;  %v3090_v56 = vrot.slane %v3045_v13, 5 }
0x105c   : > { %v3070_v51 = vrot.slane %v3006_v14, 4  ;;  %v3071_v20 = vrot.slane %v3006_v14, 5  ;;  %v3106_v29 = vrot.slane %v11706_v17, 7  ;;  %v11831_v13 = vld [vmem:[%s11322_s27 + $0x1e0] ss:$12 sps:$4 sm:$0xff]  }
0x105d   : > { %v3055_v43 = vadd.f32 %v3051_v25, %v11499_v36  ;;  %v3056_v49 = vadd.f32 %v3052_v27, %v11503_v41 }
0x105e   : > { %v3074_v28 = vadd.f32 %v3070_v51, %v11501_v40  ;;  %v3075_v62 = vadd.f32 %v3071_v20, %v11505_v30 }
0x105f   : > { %v7849_v52 = vmul.f32 -1.442695, %v3055_v43  ;;  %v7850_v61 = vmul.f32 -1.442695, %v3056_v49 }
0x1060   : > { %v7851_v58 = vmul.f32 -1.442695, %v3074_v28  ;;  %v7852_v6 = vmul.f32 -1.442695, %v3075_v62 }
0x1061   : > { %9770 = vpow2.f32 %v7849_v52 }
0x1062   : > { %9772 = vpow2.f32 %v7850_v61 }
0x1063   : > { %9774 = vpow2.f32 %v7851_v58 }
0x1064   : > { %9776 = vpow2.f32 %v7852_v6 }
0x106b   : > { %v9771_v24 = vpop.eup %9770 }
0x106c   : > { %v9773_v10 = vpop.eup %9772  ;;  %v3063_v19 = vadd.f32 1.0, %v9771_v24 }
0x106d   : > { %v9775_v7 = vpop.eup %9774  ;;  %v3064_v2 = vadd.f32 1.0, %v9773_v10 }
0x106e   : > { %v9777_v53 = vpop.eup %9776  ;;  %9778 = vrcp.f32 %v3063_v19  ;;  %v3082_v60 = vadd.f32 1.0, %v9775_v7  ;;  %v11798_v7 = vld [vmem:[%s11322_s27 + $0x188] ss:$12 sps:$4 sm:$0xff]  }
0x106f   : > { %9780 = vrcp.f32 %v3064_v2  ;;  %v3083_v35 = vadd.f32 1.0, %v9777_v53  ;;  %v11808_v2 = vld [vmem:[%s11322_s27 + $0x1a0] ss:$12 sps:$4 sm:$0xff]   ;;  %v11815_v53 = vld [vmem:[%s11322_s27 + $0x1b8] ss:$12 sps:$4 sm:$0xff]  }
0x1070   : > { %9782 = vrcp.f32 %v3082_v60  ;;  %v11822_v60 = vld [vmem:[%s11322_s27 + $0x1d0] ss:$12 sps:$4 sm:$0xff]  }
0x1071   : > { %9784 = vrcp.f32 %v3083_v35  ;;  %v11826_v35 = vld [vmem:[%s11322_s27 + $0x1e4] ss:$12 sps:$4 sm:$0xff]  }
0x1078   : > { %v9779_v46 = vpop.eup %9778 }
0x1079   : > { %v9781_v3 = vpop.eup %9780  ;;  %v3093_v21 = vmul.f32 %v9779_v46, %v3089_v44  ;;  %v11835_v44 = vld [vmem:[%s11322_s27 + $0x1e8] ss:$12 sps:$4 sm:$0xff]  }
0x107a   : > { %v9783_v22 = vpop.eup %9782  ;;  %v3094_v14 = vmul.f32 %v9781_v3, %v3090_v56  ;;  %v11839_v46 = vld [vmem:[%s11322_s27 + $0x1fc] ss:$12 sps:$4 sm:$0xff]   ;;  %v11844_v56 = vld [vmem:[%s11322_s27 + $0x1f8] ss:$12 sps:$4 sm:$0xff]   ;;  %v11848_v3 = vld [vmem:[%s11322_s27 + $0x200] ss:$12 sps:$4 sm:$0xff]  }
0x107b   : > { %v9785_v16 = vpop.eup %9784  ;;  %v3095_v25 = vadd.f32 %v3093_v21, %v11508_v42  ;;  %v3109_v27 = vmul.f32 %v9783_v22, %v3105_v26  ;;  %v3099_v18 = vsub.f32 1.0, %v9783_v22  ;;  %v11852_v21 = vld [vmem:[%s11322_s27 + $0x214] ss:$12 sps:$4 sm:$0xff]   ;;  %v11857_v26 = vld [vmem:[%s11322_s27 + $0x210] ss:$12 sps:$4 sm:$0xff]  }
0x107c   : > { %v3096_v32 = vadd.f32 %v3094_v14, %v11510_v34  ;;  %v3110_v48 = vmul.f32 %v9785_v16, %v3106_v29  ;;  %v3100_v20 = vsub.f32 1.0, %v9785_v16  ;;  %v11861_v22 = vld [vmem:[%s11322_s27 + $0x218] ss:$12 sps:$4 sm:$0xff]   ;;  %v11870_v29 = vld [vmem:[%s11322_s27 + $0x228] ss:$12 sps:$4 sm:$0xff]  }
0x107d   : > { %9786 = vtanh.f32 %v3095_v25  ;;  %v11865_v14 = vld [vmem:[%s11322_s27 + $0x22c] ss:$12 sps:$4 sm:$0xff]   ;;  %v11874_v16 = vld [vmem:[%s11322_s27 + $0x230] ss:$12 sps:$4 sm:$0xff]  }
0x107e   : > { %9788 = vtanh.f32 %v3096_v32 }
0x1087   : > { %v9787_v51 = vpop.eup %9786 }
0x1088   : > { %v9789_v43 = vpop.eup %9788  ;;  %v3101_v49 = vmul.f32 %v9787_v51, %v3099_v18 }
0x1089   : > { %v3102_v28 = vmul.f32 %v9789_v43, %v3100_v20 }
0x108a   : > { %v11785_v54 = vadd.f32 %v3109_v27, %v3101_v49 }
0x108b   : > { %v11787_v62 = vadd.f32 %v3110_v48, %v3102_v28 }
0x108c   : > { %3113 = vst [vmem:[#allocation2] sm:$0x10] %v11785_v54  ;;  %v3115_v17 = vpack.c.bf16 %v11785_v54, %v11785_v54 }
0x108d   : > { %3114 = vst [vmem:[#allocation2 + $0x8] sm:$0x10] %v11787_v62  ;;  %v3116_v52 = vpack.c.bf16 %v11787_v62, %v11787_v62 }
0x108e   : > { %v3119_v61 = vunpack.c.l.b16 %v3115_v17 }
0x108f   : > { %v3120_v58 = vunpack.c.l.b16 %v3116_v52 }
0x1090   : > { %v3121_v6 = vrot.slane %v3119_v61, 4 }
0x1091   : > { %v3122_v24 = vrot.slane %v3120_v58, 3 }
0x1093   : > { %v3123_v10 = vsel %vm806_vm2, %v3122_v24, %v3121_v6 }
0x1094   : > { %v3124_v19 = vpack.c.b16 %v3123_v10, %v3123_v10 }
0x1096   : > { %3159 = vmatmul.mubr.bf16.vlgmr.msra.gmra.mrb[24].mxu0 %v3124_v19  ;;  %8865 = vmatmul.mubr.bf16.vlgmr.msra.gmra.mrb[24].mxu1 %v3124_v19 }
0x1097   : > { %3284 = vmatpush1.bf16.msra.mxu0 %v11716_v38  ;;  %8869 = vmatpush3.bf16.msra.mxu1 %v11798_v7 }
0x1098   : > { %3285 = vmatprep.subr.bf16.mxu0 %v11721_v11  ;;  %8870 = vmatprep.subr.bf16.mxu1 %v13470_v55 }
0x1099   : > { %3315 = vmatprep.mubr.bf16.mxu0 %v13469_v31  ;;  %8884 = vmatprep.mubr.msk.bf16.mxu1 %vm10473_vm3, %v13470_v55 }
0x109b   : > { %3286 = vmatpush1.bf16.msra.mxu0 %v11729_v23  ;;  %8871 = vmatpush3.bf16.msra.mxu1 %v11808_v2 }
0x109c   : > { %3287 = vmatprep.subr.bf16.mxu0 %v11734_v39  ;;  %8872 = vmatprep.subr.bf16.mxu1 %v13470_v55 }
0x109f   : > { %3288 = vmatpush1.bf16.msra.mxu0 %v11739_v12  ;;  %8873 = vmatpush3.bf16.msra.mxu1 %v11815_v53 }
0x10a0   : > { %3289 = vmatprep.subr.bf16.mxu0 %v11744_v33  ;;  %8874 = vmatprep.subr.bf16.mxu1 %v13470_v55 }
0x10a3   : > { %3290 = vmatpush1.bf16.msra.mxu0 %v11749_v37  ;;  %8875 = vmatpush3.bf16.msra.mxu1 %v11822_v60 }
0x10a4   : > { %3291 = vmatprep.subr.bf16.mxu0 %v11826_v35  ;;  %8876 = vmatprep.subr.bf16.mxu1 %v13470_v55 }
0x10a7   : > { %3292 = vmatpush1.bf16.msra.mxu0 %v11831_v13  ;;  %8877 = vmatpush3.bf16.msra.mxu1 %v11835_v44 }
0x10a8   : > { %3293 = vmatprep.subr.bf16.mxu0 %v11839_v46  ;;  %8878 = vmatprep.subr.bf16.mxu1 %v13470_v55 }
0x10ab   : > { %3294 = vmatpush1.bf16.msra.mxu0 %v11844_v56  ;;  %8879 = vmatpush3.bf16.msra.mxu1 %v11848_v3 }
0x10ac   : > { %3295 = vmatprep.subr.bf16.mxu0 %v11852_v21  ;;  %8880 = vmatprep.subr.bf16.mxu1 %v13470_v55 }
0x10af   : > { %3296 = vmatpush1.bf16.msra.mxu0 %v11857_v26  ;;  %8881 = vmatpush3.bf16.msra.mxu1 %v11861_v22 }
0x10b0   : > { %3297 = vmatprep.subr.bf16.mxu0 %v11865_v14  ;;  %8882 = vmatprep.subr.bf16.mxu1 %v13470_v55 }
0x10b3   : > { %3298 = vmatpush1.bf16.msra.mxu0 %v11870_v29  ;;  %8883 = vmatpush3.bf16.msra.mxu1 %v11874_v16 }
0x10b4   : > { %3440 = vmatprep.subr.bf16.mxu0 %v11770_v50  ;;  %8888 = vmatprep.subr.bf16.mxu1 %v13470_v55 }
0x1169   : > { %v3160_v25 = vpop.f32.mrb[24].mxu0  ;;  %v3201_v27 = vpop.f32.mrb[24].mxu1 }
0x116a   : > { %v3161_v32 = vadd.f32 %v3160_v25, %v11516_v4  ;;  %v3162_v48 = vpop.f32.mrb[25].mxu0  ;;  %v8866_v18 = vpop.f32.mrb[25].mxu1 }
0x116b   : > { %v3163_v51 = vadd.f32 %v3162_v48, %v11519_v15  ;;  %v3164_v20 = vpop.f32.mrb[26].mxu0  ;;  %v3204_v43 = vpop.f32.mrb[26].mxu1 }
0x116c   : > { %v3208_v49 = vrot.slane %v3161_v32, 3  ;;  %v3209_v28 = vrot.slane %v3161_v32, 4  ;;  %v3165_v17 = vpop.f32.mrb[27].mxu0  ;;  %v8867_v52 = vpop.f32.mrb[27].mxu1 }
0x116d   : > { %v3227_v61 = vrot.slane %v3163_v51, 3  ;;  %v3228_v58 = vrot.slane %v3163_v51, 4 }
0x116e   : > { %v3212_v50 = vadd.f32 %v3208_v49, %v11499_v36  ;;  %v3213_v6 = vadd.f32 %v3209_v28, %v11503_v41 }
0x116f   : > { %v3231_v24 = vadd.f32 %v3227_v61, %v11501_v40  ;;  %v3232_v10 = vadd.f32 %v3228_v58, %v11505_v30  ;;  %v3202_v61 = vadd.f32 %v3201_v27, %v11528_v59 }
0x1170   : > { %v7853_v19 = vmul.f32 -1.442695, %v3212_v50  ;;  %v7854_v25 = vmul.f32 -1.442695, %v3213_v6 }
0x1171   : > { %v7855_v18 = vmul.f32 -1.442695, %v3231_v24  ;;  %v7856_v48 = vmul.f32 -1.442695, %v3232_v10  ;;  %v3246_v58 = vrot.slane %v3202_v61, 3  ;;  %v3247_v6 = vrot.slane %v3202_v61, 4 }
0x1172   : > { %9790 = vpow2.f32 %v7853_v19  ;;  %v3262_v19 = vrot.slane %v11785_v54, 7 }
0x1173   : > { %9792 = vpow2.f32 %v7854_v25 }
0x1174   : > { %9794 = vpow2.f32 %v7855_v18 }
0x1175   : > { %9796 = vpow2.f32 %v7856_v48  ;;  %v3263_v48 = vrot.slane %v11787_v62, 7 }
0x117c   : > { %v9791_v32 = vpop.eup %9790 }
0x117d   : > { %v9793_v20 = vpop.eup %9792  ;;  %v3220_v43 = vadd.f32 1.0, %v9791_v32 }
0x117e   : > { %v9795_v51 = vpop.eup %9794  ;;  %v3221_v17 = vadd.f32 1.0, %v9793_v20 }
0x117f   : > { %v9797_v49 = vpop.eup %9796  ;;  %9798 = vrcp.f32 %v3220_v43  ;;  %v3239_v28 = vadd.f32 1.0, %v9795_v51 }
0x1180   : > { %9800 = vrcp.f32 %v3221_v17  ;;  %v3240_v52 = vadd.f32 1.0, %v9797_v49 }
0x1181   : > { %9802 = vrcp.f32 %v3239_v28 }
0x1182   : > { %9804 = vrcp.f32 %v3240_v52 }
0x1189   : > { %v9799_v50 = vpop.eup %9798 }
0x118a   : > { %v9801_v24 = vpop.eup %9800  ;;  %v3250_v10 = vmul.f32 %v9799_v50, %v3246_v58 }
0x118b   : > { %v9803_v25 = vpop.eup %9802  ;;  %v3251_v18 = vmul.f32 %v9801_v24, %v3247_v6 }
0x118c   : > { %v9805_v32 = vpop.eup %9804  ;;  %v3252_v20 = vadd.f32 %v3250_v10, %v11508_v42  ;;  %v3266_v43 = vmul.f32 %v9803_v25, %v3262_v19  ;;  %v3256_v27 = vsub.f32 1.0, %v9803_v25 }
0x118d   : > { %v3253_v51 = vadd.f32 %v3251_v18, %v11510_v34  ;;  %v3267_v17 = vmul.f32 %v9805_v32, %v3263_v48  ;;  %v3257_v28 = vsub.f32 1.0, %v9805_v32 }
0x118e   : > { %9806 = vtanh.f32 %v3252_v20 }
0x118f   : > { %9808 = vtanh.f32 %v3253_v51 }
0x1198   : > { %v9807_v49 = vpop.eup %9806 }
0x1199   : > { %v9809_v52 = vpop.eup %9808  ;;  %v3258_v61 = vmul.f32 %v9807_v49, %v3256_v27 }
0x119a   : > { %v3259_v58 = vmul.f32 %v9809_v52, %v3257_v28 }
0x119b   : > { %v11890_v54 = vadd.f32 %v3266_v43, %v3258_v61 }
0x119c   : > { %v11892_v50 = vadd.f32 %v3267_v17, %v3259_v58 }
0x119d   : > { %3270 = vst [vmem:[#allocation2] sm:$0x20] %v11890_v54  ;;  %v3272_v62 = vpack.c.bf16 %v11890_v54, %v11890_v54 }
0x119e   : > { %3271 = vst [vmem:[#allocation2 + $0x8] sm:$0x20] %v11892_v50  ;;  %v3273_v6 = vpack.c.bf16 %v11892_v50, %v11892_v50 }
0x119f   : > { %v3276_v24 = vunpack.c.l.b16 %v3272_v62  ;;  %v3419_v62 = vrot.slane %v11890_v54, 7 }
0x11a0   : > { %v3277_v10 = vunpack.c.l.b16 %v3273_v6 }
0x11a1   : > { %v3278_v19 = vrot.slane %v3276_v24, 5 }
0x11a2   : > { %v3279_v25 = vrot.slane %v3277_v10, 4  ;;  %v3420_v10 = vrot.slane %v11892_v50, 7 }
0x11a4   : > { %v3280_v18 = vsel %vm806_vm2, %v3279_v25, %v3278_v19 }
0x11a5   : > { %v3281_v48 = vpack.c.b16 %v3280_v18, %v3280_v18 }
0x11a7   : > { %3316 = vmatmul.mubr.bf16.vlgmr.msra.gmra.mrb[28].mxu0 %v3281_v48  ;;  %8885 = vmatmul.mubr.bf16.vlgmr.msra.gmra.mrb[28].mxu1 %v3281_v48 }
0x11a8   : > { %3441 = vmatpush1.bf16.msra.mxu0 %v11716_v38  ;;  %8889 = vmatpush3.bf16.msra.mxu1 %v11798_v7 }
0x11a9   : > { %3442 = vmatprep.subr.bf16.mxu0 %v11721_v11  ;;  %8890 = vmatprep.subr.bf16.mxu1 %v13470_v55 }
0x11aa   : > { %3472 = vmatprep.mubr.bf16.mxu0 %v13469_v31  ;;  %8904 = vmatprep.mubr.msk.bf16.mxu1 %vm10473_vm3, %v13470_v55 }
0x11ac   : > { %3443 = vmatpush1.bf16.msra.mxu0 %v11729_v23  ;;  %8891 = vmatpush3.bf16.msra.mxu1 %v11808_v2 }
0x11ad   : > { %3444 = vmatprep.subr.bf16.mxu0 %v11734_v39  ;;  %8892 = vmatprep.subr.bf16.mxu1 %v13470_v55 }
0x11b0   : > { %3445 = vmatpush1.bf16.msra.mxu0 %v11739_v12  ;;  %8893 = vmatpush3.bf16.msra.mxu1 %v11815_v53 }
0x11b1   : > { %3446 = vmatprep.subr.bf16.mxu0 %v11744_v33  ;;  %8894 = vmatprep.subr.bf16.mxu1 %v13470_v55 }
0x11b4   : > { %3447 = vmatpush1.bf16.msra.mxu0 %v11749_v37  ;;  %8895 = vmatpush3.bf16.msra.mxu1 %v11822_v60 }
0x11b5   : > { %3448 = vmatprep.subr.bf16.mxu0 %v11826_v35  ;;  %8896 = vmatprep.subr.bf16.mxu1 %v13470_v55 }
0x11b8   : > { %3449 = vmatpush1.bf16.msra.mxu0 %v11831_v13  ;;  %8897 = vmatpush3.bf16.msra.mxu1 %v11835_v44 }
0x11b9   : > { %3450 = vmatprep.subr.bf16.mxu0 %v11839_v46  ;;  %8898 = vmatprep.subr.bf16.mxu1 %v13470_v55 }
0x11bc   : > { %3451 = vmatpush1.bf16.msra.mxu0 %v11844_v56  ;;  %8899 = vmatpush3.bf16.msra.mxu1 %v11848_v3 }
0x11bd   : > { %3452 = vmatprep.subr.bf16.mxu0 %v11852_v21  ;;  %8900 = vmatprep.subr.bf16.mxu1 %v13470_v55 }
0x11c0   : > { %3453 = vmatpush1.bf16.msra.mxu0 %v11857_v26  ;;  %8901 = vmatpush3.bf16.msra.mxu1 %v11861_v22 }
0x11c1   : > { %3454 = vmatprep.subr.bf16.mxu0 %v11865_v14  ;;  %8902 = vmatprep.subr.bf16.mxu1 %v13470_v55 }
0x11c4   : > { %3455 = vmatpush1.bf16.msra.mxu0 %v11870_v29  ;;  %8903 = vmatpush3.bf16.msra.mxu1 %v11874_v16 }
0x127a   : > { %v3317_v31 = vpop.f32.mrb[28].mxu0  ;;  %v3358_v38 = vpop.f32.mrb[28].mxu1 }
0x127b   : > { %v3318_v11 = vadd.f32 %v3317_v31, %v11516_v4  ;;  %v3319_v23 = vpop.f32.mrb[29].mxu0  ;;  %v8886_v39 = vpop.f32.mrb[29].mxu1  ;;  %v3359_v27 = vadd.f32 %v3358_v38, %v11528_v59 }
0x127c   : > { %v3320_v12 = vadd.f32 %v3319_v23, %v11519_v15  ;;  %v3321_v33 = vpop.f32.mrb[30].mxu0  ;;  %v3361_v37 = vpop.f32.mrb[30].mxu1 }
0x127d   : > { %v3365_v7 = vrot.slane %v3318_v11, 2  ;;  %v3366_v2 = vrot.slane %v3318_v11, 3  ;;  %v3322_v53 = vpop.f32.mrb[31].mxu0  ;;  %v8887_v60 = vpop.f32.mrb[31].mxu1  ;;  %v3403_v49 = vrot.slane %v3359_v27, 2  ;;  %v3404_v52 = vrot.slane %v3359_v27, 3 }
0x127e   : > { %v3384_v35 = vrot.slane %v3320_v12, 2  ;;  %v3385_v55 = vrot.slane %v3320_v12, 3 }
0x127f   : > { %v3369_v13 = vadd.f32 %v3365_v7, %v11499_v36  ;;  %v3370_v44 = vadd.f32 %v3366_v2, %v11503_v41 }
0x1280   : > { %v3388_v46 = vadd.f32 %v3384_v35, %v11501_v40  ;;  %v3389_v56 = vadd.f32 %v3385_v55, %v11505_v30 }
0x1281   : > { %v7857_v3 = vmul.f32 -1.442695, %v3369_v13  ;;  %v7858_v21 = vmul.f32 -1.442695, %v3370_v44 }
0x1282   : > { %v7859_v26 = vmul.f32 -1.442695, %v3388_v46  ;;  %v7860_v22 = vmul.f32 -1.442695, %v3389_v56 }
0x1283   : > { %9810 = vpow2.f32 %v7857_v3 }
0x1284   : > { %9812 = vpow2.f32 %v7858_v21 }
0x1285   : > { %9814 = vpow2.f32 %v7859_v26 }
0x1286   : > { %9816 = vpow2.f32 %v7860_v22 }
0x128d   : > { %v9811_v14 = vpop.eup %9810 }
0x128e   : > { %v9813_v29 = vpop.eup %9812  ;;  %v3377_v16 = vadd.f32 1.0, %v9811_v14 }
0x128f   : > { %v9815_v32 = vpop.eup %9814  ;;  %v3378_v20 = vadd.f32 1.0, %v9813_v29 }
0x1290   : > { %v9817_v43 = vpop.eup %9816  ;;  %9818 = vrcp.f32 %v3377_v16  ;;  %v3396_v51 = vadd.f32 1.0, %v9815_v32 }
0x1291   : > { %9820 = vrcp.f32 %v3378_v20  ;;  %v3397_v17 = vadd.f32 1.0, %v9817_v43 }
0x1292   : > { %9822 = vrcp.f32 %v3396_v51 }
0x1293   : > { %9824 = vrcp.f32 %v3397_v17 }
0x129a   : > { %v9819_v28 = vpop.eup %9818 }
0x129b   : > { %v9821_v61 = vpop.eup %9820  ;;  %v3407_v58 = vmul.f32 %v9819_v28, %v3403_v49 }
0x129c   : > { %v9823_v6 = vpop.eup %9822  ;;  %v3408_v24 = vmul.f32 %v9821_v61, %v3404_v52 }
0x129d   : > { %v9825_v19 = vpop.eup %9824  ;;  %v3409_v25 = vadd.f32 %v3407_v58, %v11508_v42  ;;  %v3423_v18 = vmul.f32 %v9823_v6, %v3419_v62  ;;  %v3413_v38 = vsub.f32 1.0, %v9823_v6 }
0x129e   : > { %v3410_v48 = vadd.f32 %v3408_v24, %v11510_v34  ;;  %v3424_v31 = vmul.f32 %v9825_v19, %v3420_v10  ;;  %v3414_v23 = vsub.f32 1.0, %v9825_v19 }
0x129f   : > { %9826 = vtanh.f32 %v3409_v25 }
0x12a0   : > { %9828 = vtanh.f32 %v3410_v48 }
0x12a9   : > { %v9827_v11 = vpop.eup %9826 }
0x12aa   : > { %v9829_v39 = vpop.eup %9828  ;;  %v3415_v12 = vmul.f32 %v9827_v11, %v3413_v38 }
0x12ab   : > { %v3416_v33 = vmul.f32 %v9829_v39, %v3414_v23 }
0x12ac   : > { %v11945_v54 = vadd.f32 %v3423_v18, %v3415_v12 }
0x12ad   : > { %v11947_v37 = vadd.f32 %v3424_v31, %v3416_v33 }
0x12ae   : > { %3427 = vst [vmem:[#allocation2] sm:$0x40] %v11945_v54  ;;  %v3429_v50 = vpack.c.bf16 %v11945_v54, %v11945_v54  ;;  %v3576_v31 = vrot.slane %v11945_v54, 7 }
0x12af   : > { %3428 = vst [vmem:[#allocation2 + $0x8] sm:$0x40] %v11947_v37  ;;  %v3430_v7 = vpack.c.bf16 %v11947_v37, %v11947_v37  ;;  %v3577_v23 = vrot.slane %v11947_v37, 7  ;;  %v3589_v37 = vpack.c.bf16 (%p1900_p1), %v11294_v5, %v11294_v5 }
0x12b0   : > { %v3433_v2 = vunpack.c.l.b16 %v3429_v50 }
0x12b1   : > { %v3434_v53 = vunpack.c.l.b16 %v3430_v7 }
0x12b2   : > { %v3435_v60 = vrot.slane %v3433_v2, 6 }
0x12b3   : > { %v3436_v35 = vrot.slane %v3434_v53, 5 }
0x12b5   : > { %v3437_v55 = vsel %vm806_vm2, %v3436_v35, %v3435_v60 }
0x12b6   : > { %v3438_v13 = vpack.c.b16 %v3437_v55, %v3437_v55 }
0x12b8   : > { %3473 = vmatmul.mubr.bf16.vlgmr.msra.gmra.mrb[32].mxu0 %v3438_v13  ;;  %8905 = vmatmul.mubr.bf16.vlgmr.msra.gmra.mrb[32].mxu1 %v3438_v13 }
0x138b   : > { %v3474_v44 = vpop.f32.mrb[32].mxu0  ;;  %v3515_v46 = vpop.f32.mrb[32].mxu1 }
0x138c   : > { %v3475_v56 = vadd.f32 %v3474_v44, %v11516_v4  ;;  %v3476_v3 = vpop.f32.mrb[33].mxu0  ;;  %v8906_v21 = vpop.f32.mrb[33].mxu1 }
0x138d   : > { %v3477_v26 = vadd.f32 %v3476_v3, %v11519_v15  ;;  %v3478_v22 = vpop.f32.mrb[34].mxu0  ;;  %v3518_v14 = vpop.f32.mrb[34].mxu1 }
0x138e   : > { %v3522_v29 = vrot.slane %v3475_v56, 1  ;;  %v3523_v16 = vrot.slane %v3475_v56, 2  ;;  %v3479_v32 = vpop.f32.mrb[35].mxu0  ;;  %v8907_v20 = vpop.f32.mrb[35].mxu1 }
0x138f   : > { %v3541_v43 = vrot.slane %v3477_v26, 1  ;;  %v3542_v51 = vrot.slane %v3477_v26, 2 }
0x1390   : > { %v3526_v17 = vadd.f32 %v3522_v29, %v11499_v36  ;;  %v3527_v27 = vadd.f32 %v3523_v16, %v11503_v41 }
0x1391   : > { %v3545_v49 = vadd.f32 %v3541_v43, %v11501_v40  ;;  %v3546_v4 = vadd.f32 %v3542_v51, %v11505_v30  ;;  %v3516_v30 = vadd.f32 %v3515_v46, %v11528_v59 }
0x1392   : > { %v7861_v28 = vmul.f32 -1.442695, %v3526_v17  ;;  %v7862_v52 = vmul.f32 -1.442695, %v3527_v27 }
0x1393   : > { %v7863_v61 = vmul.f32 -1.442695, %v3545_v49  ;;  %v7864_v15 = vmul.f32 -1.442695, %v3546_v4  ;;  %v3560_v19 = vrot.slane %v3516_v30, 1  ;;  %v3561_v18 = vrot.slane %v3516_v30, 2 }
0x1394   : > { %9830 = vpow2.f32 %v7861_v28 }
0x1395   : > { %9832 = vpow2.f32 %v7862_v52 }
0x1396   : > { %9834 = vpow2.f32 %v7863_v61 }
0x1397   : > { %9836 = vpow2.f32 %v7864_v15 }
0x139e   : > { %v9831_v58 = vpop.eup %9830 }
0x139f   : > { %v9833_v62 = vpop.eup %9832  ;;  %v3534_v6 = vadd.f32 1.0, %v9831_v58 }
0x13a0   : > { %v9835_v24 = vpop.eup %9834  ;;  %v3535_v10 = vadd.f32 1.0, %v9833_v62 }
0x13a1   : > { %v9837_v36 = vpop.eup %9836  ;;  %9838 = vrcp.f32 %v3534_v6  ;;  %v3553_v41 = vadd.f32 1.0, %v9835_v24 }
0x13a2   : > { %9840 = vrcp.f32 %v3535_v10  ;;  %v3554_v40 = vadd.f32 1.0, %v9837_v36 }
0x13a3   : > { %9842 = vrcp.f32 %v3553_v41 }
0x13a4   : > { %9844 = vrcp.f32 %v3554_v40 }
0x13ab   : > { %v9839_v25 = vpop.eup %9838 }
0x13ac   : > { %v9841_v48 = vpop.eup %9840  ;;  %v3564_v38 = vmul.f32 %v9839_v25, %v3560_v19 }
0x13ad   : > { %v9843_v11 = vpop.eup %9842  ;;  %v3565_v39 = vmul.f32 %v9841_v48, %v3561_v18 }
0x13ae   : > { %v9845_v12 = vpop.eup %9844  ;;  %v3566_v33 = vadd.f32 %v3564_v38, %v11508_v42  ;;  %v3580_v50 = vmul.f32 %v9843_v11, %v3576_v31  ;;  %v3570_v59 = vsub.f32 1.0, %v9843_v11  ;;  %v13471_v42 = vmov (%p1900_p1), 0.0  }
0x13af   : > { %v3567_v7 = vadd.f32 %v3565_v39, %v11510_v34  ;;  %v3581_v2 = vmul.f32 %v9845_v12, %v3577_v23  ;;  %v3571_v60 = vsub.f32 1.0, %v9845_v12  ;;  %8908 = vmatprep.subr.bf16.mxu0 (%p1900_p1), %v13471_v42  ;;  %v3588_v34 = vpack.c.bf16 (%p1900_p1), %v11292_v63, %v11292_v63  ;;  %8914 = vmatprep.subr.bf16.mxu1 (%p1900_p1), %v13471_v42 }
0x13b0   : > { %9846 = vtanh.f32 %v3566_v33  ;;  %8910 = vmatprep.mubr.msk.bf16.mxu0 (%p1900_p1), %vm10467_vm0, %v13471_v42  ;;  %8916 = vmatprep.mubr.msk.bf16.mxu1 (%p1900_p1), %vm10467_vm0, %v13471_v42 }
0x13b1   : > { %9848 = vtanh.f32 %v3567_v7  ;;  %8909 = vmatpush3.bf16.xpose.msra.mxu0 (%p1900_p1), %v3588_v34  ;;  %8915 = vmatpush3.bf16.xpose.msra.mxu1 (%p1900_p1), %v3589_v37 }
0x13b2   :  { %8920 = vmatprep.subr.bf16.mxu0 (%p1900_p1), %v13471_v42  ;;  %8926 = vmatprep.subr.bf16.mxu1 (%p1900_p1), %v13471_v42 }
0x13b8   :  { %8911 = vmatmul.mubr.bf16.vlgmr.msra.gmra.mrb[0].mxu0 (%p1900_p1), %v10579_v8  ;;  %8917 = vmatmul.mubr.bf16.vlgmr.msra.gmra.mrb[0].mxu1 (%p1900_p1), %v10581_v9 }
0x13b9   :  { %8922 = vmatprep.mubr.msk.bf16.mxu0 (%p1900_p1), %vm10467_vm0, %v13471_v42  ;;  %8928 = vmatprep.mubr.msk.bf16.mxu1 (%p1900_p1), %vm10467_vm0, %v13471_v42 }
0x13ba   : > { %v9847_v53 = vpop.eup %9846  ;;  %1902 = sbr.rel (!%p1900_p1) target bundleno = 2815 (0xaff), region = 123 }
0x13bb   : > { %v9849_v35 = vpop.eup %9848  ;;  %v3572_v55 = vmul.f32 %v9847_v53, %v3570_v59 }
0x13bc   : > { %v3573_v54 = vmul.f32 %v9849_v35, %v3571_v60 }
0x13bd   : > { %v3582_v13 = vadd.f32 %v3580_v50, %v3572_v55 }
0x13be   : > { %v3583_v44 = vadd.f32 %v3581_v2, %v3573_v54 }
0x13bf   : > { %3584 = vst [vmem:[#allocation2] sm:$0x80] %v3582_v13 }
0x13c0   : > { %3585 = vst [vmem:[#allocation2 + $0x8] sm:$0x80] %v3583_v44 }
0x13c6   :  { %v3586_v62 = vld [vmem:[#allocation2] sm:$0xff] }
0x13c7   :  { %v3699_v6 = vpack.c.bf16 %v3586_v62, %v3586_v62  ;;  %v3587_v10 = vld [vmem:[#allocation2 + $0x8] sm:$0xff] }
0x13c8   :  { %v3700_v36 = vpack.c.bf16 %v3587_v10, %v3587_v10 }
0x13c9   :  { %v3706_v24 = vsel %vm3704_vm5, %v3699_v6, 0 }
0x13ca   :  { %8921 = vmatpush3.bf16.msra.mxu0 %v3706_v24  ;;  %v3752_v41 = vsel %vm3704_vm5, %v3700_v36, 0 }
0x13cb   :  { %8927 = vmatpush3.bf16.msra.mxu1 %v3752_v41 }
0x148b   :  { %v3624_v63 = vpop.f32.mrb[0].mxu0  ;;  %v3664_v5 = vpop.f32.mrb[0].mxu1 }
0x148c   :  { %v3670_v46 = vmax.f32 %v3624_v63, 0.0  ;;  %v8912_v56 = vpop.f32.mrb[1].mxu0  ;;  %v3671_v3 = vmax.f32 %v3664_v5, 0.0  ;;  %v8918_v21 = vpop.f32.mrb[1].mxu1 }
0x148d   :  { %v3627_v26 = vpop.f32.mrb[2].mxu0  ;;  %v3667_v22 = vpop.f32.mrb[2].mxu1 }
0x148e   :  { %v3672_v14 = vadd.f32 %v3670_v46, %v10552_v0  ;;  %v3673_v29 = vadd.f32 %v3671_v3, %v10557_v1  ;;  %v8913_v16 = vpop.f32.mrb[3].mxu0  ;;  %v8919_v32 = vpop.f32.mrb[3].mxu1 }
0x1490   :  { %v3675_v20 = vsel %vm3674_vm4, %v3672_v14, -inf  ;;  %v3678_v43 = vsel %vm3674_vm4, %v3673_v29, -inf }
0x1491   :  { %3676 = vmax.xlane.f32.xlu0 %v3675_v20 }
0x1495   :  { %3679 = vmax.xlane.f32.xlu0 %v3678_v43 }
0x151e   :  { %v3677_v51 = vpop.xlane.xlu0 %3676 }
0x151f   :  { %v3681_v17 = vsub.f32 %v3672_v14, %v3677_v51 }
0x1521   :  { %v3683_v27 = vmul.f32 1.442695, %v3681_v17 }
0x1522   :  { %v3680_v49 = vpop.xlane.xlu0 %3679 }
0x1523   :  { %9874 = vpow2.f32 %v3683_v27  ;;  %v3682_v4 = vsub.f32 %v3673_v29, %v3680_v49 }
0x1525   :  { %v3685_v28 = vmul.f32 1.442695, %v3682_v4 }
0x1527   :  { %9876 = vpow2.f32 %v3685_v28 }
0x152d   :  { %v9875_v52 = vpop.eup %9874 }
0x152e   :  { %v3687_v61 = vsel %vm3674_vm4, %v9875_v52, 0.0 }
0x152f   :  { %3688 = vadd.xlane.f32.xlu1 %v3687_v61 }
0x1531   :  { %v9877_v15 = vpop.eup %9876 }
0x1532   :  { %v3690_v58 = vsel %vm3674_vm4, %v9877_v15, 0.0 }
0x1533   :  { %3691 = vadd.xlane.f32.xlu1 %v3690_v58 }
0x15bc   :  { %v3689_v40 = vpop.xlane.xlu1 %3688 }
0x15bd   :  { %9878 = vrcp.f32 %v3689_v40 }
0x15c0   :  { %v3692_v30 = vpop.xlane.xlu1 %3691 }
0x15c1   :  { %9880 = vrcp.f32 %v3692_v30 }
0x15c7   :  { %v9879_v19 = vpop.eup %9878 }
0x15c8   :  { %v3694_v25 = vmul.f32 %v9879_v19, %v9875_v52 }
0x15ca   :  { %v3697_v18 = vpack.c.bf16 %v3694_v25, %v3694_v25 }
0x15cb   :  { %v9881_v48 = vpop.eup %9880 }
0x15cc   :  { %v3696_v31 = vmul.f32 %v9881_v48, %v9877_v15  ;;  %8923 = vmatmul.mubr.msk.bf16.vlgmr.msra.gmra.mrb[4].mxu0 %vm3674_vm4, %v3697_v18 }
0x15ce   :  { %v3698_v38 = vpack.c.bf16 %v3696_v31, %v3696_v31 }
0x15d0   :  { %8929 = vmatmul.mubr.msk.bf16.vlgmr.msra.gmra.mrb[4].mxu1 %vm3674_vm4, %v3698_v38 }
0x169f   :  { %v3742_v11 = vpop.f32.mrb[4].mxu0 }
0x16a0   :  { %v3794_v23 = vmax.f32 %v3742_v11, 0.0  ;;  %v8924_v39 = vpop.f32.mrb[5].mxu0 }
0x16a1   :  { %v3745_v12 = vpop.f32.mrb[6].mxu0 }
0x16a2   :  { %v11998_v33 = vadd.f32 %v3794_v23, %v3586_v62  ;;  %v8925_v50 = vpop.f32.mrb[7].mxu0 }
0x16a3   :  { %v3788_v7 = vpop.f32.mrb[4].mxu1 }
0x16a4   :  { %3798 = vst [vmem:[#allocation2] sm:$0xff] %v11998_v33  ;;  %v3795_v2 = vmax.f32 %v3788_v7, 0.0  ;;  %v8930_v59 = vpop.f32.mrb[5].mxu1 }
0x16a5   :  { %v3791_v53 = vpop.f32.mrb[6].mxu1 }
0x16a6   :  { %v12001_v60 = vadd.f32 %v3795_v2, %v3587_v10  ;;  %v8931_v35 = vpop.f32.mrb[7].mxu1 }
0x16a8   :  { %3799 = vst [vmem:[#allocation2 + $0x8] sm:$0xff] %v12001_v60 }
0x16a9 LB: > { %v13467_v55 = vmov 0.0   ;;  %v13465_v54 = vmov 0   ;;  %s7582_s15 = smul.u32 192, %s10460_s14  ;;  %vm10476_vm6 = vmmov 0   ;;  %s10460_s14 = sphi %s12004_s14, %s3805_s14  }
0x16aa   : > { %8932 = vmatprep.subr.bf16.mxu1 %v13467_v55  ;;  %4060 = vmatprep.mubr.bf16.mxu0 %v13465_v54  ;;  %s7588_s21 = smul.u32 3, %s10460_s14  ;;  %s3805_s14 = sadd.s32 1, %s10460_s14  }
0x16ab   : > { %8948 = vmatprep.mubr.msk.bf16.mxu1 %vm10476_vm6, %v13467_v55  ;;  %s12017_s18 = scalar_lea.vmem %s13451_s6, %s7582_s15  ;;  %s12030_s20 = scalar_lea.vmem %s13452_s7, %s7582_s15  ;;  %v3881_v17 = vld [vmem:[#allocation2] sm:$0xff] }
0x16ac   : > { %v9882_v13 = vld [vmem:[%s12017_s18 + $0x304] ss:$12 sps:$4 sm:$0xff]   ;;  %v9884_v44 = vld [vmem:[%s12017_s18 + $0x300] ss:$12 sps:$4 sm:$0xff]   ;;  %v9885_v42 = vld [vmem:[%s12017_s18 + $0x31c] ss:$12 sps:$4 sm:$0xff]   ;;  %s7589_s24 = scalar_lea.vmem %s13453_s8, %s7588_s21  ;;  %s7592_s2 = scalar_lea.vmem %s13454_s9, %s7588_s21 }
0x16ad   : > { %4028 = vmatprep.subr.bf16.mxu0 %v9882_v13  ;;  %v9887_v34 = vld [vmem:[%s12017_s18 + $0x318] ss:$12 sps:$4 sm:$0xff]   ;;  %v9888_v37 = vld [vmem:[%s12017_s18 + $0x334] ss:$12 sps:$4 sm:$0xff]   ;;  %v9890_v63 = vld [vmem:[%s12017_s18 + $0x330] ss:$12 sps:$4 sm:$0xff]  }
0x16ae   : > { %4029 = vmatpush1.bf16.msra.mxu0 %v9884_v44  ;;  %v9891_v5 = vld [vmem:[%s12017_s18 + $0x34c] ss:$12 sps:$4 sm:$0xff]   ;;  %v9903_v46 = vld [vmem:[%s12017_s18 + $0x308] ss:$12 sps:$4 sm:$0xff]   ;;  %v9894_v3 = vld [vmem:[%s12017_s18 + $0x364] ss:$12 sps:$4 sm:$0xff]  }
0x16af   : > { %4030 = vmatprep.subr.bf16.mxu0 %v9885_v42  ;;  %v9893_v56 = vld [vmem:[%s12017_s18 + $0x348] ss:$12 sps:$4 sm:$0xff]   ;;  %8933 = vmatpush3.bf16.msra.mxu1 %v9903_v46  ;;  %v9907_v21 = vld [vmem:[%s12017_s18 + $0x320] ss:$12 sps:$4 sm:$0xff]   ;;  %v9911_v14 = vld [vmem:[%s12017_s18 + $0x338] ss:$12 sps:$4 sm:$0xff]  }
0x16b0   : > { %8934 = vmatprep.subr.bf16.mxu1 %v13467_v55  ;;  %v9896_v26 = vld [vmem:[%s12017_s18 + $0x360] ss:$12 sps:$4 sm:$0xff]   ;;  %v9897_v22 = vld [vmem:[%s12017_s18 + $0x37c] ss:$12 sps:$4 sm:$0xff]   ;;  %v9899_v29 = vld [vmem:[%s12017_s18 + $0x378] ss:$12 sps:$4 sm:$0xff]  }
0x16b1   : > { %v9900_v16 = vld [vmem:[%s12017_s18 + $0x394] ss:$12 sps:$4 sm:$0xff]   ;;  %v9915_v32 = vld [vmem:[%s12017_s18 + $0x350] ss:$12 sps:$4 sm:$0xff]   ;;  %v9904_v43 = vld [vmem:[%s12017_s18 + $0x3ac] ss:$12 sps:$4 sm:$0xff]  }
0x16b2   : > { %4031 = vmatpush1.bf16.msra.mxu0 %v9887_v34  ;;  %v9902_v20 = vld [vmem:[%s12017_s18 + $0x390] ss:$12 sps:$4 sm:$0xff]   ;;  %v9919_v51 = vld [vmem:[%s12017_s18 + $0x368] ss:$12 sps:$4 sm:$0xff]   ;;  %v9923_v28 = vld [vmem:[%s12017_s18 + $0x380] ss:$12 sps:$4 sm:$0xff]  }
0x16b3   : > { %4032 = vmatprep.subr.bf16.mxu0 %v9888_v37  ;;  %8935 = vmatpush3.bf16.msra.mxu1 %v9907_v21  ;;  %v3882_v27 = vld [vmem:[#allocation2 + $0x8] sm:$0xff]  ;;  %v12050_v4 = vld [vmem:[%s12030_s20 + $0x304] ss:$12 sps:$4 sm:$0xff]   ;;  %v12068_v6 = vld [vmem:[%s12030_s20 + $0x334] ss:$12 sps:$4 sm:$0xff]   ;;  %p3802_p2 = scmp.ge.s32.totalorder %s3805_s14, 2  }
0x16b4   : > { %8936 = vmatprep.subr.bf16.mxu1 %v13467_v55  ;;  %v9906_v49 = vld [vmem:[%s12017_s18 + $0x3a8] ss:$12 sps:$4 sm:$0xff]   ;;  %v3883_v52 = vpack.c.bf16 %v3882_v27, %v3881_v17  ;;  %v12055_v61 = vld [vmem:[%s12030_s20 + $0x300] ss:$12 sps:$4 sm:$0xff]   ;;  %v9927_v58 = vld [vmem:[%s12017_s18 + $0x398] ss:$12 sps:$4 sm:$0xff]  }
0x16b5   : > { %v12058_v15 = vld [vmem:[%s12030_s20 + $0x31c] ss:$12 sps:$4 sm:$0xff]   ;;  %v12064_v62 = vld [vmem:[%s12030_s20 + $0x318] ss:$12 sps:$4 sm:$0xff]   ;;  %v12096_v19 = vld [vmem:[%s12030_s20 + $0x320] ss:$12 sps:$4 sm:$0xff]  }
0x16b6   : > { %4033 = vmatpush1.bf16.msra.mxu0 %v9890_v63  ;;  %v9931_v24 = vld [vmem:[%s12017_s18 + $0x3b0] ss:$12 sps:$4 sm:$0xff]   ;;  %v12080_v36 = vld [vmem:[%s12030_s20 + $0x34c] ss:$12 sps:$4 sm:$0xff]   ;;  %v12083_v41 = vld [vmem:[%s12030_s20 + $0x308] ss:$12 sps:$4 sm:$0xff]  }
0x16b7   : > { %4034 = vmatprep.subr.bf16.mxu0 %v9891_v5  ;;  %8937 = vmatpush3.bf16.msra.mxu1 %v9911_v14  ;;  %v12076_v10 = vld [vmem:[%s12030_s20 + $0x330] ss:$12 sps:$4 sm:$0xff]   ;;  %v12088_v40 = vld [vmem:[%s12030_s20 + $0x348] ss:$12 sps:$4 sm:$0xff]   ;;  %v12103_v25 = vld [vmem:[%s12030_s20 + $0x360] ss:$12 sps:$4 sm:$0xff]  }
0x16b8   : > { %8938 = vmatprep.subr.bf16.mxu1 %v13467_v55  ;;  %v12092_v30 = vld [vmem:[%s12030_s20 + $0x364] ss:$12 sps:$4 sm:$0xff]   ;;  %v12107_v18 = vld [vmem:[%s12030_s20 + $0x37c] ss:$12 sps:$4 sm:$0xff]   ;;  %v12120_v38 = vld [vmem:[%s12030_s20 + $0x394] ss:$12 sps:$4 sm:$0xff]  }
0x16b9   : > { %v12111_v48 = vld [vmem:[%s12030_s20 + $0x338] ss:$12 sps:$4 sm:$0xff]   ;;  %v12124_v11 = vld [vmem:[%s12030_s20 + $0x350] ss:$12 sps:$4 sm:$0xff]   ;;  %v12137_v12 = vld [vmem:[%s12030_s20 + $0x368] ss:$12 sps:$4 sm:$0xff]  }
0x16ba   : > { %4035 = vmatpush1.bf16.msra.mxu0 %v9893_v56  ;;  %v12116_v31 = vld [vmem:[%s12030_s20 + $0x378] ss:$12 sps:$4 sm:$0xff]   ;;  %v12129_v23 = vld [vmem:[%s12030_s20 + $0x390] ss:$12 sps:$4 sm:$0xff]   ;;  %v12142_v50 = vld [vmem:[%s12030_s20 + $0x3a8] ss:$12 sps:$4 sm:$0xff]  }
0x16bb   : > { %4036 = vmatprep.subr.bf16.mxu0 %v9894_v3  ;;  %8939 = vmatpush3.bf16.msra.mxu1 %v9915_v32  ;;  %v12133_v39 = vld [vmem:[%s12030_s20 + $0x3ac] ss:$12 sps:$4 sm:$0xff]   ;;  %v12162_v59 = vld [vmem:[%s12030_s20 + $0x3b0] ss:$12 sps:$4 sm:$0xff]   ;;  %s12706_s3 = smov (%p3802_p2), 0  }
0x16bc   : > { %8940 = vmatprep.subr.bf16.mxu1 %v13467_v55  ;;  %v12147_v7 = vld [vmem:[%s12030_s20 + $0x380] ss:$12 sps:$4 sm:$0xff]   ;;  %v12153_v2 = vld [vmem:[%s12030_s20 + $0x398] ss:$12 sps:$4 sm:$0xff]  }
0x16bd   : > { %v7931_v53 = vld [vmem:[%s7589_s24 + $0xc] sm:$0x7] }
0x16be   : > { %4037 = vmatpush1.bf16.msra.mxu0 %v9896_v26  ;;  %v3888_v35 = vrot.slane %v7931_v53, %v10813_v45  ;;  %v3892_v13 = vrot.slane %v7931_v53, %v10815_v47  ;;  %v3896_v3 = vrot.slane %v7931_v53, %v10823_v57  ;;  %v7932_v32 = vld [vmem:[%s7592_s2 + $0xc] sm:$0x7] }
0x16bf   : > { %4038 = vmatprep.subr.bf16.mxu0 %v9897_v22  ;;  %8941 = vmatpush3.bf16.msra.mxu1 %v9919_v51 }
0x16c0   : > { %8942 = vmatprep.subr.bf16.mxu1 %v13467_v55 }
0x16c2   : > { %4039 = vmatpush1.bf16.msra.mxu0 %v9899_v29 }
0x16c3   : > { %4040 = vmatprep.subr.bf16.mxu0 %v9900_v16  ;;  %8943 = vmatpush3.bf16.msra.mxu1 %v9923_v28 }
0x16c4   : > { %8944 = vmatprep.subr.bf16.mxu1 %v13467_v55 }
0x16c6   : > { %4041 = vmatpush1.bf16.msra.mxu0 %v9902_v20  ;;  %v12224_v20 = vrot.slane %v7932_v32, %v10813_v45 }
0x16c7   : > { %4042 = vmatprep.subr.bf16.mxu0 %v9904_v43  ;;  %8945 = vmatpush3.bf16.msra.mxu1 %v9927_v58  ;;  %v12227_v43 = vrot.slane %v7932_v32, %v10815_v47 }
0x16c8   : > { %8946 = vmatprep.subr.bf16.mxu1 %v13467_v55 }
0x16ca   : > { %4043 = vmatpush1.bf16.msra.mxu0 %v9906_v49 }
0x16cb   : > { %4256 = vmatprep.subr.bf16.mxu0 %v12050_v4  ;;  %8947 = vmatpush3.bf16.msra.mxu1 %v9931_v24 }
0x16cc   : > { %8952 = vmatprep.subr.bf16.mxu1 %v13467_v55 }
0x16cd   : > { %4061 = vmatmul.mubr.bf16.vlgmr.msra.gmra.mrb[0].mxu0 %v3883_v52 }
0x16ce   : > { %4257 = vmatpush1.bf16.msra.mxu0 %v12055_v61  ;;  %4288 = vmatprep.mubr.bf16.mxu0 %v13465_v54 }
0x16cf   : > { %4258 = vmatprep.subr.bf16.mxu0 %v12058_v15  ;;  %8949 = vmatmul.mubr.bf16.vlgmr.msra.gmra.mrb[0].mxu1 %v3883_v52 }
0x16d0   : > { %8953 = vmatpush3.bf16.msra.mxu1 %v12083_v41  ;;  %8968 = vmatprep.mubr.msk.bf16.mxu1 %vm10476_vm6, %v13467_v55 }
0x16d1   : > { %8954 = vmatprep.subr.bf16.mxu1 %v13467_v55 }
0x16d2   : > { %4259 = vmatpush1.bf16.msra.mxu0 %v12064_v62 }
0x16d3   : > { %4260 = vmatprep.subr.bf16.mxu0 %v12068_v6 }
0x16d4   : > { %8955 = vmatpush3.bf16.msra.mxu1 %v12096_v19 }
0x16d5   : > { %8956 = vmatprep.subr.bf16.mxu1 %v13467_v55 }
0x16d6   : > { %4261 = vmatpush1.bf16.msra.mxu0 %v12076_v10 }
0x16d7   : > { %4262 = vmatprep.subr.bf16.mxu0 %v12080_v36 }
0x16d8   : > { %8957 = vmatpush3.bf16.msra.mxu1 %v12111_v48 }
0x16d9   : > { %8958 = vmatprep.subr.bf16.mxu1 %v13467_v55 }
0x16da   : > { %4263 = vmatpush1.bf16.msra.mxu0 %v12088_v40 }
0x16db   : > { %4264 = vmatprep.subr.bf16.mxu0 %v12092_v30 }
0x16dc   : > { %8959 = vmatpush3.bf16.msra.mxu1 %v12124_v11 }
0x16dd   : > { %8960 = vmatprep.subr.bf16.mxu1 %v13467_v55 }
0x16de   : > { %4265 = vmatpush1.bf16.msra.mxu0 %v12103_v25 }
0x16df   : > { %4266 = vmatprep.subr.bf16.mxu0 %v12107_v18 }
0x16e0   : > { %8961 = vmatpush3.bf16.msra.mxu1 %v12137_v12 }
0x16e1   : > { %8962 = vmatprep.subr.bf16.mxu1 %v13467_v55 }
0x16e2   : > { %4267 = vmatpush1.bf16.msra.mxu0 %v12116_v31 }
0x16e3   : > { %4268 = vmatprep.subr.bf16.mxu0 %v12120_v38 }
0x16e4   : > { %8963 = vmatpush3.bf16.msra.mxu1 %v12147_v7 }
0x16e5   : > { %8964 = vmatprep.subr.bf16.mxu1 %v13467_v55 }
0x16e6   : > { %4269 = vmatpush1.bf16.msra.mxu0 %v12129_v23 }
0x16e7   : > { %4270 = vmatprep.subr.bf16.mxu0 %v12133_v39 }
0x16e8   : > { %8965 = vmatpush3.bf16.msra.mxu1 %v12153_v2 }
0x16e9   : > { %8966 = vmatprep.subr.bf16.mxu1 %v13467_v55 }
0x16ea   : > { %4271 = vmatpush1.bf16.msra.mxu0 %v12142_v50 }
0x16eb   : > { %4404 = vmatprep.subr.bf16.mxu0 %v12050_v4 }
0x16ec   : > { %8967 = vmatpush3.bf16.msra.mxu1 %v12162_v59 }
0x16ed   : > { %4289 = vmatmul.mubr.bf16.vlgmr.msra.gmra.mrb[4].mxu0 %v13465_v54  ;;  %8972 = vmatprep.subr.bf16.mxu1 %v13467_v55 }
0x16ee   : > { %4405 = vmatpush1.bf16.msra.mxu0 %v12055_v61  ;;  %4436 = vmatprep.mubr.bf16.mxu0 %v13465_v54 }
0x16ef   : > { %4406 = vmatprep.subr.bf16.mxu0 %v12058_v15  ;;  %8969 = vmatmul.mubr.bf16.vlgmr.msra.gmra.mrb[4].mxu1 %v13465_v54 }
0x16f0   : > { %8973 = vmatpush3.bf16.msra.mxu1 %v12083_v41  ;;  %8988 = vmatprep.mubr.msk.bf16.mxu1 %vm10476_vm6, %v13467_v55 }
0x16f1   : > { %8974 = vmatprep.subr.bf16.mxu1 %v13467_v55 }
0x16f2   : > { %4407 = vmatpush1.bf16.msra.mxu0 %v12064_v62 }
0x16f3   : > { %4408 = vmatprep.subr.bf16.mxu0 %v12068_v6 }
0x16f4   : > { %8975 = vmatpush3.bf16.msra.mxu1 %v12096_v19 }
0x16f5   : > { %8976 = vmatprep.subr.bf16.mxu1 %v13467_v55 }
0x16f6   : > { %4409 = vmatpush1.bf16.msra.mxu0 %v12076_v10 }
0x16f7   : > { %4410 = vmatprep.subr.bf16.mxu0 %v12080_v36 }
0x16f8   : > { %8977 = vmatpush3.bf16.msra.mxu1 %v12111_v48 }
0x16f9   : > { %8978 = vmatprep.subr.bf16.mxu1 %v13467_v55 }
0x16fa   : > { %4411 = vmatpush1.bf16.msra.mxu0 %v12088_v40 }
0x16fb   : > { %4412 = vmatprep.subr.bf16.mxu0 %v12092_v30 }
0x16fc   : > { %8979 = vmatpush3.bf16.msra.mxu1 %v12124_v11 }
0x16fd   : > { %8980 = vmatprep.subr.bf16.mxu1 %v13467_v55 }
0x16fe   : > { %4413 = vmatpush1.bf16.msra.mxu0 %v12103_v25 }
0x16ff   : > { %4414 = vmatprep.subr.bf16.mxu0 %v12107_v18 }
0x1700   : > { %8981 = vmatpush3.bf16.msra.mxu1 %v12137_v12 }
0x1701   : > { %8982 = vmatprep.subr.bf16.mxu1 %v13467_v55 }
0x1702   : > { %4415 = vmatpush1.bf16.msra.mxu0 %v12116_v31 }
0x1703   : > { %4416 = vmatprep.subr.bf16.mxu0 %v12120_v38 }
0x1704   : > { %8983 = vmatpush3.bf16.msra.mxu1 %v12147_v7 }
0x1705   : > { %8984 = vmatprep.subr.bf16.mxu1 %v13467_v55 }
0x1706   : > { %4417 = vmatpush1.bf16.msra.mxu0 %v12129_v23 }
0x1707   : > { %4418 = vmatprep.subr.bf16.mxu0 %v12133_v39 }
0x1708   : > { %8985 = vmatpush3.bf16.msra.mxu1 %v12153_v2 }
0x1709   : > { %8986 = vmatprep.subr.bf16.mxu1 %v13467_v55 }
0x170a   : > { %4419 = vmatpush1.bf16.msra.mxu0 %v12142_v50 }
0x170b   : > { %4557 = vmatprep.subr.bf16.mxu0 %v12050_v4 }
0x170c   : > { %8987 = vmatpush3.bf16.msra.mxu1 %v12162_v59 }
0x170d   : > { %8992 = vmatprep.subr.bf16.mxu1 %v13467_v55 }
0x17a0   : > { %v4062_v44 = vpop.f32.mrb[0].mxu0 }
0x17a1   : > { %v12207_v42 = vadd.f32 %v4062_v44, %v3888_v35  ;;  %v4064_v34 = vpop.f32.mrb[1].mxu0 }
0x17a2   : > { %v12209_v37 = vadd.f32 %v4064_v34, %v3892_v13  ;;  %v4066_v63 = vpop.f32.mrb[2].mxu0  ;;  %v4105_v21 = vpop.f32.mrb[0].mxu1 }
0x17a3   : > { %v12211_v5 = vadd.f32 %v4066_v63, %v3888_v35  ;;  %v4068_v46 = vpop.f32.mrb[3].mxu0  ;;  %v12216_v26 = vadd.f32 %v4105_v21, %v3896_v3  ;;  %v8950_v22 = vpop.f32.mrb[1].mxu1 }
0x17a4   : > { %v12213_v56 = vadd.f32 %v4068_v46, %v3892_v13  ;;  %v4108_v14 = vpop.f32.mrb[2].mxu1 }
0x17a5   : > { %v12218_v29 = vadd.f32 %v4108_v14, %v3896_v3  ;;  %v8951_v16 = vpop.f32.mrb[3].mxu1 }
0x17c0   : > { %v4290_v51 = vpop.f32.mrb[4].mxu0 }
0x17c1   : > { %v4291_v17 = vadd.f32 %v4290_v51, %v12224_v20  ;;  %v4292_v27 = vpop.f32.mrb[5].mxu0 }
0x17c2   : > { %v4293_v49 = vadd.f32 %v4292_v27, %v12227_v43  ;;  %v4294_v28 = vpop.f32.mrb[6].mxu0  ;;  %v4331_v46 = vpop.f32.mrb[4].mxu1 }
0x17c3   : > { %v4338_v52 = vrot.slane %v4291_v17, 1  ;;  %v4341_v58 = vadd.f32 %v4291_v17, %v12207_v42  ;;  %v4295_v24 = vpop.f32.mrb[7].mxu0  ;;  %v8970_v21 = vpop.f32.mrb[5].mxu1 }
0x17c4   : > { %v4356_v53 = vrot.slane %v4293_v49, 1  ;;  %v4359_v44 = vadd.f32 %v4293_v49, %v12209_v37  ;;  %v4334_v22 = vpop.f32.mrb[6].mxu1  ;;  %v12236_v49 = vrot.slane %v7932_v32, %v10823_v57 }
0x17c5   : > { %v4342_v35 = vadd.f32 %v4338_v52, %v12211_v5  ;;  %v7981_v13 = vmul.f32 -1.442695, %v4341_v58  ;;  %v8971_v16 = vpop.f32.mrb[7].mxu1 }
0x17c6   : > { %v4360_v63 = vadd.f32 %v4356_v53, %v12213_v56  ;;  %v7983_v3 = vmul.f32 -1.442695, %v4359_v44  ;;  %v4332_v58 = vadd.f32 %v4331_v46, %v12236_v49 }
0x17c7   : > { %9946 = vpow2.f32 %v7981_v13  ;;  %v7982_v34 = vmul.f32 -1.442695, %v4342_v35 }
0x17c8   : > { %v7984_v14 = vmul.f32 -1.442695, %v4360_v63  ;;  %v4374_v13 = vrot.slane %v4332_v58, 1 }
0x17c9   : > { %9948 = vpow2.f32 %v7982_v34 }
0x17ca   : > { %9950 = vpow2.f32 %v7983_v3 }
0x17cb   : > { %9952 = vpow2.f32 %v7984_v14 }
0x17d1   : > { %v9947_v51 = vpop.eup %9946 }
0x17d2   : > { %v4349_v17 = vadd.f32 1.0, %v9947_v51 }
0x17d3   : > { %v9949_v27 = vpop.eup %9948 }
0x17d4   : > { %v4350_v28 = vadd.f32 1.0, %v9949_v27  ;;  %9954 = vrcp.f32 %v4349_v17  ;;  %v9951_v52 = vpop.eup %9950 }
0x17d5   : > { %v9953_v24 = vpop.eup %9952  ;;  %v4367_v53 = vadd.f32 1.0, %v9951_v52 }
0x17d6   : > { %9956 = vrcp.f32 %v4350_v28  ;;  %v4368_v35 = vadd.f32 1.0, %v9953_v24 }
0x17d7   : > { %9958 = vrcp.f32 %v4367_v53 }
0x17d8   : > { %9960 = vrcp.f32 %v4368_v35 }
0x17de   : > { %v9955_v44 = vpop.eup %9954 }
0x17df   : > { %v4377_v34 = vmul.f32 %v9955_v44, %v4332_v58 }
0x17e0   : > { %v9957_v63 = vpop.eup %9956 }
0x17e1   : > { %v4378_v3 = vmul.f32 %v9957_v63, %v4374_v13  ;;  %v4379_v21 = vadd.f32 %v4377_v34, %v12216_v26  ;;  %v9959_v32 = vpop.eup %9958 }
0x17e2   : > { %v9961_v14 = vpop.eup %9960  ;;  %v4383_v16 = vsub.f32 1.0, %v9959_v32  ;;  %v4387_v27 = vmul.f32 0.0, %v9959_v32 }
0x17e3   : > { %v4380_v22 = vadd.f32 %v4378_v3, %v12218_v29  ;;  %9962 = vtanh.f32 %v4379_v21  ;;  %v4384_v17 = vsub.f32 1.0, %v9961_v14  ;;  %v4388_v24 = vmul.f32 0.0, %v9961_v14 }
0x17e5   : > { %9964 = vtanh.f32 %v4380_v22 }
0x17ed   : > { %v9963_v46 = vpop.eup %9962 }
0x17ee   : > { %v4385_v51 = vmul.f32 %v9963_v46, %v4383_v16 }
0x17ef   : > { %v9965_v28 = vpop.eup %9964 }
0x17f0   : > { %v4386_v52 = vmul.f32 %v9965_v28, %v4384_v17  ;;  %v12241_v58 = vadd.f32 %v4387_v27, %v4385_v51 }
0x17f2   : > { %v12243_v53 = vadd.f32 %v4388_v24, %v4386_v52  ;;  %4391 = vst [vmem:[#allocation2] sm:$0x1] %v12241_v58  ;;  %v4393_v35 = vpack.c.bf16 %v12241_v58, %v12241_v58 }
0x17f4   : > { %4392 = vst [vmem:[#allocation2 + $0x8] sm:$0x1] %v12243_v53  ;;  %v4394_v13 = vpack.c.bf16 %v12243_v53, %v12243_v53  ;;  %v4397_v34 = vunpack.c.l.b16 %v4393_v35 }
0x17f6   : > { %v4398_v44 = vunpack.c.l.b16 %v4394_v13 }
0x17f8   : > { %v4399_v63 = vrot.slane %v4398_v44, 7 }
0x17fa   : > { %v4401_v3 = vsel %vm806_vm2, %v4399_v63, %v4397_v34 }
0x17fb   : > { %v4402_v21 = vpack.c.b16 %v4401_v3, %v4401_v3 }
0x17fd   : > { %4437 = vmatmul.mubr.bf16.vlgmr.msra.gmra.mrb[8].mxu0 %v4402_v21  ;;  %8989 = vmatmul.mubr.bf16.vlgmr.msra.gmra.mrb[8].mxu1 %v4402_v21 }
0x17fe   : > { %4558 = vmatpush1.bf16.msra.mxu0 %v12055_v61  ;;  %8993 = vmatpush3.bf16.msra.mxu1 %v12083_v41 }
0x17ff   : > { %4559 = vmatprep.subr.bf16.mxu0 %v12058_v15  ;;  %8994 = vmatprep.subr.bf16.mxu1 %v13467_v55 }
0x1800   : > { %4589 = vmatprep.mubr.bf16.mxu0 %v13465_v54  ;;  %9008 = vmatprep.mubr.msk.bf16.mxu1 %vm10476_vm6, %v13467_v55 }
0x1802   : > { %4560 = vmatpush1.bf16.msra.mxu0 %v12064_v62  ;;  %8995 = vmatpush3.bf16.msra.mxu1 %v12096_v19 }
0x1803   : > { %4561 = vmatprep.subr.bf16.mxu0 %v12068_v6  ;;  %8996 = vmatprep.subr.bf16.mxu1 %v13467_v55 }
0x1806   : > { %4562 = vmatpush1.bf16.msra.mxu0 %v12076_v10  ;;  %8997 = vmatpush3.bf16.msra.mxu1 %v12111_v48 }
0x1807   : > { %4563 = vmatprep.subr.bf16.mxu0 %v12080_v36  ;;  %8998 = vmatprep.subr.bf16.mxu1 %v13467_v55 }
0x180a   : > { %4564 = vmatpush1.bf16.msra.mxu0 %v12088_v40  ;;  %8999 = vmatpush3.bf16.msra.mxu1 %v12124_v11 }
0x180b   : > { %4565 = vmatprep.subr.bf16.mxu0 %v12092_v30  ;;  %9000 = vmatprep.subr.bf16.mxu1 %v13467_v55 }
0x180e   : > { %4566 = vmatpush1.bf16.msra.mxu0 %v12103_v25  ;;  %9001 = vmatpush3.bf16.msra.mxu1 %v12137_v12 }
0x180f   : > { %4567 = vmatprep.subr.bf16.mxu0 %v12107_v18  ;;  %9002 = vmatprep.subr.bf16.mxu1 %v13467_v55 }
0x1812   : > { %4568 = vmatpush1.bf16.msra.mxu0 %v12116_v31  ;;  %9003 = vmatpush3.bf16.msra.mxu1 %v12147_v7 }
0x1813   : > { %4569 = vmatprep.subr.bf16.mxu0 %v12120_v38  ;;  %9004 = vmatprep.subr.bf16.mxu1 %v13467_v55 }
0x1816   : > { %4570 = vmatpush1.bf16.msra.mxu0 %v12129_v23  ;;  %9005 = vmatpush3.bf16.msra.mxu1 %v12153_v2 }
0x1817   : > { %4571 = vmatprep.subr.bf16.mxu0 %v12133_v39  ;;  %9006 = vmatprep.subr.bf16.mxu1 %v13467_v55 }
0x181a   : > { %4572 = vmatpush1.bf16.msra.mxu0 %v12142_v50  ;;  %9007 = vmatpush3.bf16.msra.mxu1 %v12162_v59 }
0x181b   : > { %4714 = vmatprep.subr.bf16.mxu0 %v12050_v4  ;;  %9012 = vmatprep.subr.bf16.mxu1 %v13467_v55 }
0x18d0   : > { %v4438_v22 = vpop.f32.mrb[8].mxu0  ;;  %v4479_v32 = vpop.f32.mrb[8].mxu1 }
0x18d1   : > { %v4439_v14 = vadd.f32 %v4438_v22, %v12224_v20  ;;  %v4440_v16 = vpop.f32.mrb[9].mxu0  ;;  %v8990_v46 = vpop.f32.mrb[9].mxu1 }
0x18d2   : > { %v4441_v51 = vadd.f32 %v4440_v16, %v12227_v43  ;;  %v4442_v17 = vpop.f32.mrb[10].mxu0  ;;  %v4482_v27 = vpop.f32.mrb[10].mxu1 }
0x18d3   : > { %v4486_v28 = vrot.slane %v4439_v14, 7  ;;  %v4490_v52 = vadd.f32 %v4439_v14, %v12211_v5  ;;  %v4443_v24 = vpop.f32.mrb[11].mxu0  ;;  %v8991_v35 = vpop.f32.mrb[11].mxu1 }
0x18d4   : > { %v4504_v13 = vrot.slane %v4441_v51, 7  ;;  %v4508_v44 = vadd.f32 %v4441_v51, %v12213_v56 }
0x18d5   : > { %v4489_v34 = vadd.f32 %v4486_v28, %v12207_v42  ;;  %v7986_v63 = vmul.f32 -1.442695, %v4490_v52  ;;  %v4480_v28 = vadd.f32 %v4479_v32, %v12236_v49 }
0x18d6   : > { %v4507_v3 = vadd.f32 %v4504_v13, %v12209_v37  ;;  %v7988_v21 = vmul.f32 -1.442695, %v4508_v44  ;;  %v4538_v13 = vrot.slane %v12243_v53, 7 }
0x18d7   : > { %v7985_v22 = vmul.f32 -1.442695, %v4489_v34  ;;  %9966 = vpow2.f32 %v7986_v63  ;;  %v4522_v34 = vrot.slane %v4480_v28, 7 }
0x18d8   : > { %v7987_v46 = vmul.f32 -1.442695, %v4507_v3  ;;  %9968 = vpow2.f32 %v7988_v21  ;;  %v4537_v21 = vrot.slane %v12241_v58, 7 }
0x18d9   : > { %9970 = vpow2.f32 %v7985_v22 }
0x18da   : > { %9972 = vpow2.f32 %v7987_v46 }
0x18e1   : > { %v9967_v16 = vpop.eup %9966 }
0x18e2   : > { %v9969_v17 = vpop.eup %9968  ;;  %v4498_v14 = vadd.f32 1.0, %v9967_v16 }
0x18e3   : > { %v9971_v27 = vpop.eup %9970  ;;  %v4516_v24 = vadd.f32 1.0, %v9969_v17 }
0x18e4   : > { %v9973_v35 = vpop.eup %9972  ;;  %v4497_v54 = vadd.f32 1.0, %v9971_v27  ;;  %9974 = vrcp.f32 %v4498_v14 }
0x18e5   : > { %v4515_v51 = vadd.f32 1.0, %v9973_v35  ;;  %9976 = vrcp.f32 %v4516_v24 }
0x18e6   : > { %9978 = vrcp.f32 %v4497_v54 }
0x18e7   : > { %9980 = vrcp.f32 %v4515_v51 }
0x18ee   : > { %v9975_v52 = vpop.eup %9974 }
0x18ef   : > { %v9977_v44 = vpop.eup %9976  ;;  %v4526_v63 = vmul.f32 %v9975_v52, %v4480_v28 }
0x18f0   : > { %v9979_v3 = vpop.eup %9978  ;;  %v4542_v22 = vmul.f32 %v9977_v44, %v4538_v13  ;;  %v4532_v32 = vsub.f32 1.0, %v9977_v44 }
0x18f1   : > { %v9981_v46 = vpop.eup %9980  ;;  %v4525_v16 = vmul.f32 %v9979_v3, %v4522_v34  ;;  %v4528_v17 = vadd.f32 %v4526_v63, %v12218_v29 }
0x18f2   : > { %v4541_v14 = vmul.f32 %v9981_v46, %v4537_v21  ;;  %v4531_v24 = vsub.f32 1.0, %v9981_v46 }
0x18f3   : > { %v4527_v54 = vadd.f32 %v4525_v16, %v12216_v26  ;;  %9982 = vtanh.f32 %v4528_v17 }
0x18f5   : > { %9984 = vtanh.f32 %v4527_v54 }
0x18fd   : > { %v9983_v27 = vpop.eup %9982 }
0x18fe   : > { %v4534_v53 = vmul.f32 %v9983_v27, %v4532_v32 }
0x18ff   : > { %v9985_v35 = vpop.eup %9984 }
0x1900   : > { %v4533_v51 = vmul.f32 %v9985_v35, %v4531_v24  ;;  %v12298_v28 = vadd.f32 %v4542_v22, %v4534_v53  ;;  %v13472_v22 = vmov 0  }
0x1902   : > { %v12300_v52 = vadd.f32 %v4541_v14, %v4533_v51  ;;  %4546 = vst [vmem:[#allocation2 + $0x8] sm:$0x2] %v12298_v28  ;;  %v4548_v13 = vpack.c.bf16 %v12298_v28, %v12298_v28 }
0x1904   : > { %4545 = vst [vmem:[#allocation2] sm:$0x2] %v12300_v52  ;;  %v4547_v58 = vpack.c.bf16 %v12300_v52, %v12300_v52  ;;  %v4552_v34 = vunpack.c.l.b16 %v4548_v13 }
0x1906   : > { %v4551_v44 = vunpack.c.l.b16 %v4547_v58 }
0x1908   : > { %v4553_v63 = vrot.slane %v4551_v44, 1 }
0x190a   : > { %v4554_v3 = vsel %vm806_vm2, %v4552_v34, %v4553_v63 }
0x190b   : > { %v4555_v21 = vpack.c.b16 %v4554_v3, %v4554_v3 }
0x190d   : > { %4590 = vmatmul.mubr.bf16.vlgmr.msra.gmra.mrb[12].mxu0 %v4555_v21  ;;  %9009 = vmatmul.mubr.bf16.vlgmr.msra.gmra.mrb[12].mxu1 %v4555_v21 }
0x190e   : > { %4715 = vmatpush1.bf16.msra.mxu0 %v12055_v61  ;;  %9013 = vmatpush3.bf16.msra.mxu1 %v12083_v41 }
0x190f   : > { %4716 = vmatprep.subr.bf16.mxu0 %v12058_v15  ;;  %9014 = vmatprep.subr.bf16.mxu1 %v13467_v55 }
0x1910   : > { %4746 = vmatprep.mubr.bf16.mxu0 %v13472_v22  ;;  %9028 = vmatprep.mubr.msk.bf16.mxu1 %vm10476_vm6, %v13467_v55 }
0x1912   : > { %4717 = vmatpush1.bf16.msra.mxu0 %v12064_v62  ;;  %9015 = vmatpush3.bf16.msra.mxu1 %v12096_v19 }
0x1913   : > { %4718 = vmatprep.subr.bf16.mxu0 %v12068_v6  ;;  %9016 = vmatprep.subr.bf16.mxu1 %v13467_v55 }
0x1916   : > { %4719 = vmatpush1.bf16.msra.mxu0 %v12076_v10  ;;  %9017 = vmatpush3.bf16.msra.mxu1 %v12111_v48 }
0x1917   : > { %4720 = vmatprep.subr.bf16.mxu0 %v12080_v36  ;;  %9018 = vmatprep.subr.bf16.mxu1 %v13467_v55 }
0x191a   : > { %4721 = vmatpush1.bf16.msra.mxu0 %v12088_v40  ;;  %9019 = vmatpush3.bf16.msra.mxu1 %v12124_v11 }
0x191b   : > { %4722 = vmatprep.subr.bf16.mxu0 %v12092_v30  ;;  %9020 = vmatprep.subr.bf16.mxu1 %v13467_v55 }
0x191e   : > { %4723 = vmatpush1.bf16.msra.mxu0 %v12103_v25  ;;  %9021 = vmatpush3.bf16.msra.mxu1 %v12137_v12 }
0x191f   : > { %4724 = vmatprep.subr.bf16.mxu0 %v12107_v18  ;;  %9022 = vmatprep.subr.bf16.mxu1 %v13467_v55 }
0x1922   : > { %4725 = vmatpush1.bf16.msra.mxu0 %v12116_v31  ;;  %9023 = vmatpush3.bf16.msra.mxu1 %v12147_v7 }
0x1923   : > { %4726 = vmatprep.subr.bf16.mxu0 %v12120_v38  ;;  %9024 = vmatprep.subr.bf16.mxu1 %v13467_v55 }
0x1926   : > { %4727 = vmatpush1.bf16.msra.mxu0 %v12129_v23  ;;  %9025 = vmatpush3.bf16.msra.mxu1 %v12153_v2 }
0x1927   : > { %4728 = vmatprep.subr.bf16.mxu0 %v12133_v39  ;;  %9026 = vmatprep.subr.bf16.mxu1 %v13467_v55 }
0x192a   : > { %4729 = vmatpush1.bf16.msra.mxu0 %v12142_v50  ;;  %9027 = vmatpush3.bf16.msra.mxu1 %v12162_v59 }
0x192b   : > { %4871 = vmatprep.subr.bf16.mxu0 %v12050_v4  ;;  %9032 = vmatprep.subr.bf16.mxu1 %v13467_v55 }
0x19e0   : > { %v4591_v46 = vpop.f32.mrb[12].mxu0  ;;  %v4632_v16 = vpop.f32.mrb[12].mxu1 }
0x19e1   : > { %v4592_v17 = vadd.f32 %v4591_v46, %v12224_v20  ;;  %v4593_v14 = vpop.f32.mrb[13].mxu0  ;;  %v9010_v54 = vpop.f32.mrb[13].mxu1 }
0x19e2   : > { %v4594_v32 = vadd.f32 %v4593_v14, %v12227_v43  ;;  %v4595_v27 = vpop.f32.mrb[14].mxu0  ;;  %v4635_v24 = vpop.f32.mrb[14].mxu1 }
0x19e3   : > { %v4639_v53 = vrot.slane %v4592_v17, 6  ;;  %v4640_v35 = vrot.slane %v4592_v17, 7  ;;  %v4596_v51 = vpop.f32.mrb[15].mxu0  ;;  %v9011_v58 = vpop.f32.mrb[15].mxu1 }
0x19e4   : > { %v4658_v13 = vrot.slane %v4594_v32, 6  ;;  %v4659_v44 = vrot.slane %v4594_v32, 7 }
0x19e5   : > { %v4643_v34 = vadd.f32 %v4639_v53, %v12207_v42  ;;  %v4644_v63 = vadd.f32 %v4640_v35, %v12211_v5 }
0x19e6   : > { %v4662_v3 = vadd.f32 %v4658_v13, %v12209_v37  ;;  %v4663_v21 = vadd.f32 %v4659_v44, %v12213_v56  ;;  %v4633_v13 = vadd.f32 %v4632_v16, %v12236_v49 }
0x19e7   : > { %v7989_v46 = vmul.f32 -1.442695, %v4643_v34  ;;  %v7990_v54 = vmul.f32 -1.442695, %v4644_v63 }
0x19e8   : > { %v7991_v55 = vmul.f32 -1.442695, %v4662_v3  ;;  %v7992_v14 = vmul.f32 -1.442695, %v4663_v21  ;;  %v4677_v44 = vrot.slane %v4633_v13, 6  ;;  %v4678_v63 = vrot.slane %v4633_v13, 7 }
0x19e9   : > { %9986 = vpow2.f32 %v7989_v46  ;;  %v4693_v21 = vrot.slane %v12300_v52, 7 }
0x19ea   : > { %9988 = vpow2.f32 %v7990_v54 }
0x19eb   : > { %9990 = vpow2.f32 %v7991_v55 }
0x19ec   : > { %9992 = vpow2.f32 %v7992_v14  ;;  %v4694_v14 = vrot.slane %v12298_v28, 7 }
0x19f3   : > { %v9987_v17 = vpop.eup %9986 }
0x19f4   : > { %v9989_v27 = vpop.eup %9988  ;;  %v4651_v24 = vadd.f32 1.0, %v9987_v17 }
0x19f5   : > { %v9991_v32 = vpop.eup %9990  ;;  %v4652_v51 = vadd.f32 1.0, %v9989_v27 }
0x19f6   : > { %v9993_v53 = vpop.eup %9992  ;;  %9994 = vrcp.f32 %v4651_v24  ;;  %v4670_v35 = vadd.f32 1.0, %v9991_v32 }
0x19f7   : > { %9996 = vrcp.f32 %v4652_v51  ;;  %v4671_v58 = vadd.f32 1.0, %v9993_v53 }
0x19f8   : > { %9998 = vrcp.f32 %v4670_v35 }
0x19f9   : > { %10000 = vrcp.f32 %v4671_v58 }
0x1a00   : > { %v9995_v34 = vpop.eup %9994 }
0x1a01   : > { %v9997_v3 = vpop.eup %9996  ;;  %v4681_v55 = vmul.f32 %v9995_v34, %v4677_v44 }
0x1a02   : > { %v9999_v46 = vpop.eup %9998  ;;  %v4682_v54 = vmul.f32 %v9997_v3, %v4678_v63 }
0x1a03   : > { %v10001_v17 = vpop.eup %10000  ;;  %v4683_v27 = vadd.f32 %v4681_v55, %v12216_v26  ;;  %v4697_v24 = vmul.f32 %v9999_v46, %v4693_v21  ;;  %v4687_v16 = vsub.f32 1.0, %v9999_v46 }
0x1a04   : > { %v4684_v32 = vadd.f32 %v4682_v54, %v12218_v29  ;;  %v4698_v51 = vmul.f32 %v10001_v17, %v4694_v14  ;;  %v4688_v35 = vsub.f32 1.0, %v10001_v17  ;;  %v13473_v17 = vmov 0.0  }
0x1a05   : > { %10002 = vtanh.f32 %v4683_v27 }
0x1a06   : > { %10004 = vtanh.f32 %v4684_v32 }
0x1a0f   : > { %v10003_v53 = vpop.eup %10002 }
0x1a10   : > { %v10005_v58 = vpop.eup %10004  ;;  %v4689_v13 = vmul.f32 %v10003_v53, %v4687_v16 }
0x1a11   : > { %v4690_v44 = vmul.f32 %v10005_v58, %v4688_v35 }
0x1a12   : > { %v12355_v52 = vadd.f32 %v4697_v24, %v4689_v13 }
0x1a13   : > { %v12357_v34 = vadd.f32 %v4698_v51, %v4690_v44 }
0x1a14   : > { %4701 = vst [vmem:[#allocation2] sm:$0x4] %v12355_v52  ;;  %v4703_v28 = vpack.c.bf16 %v12355_v52, %v12355_v52 }
0x1a15   : > { %4702 = vst [vmem:[#allocation2 + $0x8] sm:$0x4] %v12357_v34  ;;  %v4704_v63 = vpack.c.bf16 %v12357_v34, %v12357_v34 }
0x1a16   : > { %v4707_v3 = vunpack.c.l.b16 %v4703_v28 }
0x1a17   : > { %v4708_v55 = vunpack.c.l.b16 %v4704_v63 }
0x1a18   : > { %v4709_v21 = vrot.slane %v4707_v3, 2 }
0x1a19   : > { %v4710_v46 = vrot.slane %v4708_v55, 1 }
0x1a1b   : > { %v4711_v54 = vsel %vm806_vm2, %v4710_v46, %v4709_v21 }
0x1a1c   : > { %v4712_v14 = vpack.c.b16 %v4711_v54, %v4711_v54 }
0x1a1e   : > { %4747 = vmatmul.mubr.bf16.vlgmr.msra.gmra.mrb[16].mxu0 %v4712_v14  ;;  %9029 = vmatmul.mubr.bf16.vlgmr.msra.gmra.mrb[16].mxu1 %v4712_v14 }
0x1a1f   : > { %4872 = vmatpush1.bf16.msra.mxu0 %v12055_v61  ;;  %9033 = vmatpush3.bf16.msra.mxu1 %v12083_v41 }
0x1a20   : > { %4873 = vmatprep.subr.bf16.mxu0 %v12058_v15  ;;  %9034 = vmatprep.subr.bf16.mxu1 %v13473_v17 }
0x1a21   : > { %4903 = vmatprep.mubr.bf16.mxu0 %v13472_v22  ;;  %9048 = vmatprep.mubr.msk.bf16.mxu1 %vm10476_vm6, %v13473_v17 }
0x1a23   : > { %4874 = vmatpush1.bf16.msra.mxu0 %v12064_v62  ;;  %9035 = vmatpush3.bf16.msra.mxu1 %v12096_v19 }
0x1a24   : > { %4875 = vmatprep.subr.bf16.mxu0 %v12068_v6  ;;  %9036 = vmatprep.subr.bf16.mxu1 %v13473_v17 }
0x1a27   : > { %4876 = vmatpush1.bf16.msra.mxu0 %v12076_v10  ;;  %9037 = vmatpush3.bf16.msra.mxu1 %v12111_v48 }
0x1a28   : > { %4877 = vmatprep.subr.bf16.mxu0 %v12080_v36  ;;  %9038 = vmatprep.subr.bf16.mxu1 %v13473_v17 }
0x1a2b   : > { %4878 = vmatpush1.bf16.msra.mxu0 %v12088_v40  ;;  %9039 = vmatpush3.bf16.msra.mxu1 %v12124_v11 }
0x1a2c   : > { %4879 = vmatprep.subr.bf16.mxu0 %v12092_v30  ;;  %9040 = vmatprep.subr.bf16.mxu1 %v13473_v17 }
0x1a2f   : > { %4880 = vmatpush1.bf16.msra.mxu0 %v12103_v25  ;;  %9041 = vmatpush3.bf16.msra.mxu1 %v12137_v12 }
0x1a30   : > { %4881 = vmatprep.subr.bf16.mxu0 %v12107_v18  ;;  %9042 = vmatprep.subr.bf16.mxu1 %v13473_v17 }
0x1a33   : > { %4882 = vmatpush1.bf16.msra.mxu0 %v12116_v31  ;;  %9043 = vmatpush3.bf16.msra.mxu1 %v12147_v7 }
0x1a34   : > { %4883 = vmatprep.subr.bf16.mxu0 %v12120_v38  ;;  %9044 = vmatprep.subr.bf16.mxu1 %v13473_v17 }
0x1a37   : > { %4884 = vmatpush1.bf16.msra.mxu0 %v12129_v23  ;;  %9045 = vmatpush3.bf16.msra.mxu1 %v12153_v2 }
0x1a38   : > { %4885 = vmatprep.subr.bf16.mxu0 %v12133_v39  ;;  %9046 = vmatprep.subr.bf16.mxu1 %v13473_v17 }
0x1a3b   : > { %4886 = vmatpush1.bf16.msra.mxu0 %v12142_v50  ;;  %9047 = vmatpush3.bf16.msra.mxu1 %v12162_v59 }
0x1a3c   : > { %5028 = vmatprep.subr.bf16.mxu0 %v12050_v4  ;;  %9052 = vmatprep.subr.bf16.mxu1 %v13473_v17 }
0x1af1   : > { %v4748_v61 = vpop.f32.mrb[16].mxu0  ;;  %v4789_v15 = vpop.f32.mrb[16].mxu1 }
0x1af2   : > { %v4749_v62 = vadd.f32 %v4748_v61, %v12224_v20  ;;  %v4750_v6 = vpop.f32.mrb[17].mxu0  ;;  %v9030_v10 = vpop.f32.mrb[17].mxu1 }
0x1af3   : > { %v4751_v36 = vadd.f32 %v4750_v6, %v12227_v43  ;;  %v4752_v40 = vpop.f32.mrb[18].mxu0  ;;  %v4792_v27 = vpop.f32.mrb[18].mxu1 }
0x1af4   : > { %v4796_v24 = vrot.slane %v4749_v62, 5  ;;  %v4797_v32 = vrot.slane %v4749_v62, 6  ;;  %v4753_v51 = vpop.f32.mrb[19].mxu0  ;;  %v9031_v16 = vpop.f32.mrb[19].mxu1 }
0x1af5   : > { %v4815_v53 = vrot.slane %v4751_v36, 5  ;;  %v4816_v35 = vrot.slane %v4751_v36, 6  ;;  %v4790_v36 = vadd.f32 %v4789_v15, %v12236_v49  ;;  %v4850_v16 = vrot.slane %v12355_v52, 7 }
0x1af6   : > { %v4800_v4 = vadd.f32 %v4796_v24, %v12207_v42  ;;  %v4801_v58 = vadd.f32 %v4797_v32, %v12211_v5 }
0x1af7   : > { %v4819_v13 = vadd.f32 %v4815_v53, %v12209_v37  ;;  %v4820_v44 = vadd.f32 %v4816_v35, %v12213_v56  ;;  %v4834_v40 = vrot.slane %v4790_v36, 5  ;;  %v4835_v24 = vrot.slane %v4790_v36, 6 }
0x1af8   : > { %v7993_v28 = vmul.f32 -1.442695, %v4800_v4  ;;  %v7994_v63 = vmul.f32 -1.442695, %v4801_v58  ;;  %v4851_v4 = vrot.slane %v12357_v34, 7 }
0x1af9   : > { %v7995_v3 = vmul.f32 -1.442695, %v4819_v13  ;;  %v7996_v55 = vmul.f32 -1.442695, %v4820_v44 }
0x1afa   : > { %10006 = vpow2.f32 %v7993_v28 }
0x1afb   : > { %10008 = vpow2.f32 %v7994_v63 }
0x1afc   : > { %10010 = vpow2.f32 %v7995_v3 }
0x1afd   : > { %10012 = vpow2.f32 %v7996_v55 }
0x1b04   : > { %v10007_v21 = vpop.eup %10006 }
0x1b05   : > { %v10009_v46 = vpop.eup %10008  ;;  %v4808_v54 = vadd.f32 1.0, %v10007_v21 }
0x1b06   : > { %v10011_v14 = vpop.eup %10010  ;;  %v4809_v61 = vadd.f32 1.0, %v10009_v46 }
0x1b07   : > { %v10013_v62 = vpop.eup %10012  ;;  %10014 = vrcp.f32 %v4808_v54  ;;  %v4827_v6 = vadd.f32 1.0, %v10011_v14 }
0x1b08   : > { %10016 = vrcp.f32 %v4809_v61  ;;  %v4828_v10 = vadd.f32 1.0, %v10013_v62 }
0x1b09   : > { %10018 = vrcp.f32 %v4827_v6 }
0x1b0a   : > { %10020 = vrcp.f32 %v4828_v10 }
0x1b11   : > { %v10015_v27 = vpop.eup %10014 }
0x1b12   : > { %v10017_v32 = vpop.eup %10016  ;;  %v4838_v51 = vmul.f32 %v10015_v27, %v4834_v40 }
0x1b13   : > { %v10019_v53 = vpop.eup %10018  ;;  %v4839_v35 = vmul.f32 %v10017_v32, %v4835_v24  ;;  %v12424_v24 = vld [vmem:[%s12030_s20 + $0x300] ss:$12 sps:$4 sm:$0xff]   ;;  %v12429_v32 = vld [vmem:[%s12030_s20 + $0x31c] ss:$12 sps:$4 sm:$0xff]  }
0x1b14   : > { %v10021_v58 = vpop.eup %10020  ;;  %v4840_v13 = vadd.f32 %v4838_v51, %v12216_v26  ;;  %v4854_v44 = vmul.f32 %v10019_v53, %v4850_v16  ;;  %v4844_v15 = vsub.f32 1.0, %v10019_v53  ;;  %v12437_v51 = vld [vmem:[%s12030_s20 + $0x318] ss:$12 sps:$4 sm:$0xff]   ;;  %v12442_v16 = vld [vmem:[%s12030_s20 + $0x334] ss:$12 sps:$4 sm:$0xff]  }
0x1b15   : > { %v4841_v28 = vadd.f32 %v4839_v35, %v12218_v29  ;;  %v4855_v63 = vmul.f32 %v10021_v58, %v4851_v4  ;;  %v4845_v55 = vsub.f32 1.0, %v10021_v58  ;;  %v12452_v53 = vld [vmem:[%s12030_s20 + $0x34c] ss:$12 sps:$4 sm:$0xff]   ;;  %v12457_v35 = vld [vmem:[%s12030_s20 + $0x348] ss:$12 sps:$4 sm:$0xff]  }
0x1b16   : > { %10022 = vtanh.f32 %v4840_v13 }
0x1b17   : > { %10024 = vtanh.f32 %v4841_v28 }
0x1b20   : > { %v10023_v3 = vpop.eup %10022 }
0x1b21   : > { %v10025_v21 = vpop.eup %10024  ;;  %v4846_v46 = vmul.f32 %v10023_v3, %v4844_v15 }
0x1b22   : > { %v4847_v52 = vmul.f32 %v10025_v21, %v4845_v55 }
0x1b23   : > { %v12412_v54 = vadd.f32 %v4854_v44, %v4846_v46 }
0x1b24   : > { %v12414_v14 = vadd.f32 %v4855_v63, %v4847_v52 }
0x1b25   : > { %4858 = vst [vmem:[#allocation2] sm:$0x8] %v12412_v54  ;;  %v4860_v34 = vpack.c.bf16 %v12412_v54, %v12412_v54 }
0x1b26   : > { %4859 = vst [vmem:[#allocation2 + $0x8] sm:$0x8] %v12414_v14  ;;  %v4861_v61 = vpack.c.bf16 %v12414_v14, %v12414_v14 }
0x1b27   : > { %v4864_v62 = vunpack.c.l.b16 %v4860_v34 }
0x1b28   : > { %v4865_v6 = vunpack.c.l.b16 %v4861_v61 }
0x1b29   : > { %v4866_v10 = vrot.slane %v4864_v62, 3 }
0x1b2a   : > { %v4867_v36 = vrot.slane %v4865_v6, 2 }
0x1b2c   : > { %v4868_v40 = vsel %vm806_vm2, %v4867_v36, %v4866_v10 }
0x1b2d   : > { %v4869_v27 = vpack.c.b16 %v4868_v40, %v4868_v40 }
0x1b2f   : > { %4904 = vmatmul.mubr.bf16.vlgmr.msra.gmra.mrb[20].mxu0 %v4869_v27  ;;  %9049 = vmatmul.mubr.bf16.vlgmr.msra.gmra.mrb[20].mxu1 %v4869_v27 }
0x1b30   : > { %5029 = vmatpush1.bf16.msra.mxu0 %v12424_v24  ;;  %9053 = vmatpush3.bf16.msra.mxu1 %v12083_v41  ;;  %v12447_v41 = vld [vmem:[%s12030_s20 + $0x330] ss:$12 sps:$4 sm:$0xff]  }
0x1b31   : > { %5030 = vmatprep.subr.bf16.mxu0 %v12429_v32  ;;  %9054 = vmatprep.subr.bf16.mxu1 %v13473_v17 }
0x1b32   : > { %5060 = vmatprep.mubr.bf16.mxu0 %v13472_v22  ;;  %9068 = vmatprep.mubr.msk.bf16.mxu1 %vm10476_vm6, %v13473_v17 }
0x1b34   : > { %5031 = vmatpush1.bf16.msra.mxu0 %v12437_v51  ;;  %9055 = vmatpush3.bf16.msra.mxu1 %v12096_v19 }
0x1b35   : > { %5032 = vmatprep.subr.bf16.mxu0 %v12442_v16  ;;  %9056 = vmatprep.subr.bf16.mxu1 %v13473_v17 }
0x1b38   : > { %5033 = vmatpush1.bf16.msra.mxu0 %v12447_v41  ;;  %9057 = vmatpush3.bf16.msra.mxu1 %v12111_v48 }
0x1b39   : > { %5034 = vmatprep.subr.bf16.mxu0 %v12452_v53  ;;  %9058 = vmatprep.subr.bf16.mxu1 %v13473_v17 }
0x1b3c   : > { %5035 = vmatpush1.bf16.msra.mxu0 %v12457_v35  ;;  %9059 = vmatpush3.bf16.msra.mxu1 %v12124_v11 }
0x1b3d   : > { %5036 = vmatprep.subr.bf16.mxu0 %v12092_v30  ;;  %9060 = vmatprep.subr.bf16.mxu1 %v13473_v17  ;;  %v12478_v30 = vld [vmem:[%s12030_s20 + $0x304] ss:$12 sps:$4 sm:$0xff]  }
0x1b40   : > { %5037 = vmatpush1.bf16.msra.mxu0 %v12103_v25  ;;  %9061 = vmatpush3.bf16.msra.mxu1 %v12137_v12 }
0x1b41   : > { %5038 = vmatprep.subr.bf16.mxu0 %v12107_v18  ;;  %9062 = vmatprep.subr.bf16.mxu1 %v13473_v17 }
0x1b44   : > { %5039 = vmatpush1.bf16.msra.mxu0 %v12116_v31  ;;  %9063 = vmatpush3.bf16.msra.mxu1 %v12147_v7 }
0x1b45   : > { %5040 = vmatprep.subr.bf16.mxu0 %v12120_v38  ;;  %9064 = vmatprep.subr.bf16.mxu1 %v13473_v17 }
0x1b48   : > { %5041 = vmatpush1.bf16.msra.mxu0 %v12129_v23  ;;  %9065 = vmatpush3.bf16.msra.mxu1 %v12153_v2 }
0x1b49   : > { %5042 = vmatprep.subr.bf16.mxu0 %v12133_v39  ;;  %9066 = vmatprep.subr.bf16.mxu1 %v13473_v17 }
0x1b4c   : > { %5043 = vmatpush1.bf16.msra.mxu0 %v12142_v50  ;;  %9067 = vmatpush3.bf16.msra.mxu1 %v12162_v59 }
0x1b4d   : > { %5185 = vmatprep.subr.bf16.mxu0 %v12478_v30  ;;  %9072 = vmatprep.subr.bf16.mxu1 %v13473_v17 }
0x1c02   : > { %v4905_v19 = vpop.f32.mrb[20].mxu0  ;;  %v4946_v25 = vpop.f32.mrb[20].mxu1 }
0x1c03   : > { %v4906_v18 = vadd.f32 %v4905_v19, %v12224_v20  ;;  %v4907_v48 = vpop.f32.mrb[21].mxu0  ;;  %v9050_v31 = vpop.f32.mrb[21].mxu1  ;;  %v4947_v10 = vadd.f32 %v4946_v25, %v12236_v49 }
0x1c04   : > { %v4908_v38 = vadd.f32 %v4907_v48, %v12227_v43  ;;  %v4909_v11 = vpop.f32.mrb[22].mxu0  ;;  %v4949_v23 = vpop.f32.mrb[22].mxu1  ;;  %v5007_v48 = vrot.slane %v12412_v54, 7 }
0x1c05   : > { %v4953_v39 = vrot.slane %v4906_v18, 4  ;;  %v4954_v12 = vrot.slane %v4906_v18, 5  ;;  %v4910_v50 = vpop.f32.mrb[23].mxu0  ;;  %v9051_v7 = vpop.f32.mrb[23].mxu1  ;;  %v4991_v36 = vrot.slane %v4947_v10, 4  ;;  %v4992_v27 = vrot.slane %v4947_v10, 5 }
0x1c06   : > { %v4972_v2 = vrot.slane %v4908_v38, 4  ;;  %v4973_v59 = vrot.slane %v4908_v38, 5  ;;  %v5008_v11 = vrot.slane %v12414_v14, 7  ;;  %v12539_v10 = vld [vmem:[%s12030_s20 + $0x360] ss:$12 sps:$4 sm:$0xff]  }
0x1c07   : > { %v4957_v4 = vadd.f32 %v4953_v39, %v12207_v42  ;;  %v4958_v58 = vadd.f32 %v4954_v12, %v12211_v5 }
0x1c08   : > { %v4976_v13 = vadd.f32 %v4972_v2, %v12209_v37  ;;  %v4977_v44 = vadd.f32 %v4973_v59, %v12213_v56 }
0x1c09   : > { %v7997_v28 = vmul.f32 -1.442695, %v4957_v4  ;;  %v7998_v63 = vmul.f32 -1.442695, %v4958_v58 }
0x1c0a   : > { %v7999_v15 = vmul.f32 -1.442695, %v4976_v13  ;;  %v8000_v3 = vmul.f32 -1.442695, %v4977_v44 }
0x1c0b   : > { %10026 = vpow2.f32 %v7997_v28 }
0x1c0c   : > { %10028 = vpow2.f32 %v7998_v63 }
0x1c0d   : > { %10030 = vpow2.f32 %v7999_v15 }
0x1c0e   : > { %10032 = vpow2.f32 %v8000_v3 }
0x1c15   : > { %v10027_v55 = vpop.eup %10026 }
0x1c16   : > { %v10029_v21 = vpop.eup %10028  ;;  %v4965_v46 = vadd.f32 1.0, %v10027_v55 }
0x1c17   : > { %v10031_v52 = vpop.eup %10030  ;;  %v4966_v34 = vadd.f32 1.0, %v10029_v21 }
0x1c18   : > { %v10033_v61 = vpop.eup %10032  ;;  %10034 = vrcp.f32 %v4965_v46  ;;  %v4984_v62 = vadd.f32 1.0, %v10031_v52  ;;  %v12506_v52 = vld [vmem:[%s12030_s20 + $0x308] ss:$12 sps:$4 sm:$0xff]  }
0x1c19   : > { %10036 = vrcp.f32 %v4966_v34  ;;  %v4985_v6 = vadd.f32 1.0, %v10033_v61  ;;  %v12516_v34 = vld [vmem:[%s12030_s20 + $0x320] ss:$12 sps:$4 sm:$0xff]   ;;  %v12523_v61 = vld [vmem:[%s12030_s20 + $0x338] ss:$12 sps:$4 sm:$0xff]  }
0x1c1a   : > { %10038 = vrcp.f32 %v4984_v62  ;;  %v12530_v62 = vld [vmem:[%s12030_s20 + $0x350] ss:$12 sps:$4 sm:$0xff]  }
0x1c1b   : > { %10040 = vrcp.f32 %v4985_v6  ;;  %v12534_v6 = vld [vmem:[%s12030_s20 + $0x364] ss:$12 sps:$4 sm:$0xff]  }
0x1c22   : > { %v10035_v40 = vpop.eup %10034 }
0x1c23   : > { %v10037_v19 = vpop.eup %10036  ;;  %v4995_v18 = vmul.f32 %v10035_v40, %v4991_v36  ;;  %v12543_v36 = vld [vmem:[%s12030_s20 + $0x368] ss:$12 sps:$4 sm:$0xff]  }
0x1c24   : > { %v10039_v31 = vpop.eup %10038  ;;  %v4996_v38 = vmul.f32 %v10037_v19, %v4992_v27  ;;  %v12547_v40 = vld [vmem:[%s12030_s20 + $0x37c] ss:$12 sps:$4 sm:$0xff]   ;;  %v12552_v27 = vld [vmem:[%s12030_s20 + $0x378] ss:$12 sps:$4 sm:$0xff]   ;;  %v12556_v19 = vld [vmem:[%s12030_s20 + $0x380] ss:$12 sps:$4 sm:$0xff]  }
0x1c25   : > { %v10041_v23 = vpop.eup %10040  ;;  %v4997_v39 = vadd.f32 %v4995_v18, %v12216_v26  ;;  %v5011_v12 = vmul.f32 %v10039_v31, %v5007_v48  ;;  %v5001_v25 = vsub.f32 1.0, %v10039_v31  ;;  %v12560_v18 = vld [vmem:[%s12030_s20 + $0x394] ss:$12 sps:$4 sm:$0xff]   ;;  %v12565_v48 = vld [vmem:[%s12030_s20 + $0x390] ss:$12 sps:$4 sm:$0xff]  }
0x1c26   : > { %v4998_v50 = vadd.f32 %v4996_v38, %v12218_v29  ;;  %v5012_v7 = vmul.f32 %v10041_v23, %v5008_v11  ;;  %v5002_v59 = vsub.f32 1.0, %v10041_v23  ;;  %v12569_v31 = vld [vmem:[%s12030_s20 + $0x398] ss:$12 sps:$4 sm:$0xff]   ;;  %v12578_v11 = vld [vmem:[%s12030_s20 + $0x3a8] ss:$12 sps:$4 sm:$0xff]  }
0x1c27   : > { %10042 = vtanh.f32 %v4997_v39  ;;  %v12573_v38 = vld [vmem:[%s12030_s20 + $0x3ac] ss:$12 sps:$4 sm:$0xff]   ;;  %v12582_v23 = vld [vmem:[%s12030_s20 + $0x3b0] ss:$12 sps:$4 sm:$0xff]  }
0x1c28   : > { %10044 = vtanh.f32 %v4998_v50 }
0x1c31   : > { %v10043_v2 = vpop.eup %10042 }
0x1c32   : > { %v10045_v4 = vpop.eup %10044  ;;  %v5003_v58 = vmul.f32 %v10043_v2, %v5001_v25 }
0x1c33   : > { %v5004_v13 = vmul.f32 %v10045_v4, %v5002_v59 }
0x1c34   : > { %v12493_v54 = vadd.f32 %v5011_v12, %v5003_v58 }
0x1c35   : > { %v12495_v44 = vadd.f32 %v5012_v7, %v5004_v13 }
0x1c36   : > { %5015 = vst [vmem:[#allocation2] sm:$0x10] %v12493_v54  ;;  %v5017_v14 = vpack.c.bf16 %v12493_v54, %v12493_v54 }
0x1c37   : > { %5016 = vst [vmem:[#allocation2 + $0x8] sm:$0x10] %v12495_v44  ;;  %v5018_v28 = vpack.c.bf16 %v12495_v44, %v12495_v44 }
0x1c38   : > { %v5021_v63 = vunpack.c.l.b16 %v5017_v14 }
0x1c39   : > { %v5022_v15 = vunpack.c.l.b16 %v5018_v28 }
0x1c3a   : > { %v5023_v3 = vrot.slane %v5021_v63, 4 }
0x1c3b   : > { %v5024_v55 = vrot.slane %v5022_v15, 3 }
0x1c3d   : > { %v5025_v21 = vsel %vm806_vm2, %v5024_v55, %v5023_v3 }
0x1c3e   : > { %v5026_v46 = vpack.c.b16 %v5025_v21, %v5025_v21 }
0x1c40   : > { %5061 = vmatmul.mubr.bf16.vlgmr.msra.gmra.mrb[24].mxu0 %v5026_v46  ;;  %9069 = vmatmul.mubr.bf16.vlgmr.msra.gmra.mrb[24].mxu1 %v5026_v46 }
0x1c41   : > { %5186 = vmatpush1.bf16.msra.mxu0 %v12424_v24  ;;  %9073 = vmatpush3.bf16.msra.mxu1 %v12506_v52 }
0x1c42   : > { %5187 = vmatprep.subr.bf16.mxu0 %v12429_v32  ;;  %9074 = vmatprep.subr.bf16.mxu1 %v13473_v17 }
0x1c43   : > { %5217 = vmatprep.mubr.bf16.mxu0 %v13472_v22  ;;  %9088 = vmatprep.mubr.msk.bf16.mxu1 %vm10476_vm6, %v13473_v17 }
0x1c45   : > { %5188 = vmatpush1.bf16.msra.mxu0 %v12437_v51  ;;  %9075 = vmatpush3.bf16.msra.mxu1 %v12516_v34 }
0x1c46   : > { %5189 = vmatprep.subr.bf16.mxu0 %v12442_v16  ;;  %9076 = vmatprep.subr.bf16.mxu1 %v13473_v17 }
0x1c49   : > { %5190 = vmatpush1.bf16.msra.mxu0 %v12447_v41  ;;  %9077 = vmatpush3.bf16.msra.mxu1 %v12523_v61 }
0x1c4a   : > { %5191 = vmatprep.subr.bf16.mxu0 %v12452_v53  ;;  %9078 = vmatprep.subr.bf16.mxu1 %v13473_v17 }
0x1c4d   : > { %5192 = vmatpush1.bf16.msra.mxu0 %v12457_v35  ;;  %9079 = vmatpush3.bf16.msra.mxu1 %v12530_v62 }
0x1c4e   : > { %5193 = vmatprep.subr.bf16.mxu0 %v12534_v6  ;;  %9080 = vmatprep.subr.bf16.mxu1 %v13473_v17 }
0x1c51   : > { %5194 = vmatpush1.bf16.msra.mxu0 %v12539_v10  ;;  %9081 = vmatpush3.bf16.msra.mxu1 %v12543_v36 }
0x1c52   : > { %5195 = vmatprep.subr.bf16.mxu0 %v12547_v40  ;;  %9082 = vmatprep.subr.bf16.mxu1 %v13473_v17 }
0x1c55   : > { %5196 = vmatpush1.bf16.msra.mxu0 %v12552_v27  ;;  %9083 = vmatpush3.bf16.msra.mxu1 %v12556_v19 }
0x1c56   : > { %5197 = vmatprep.subr.bf16.mxu0 %v12560_v18  ;;  %9084 = vmatprep.subr.bf16.mxu1 %v13473_v17 }
0x1c59   : > { %5198 = vmatpush1.bf16.msra.mxu0 %v12565_v48  ;;  %9085 = vmatpush3.bf16.msra.mxu1 %v12569_v31 }
0x1c5a   : > { %5199 = vmatprep.subr.bf16.mxu0 %v12573_v38  ;;  %9086 = vmatprep.subr.bf16.mxu1 %v13473_v17 }
0x1c5d   : > { %5200 = vmatpush1.bf16.msra.mxu0 %v12578_v11  ;;  %9087 = vmatpush3.bf16.msra.mxu1 %v12582_v23 }
0x1c5e   : > { %5342 = vmatprep.subr.bf16.mxu0 %v12478_v30  ;;  %9092 = vmatprep.subr.bf16.mxu1 %v13473_v17 }
0x1d13   : > { %v5062_v39 = vpop.f32.mrb[24].mxu0  ;;  %v5103_v12 = vpop.f32.mrb[24].mxu1 }
0x1d14   : > { %v5063_v50 = vadd.f32 %v5062_v39, %v12224_v20  ;;  %v5064_v7 = vpop.f32.mrb[25].mxu0  ;;  %v9070_v25 = vpop.f32.mrb[25].mxu1 }
0x1d15   : > { %v5065_v2 = vadd.f32 %v5064_v7, %v12227_v43  ;;  %v5066_v59 = vpop.f32.mrb[26].mxu0  ;;  %v5106_v4 = vpop.f32.mrb[26].mxu1 }
0x1d16   : > { %v5110_v58 = vrot.slane %v5063_v50, 3  ;;  %v5111_v13 = vrot.slane %v5063_v50, 4  ;;  %v5067_v14 = vpop.f32.mrb[27].mxu0  ;;  %v9071_v28 = vpop.f32.mrb[27].mxu1 }
0x1d17   : > { %v5129_v63 = vrot.slane %v5065_v2, 3  ;;  %v5130_v15 = vrot.slane %v5065_v2, 4 }
0x1d18   : > { %v5114_v30 = vadd.f32 %v5110_v58, %v12207_v42  ;;  %v5115_v3 = vadd.f32 %v5111_v13, %v12211_v5 }
0x1d19   : > { %v5133_v55 = vadd.f32 %v5129_v63, %v12209_v37  ;;  %v5134_v21 = vadd.f32 %v5130_v15, %v12213_v56  ;;  %v5104_v63 = vadd.f32 %v5103_v12, %v12236_v49 }
0x1d1a   : > { %v8001_v46 = vmul.f32 -1.442695, %v5114_v30  ;;  %v8002_v39 = vmul.f32 -1.442695, %v5115_v3 }
0x1d1b   : > { %v8003_v25 = vmul.f32 -1.442695, %v5133_v55  ;;  %v8004_v7 = vmul.f32 -1.442695, %v5134_v21  ;;  %v5148_v15 = vrot.slane %v5104_v63, 3  ;;  %v5149_v3 = vrot.slane %v5104_v63, 4 }
0x1d1c   : > { %10046 = vpow2.f32 %v8001_v46  ;;  %v5164_v46 = vrot.slane %v12493_v54, 7 }
0x1d1d   : > { %10048 = vpow2.f32 %v8002_v39 }
0x1d1e   : > { %10050 = vpow2.f32 %v8003_v25 }
0x1d1f   : > { %10052 = vpow2.f32 %v8004_v7  ;;  %v5165_v7 = vrot.slane %v12495_v44, 7 }
0x1d26   : > { %v10047_v50 = vpop.eup %10046 }
0x1d27   : > { %v10049_v59 = vpop.eup %10048  ;;  %v5122_v4 = vadd.f32 1.0, %v10047_v50 }
0x1d28   : > { %v10051_v2 = vpop.eup %10050  ;;  %v5123_v14 = vadd.f32 1.0, %v10049_v59 }
0x1d29   : > { %v10053_v58 = vpop.eup %10052  ;;  %10054 = vrcp.f32 %v5122_v4  ;;  %v5141_v13 = vadd.f32 1.0, %v10051_v2 }
0x1d2a   : > { %10056 = vrcp.f32 %v5123_v14  ;;  %v5142_v28 = vadd.f32 1.0, %v10053_v58 }
0x1d2b   : > { %10058 = vrcp.f32 %v5141_v13 }
0x1d2c   : > { %10060 = vrcp.f32 %v5142_v28 }
0x1d33   : > { %v10055_v30 = vpop.eup %10054 }
0x1d34   : > { %v10057_v55 = vpop.eup %10056  ;;  %v5152_v21 = vmul.f32 %v10055_v30, %v5148_v15 }
0x1d35   : > { %v10059_v39 = vpop.eup %10058  ;;  %v5153_v25 = vmul.f32 %v10057_v55, %v5149_v3 }
0x1d36   : > { %v10061_v50 = vpop.eup %10060  ;;  %v5154_v59 = vadd.f32 %v5152_v21, %v12216_v26  ;;  %v5168_v4 = vmul.f32 %v10059_v39, %v5164_v46  ;;  %v5158_v12 = vsub.f32 1.0, %v10059_v39 }
0x1d37   : > { %v5155_v2 = vadd.f32 %v5153_v25, %v12218_v29  ;;  %v5169_v14 = vmul.f32 %v10061_v50, %v5165_v7  ;;  %v5159_v13 = vsub.f32 1.0, %v10061_v50 }
0x1d38   : > { %10062 = vtanh.f32 %v5154_v59 }
0x1d39   : > { %10064 = vtanh.f32 %v5155_v2 }
0x1d42   : > { %v10063_v58 = vpop.eup %10062 }
0x1d43   : > { %v10065_v28 = vpop.eup %10064  ;;  %v5160_v63 = vmul.f32 %v10063_v58, %v5158_v12 }
0x1d44   : > { %v5161_v15 = vmul.f32 %v10065_v28, %v5159_v13 }
0x1d45   : > { %v12598_v54 = vadd.f32 %v5168_v4, %v5160_v63 }
0x1d46   : > { %v12600_v30 = vadd.f32 %v5169_v14, %v5161_v15 }
0x1d47   : > { %5172 = vst [vmem:[#allocation2] sm:$0x20] %v12598_v54  ;;  %v5174_v44 = vpack.c.bf16 %v12598_v54, %v12598_v54 }
0x1d48   : > { %5173 = vst [vmem:[#allocation2 + $0x8] sm:$0x20] %v12600_v30  ;;  %v5175_v3 = vpack.c.bf16 %v12600_v30, %v12600_v30 }
0x1d49   : > { %v5178_v55 = vunpack.c.l.b16 %v5174_v44  ;;  %v5321_v44 = vrot.slane %v12598_v54, 7 }
0x1d4a   : > { %v5179_v21 = vunpack.c.l.b16 %v5175_v3 }
0x1d4b   : > { %v5180_v46 = vrot.slane %v5178_v55, 5 }
0x1d4c   : > { %v5181_v39 = vrot.slane %v5179_v21, 4  ;;  %v5322_v21 = vrot.slane %v12600_v30, 7 }
0x1d4e   : > { %v5182_v25 = vsel %vm806_vm2, %v5181_v39, %v5180_v46 }
0x1d4f   : > { %v5183_v7 = vpack.c.b16 %v5182_v25, %v5182_v25 }
0x1d51   : > { %5218 = vmatmul.mubr.bf16.vlgmr.msra.gmra.mrb[28].mxu0 %v5183_v7  ;;  %9089 = vmatmul.mubr.bf16.vlgmr.msra.gmra.mrb[28].mxu1 %v5183_v7 }
0x1d52   : > { %5343 = vmatpush1.bf16.msra.mxu0 %v12424_v24  ;;  %9093 = vmatpush3.bf16.msra.mxu1 %v12506_v52 }
0x1d53   : > { %5344 = vmatprep.subr.bf16.mxu0 %v12429_v32  ;;  %9094 = vmatprep.subr.bf16.mxu1 %v13473_v17 }
0x1d54   : > { %5374 = vmatprep.mubr.bf16.mxu0 %v13472_v22  ;;  %9108 = vmatprep.mubr.msk.bf16.mxu1 %vm10476_vm6, %v13473_v17 }
0x1d56   : > { %5345 = vmatpush1.bf16.msra.mxu0 %v12437_v51  ;;  %9095 = vmatpush3.bf16.msra.mxu1 %v12516_v34 }
0x1d57   : > { %5346 = vmatprep.subr.bf16.mxu0 %v12442_v16  ;;  %9096 = vmatprep.subr.bf16.mxu1 %v13473_v17 }
0x1d5a   : > { %5347 = vmatpush1.bf16.msra.mxu0 %v12447_v41  ;;  %9097 = vmatpush3.bf16.msra.mxu1 %v12523_v61 }
0x1d5b   : > { %5348 = vmatprep.subr.bf16.mxu0 %v12452_v53  ;;  %9098 = vmatprep.subr.bf16.mxu1 %v13473_v17 }
0x1d5e   : > { %5349 = vmatpush1.bf16.msra.mxu0 %v12457_v35  ;;  %9099 = vmatpush3.bf16.msra.mxu1 %v12530_v62 }
0x1d5f   : > { %5350 = vmatprep.subr.bf16.mxu0 %v12534_v6  ;;  %9100 = vmatprep.subr.bf16.mxu1 %v13473_v17 }
0x1d62   : > { %5351 = vmatpush1.bf16.msra.mxu0 %v12539_v10  ;;  %9101 = vmatpush3.bf16.msra.mxu1 %v12543_v36 }
0x1d63   : > { %5352 = vmatprep.subr.bf16.mxu0 %v12547_v40  ;;  %9102 = vmatprep.subr.bf16.mxu1 %v13473_v17 }
0x1d66   : > { %5353 = vmatpush1.bf16.msra.mxu0 %v12552_v27  ;;  %9103 = vmatpush3.bf16.msra.mxu1 %v12556_v19 }
0x1d67   : > { %5354 = vmatprep.subr.bf16.mxu0 %v12560_v18  ;;  %9104 = vmatprep.subr.bf16.mxu1 %v13473_v17 }
0x1d6a   : > { %5355 = vmatpush1.bf16.msra.mxu0 %v12565_v48  ;;  %9105 = vmatpush3.bf16.msra.mxu1 %v12569_v31 }
0x1d6b   : > { %5356 = vmatprep.subr.bf16.mxu0 %v12573_v38  ;;  %9106 = vmatprep.subr.bf16.mxu1 %v13473_v17 }
0x1d6e   : > { %5357 = vmatpush1.bf16.msra.mxu0 %v12578_v11  ;;  %9107 = vmatpush3.bf16.msra.mxu1 %v12582_v23 }
0x1e24   : > { %v5219_v22 = vpop.f32.mrb[28].mxu0  ;;  %v5260_v24 = vpop.f32.mrb[28].mxu1 }
0x1e25   : > { %v5220_v32 = vadd.f32 %v5219_v22, %v12224_v20  ;;  %v5221_v51 = vpop.f32.mrb[29].mxu0  ;;  %v9090_v16 = vpop.f32.mrb[29].mxu1  ;;  %v5261_v12 = vadd.f32 %v5260_v24, %v12236_v49 }
0x1e26   : > { %v5222_v41 = vadd.f32 %v5221_v51, %v12227_v43  ;;  %v5223_v53 = vpop.f32.mrb[30].mxu0  ;;  %v5263_v35 = vpop.f32.mrb[30].mxu1 }
0x1e27   : > { %v5267_v52 = vrot.slane %v5220_v32, 2  ;;  %v5268_v34 = vrot.slane %v5220_v32, 3  ;;  %v5224_v61 = vpop.f32.mrb[31].mxu0  ;;  %v9091_v62 = vpop.f32.mrb[31].mxu1  ;;  %v5305_v58 = vrot.slane %v5261_v12, 2  ;;  %v5306_v28 = vrot.slane %v5261_v12, 3 }
0x1e28   : > { %v5286_v6 = vrot.slane %v5222_v41, 2  ;;  %v5287_v17 = vrot.slane %v5222_v41, 3 }
0x1e29   : > { %v5271_v10 = vadd.f32 %v5267_v52, %v12207_v42  ;;  %v5272_v36 = vadd.f32 %v5268_v34, %v12211_v5 }
0x1e2a   : > { %v5290_v40 = vadd.f32 %v5286_v6, %v12209_v37  ;;  %v5291_v27 = vadd.f32 %v5287_v17, %v12213_v56 }
0x1e2b   : > { %v8005_v19 = vmul.f32 -1.442695, %v5271_v10  ;;  %v8006_v18 = vmul.f32 -1.442695, %v5272_v36 }
0x1e2c   : > { %v8007_v48 = vmul.f32 -1.442695, %v5290_v40  ;;  %v8008_v31 = vmul.f32 -1.442695, %v5291_v27 }
0x1e2d   : > { %10066 = vpow2.f32 %v8005_v19 }
0x1e2e   : > { %10068 = vpow2.f32 %v8006_v18 }
0x1e2f   : > { %10070 = vpow2.f32 %v8007_v48 }
0x1e30   : > { %10072 = vpow2.f32 %v8008_v31 }
0x1e37   : > { %v10067_v38 = vpop.eup %10066 }
0x1e38   : > { %v10069_v11 = vpop.eup %10068  ;;  %v5279_v23 = vadd.f32 1.0, %v10067_v38 }
0x1e39   : > { %v10071_v50 = vpop.eup %10070  ;;  %v5280_v59 = vadd.f32 1.0, %v10069_v11 }
0x1e3a   : > { %v10073_v4 = vpop.eup %10072  ;;  %10074 = vrcp.f32 %v5279_v23  ;;  %v5298_v2 = vadd.f32 1.0, %v10071_v50 }
0x1e3b   : > { %10076 = vrcp.f32 %v5280_v59  ;;  %v5299_v14 = vadd.f32 1.0, %v10073_v4 }
0x1e3c   : > { %10078 = vrcp.f32 %v5298_v2 }
0x1e3d   : > { %10080 = vrcp.f32 %v5299_v14 }
0x1e44   : > { %v10075_v13 = vpop.eup %10074 }
0x1e45   : > { %v10077_v63 = vpop.eup %10076  ;;  %v5309_v15 = vmul.f32 %v10075_v13, %v5305_v58 }
0x1e46   : > { %v10079_v3 = vpop.eup %10078  ;;  %v5310_v55 = vmul.f32 %v10077_v63, %v5306_v28 }
0x1e47   : > { %v10081_v46 = vpop.eup %10080  ;;  %v5311_v39 = vadd.f32 %v5309_v15, %v12216_v26  ;;  %v5325_v25 = vmul.f32 %v10079_v3, %v5321_v44  ;;  %v5315_v24 = vsub.f32 1.0, %v10079_v3 }
0x1e48   : > { %v5312_v7 = vadd.f32 %v5310_v55, %v12218_v29  ;;  %v5326_v22 = vmul.f32 %v10081_v46, %v5322_v21  ;;  %v5316_v51 = vsub.f32 1.0, %v10081_v46 }
0x1e49   : > { %10082 = vtanh.f32 %v5311_v39 }
0x1e4a   : > { %10084 = vtanh.f32 %v5312_v7 }
0x1e53   : > { %v10083_v32 = vpop.eup %10082 }
0x1e54   : > { %v10085_v16 = vpop.eup %10084  ;;  %v5317_v41 = vmul.f32 %v10083_v32, %v5315_v24 }
0x1e55   : > { %v5318_v53 = vmul.f32 %v10085_v16, %v5316_v51 }
0x1e56   : > { %v12653_v54 = vadd.f32 %v5325_v25, %v5317_v41 }
0x1e57   : > { %v12655_v35 = vadd.f32 %v5326_v22, %v5318_v53 }
0x1e58   : > { %5329 = vst [vmem:[#allocation2] sm:$0x40] %v12653_v54  ;;  %v5331_v30 = vpack.c.bf16 %v12653_v54, %v12653_v54  ;;  %v5478_v22 = vrot.slane %v12653_v54, 7 }
0x1e59   : > { %5330 = vst [vmem:[#allocation2 + $0x8] sm:$0x40] %v12655_v35  ;;  %v5332_v52 = vpack.c.bf16 %v12655_v35, %v12655_v35  ;;  %v5479_v51 = vrot.slane %v12655_v35, 7  ;;  %v5491_v35 = vpack.c.bf16 (%p3802_p2), %v12001_v60, %v12001_v60 }
0x1e5a   : > { %v5335_v34 = vunpack.c.l.b16 %v5331_v30 }
0x1e5b   : > { %v5336_v61 = vunpack.c.l.b16 %v5332_v52 }
0x1e5c   : > { %v5337_v62 = vrot.slane %v5335_v34, 6 }
0x1e5d   : > { %v5338_v6 = vrot.slane %v5336_v61, 5 }
0x1e5f   : > { %v5339_v17 = vsel %vm806_vm2, %v5338_v6, %v5337_v62 }
0x1e60   : > { %v5340_v10 = vpack.c.b16 %v5339_v17, %v5339_v17 }
0x1e62   : > { %5375 = vmatmul.mubr.bf16.vlgmr.msra.gmra.mrb[32].mxu0 %v5340_v10  ;;  %9109 = vmatmul.mubr.bf16.vlgmr.msra.gmra.mrb[32].mxu1 %v5340_v10 }
0x1f35   : > { %v5376_v36 = vpop.f32.mrb[32].mxu0  ;;  %v5417_v40 = vpop.f32.mrb[32].mxu1 }
0x1f36   : > { %v5377_v27 = vadd.f32 %v5376_v36, %v12224_v20  ;;  %v5378_v19 = vpop.f32.mrb[33].mxu0  ;;  %v9110_v18 = vpop.f32.mrb[33].mxu1 }
0x1f37   : > { %v5379_v48 = vadd.f32 %v5378_v19, %v12227_v43  ;;  %v5380_v31 = vpop.f32.mrb[34].mxu0  ;;  %v5420_v38 = vpop.f32.mrb[34].mxu1 }
0x1f38   : > { %v5424_v11 = vrot.slane %v5377_v27, 1  ;;  %v5425_v23 = vrot.slane %v5377_v27, 2  ;;  %v5381_v50 = vpop.f32.mrb[35].mxu0  ;;  %v9111_v59 = vpop.f32.mrb[35].mxu1 }
0x1f39   : > { %v5443_v4 = vrot.slane %v5379_v48, 1  ;;  %v5444_v2 = vrot.slane %v5379_v48, 2 }
0x1f3a   : > { %v5428_v14 = vadd.f32 %v5424_v11, %v12207_v42  ;;  %v5429_v12 = vadd.f32 %v5425_v23, %v12211_v5 }
0x1f3b   : > { %v5447_v58 = vadd.f32 %v5443_v4, %v12209_v37  ;;  %v5448_v20 = vadd.f32 %v5444_v2, %v12213_v56  ;;  %v5418_v56 = vadd.f32 %v5417_v40, %v12236_v49 }
0x1f3c   : > { %v8009_v13 = vmul.f32 -1.442695, %v5428_v14  ;;  %v8010_v28 = vmul.f32 -1.442695, %v5429_v12 }
0x1f3d   : > { %v8011_v63 = vmul.f32 -1.442695, %v5447_v58  ;;  %v8012_v43 = vmul.f32 -1.442695, %v5448_v20  ;;  %v5462_v46 = vrot.slane %v5418_v56, 1  ;;  %v5463_v25 = vrot.slane %v5418_v56, 2 }
0x1f3e   : > { %10086 = vpow2.f32 %v8009_v13 }
0x1f3f   : > { %10088 = vpow2.f32 %v8010_v28 }
0x1f40   : > { %10090 = vpow2.f32 %v8011_v63 }
0x1f41   : > { %10092 = vpow2.f32 %v8012_v43 }
0x1f48   : > { %v10087_v15 = vpop.eup %10086 }
0x1f49   : > { %v10089_v44 = vpop.eup %10088  ;;  %v5436_v3 = vadd.f32 1.0, %v10087_v15 }
0x1f4a   : > { %v10091_v55 = vpop.eup %10090  ;;  %v5437_v21 = vadd.f32 1.0, %v10089_v44 }
0x1f4b   : > { %v10093_v42 = vpop.eup %10092  ;;  %10094 = vrcp.f32 %v5436_v3  ;;  %v5455_v5 = vadd.f32 1.0, %v10091_v55 }
0x1f4c   : > { %10096 = vrcp.f32 %v5437_v21  ;;  %v5456_v37 = vadd.f32 1.0, %v10093_v42 }
0x1f4d   : > { %10098 = vrcp.f32 %v5455_v5 }
0x1f4e   : > { %10100 = vrcp.f32 %v5456_v37 }
0x1f55   : > { %v10095_v39 = vpop.eup %10094 }
0x1f56   : > { %v10097_v7 = vpop.eup %10096  ;;  %v5466_v24 = vmul.f32 %v10095_v39, %v5462_v46 }
0x1f57   : > { %v10099_v32 = vpop.eup %10098  ;;  %v5467_v16 = vmul.f32 %v10097_v7, %v5463_v25 }
0x1f58   : > { %v10101_v41 = vpop.eup %10100  ;;  %v5468_v53 = vadd.f32 %v5466_v24, %v12216_v26  ;;  %v5482_v30 = vmul.f32 %v10099_v32, %v5478_v22  ;;  %v5472_v49 = vsub.f32 1.0, %v10099_v32  ;;  %v13474_v26 = vmov (%p3802_p2), 0.0  }
0x1f59   : > { %v5469_v52 = vadd.f32 %v5467_v16, %v12218_v29  ;;  %v5483_v34 = vmul.f32 %v10101_v41, %v5479_v51  ;;  %v5473_v62 = vsub.f32 1.0, %v10101_v41  ;;  %9112 = vmatprep.subr.bf16.mxu0 (%p3802_p2), %v13474_v26  ;;  %v5490_v29 = vpack.c.bf16 (%p3802_p2), %v11998_v33, %v11998_v33  ;;  %9118 = vmatprep.subr.bf16.mxu1 (%p3802_p2), %v13474_v26 }
0x1f5a   : > { %10102 = vtanh.f32 %v5468_v53  ;;  %9114 = vmatprep.mubr.msk.bf16.mxu0 (%p3802_p2), %vm10467_vm0, %v13474_v26  ;;  %9120 = vmatprep.mubr.msk.bf16.mxu1 (%p3802_p2), %vm10467_vm0, %v13474_v26 }
0x1f5b   : > { %10104 = vtanh.f32 %v5469_v52  ;;  %9113 = vmatpush3.bf16.xpose.msra.mxu0 (%p3802_p2), %v5490_v29  ;;  %9119 = vmatpush3.bf16.xpose.msra.mxu1 (%p3802_p2), %v5491_v35 }
0x1f5c   :  { %9124 = vmatprep.subr.bf16.mxu0 (%p3802_p2), %v13474_v26  ;;  %9130 = vmatprep.subr.bf16.mxu1 (%p3802_p2), %v13474_v26 }
0x1f62   :  { %9115 = vmatmul.mubr.bf16.vlgmr.msra.gmra.mrb[0].mxu0 (%p3802_p2), %v10579_v8  ;;  %9121 = vmatmul.mubr.bf16.vlgmr.msra.gmra.mrb[0].mxu1 (%p3802_p2), %v10581_v9 }
0x1f63   :  { %9126 = vmatprep.mubr.msk.bf16.mxu0 (%p3802_p2), %vm10467_vm0, %v13474_v26  ;;  %9132 = vmatprep.mubr.msk.bf16.mxu1 (%p3802_p2), %vm10467_vm0, %v13474_v26 }
0x1f64   : > { %v10103_v61 = vpop.eup %10102  ;;  %3804 = sbr.rel (!%p3802_p2) target bundleno = 5801 (0x16a9), region = 134 }
0x1f65   : > { %v10105_v6 = vpop.eup %10104  ;;  %v5474_v17 = vmul.f32 %v10103_v61, %v5472_v49 }
0x1f66   : > { %v5475_v54 = vmul.f32 %v10105_v6, %v5473_v62 }
0x1f67   : > { %v5484_v10 = vadd.f32 %v5482_v30, %v5474_v17 }
0x1f68   : > { %v5485_v36 = vadd.f32 %v5483_v34, %v5475_v54 }
0x1f69   : > { %5486 = vst [vmem:[#allocation2] sm:$0x80] %v5484_v10 }
0x1f6a   : > { %5487 = vst [vmem:[#allocation2 + $0x8] sm:$0x80] %v5485_v36 }
0x1f70   :  { %v5488_v28 = vld [vmem:[#allocation2] sm:$0xff] }
0x1f71   :  { %v5489_v63 = vld [vmem:[#allocation2 + $0x8] sm:$0xff]  ;;  %v5600_v43 = vpack.c.bf16 %v5488_v28, %v5488_v28 }
0x1f72   :  { %v5601_v15 = vpack.c.bf16 %v5489_v63, %v5489_v63 }
0x1f73   :  { %v5606_v44 = vsel %vm3704_vm5, %v5600_v43, 0 }
0x1f74   :  { %v5652_v3 = vsel %vm3704_vm5, %v5601_v15, 0  ;;  %9125 = vmatpush3.bf16.msra.mxu0 %v5606_v44 }
0x1f75   :  { %9131 = vmatpush3.bf16.msra.mxu1 %v5652_v3 }
0x2035   :  { %v5526_v33 = vpop.f32.mrb[0].mxu0  ;;  %v5566_v60 = vpop.f32.mrb[0].mxu1 }
0x2036   :  { %v5572_v40 = vmax.f32 %v5526_v33, 0.0  ;;  %v9116_v27 = vpop.f32.mrb[1].mxu0  ;;  %v5573_v19 = vmax.f32 %v5566_v60, 0.0  ;;  %v9122_v18 = vpop.f32.mrb[1].mxu1 }
0x2037   :  { %v5529_v48 = vpop.f32.mrb[2].mxu0  ;;  %v5569_v31 = vpop.f32.mrb[2].mxu1 }
0x2038   :  { %v5574_v38 = vadd.f32 %v5572_v40, %v10552_v0  ;;  %v5575_v8 = vadd.f32 %v5573_v19, %v10557_v1  ;;  %v9117_v11 = vpop.f32.mrb[3].mxu0  ;;  %v9123_v9 = vpop.f32.mrb[3].mxu1 }
0x203a   :  { %v5576_v23 = vsel %vm3674_vm4, %v5574_v38, -inf  ;;  %v5579_v50 = vsel %vm3674_vm4, %v5575_v8, -inf }
0x203b   :  { %5577 = vmax.xlane.f32.xlu0 %v5576_v23 }
0x203f   :  { %5580 = vmax.xlane.f32.xlu0 %v5579_v50 }
0x20c8   :  { %v5578_v59 = vpop.xlane.xlu0 %5577 }
0x20c9   :  { %v5582_v4 = vsub.f32 %v5574_v38, %v5578_v59 }
0x20cb   :  { %v5584_v2 = vmul.f32 1.442695, %v5582_v4 }
0x20cc   :  { %v5581_v14 = vpop.xlane.xlu0 %5580 }
0x20cd   :  { %10130 = vpow2.f32 %v5584_v2  ;;  %v5583_v12 = vsub.f32 %v5575_v8, %v5581_v14 }
0x20cf   :  { %v5586_v58 = vmul.f32 1.442695, %v5583_v12 }
0x20d1   :  { %10132 = vpow2.f32 %v5586_v58 }
0x20d7   :  { %v10131_v20 = vpop.eup %10130 }
0x20d8   :  { %v5588_v0 = vsel %vm3674_vm4, %v10131_v20, 0.0 }
0x20d9   :  { %5589 = vadd.xlane.f32.xlu1 %v5588_v0 }
0x20db   :  { %v10133_v1 = vpop.eup %10132 }
0x20dc   :  { %v5591_v13 = vsel %vm3674_vm4, %v10133_v1, 0.0 }
0x20dd   :  { %5592 = vadd.xlane.f32.xlu1 %v5591_v13 }
0x2166   :  { %v5590_v55 = vpop.xlane.xlu1 %5589 }
0x2167   :  { %10134 = vrcp.f32 %v5590_v55 }
0x216a   :  { %v5593_v21 = vpop.xlane.xlu1 %5592 }
0x216b   :  { %10136 = vrcp.f32 %v5593_v21 }
0x2171   :  { %v10135_v42 = vpop.eup %10134 }
0x2172   :  { %v5595_v5 = vmul.f32 %v10135_v42, %v10131_v20 }
0x2174   :  { %v5598_v37 = vpack.c.bf16 %v5595_v5, %v5595_v5 }
0x2175   :  { %v10137_v56 = vpop.eup %10136 }
0x2176   :  { %9127 = vmatmul.mubr.msk.bf16.vlgmr.msra.gmra.mrb[4].mxu0 %vm3674_vm4, %v5598_v37  ;;  %v5597_v46 = vmul.f32 %v10137_v56, %v10133_v1 }
0x2178   :  { %v5599_v39 = vpack.c.bf16 %v5597_v46, %v5597_v46 }
0x217a   :  { %9133 = vmatmul.mubr.msk.bf16.vlgmr.msra.gmra.mrb[4].mxu1 %vm3674_vm4, %v5599_v39 }
0x2249   :  { %v5642_v25 = vpop.f32.mrb[4].mxu0 }
0x224a   :  { %v5694_v7 = vmax.f32 %v5642_v25, 0.0  ;;  %v9128_v22 = vpop.f32.mrb[5].mxu0 }
0x224b   :  { %v5645_v24 = vpop.f32.mrb[6].mxu0 }
0x224c   :  { %v5696_v32 = vadd.f32 %v5694_v7, %v5488_v28  ;;  %v9129_v51 = vpop.f32.mrb[7].mxu0 }
0x224d   :  { %v5688_v16 = vpop.f32.mrb[4].mxu1 }
0x224e   :  { %5698 = vst [vmem:[#allocation2] sm:$0xff] %v5696_v32  ;;  %v5695_v41 = vmax.f32 %v5688_v16, 0.0  ;;  %v9134_v53 = vpop.f32.mrb[5].mxu1 }
0x224f   :  { %v5691_v30 = vpop.f32.mrb[6].mxu1 }
0x2250   :  { %v5697_v52 = vadd.f32 %v5695_v41, %v5489_v63  ;;  %v9135_v34 = vpop.f32.mrb[7].mxu1 }
0x2252   :  { %5699 = vst [vmem:[#allocation2 + $0x8] sm:$0xff] %v5697_v52 }
0x2253 LB: > { %v10477_v49 = vmov 0.0   ;;  %v10478_v61 = vmov 0   ;;  %s7594_s27 = smul.u32 192, %s10464_s3  ;;  %vm10479_vm7 = vmmov 0   ;;  %s10464_s3 = sphi %s12706_s3, %s5705_s3  }
0x2254   : > { %9136 = vmatprep.subr.bf16.mxu1 %v10477_v49  ;;  %5960 = vmatprep.mubr.bf16.mxu0 %v10478_v61  ;;  %s7600_s13 = smul.u32 3, %s10464_s3  ;;  %s5705_s3 = sadd.s32 1, %s10464_s3  }
0x2255   : > { %9152 = vmatprep.mubr.msk.bf16.mxu1 %vm10479_vm7, %v10477_v49  ;;  %s12719_s4 = scalar_lea.vmem %s13451_s6, %s7594_s27  ;;  %s12732_s30 = scalar_lea.vmem %s13452_s7, %s7594_s27  ;;  %v5781_v9 = vld [vmem:[#allocation2] sm:$0xff] }
0x2256   : > { %v10138_v62 = vld [vmem:[%s12719_s4 + $0x484] ss:$12 sps:$4 sm:$0xff]   ;;  %v10140_v6 = vld [vmem:[%s12719_s4 + $0x480] ss:$12 sps:$4 sm:$0xff]   ;;  %v10141_v17 = vld [vmem:[%s12719_s4 + $0x49c] ss:$12 sps:$4 sm:$0xff]   ;;  %s7601_s16 = scalar_lea.vmem %s13453_s8, %s7600_s13  ;;  %s7604_s19 = scalar_lea.vmem %s13454_s9, %s7600_s13 }
0x2257   : > { %5928 = vmatprep.subr.bf16.mxu0 %v10138_v62  ;;  %v10143_v54 = vld [vmem:[%s12719_s4 + $0x498] ss:$12 sps:$4 sm:$0xff]   ;;  %v10144_v10 = vld [vmem:[%s12719_s4 + $0x4b4] ss:$12 sps:$4 sm:$0xff]   ;;  %v10146_v36 = vld [vmem:[%s12719_s4 + $0x4b0] ss:$12 sps:$4 sm:$0xff]  }
0x2258   : > { %5929 = vmatpush1.bf16.msra.mxu0 %v10140_v6  ;;  %v10147_v26 = vld [vmem:[%s12719_s4 + $0x4cc] ss:$12 sps:$4 sm:$0xff]   ;;  %v10159_v29 = vld [vmem:[%s12719_s4 + $0x488] ss:$12 sps:$4 sm:$0xff]   ;;  %v10150_v33 = vld [vmem:[%s12719_s4 + $0x4e4] ss:$12 sps:$4 sm:$0xff]  }
0x2259   : > { %5930 = vmatprep.subr.bf16.mxu0 %v10141_v17  ;;  %v10149_v35 = vld [vmem:[%s12719_s4 + $0x4c8] ss:$12 sps:$4 sm:$0xff]   ;;  %9137 = vmatpush3.bf16.msra.mxu1 %v10159_v29  ;;  %v10163_v60 = vld [vmem:[%s12719_s4 + $0x4a0] ss:$12 sps:$4 sm:$0xff]   ;;  %v10167_v19 = vld [vmem:[%s12719_s4 + $0x4b8] ss:$12 sps:$4 sm:$0xff]  }
0x225a   : > { %9138 = vmatprep.subr.bf16.mxu1 %v10477_v49  ;;  %v10152_v40 = vld [vmem:[%s12719_s4 + $0x4e0] ss:$12 sps:$4 sm:$0xff]   ;;  %v10153_v27 = vld [vmem:[%s12719_s4 + $0x4fc] ss:$12 sps:$4 sm:$0xff]   ;;  %v10155_v18 = vld [vmem:[%s12719_s4 + $0x4f8] ss:$12 sps:$4 sm:$0xff]  }
0x225b   : > { %v10156_v48 = vld [vmem:[%s12719_s4 + $0x514] ss:$12 sps:$4 sm:$0xff]   ;;  %v10171_v31 = vld [vmem:[%s12719_s4 + $0x4d0] ss:$12 sps:$4 sm:$0xff]   ;;  %v10160_v8 = vld [vmem:[%s12719_s4 + $0x52c] ss:$12 sps:$4 sm:$0xff]  }
0x225c   : > { %5931 = vmatpush1.bf16.msra.mxu0 %v10143_v54  ;;  %v10158_v38 = vld [vmem:[%s12719_s4 + $0x510] ss:$12 sps:$4 sm:$0xff]   ;;  %v10175_v11 = vld [vmem:[%s12719_s4 + $0x4e8] ss:$12 sps:$4 sm:$0xff]   ;;  %v10179_v4 = vld [vmem:[%s12719_s4 + $0x500] ss:$12 sps:$4 sm:$0xff]  }
0x225d   : > { %5932 = vmatprep.subr.bf16.mxu0 %v10144_v10  ;;  %9139 = vmatpush3.bf16.msra.mxu1 %v10163_v60  ;;  %v5782_v23 = vld [vmem:[#allocation2 + $0x8] sm:$0xff]  ;;  %v12752_v59 = vld [vmem:[%s12732_s30 + $0x484] ss:$12 sps:$4 sm:$0xff]   ;;  %v12770_v0 = vld [vmem:[%s12732_s30 + $0x4b4] ss:$12 sps:$4 sm:$0xff]   ;;  %p5702_p3 = scmp.ge.s32.totalorder %s5705_s3, 2  }
0x225e   : > { %9140 = vmatprep.subr.bf16.mxu1 %v10477_v49  ;;  %v10162_v50 = vld [vmem:[%s12719_s4 + $0x528] ss:$12 sps:$4 sm:$0xff]   ;;  %v5783_v2 = vpack.c.bf16 %v5782_v23, %v5781_v9  ;;  %v12757_v14 = vld [vmem:[%s12732_s30 + $0x480] ss:$12 sps:$4 sm:$0xff]   ;;  %v10183_v58 = vld [vmem:[%s12719_s4 + $0x518] ss:$12 sps:$4 sm:$0xff]  }
0x225f   : > { %v12760_v12 = vld [vmem:[%s12732_s30 + $0x49c] ss:$12 sps:$4 sm:$0xff]   ;;  %v12766_v20 = vld [vmem:[%s12732_s30 + $0x498] ss:$12 sps:$4 sm:$0xff]   ;;  %v12798_v44 = vld [vmem:[%s12732_s30 + $0x4a0] ss:$12 sps:$4 sm:$0xff]  }
0x2260   : > { %5933 = vmatpush1.bf16.msra.mxu0 %v10146_v36  ;;  %v10187_v1 = vld [vmem:[%s12719_s4 + $0x530] ss:$12 sps:$4 sm:$0xff]   ;;  %v12782_v28 = vld [vmem:[%s12732_s30 + $0x4cc] ss:$12 sps:$4 sm:$0xff]   ;;  %v12785_v63 = vld [vmem:[%s12732_s30 + $0x488] ss:$12 sps:$4 sm:$0xff]  }
0x2261   : > { %5934 = vmatprep.subr.bf16.mxu0 %v10147_v26  ;;  %9141 = vmatpush3.bf16.msra.mxu1 %v10167_v19  ;;  %v12778_v13 = vld [vmem:[%s12732_s30 + $0x4b0] ss:$12 sps:$4 sm:$0xff]   ;;  %v12790_v43 = vld [vmem:[%s12732_s30 + $0x4c8] ss:$12 sps:$4 sm:$0xff]   ;;  %v12805_v3 = vld [vmem:[%s12732_s30 + $0x4e0] ss:$12 sps:$4 sm:$0xff]  }
0x2262   : > { %9142 = vmatprep.subr.bf16.mxu1 %v10477_v49  ;;  %v12794_v15 = vld [vmem:[%s12732_s30 + $0x4e4] ss:$12 sps:$4 sm:$0xff]   ;;  %v12809_v55 = vld [vmem:[%s12732_s30 + $0x4fc] ss:$12 sps:$4 sm:$0xff]   ;;  %v12822_v5 = vld [vmem:[%s12732_s30 + $0x514] ss:$12 sps:$4 sm:$0xff]  }
0x2263   : > { %v12813_v21 = vld [vmem:[%s12732_s30 + $0x4b8] ss:$12 sps:$4 sm:$0xff]   ;;  %v12826_v37 = vld [vmem:[%s12732_s30 + $0x4d0] ss:$12 sps:$4 sm:$0xff]   ;;  %v12839_v39 = vld [vmem:[%s12732_s30 + $0x4e8] ss:$12 sps:$4 sm:$0xff]  }
0x2264   : > { %5935 = vmatpush1.bf16.msra.mxu0 %v10149_v35  ;;  %v12818_v42 = vld [vmem:[%s12732_s30 + $0x4f8] ss:$12 sps:$4 sm:$0xff]   ;;  %v12831_v56 = vld [vmem:[%s12732_s30 + $0x510] ss:$12 sps:$4 sm:$0xff]   ;;  %v12844_v25 = vld [vmem:[%s12732_s30 + $0x528] ss:$12 sps:$4 sm:$0xff]  }
0x2265   : > { %5936 = vmatprep.subr.bf16.mxu0 %v10150_v33  ;;  %9143 = vmatpush3.bf16.msra.mxu1 %v10171_v31  ;;  %v12835_v46 = vld [vmem:[%s12732_s30 + $0x52c] ss:$12 sps:$4 sm:$0xff]   ;;  %v12864_v24 = vld [vmem:[%s12732_s30 + $0x530] ss:$12 sps:$4 sm:$0xff]   ;;  %s10481_s25 = smov (%p5702_p3), [#allocation3]  }
0x2266   : > { %9144 = vmatprep.subr.bf16.mxu1 %v10477_v49  ;;  %v12849_v7 = vld [vmem:[%s12732_s30 + $0x500] ss:$12 sps:$4 sm:$0xff]   ;;  %v12855_v22 = vld [vmem:[%s12732_s30 + $0x518] ss:$12 sps:$4 sm:$0xff]   ;;  %v8079_v32 = vld [vmem:[%s7601_s16 + $0x12] sm:$0x7] }
0x2267   : > { %v5788_v51 = vrot.slane %v8079_v32, %v10813_v45  ;;  %v5792_v16 = vrot.slane %v8079_v32, %v10815_v47  ;;  %v5796_v54 = vrot.slane %v8079_v32, %v10823_v57  ;;  %v8080_v60 = vld [vmem:[%s7604_s19 + $0x12] sm:$0x7]  ;;  %s7551_s26 = sshll.u32 (%p5702_p3), %s10481_s25, 4  ;;  %s7552_s26 = int_to_ptr.vmem [resolvable:$true] %s7551_s26 }
0x2268   : > { %5937 = vmatpush1.bf16.msra.mxu0 %v10152_v40  ;;  %v12926_v40 = vrot.slane %v8080_v60, %v10813_v45  ;;  %p10415_p5 = scmp.lt.s32.totalorder (%p5702_p3), %s7552_s26, %s7552_s26 }
0x2269   : > { %5938 = vmatprep.subr.bf16.mxu0 %v10153_v27  ;;  %9145 = vmatpush3.bf16.msra.mxu1 %v10175_v11  ;;  %v12929_v27 = vrot.slane %v8080_v60, %v10815_v47 }
0x226a   : > { %9146 = vmatprep.subr.bf16.mxu1 %v10477_v49 }
0x226c   : > { %5939 = vmatpush1.bf16.msra.mxu0 %v10155_v18 }
0x226d   : > { %5940 = vmatprep.subr.bf16.mxu0 %v10156_v48  ;;  %9147 = vmatpush3.bf16.msra.mxu1 %v10179_v4 }
0x226e   : > { %9148 = vmatprep.subr.bf16.mxu1 %v10477_v49 }
0x2270   : > { %5941 = vmatpush1.bf16.msra.mxu0 %v10158_v38 }
0x2271   : > { %5942 = vmatprep.subr.bf16.mxu0 %v10160_v8  ;;  %9149 = vmatpush3.bf16.msra.mxu1 %v10183_v58 }
0x2272   : > { %9150 = vmatprep.subr.bf16.mxu1 %v10477_v49 }
0x2274   : > { %5943 = vmatpush1.bf16.msra.mxu0 %v10162_v50 }
0x2275   : > { %6156 = vmatprep.subr.bf16.mxu0 %v12752_v59  ;;  %9151 = vmatpush3.bf16.msra.mxu1 %v10187_v1 }
0x2276   : > { %9156 = vmatprep.subr.bf16.mxu1 %v10477_v49 }
0x2277   : > { %5961 = vmatmul.mubr.bf16.vlgmr.msra.gmra.mrb[0].mxu0 %v5783_v2 }
0x2278   : > { %6157 = vmatpush1.bf16.msra.mxu0 %v12757_v14  ;;  %6188 = vmatprep.mubr.bf16.mxu0 %v10478_v61 }
0x2279   : > { %6158 = vmatprep.subr.bf16.mxu0 %v12760_v12  ;;  %9153 = vmatmul.mubr.bf16.vlgmr.msra.gmra.mrb[0].mxu1 %v5783_v2 }
0x227a   : > { %9157 = vmatpush3.bf16.msra.mxu1 %v12785_v63  ;;  %9172 = vmatprep.mubr.msk.bf16.mxu1 %vm10479_vm7, %v10477_v49 }
0x227b   : > { %9158 = vmatprep.subr.bf16.mxu1 %v10477_v49 }
0x227c   : > { %6159 = vmatpush1.bf16.msra.mxu0 %v12766_v20 }
0x227d   : > { %6160 = vmatprep.subr.bf16.mxu0 %v12770_v0 }
0x227e   : > { %9159 = vmatpush3.bf16.msra.mxu1 %v12798_v44 }
0x227f   : > { %9160 = vmatprep.subr.bf16.mxu1 %v10477_v49 }
0x2280   : > { %6161 = vmatpush1.bf16.msra.mxu0 %v12778_v13 }
0x2281   : > { %6162 = vmatprep.subr.bf16.mxu0 %v12782_v28 }
0x2282   : > { %9161 = vmatpush3.bf16.msra.mxu1 %v12813_v21 }
0x2283   : > { %9162 = vmatprep.subr.bf16.mxu1 %v10477_v49 }
0x2284   : > { %6163 = vmatpush1.bf16.msra.mxu0 %v12790_v43 }
0x2285   : > { %6164 = vmatprep.subr.bf16.mxu0 %v12794_v15 }
0x2286   : > { %9163 = vmatpush3.bf16.msra.mxu1 %v12826_v37 }
0x2287   : > { %9164 = vmatprep.subr.bf16.mxu1 %v10477_v49 }
0x2288   : > { %6165 = vmatpush1.bf16.msra.mxu0 %v12805_v3 }
0x2289   : > { %6166 = vmatprep.subr.bf16.mxu0 %v12809_v55 }
0x228a   : > { %9165 = vmatpush3.bf16.msra.mxu1 %v12839_v39 }
0x228b   : > { %9166 = vmatprep.subr.bf16.mxu1 %v10477_v49 }
0x228c   : > { %6167 = vmatpush1.bf16.msra.mxu0 %v12818_v42 }
0x228d   : > { %6168 = vmatprep.subr.bf16.mxu0 %v12822_v5 }
0x228e   : > { %9167 = vmatpush3.bf16.msra.mxu1 %v12849_v7 }
0x228f   : > { %9168 = vmatprep.subr.bf16.mxu1 %v10477_v49 }
0x2290   : > { %6169 = vmatpush1.bf16.msra.mxu0 %v12831_v56 }
0x2291   : > { %6170 = vmatprep.subr.bf16.mxu0 %v12835_v46 }
0x2292   : > { %9169 = vmatpush3.bf16.msra.mxu1 %v12855_v22 }
0x2293   : > { %9170 = vmatprep.subr.bf16.mxu1 %v10477_v49 }
0x2294   : > { %6171 = vmatpush1.bf16.msra.mxu0 %v12844_v25 }
0x2295   : > { %6304 = vmatprep.subr.bf16.mxu0 %v12752_v59 }
0x2296   : > { %9171 = vmatpush3.bf16.msra.mxu1 %v12864_v24 }
0x2297   : > { %6189 = vmatmul.mubr.bf16.vlgmr.msra.gmra.mrb[4].mxu0 %v10478_v61  ;;  %9176 = vmatprep.subr.bf16.mxu1 %v10477_v49 }
0x2298   : > { %6305 = vmatpush1.bf16.msra.mxu0 %v12757_v14  ;;  %6336 = vmatprep.mubr.bf16.mxu0 %v10478_v61 }
0x2299   : > { %6306 = vmatprep.subr.bf16.mxu0 %v12760_v12  ;;  %9173 = vmatmul.mubr.bf16.vlgmr.msra.gmra.mrb[4].mxu1 %v10478_v61 }
0x229a   : > { %9177 = vmatpush3.bf16.msra.mxu1 %v12785_v63  ;;  %9192 = vmatprep.mubr.msk.bf16.mxu1 %vm10479_vm7, %v10477_v49 }
0x229b   : > { %9178 = vmatprep.subr.bf16.mxu1 %v10477_v49 }
0x229c   : > { %6307 = vmatpush1.bf16.msra.mxu0 %v12766_v20 }
0x229d   : > { %6308 = vmatprep.subr.bf16.mxu0 %v12770_v0 }
0x229e   : > { %9179 = vmatpush3.bf16.msra.mxu1 %v12798_v44 }
0x229f   : > { %9180 = vmatprep.subr.bf16.mxu1 %v10477_v49 }
0x22a0   : > { %6309 = vmatpush1.bf16.msra.mxu0 %v12778_v13 }
0x22a1   : > { %6310 = vmatprep.subr.bf16.mxu0 %v12782_v28 }
0x22a2   : > { %9181 = vmatpush3.bf16.msra.mxu1 %v12813_v21 }
0x22a3   : > { %9182 = vmatprep.subr.bf16.mxu1 %v10477_v49 }
0x22a4   : > { %6311 = vmatpush1.bf16.msra.mxu0 %v12790_v43 }
0x22a5   : > { %6312 = vmatprep.subr.bf16.mxu0 %v12794_v15 }
0x22a6   : > { %9183 = vmatpush3.bf16.msra.mxu1 %v12826_v37 }
0x22a7   : > { %9184 = vmatprep.subr.bf16.mxu1 %v10477_v49 }
0x22a8   : > { %6313 = vmatpush1.bf16.msra.mxu0 %v12805_v3 }
0x22a9   : > { %6314 = vmatprep.subr.bf16.mxu0 %v12809_v55 }
0x22aa   : > { %9185 = vmatpush3.bf16.msra.mxu1 %v12839_v39 }
0x22ab   : > { %9186 = vmatprep.subr.bf16.mxu1 %v10477_v49 }
0x22ac   : > { %6315 = vmatpush1.bf16.msra.mxu0 %v12818_v42 }
0x22ad   : > { %6316 = vmatprep.subr.bf16.mxu0 %v12822_v5 }
0x22ae   : > { %9187 = vmatpush3.bf16.msra.mxu1 %v12849_v7 }
0x22af   : > { %9188 = vmatprep.subr.bf16.mxu1 %v10477_v49 }
0x22b0   : > { %6317 = vmatpush1.bf16.msra.mxu0 %v12831_v56 }
0x22b1   : > { %6318 = vmatprep.subr.bf16.mxu0 %v12835_v46 }
0x22b2   : > { %9189 = vmatpush3.bf16.msra.mxu1 %v12855_v22 }
0x22b3   : > { %9190 = vmatprep.subr.bf16.mxu1 %v10477_v49 }
0x22b4   : > { %6319 = vmatpush1.bf16.msra.mxu0 %v12844_v25 }
0x22b5   : > { %6457 = vmatprep.subr.bf16.mxu0 %v12752_v59 }
0x22b6   : > { %9191 = vmatpush3.bf16.msra.mxu1 %v12864_v24 }
0x22b7   : > { %9196 = vmatprep.subr.bf16.mxu1 %v10477_v49 }
0x234a   : > { %v5962_v41 = vpop.f32.mrb[0].mxu0 }
0x234b   : > { %v12909_v53 = vadd.f32 %v5962_v41, %v5788_v51  ;;  %v5964_v30 = vpop.f32.mrb[1].mxu0 }
0x234c   : > { %v12911_v52 = vadd.f32 %v5964_v30, %v5792_v16  ;;  %v5966_v34 = vpop.f32.mrb[2].mxu0  ;;  %v6005_v10 = vpop.f32.mrb[0].mxu1 }
0x234d   : > { %v12913_v62 = vadd.f32 %v5966_v34, %v5788_v51  ;;  %v5968_v6 = vpop.f32.mrb[3].mxu0  ;;  %v12918_v36 = vadd.f32 %v6005_v10, %v5796_v54  ;;  %v9154_v26 = vpop.f32.mrb[1].mxu1 }
0x234e   : > { %v12915_v17 = vadd.f32 %v5968_v6, %v5792_v16  ;;  %v6008_v29 = vpop.f32.mrb[2].mxu1 }
0x234f   : > { %v12920_v35 = vadd.f32 %v6008_v29, %v5796_v54  ;;  %v9155_v33 = vpop.f32.mrb[3].mxu1  ;;  %v12938_v29 = vrot.slane %v8080_v60, %v10823_v57  ;;  %v10392_v57 = vld [vmem:[%s13455_s10 + $0x24] ss:$8 sps:$4 sm:$0xff] (%p5702_p3)  }
0x236a   : > { %v6190_v19 = vpop.f32.mrb[4].mxu0 }
0x236b   : > { %v6191_v18 = vadd.f32 %v6190_v19, %v12926_v40  ;;  %v6192_v48 = vpop.f32.mrb[5].mxu0 }
0x236c   : > { %v6193_v31 = vadd.f32 %v6192_v48, %v12929_v27  ;;  %v6194_v38 = vpop.f32.mrb[6].mxu0  ;;  %v6231_v32 = vpop.f32.mrb[4].mxu1 }
0x236d   : > { %v6238_v8 = vrot.slane %v6191_v18, 1  ;;  %v6241_v11 = vadd.f32 %v6191_v18, %v12909_v53  ;;  %v6195_v9 = vpop.f32.mrb[7].mxu0  ;;  %v9174_v16 = vpop.f32.mrb[5].mxu1  ;;  %v6232_v19 = vadd.f32 %v6231_v32, %v12938_v29 }
0x236e   : > { %v6256_v23 = vrot.slane %v6193_v31, 1  ;;  %v6259_v2 = vadd.f32 %v6193_v31, %v12911_v52  ;;  %v6234_v41 = vpop.f32.mrb[6].mxu1 }
0x236f   : > { %v6242_v50 = vadd.f32 %v6238_v8, %v12913_v62  ;;  %v8129_v4 = vmul.f32 -1.442695, %v6241_v11  ;;  %v9175_v34 = vpop.f32.mrb[7].mxu1  ;;  %v6274_v38 = vrot.slane %v6232_v19, 1 }
0x2370   : > { %v6260_v1 = vadd.f32 %v6256_v23, %v12915_v17  ;;  %v8131_v51 = vmul.f32 -1.442695, %v6259_v2 }
0x2371   : > { %10202 = vpow2.f32 %v8129_v4  ;;  %v8130_v58 = vmul.f32 -1.442695, %v6242_v50 }
0x2372   : > { %v8132_v30 = vmul.f32 -1.442695, %v6260_v1 }
0x2373   : > { %10204 = vpow2.f32 %v8130_v58 }
0x2374   : > { %10206 = vpow2.f32 %v8131_v51 }
0x2375   : > { %10208 = vpow2.f32 %v8132_v30 }
0x237b   : > { %v10203_v6 = vpop.eup %10202 }
0x237c   : > { %v6249_v54 = vadd.f32 1.0, %v10203_v6 }
0x237d   : > { %v10205_v10 = vpop.eup %10204 }
0x237e   : > { %v6250_v26 = vadd.f32 1.0, %v10205_v10  ;;  %10210 = vrcp.f32 %v6249_v54  ;;  %v10207_v33 = vpop.eup %10206 }
0x237f   : > { %v10209_v18 = vpop.eup %10208  ;;  %v6267_v48 = vadd.f32 1.0, %v10207_v33 }
0x2380   : > { %10212 = vrcp.f32 %v6250_v26  ;;  %v6268_v31 = vadd.f32 1.0, %v10209_v18 }
0x2381   : > { %10214 = vrcp.f32 %v6267_v48 }
0x2382   : > { %10216 = vrcp.f32 %v6268_v31 }
0x2388   : > { %v10211_v8 = vpop.eup %10210 }
0x2389   : > { %v6277_v11 = vmul.f32 %v10211_v8, %v6232_v19 }
0x238a   : > { %v10213_v9 = vpop.eup %10212 }
0x238b   : > { %v6278_v23 = vmul.f32 %v10213_v9, %v6274_v38  ;;  %v6279_v50 = vadd.f32 %v6277_v11, %v12918_v36  ;;  %v10215_v60 = vpop.eup %10214 }
0x238c   : > { %v10217_v2 = vpop.eup %10216  ;;  %v6283_v58 = vsub.f32 1.0, %v10215_v60  ;;  %v6287_v16 = vmul.f32 0.0, %v10215_v60 }
0x238d   : > { %v6280_v4 = vadd.f32 %v6278_v23, %v12920_v35  ;;  %10218 = vtanh.f32 %v6279_v50  ;;  %v6284_v51 = vsub.f32 1.0, %v10217_v2  ;;  %v6288_v34 = vmul.f32 0.0, %v10217_v2 }
0x238f   : > { %10220 = vtanh.f32 %v6280_v4 }
0x2397   : > { %v10219_v1 = vpop.eup %10218 }
0x2398   : > { %v6285_v32 = vmul.f32 %v10219_v1, %v6283_v58 }
0x2399   : > { %v10221_v41 = vpop.eup %10220 }
0x239a   : > { %v6286_v30 = vmul.f32 %v10221_v41, %v6284_v51  ;;  %v12943_v6 = vadd.f32 %v6287_v16, %v6285_v32 }
0x239c   : > { %v12945_v54 = vadd.f32 %v6288_v34, %v6286_v30  ;;  %6291 = vst [vmem:[#allocation2] sm:$0x1] %v12943_v6  ;;  %v6293_v10 = vpack.c.bf16 %v12943_v6, %v12943_v6 }
0x239e   : > { %6292 = vst [vmem:[#allocation2 + $0x8] sm:$0x1] %v12945_v54  ;;  %v6294_v26 = vpack.c.bf16 %v12945_v54, %v12945_v54  ;;  %v6297_v19 = vunpack.c.l.b16 %v6293_v10 }
0x23a0   : > { %v6298_v33 = vunpack.c.l.b16 %v6294_v26 }
0x23a2   : > { %v6299_v18 = vrot.slane %v6298_v33, 7 }
0x23a4   : > { %v6301_v48 = vsel %vm806_vm2, %v6299_v18, %v6297_v19 }
0x23a5   : > { %v6302_v31 = vpack.c.b16 %v6301_v48, %v6301_v48 }
0x23a7   : > { %6337 = vmatmul.mubr.bf16.vlgmr.msra.gmra.mrb[8].mxu0 %v6302_v31  ;;  %9193 = vmatmul.mubr.bf16.vlgmr.msra.gmra.mrb[8].mxu1 %v6302_v31 }
0x23a8   : > { %6458 = vmatpush1.bf16.msra.mxu0 %v12757_v14  ;;  %9197 = vmatpush3.bf16.msra.mxu1 %v12785_v63 }
0x23a9   : > { %6459 = vmatprep.subr.bf16.mxu0 %v12760_v12  ;;  %9198 = vmatprep.subr.bf16.mxu1 %v10477_v49 }
0x23aa   : > { %6489 = vmatprep.mubr.bf16.mxu0 %v10478_v61  ;;  %9212 = vmatprep.mubr.msk.bf16.mxu1 %vm10479_vm7, %v10477_v49 }
0x23ac   : > { %6460 = vmatpush1.bf16.msra.mxu0 %v12766_v20  ;;  %9199 = vmatpush3.bf16.msra.mxu1 %v12798_v44 }
0x23ad   : > { %6461 = vmatprep.subr.bf16.mxu0 %v12770_v0  ;;  %9200 = vmatprep.subr.bf16.mxu1 %v10477_v49 }
0x23b0   : > { %6462 = vmatpush1.bf16.msra.mxu0 %v12778_v13  ;;  %9201 = vmatpush3.bf16.msra.mxu1 %v12813_v21 }
0x23b1   : > { %6463 = vmatprep.subr.bf16.mxu0 %v12782_v28  ;;  %9202 = vmatprep.subr.bf16.mxu1 %v10477_v49 }
0x23b4   : > { %6464 = vmatpush1.bf16.msra.mxu0 %v12790_v43  ;;  %9203 = vmatpush3.bf16.msra.mxu1 %v12826_v37 }
0x23b5   : > { %6465 = vmatprep.subr.bf16.mxu0 %v12794_v15  ;;  %9204 = vmatprep.subr.bf16.mxu1 %v10477_v49 }
0x23b8   : > { %6466 = vmatpush1.bf16.msra.mxu0 %v12805_v3  ;;  %9205 = vmatpush3.bf16.msra.mxu1 %v12839_v39 }
0x23b9   : > { %6467 = vmatprep.subr.bf16.mxu0 %v12809_v55  ;;  %9206 = vmatprep.subr.bf16.mxu1 %v10477_v49 }
0x23bc   : > { %6468 = vmatpush1.bf16.msra.mxu0 %v12818_v42  ;;  %9207 = vmatpush3.bf16.msra.mxu1 %v12849_v7 }
0x23bd   : > { %6469 = vmatprep.subr.bf16.mxu0 %v12822_v5  ;;  %9208 = vmatprep.subr.bf16.mxu1 %v10477_v49 }
0x23c0   : > { %6470 = vmatpush1.bf16.msra.mxu0 %v12831_v56  ;;  %9209 = vmatpush3.bf16.msra.mxu1 %v12855_v22 }
0x23c1   : > { %6471 = vmatprep.subr.bf16.mxu0 %v12835_v46  ;;  %9210 = vmatprep.subr.bf16.mxu1 %v10477_v49 }
0x23c4   : > { %6472 = vmatpush1.bf16.msra.mxu0 %v12844_v25  ;;  %9211 = vmatpush3.bf16.msra.mxu1 %v12864_v24 }
0x23c5   : > { %6614 = vmatprep.subr.bf16.mxu0 %v12752_v59  ;;  %9216 = vmatprep.subr.bf16.mxu1 %v10477_v49 }
0x247a   : > { %v6338_v38 = vpop.f32.mrb[8].mxu0  ;;  %v6379_v8 = vpop.f32.mrb[8].mxu1 }
0x247b   : > { %v6339_v11 = vadd.f32 %v6338_v38, %v12926_v40  ;;  %v6340_v9 = vpop.f32.mrb[9].mxu0  ;;  %v9194_v23 = vpop.f32.mrb[9].mxu1 }
0x247c   : > { %v6341_v50 = vadd.f32 %v6340_v9, %v12929_v27  ;;  %v6342_v4 = vpop.f32.mrb[10].mxu0  ;;  %v6382_v60 = vpop.f32.mrb[10].mxu1 }
0x247d   : > { %v6386_v2 = vrot.slane %v6339_v11, 7  ;;  %v6390_v58 = vadd.f32 %v6339_v11, %v12913_v62  ;;  %v6343_v1 = vpop.f32.mrb[11].mxu0  ;;  %v9195_v32 = vpop.f32.mrb[11].mxu1  ;;  %v6438_v60 = vrot.slane %v12945_v54, 7 }
0x247e   : > { %v6404_v51 = vrot.slane %v6341_v50, 7  ;;  %v6408_v16 = vadd.f32 %v6341_v50, %v12915_v17  ;;  %v6380_v50 = vadd.f32 %v6379_v8, %v12938_v29 }
0x247f   : > { %v6389_v41 = vadd.f32 %v6386_v2, %v12909_v53  ;;  %v8134_v30 = vmul.f32 -1.442695, %v6390_v58 }
0x2480   : > { %v6407_v34 = vadd.f32 %v6404_v51, %v12911_v52  ;;  %v8136_v10 = vmul.f32 -1.442695, %v6408_v16  ;;  %v6422_v58 = vrot.slane %v6380_v50, 7  ;;  %v6437_v51 = vrot.slane %v12943_v6, 7 }
0x2481   : > { %v8133_v26 = vmul.f32 -1.442695, %v6389_v41  ;;  %10222 = vpow2.f32 %v8134_v30 }
0x2482   : > { %v8135_v33 = vmul.f32 -1.442695, %v6407_v34  ;;  %10224 = vpow2.f32 %v8136_v10 }
0x2483   : > { %10226 = vpow2.f32 %v8133_v26 }
0x2484   : > { %10228 = vpow2.f32 %v8135_v33 }
0x248b   : > { %v10223_v19 = vpop.eup %10222 }
0x248c   : > { %v10225_v18 = vpop.eup %10224  ;;  %v6398_v48 = vadd.f32 1.0, %v10223_v19 }
0x248d   : > { %v10227_v31 = vpop.eup %10226  ;;  %v6416_v38 = vadd.f32 1.0, %v10225_v18 }
0x248e   : > { %v10229_v11 = vpop.eup %10228  ;;  %v6397_v9 = vadd.f32 1.0, %v10227_v31  ;;  %10230 = vrcp.f32 %v6398_v48 }
0x248f   : > { %v6415_v23 = vadd.f32 1.0, %v10229_v11  ;;  %10232 = vrcp.f32 %v6416_v38 }
0x2490   : > { %10234 = vrcp.f32 %v6397_v9 }
0x2491   : > { %10236 = vrcp.f32 %v6415_v23 }
0x2498   : > { %v10231_v4 = vpop.eup %10230 }
0x2499   : > { %v10233_v2 = vpop.eup %10232  ;;  %v6426_v1 = vmul.f32 %v10231_v4, %v6380_v50 }
0x249a   : > { %v10235_v32 = vpop.eup %10234  ;;  %v6442_v16 = vmul.f32 %v10233_v2, %v6438_v60  ;;  %v6432_v8 = vsub.f32 1.0, %v10233_v2 }
0x249b   : > { %v10237_v41 = vpop.eup %10236  ;;  %v6425_v30 = vmul.f32 %v10235_v32, %v6422_v58  ;;  %v6428_v34 = vadd.f32 %v6426_v1, %v12920_v35 }
0x249c   : > { %v6441_v10 = vmul.f32 %v10237_v41, %v6437_v51  ;;  %v6431_v19 = vsub.f32 1.0, %v10237_v41 }
0x249d   : > { %v6427_v26 = vadd.f32 %v6425_v30, %v12918_v36  ;;  %10238 = vtanh.f32 %v6428_v34 }
0x249f   : > { %10240 = vtanh.f32 %v6427_v26 }
0x24a7   : > { %v10239_v33 = vpop.eup %10238 }
0x24a8   : > { %v6434_v54 = vmul.f32 %v10239_v33, %v6432_v8 }
0x24a9   : > { %v10241_v18 = vpop.eup %10240 }
0x24aa   : > { %v6433_v48 = vmul.f32 %v10241_v18, %v6431_v19  ;;  %v13000_v31 = vadd.f32 %v6442_v16, %v6434_v54 }
0x24ac   : > { %v13002_v38 = vadd.f32 %v6441_v10, %v6433_v48  ;;  %6446 = vst [vmem:[#allocation2 + $0x8] sm:$0x2] %v13000_v31  ;;  %v6448_v11 = vpack.c.bf16 %v13000_v31, %v13000_v31 }
0x24ae   : > { %6445 = vst [vmem:[#allocation2] sm:$0x2] %v13002_v38  ;;  %v6447_v6 = vpack.c.bf16 %v13002_v38, %v13002_v38  ;;  %v6452_v23 = vunpack.c.l.b16 %v6448_v11 }
0x24b0   : > { %v6451_v9 = vunpack.c.l.b16 %v6447_v6 }
0x24b2   : > { %v6453_v50 = vrot.slane %v6451_v9, 1 }
0x24b4   : > { %v6454_v4 = vsel %vm806_vm2, %v6452_v23, %v6453_v50 }
0x24b5   : > { %v6455_v60 = vpack.c.b16 %v6454_v4, %v6454_v4 }
0x24b7   : > { %6490 = vmatmul.mubr.bf16.vlgmr.msra.gmra.mrb[12].mxu0 %v6455_v60  ;;  %9213 = vmatmul.mubr.bf16.vlgmr.msra.gmra.mrb[12].mxu1 %v6455_v60 }
0x24b8   : > { %6615 = vmatpush1.bf16.msra.mxu0 %v12757_v14  ;;  %9217 = vmatpush3.bf16.msra.mxu1 %v12785_v63 }
0x24b9   : > { %6616 = vmatprep.subr.bf16.mxu0 %v12760_v12  ;;  %9218 = vmatprep.subr.bf16.mxu1 %v10477_v49 }
0x24ba   : > { %6646 = vmatprep.mubr.bf16.mxu0 %v10478_v61  ;;  %9232 = vmatprep.mubr.msk.bf16.mxu1 %vm10479_vm7, %v10477_v49 }
0x24bc   : > { %6617 = vmatpush1.bf16.msra.mxu0 %v12766_v20  ;;  %9219 = vmatpush3.bf16.msra.mxu1 %v12798_v44 }
0x24bd   : > { %6618 = vmatprep.subr.bf16.mxu0 %v12770_v0  ;;  %9220 = vmatprep.subr.bf16.mxu1 %v10477_v49 }
0x24c0   : > { %6619 = vmatpush1.bf16.msra.mxu0 %v12778_v13  ;;  %9221 = vmatpush3.bf16.msra.mxu1 %v12813_v21 }
0x24c1   : > { %6620 = vmatprep.subr.bf16.mxu0 %v12782_v28  ;;  %9222 = vmatprep.subr.bf16.mxu1 %v10477_v49 }
0x24c4   : > { %6621 = vmatpush1.bf16.msra.mxu0 %v12790_v43  ;;  %9223 = vmatpush3.bf16.msra.mxu1 %v12826_v37 }
0x24c5   : > { %6622 = vmatprep.subr.bf16.mxu0 %v12794_v15  ;;  %9224 = vmatprep.subr.bf16.mxu1 %v10477_v49 }
0x24c8   : > { %6623 = vmatpush1.bf16.msra.mxu0 %v12805_v3  ;;  %9225 = vmatpush3.bf16.msra.mxu1 %v12839_v39 }
0x24c9   : > { %6624 = vmatprep.subr.bf16.mxu0 %v12809_v55  ;;  %9226 = vmatprep.subr.bf16.mxu1 %v10477_v49 }
0x24cc   : > { %6625 = vmatpush1.bf16.msra.mxu0 %v12818_v42  ;;  %9227 = vmatpush3.bf16.msra.mxu1 %v12849_v7 }
0x24cd   : > { %6626 = vmatprep.subr.bf16.mxu0 %v12822_v5  ;;  %9228 = vmatprep.subr.bf16.mxu1 %v10477_v49 }
0x24d0   : > { %6627 = vmatpush1.bf16.msra.mxu0 %v12831_v56  ;;  %9229 = vmatpush3.bf16.msra.mxu1 %v12855_v22 }
0x24d1   : > { %6628 = vmatprep.subr.bf16.mxu0 %v12835_v46  ;;  %9230 = vmatprep.subr.bf16.mxu1 %v10477_v49 }
0x24d4   : > { %6629 = vmatpush1.bf16.msra.mxu0 %v12844_v25  ;;  %9231 = vmatpush3.bf16.msra.mxu1 %v12864_v24 }
0x24d5   : > { %6771 = vmatprep.subr.bf16.mxu0 %v12752_v59  ;;  %9236 = vmatprep.subr.bf16.mxu1 %v10477_v49 }
0x258a   : > { %v6491_v2 = vpop.f32.mrb[12].mxu0  ;;  %v6532_v58 = vpop.f32.mrb[12].mxu1 }
0x258b   : > { %v6492_v1 = vadd.f32 %v6491_v2, %v12926_v40  ;;  %v6493_v32 = vpop.f32.mrb[13].mxu0  ;;  %v9214_v51 = vpop.f32.mrb[13].mxu1 }
0x258c   : > { %v6494_v16 = vadd.f32 %v6493_v32, %v12929_v27  ;;  %v6495_v41 = vpop.f32.mrb[14].mxu0  ;;  %v6535_v30 = vpop.f32.mrb[14].mxu1 }
0x258d   : > { %v6539_v34 = vrot.slane %v6492_v1, 6  ;;  %v6540_v10 = vrot.slane %v6492_v1, 7  ;;  %v6496_v26 = vpop.f32.mrb[15].mxu0  ;;  %v9215_v8 = vpop.f32.mrb[15].mxu1  ;;  %v6533_v30 = vadd.f32 %v6532_v58, %v12938_v29 }
0x258e   : > { %v6558_v33 = vrot.slane %v6494_v16, 6  ;;  %v6559_v19 = vrot.slane %v6494_v16, 7 }
0x258f   : > { %v6543_v54 = vadd.f32 %v6539_v34, %v12909_v53  ;;  %v6544_v18 = vadd.f32 %v6540_v10, %v12913_v62  ;;  %v6577_v34 = vrot.slane %v6533_v30, 6  ;;  %v6578_v26 = vrot.slane %v6533_v30, 7 }
0x2590   : > { %v6562_v48 = vadd.f32 %v6558_v33, %v12911_v52  ;;  %v6563_v6 = vadd.f32 %v6559_v19, %v12915_v17  ;;  %v6593_v19 = vrot.slane %v13002_v38, 7 }
0x2591   : > { %v8137_v11 = vmul.f32 -1.442695, %v6543_v54  ;;  %v8138_v9 = vmul.f32 -1.442695, %v6544_v18 }
0x2592   : > { %v8139_v23 = vmul.f32 -1.442695, %v6562_v48  ;;  %v8140_v50 = vmul.f32 -1.442695, %v6563_v6  ;;  %v6594_v48 = vrot.slane %v13000_v31, 7 }
0x2593   : > { %10242 = vpow2.f32 %v8137_v11 }
0x2594   : > { %10244 = vpow2.f32 %v8138_v9 }
0x2595   : > { %10246 = vpow2.f32 %v8139_v23 }
0x2596   : > { %10248 = vpow2.f32 %v8140_v50 }
0x259d   : > { %v10243_v4 = vpop.eup %10242 }
0x259e   : > { %v10245_v60 = vpop.eup %10244  ;;  %v6551_v2 = vadd.f32 1.0, %v10243_v4 }
0x259f   : > { %v10247_v1 = vpop.eup %10246  ;;  %v6552_v32 = vadd.f32 1.0, %v10245_v60 }
0x25a0   : > { %v10249_v51 = vpop.eup %10248  ;;  %10250 = vrcp.f32 %v6551_v2  ;;  %v6570_v16 = vadd.f32 1.0, %v10247_v1 }
0x25a1   : > { %10252 = vrcp.f32 %v6552_v32  ;;  %v6571_v41 = vadd.f32 1.0, %v10249_v51 }
0x25a2   : > { %10254 = vrcp.f32 %v6570_v16 }
0x25a3   : > { %10256 = vrcp.f32 %v6571_v41 }
0x25aa   : > { %v10251_v10 = vpop.eup %10250 }
0x25ab   : > { %v10253_v8 = vpop.eup %10252  ;;  %v6581_v33 = vmul.f32 %v10251_v10, %v6577_v34 }
0x25ac   : > { %v10255_v54 = vpop.eup %10254  ;;  %v6582_v18 = vmul.f32 %v10253_v8, %v6578_v26 }
0x25ad   : > { %v10257_v6 = vpop.eup %10256  ;;  %v6583_v11 = vadd.f32 %v6581_v33, %v12918_v36  ;;  %v6597_v9 = vmul.f32 %v10255_v54, %v6593_v19  ;;  %v6587_v58 = vsub.f32 1.0, %v10255_v54 }
0x25ae   : > { %v6584_v23 = vadd.f32 %v6582_v18, %v12920_v35  ;;  %v6598_v50 = vmul.f32 %v10257_v6, %v6594_v48  ;;  %v6588_v60 = vsub.f32 1.0, %v10257_v6 }
0x25af   : > { %10258 = vtanh.f32 %v6583_v11 }
0x25b0   : > { %10260 = vtanh.f32 %v6584_v23 }
0x25b9   : > { %v10259_v4 = vpop.eup %10258 }
0x25ba   : > { %v10261_v2 = vpop.eup %10260  ;;  %v6589_v1 = vmul.f32 %v10259_v4, %v6587_v58 }
0x25bb   : > { %v6590_v32 = vmul.f32 %v10261_v2, %v6588_v60 }
0x25bc   : > { %v13057_v38 = vadd.f32 %v6597_v9, %v6589_v1 }
0x25bd   : > { %v13059_v51 = vadd.f32 %v6598_v50, %v6590_v32 }
0x25be   : > { %6601 = vst [vmem:[#allocation2] sm:$0x4] %v13057_v38  ;;  %v6603_v31 = vpack.c.bf16 %v13057_v38, %v13057_v38 }
0x25bf   : > { %6602 = vst [vmem:[#allocation2 + $0x8] sm:$0x4] %v13059_v51  ;;  %v6604_v16 = vpack.c.bf16 %v13059_v51, %v13059_v51 }
0x25c0   : > { %v6607_v41 = vunpack.c.l.b16 %v6603_v31 }
0x25c1   : > { %v6608_v30 = vunpack.c.l.b16 %v6604_v16 }
0x25c2   : > { %v6609_v34 = vrot.slane %v6607_v41, 2 }
0x25c3   : > { %v6610_v10 = vrot.slane %v6608_v30, 1 }
0x25c5   : > { %v6611_v26 = vsel %vm806_vm2, %v6610_v10, %v6609_v34 }
0x25c6   : > { %v6612_v8 = vpack.c.b16 %v6611_v26, %v6611_v26 }
0x25c8   : > { %6647 = vmatmul.mubr.bf16.vlgmr.msra.gmra.mrb[16].mxu0 %v6612_v8  ;;  %9233 = vmatmul.mubr.bf16.vlgmr.msra.gmra.mrb[16].mxu1 %v6612_v8 }
0x25c9   : > { %6772 = vmatpush1.bf16.msra.mxu0 %v12757_v14  ;;  %9237 = vmatpush3.bf16.msra.mxu1 %v12785_v63 }
0x25ca   : > { %6773 = vmatprep.subr.bf16.mxu0 %v12760_v12  ;;  %9238 = vmatprep.subr.bf16.mxu1 %v10477_v49 }
0x25cb   : > { %6803 = vmatprep.mubr.bf16.mxu0 %v10478_v61  ;;  %9252 = vmatprep.mubr.msk.bf16.mxu1 %vm10479_vm7, %v10477_v49 }
0x25cd   : > { %6774 = vmatpush1.bf16.msra.mxu0 %v12766_v20  ;;  %9239 = vmatpush3.bf16.msra.mxu1 %v12798_v44 }
0x25ce   : > { %6775 = vmatprep.subr.bf16.mxu0 %v12770_v0  ;;  %9240 = vmatprep.subr.bf16.mxu1 %v10477_v49 }
0x25d1   : > { %6776 = vmatpush1.bf16.msra.mxu0 %v12778_v13  ;;  %9241 = vmatpush3.bf16.msra.mxu1 %v12813_v21 }
0x25d2   : > { %6777 = vmatprep.subr.bf16.mxu0 %v12782_v28  ;;  %9242 = vmatprep.subr.bf16.mxu1 %v10477_v49 }
0x25d5   : > { %6778 = vmatpush1.bf16.msra.mxu0 %v12790_v43  ;;  %9243 = vmatpush3.bf16.msra.mxu1 %v12826_v37 }
0x25d6   : > { %6779 = vmatprep.subr.bf16.mxu0 %v12794_v15  ;;  %9244 = vmatprep.subr.bf16.mxu1 %v10477_v49 }
0x25d9   : > { %6780 = vmatpush1.bf16.msra.mxu0 %v12805_v3  ;;  %9245 = vmatpush3.bf16.msra.mxu1 %v12839_v39 }
0x25da   : > { %6781 = vmatprep.subr.bf16.mxu0 %v12809_v55  ;;  %9246 = vmatprep.subr.bf16.mxu1 %v10477_v49 }
0x25dd   : > { %6782 = vmatpush1.bf16.msra.mxu0 %v12818_v42  ;;  %9247 = vmatpush3.bf16.msra.mxu1 %v12849_v7 }
0x25de   : > { %6783 = vmatprep.subr.bf16.mxu0 %v12822_v5  ;;  %9248 = vmatprep.subr.bf16.mxu1 %v10477_v49 }
0x25e1   : > { %6784 = vmatpush1.bf16.msra.mxu0 %v12831_v56  ;;  %9249 = vmatpush3.bf16.msra.mxu1 %v12855_v22 }
0x25e2   : > { %6785 = vmatprep.subr.bf16.mxu0 %v12835_v46  ;;  %9250 = vmatprep.subr.bf16.mxu1 %v10477_v49 }
0x25e5   : > { %6786 = vmatpush1.bf16.msra.mxu0 %v12844_v25  ;;  %9251 = vmatpush3.bf16.msra.mxu1 %v12864_v24 }
0x25e6   : > { %6928 = vmatprep.subr.bf16.mxu0 %v12752_v59  ;;  %9256 = vmatprep.subr.bf16.mxu1 %v10477_v49 }
0x269b   : > { %v6648_v14 = vpop.f32.mrb[16].mxu0  ;;  %v6689_v12 = vpop.f32.mrb[16].mxu1 }
0x269c   : > { %v6649_v20 = vadd.f32 %v6648_v14, %v12926_v40  ;;  %v6650_v0 = vpop.f32.mrb[17].mxu0  ;;  %v9234_v13 = vpop.f32.mrb[17].mxu1  ;;  %v6690_v26 = vadd.f32 %v6689_v12, %v12938_v29 }
0x269d   : > { %v6651_v28 = vadd.f32 %v6650_v0, %v12929_v27  ;;  %v6652_v43 = vpop.f32.mrb[18].mxu0  ;;  %v6692_v33 = vpop.f32.mrb[18].mxu1 }
0x269e   : > { %v6696_v19 = vrot.slane %v6649_v20, 5  ;;  %v6697_v54 = vrot.slane %v6649_v20, 6  ;;  %v6653_v18 = vpop.f32.mrb[19].mxu0  ;;  %v9235_v48 = vpop.f32.mrb[19].mxu1  ;;  %v6734_v8 = vrot.slane %v6690_v26, 5  ;;  %v6735_v20 = vrot.slane %v6690_v26, 6 }
0x269f   : > { %v6715_v6 = vrot.slane %v6651_v28, 5  ;;  %v6716_v11 = vrot.slane %v6651_v28, 6  ;;  %v6750_v28 = vrot.slane %v13057_v38, 7  ;;  %v13144_v26 = vld [vmem:[%s12732_s30 + $0x4b4] ss:$12 sps:$4 sm:$0xff]  }
0x26a0   : > { %v6700_v59 = vadd.f32 %v6696_v19, %v12909_v53  ;;  %v6701_v9 = vadd.f32 %v6697_v54, %v12913_v62  ;;  %v6751_v19 = vrot.slane %v13059_v51, 7 }
0x26a1   : > { %v6719_v23 = vadd.f32 %v6715_v6, %v12911_v52  ;;  %v6720_v50 = vadd.f32 %v6716_v11, %v12915_v17 }
0x26a2   : > { %v8141_v58 = vmul.f32 -1.442695, %v6700_v59  ;;  %v8142_v4 = vmul.f32 -1.442695, %v6701_v9 }
0x26a3   : > { %v8143_v60 = vmul.f32 -1.442695, %v6719_v23  ;;  %v8144_v2 = vmul.f32 -1.442695, %v6720_v50 }
0x26a4   : > { %10262 = vpow2.f32 %v8141_v58 }
0x26a5   : > { %10264 = vpow2.f32 %v8142_v4 }
0x26a6   : > { %10266 = vpow2.f32 %v8143_v60 }
0x26a7   : > { %10268 = vpow2.f32 %v8144_v2 }
0x26ae   : > { %v10263_v1 = vpop.eup %10262 }
0x26af   : > { %v10265_v32 = vpop.eup %10264  ;;  %v6708_v31 = vadd.f32 1.0, %v10263_v1 }
0x26b0   : > { %v10267_v16 = vpop.eup %10266  ;;  %v6709_v41 = vadd.f32 1.0, %v10265_v32 }
0x26b1   : > { %v10269_v30 = vpop.eup %10268  ;;  %10270 = vrcp.f32 %v6708_v31  ;;  %v6727_v34 = vadd.f32 1.0, %v10267_v16 }
0x26b2   : > { %10272 = vrcp.f32 %v6709_v41  ;;  %v6728_v10 = vadd.f32 1.0, %v10269_v30  ;;  %v13126_v30 = vld [vmem:[%s12732_s30 + $0x480] ss:$12 sps:$4 sm:$0xff]  }
0x26b3   : > { %10274 = vrcp.f32 %v6727_v34  ;;  %v13131_v34 = vld [vmem:[%s12732_s30 + $0x49c] ss:$12 sps:$4 sm:$0xff]  }
0x26b4   : > { %10276 = vrcp.f32 %v6728_v10  ;;  %v13139_v10 = vld [vmem:[%s12732_s30 + $0x498] ss:$12 sps:$4 sm:$0xff]  }
0x26bb   : > { %v10271_v14 = vpop.eup %10270 }
0x26bc   : > { %v10273_v0 = vpop.eup %10272  ;;  %v6738_v13 = vmul.f32 %v10271_v14, %v6734_v8  ;;  %v13154_v8 = vld [vmem:[%s12732_s30 + $0x4cc] ss:$12 sps:$4 sm:$0xff]   ;;  %v13159_v14 = vld [vmem:[%s12732_s30 + $0x4c8] ss:$12 sps:$4 sm:$0xff]  }
0x26bd   : > { %v10275_v43 = vpop.eup %10274  ;;  %v6739_v33 = vmul.f32 %v10273_v0, %v6735_v20 }
0x26be   : > { %v10277_v54 = vpop.eup %10276  ;;  %v6740_v18 = vadd.f32 %v6738_v13, %v12918_v36  ;;  %v6754_v48 = vmul.f32 %v10275_v43, %v6750_v28  ;;  %v6744_v12 = vsub.f32 1.0, %v10275_v43 }
0x26bf   : > { %v6741_v6 = vadd.f32 %v6739_v33, %v12920_v35  ;;  %v6755_v11 = vmul.f32 %v10277_v54, %v6751_v19  ;;  %v6745_v9 = vsub.f32 1.0, %v10277_v54 }
0x26c0   : > { %10278 = vtanh.f32 %v6740_v18 }
0x26c1   : > { %10280 = vtanh.f32 %v6741_v6 }
0x26ca   : > { %v10279_v59 = vpop.eup %10278 }
0x26cb   : > { %v10281_v23 = vpop.eup %10280  ;;  %v6746_v50 = vmul.f32 %v10279_v59, %v6744_v12 }
0x26cc   : > { %v6747_v38 = vmul.f32 %v10281_v23, %v6745_v9 }
0x26cd   : > { %v13114_v58 = vadd.f32 %v6754_v48, %v6746_v50 }
0x26ce   : > { %v13116_v4 = vadd.f32 %v6755_v11, %v6747_v38 }
0x26cf   : > { %6758 = vst [vmem:[#allocation2] sm:$0x8] %v13114_v58  ;;  %v6760_v51 = vpack.c.bf16 %v13114_v58, %v13114_v58 }
0x26d0   : > { %6759 = vst [vmem:[#allocation2 + $0x8] sm:$0x8] %v13116_v4  ;;  %v6761_v60 = vpack.c.bf16 %v13116_v4, %v13116_v4 }
0x26d1   : > { %v6764_v2 = vunpack.c.l.b16 %v6760_v51 }
0x26d2   : > { %v6765_v1 = vunpack.c.l.b16 %v6761_v60 }
0x26d3   : > { %v6766_v32 = vrot.slane %v6764_v2, 3 }
0x26d4   : > { %v6767_v31 = vrot.slane %v6765_v1, 2 }
0x26d6   : > { %v6768_v16 = vsel %vm806_vm2, %v6767_v31, %v6766_v32  ;;  %v6907_v32 = vrot.slane %v13114_v58, 7 }
0x26d7   : > { %v6769_v41 = vpack.c.b16 %v6768_v16, %v6768_v16 }
0x26d9   : > { %6804 = vmatmul.mubr.bf16.vlgmr.msra.gmra.mrb[20].mxu0 %v6769_v41  ;;  %9253 = vmatmul.mubr.bf16.vlgmr.msra.gmra.mrb[20].mxu1 %v6769_v41  ;;  %v6908_v41 = vrot.slane %v13116_v4, 7 }
0x26da   : > { %6929 = vmatpush1.bf16.msra.mxu0 %v13126_v30  ;;  %9257 = vmatpush3.bf16.msra.mxu1 %v12785_v63  ;;  %v13149_v63 = vld [vmem:[%s12732_s30 + $0x4b0] ss:$12 sps:$4 sm:$0xff]  }
0x26db   : > { %6930 = vmatprep.subr.bf16.mxu0 %v13131_v34  ;;  %9258 = vmatprep.subr.bf16.mxu1 %v10477_v49 }
0x26dc   : > { %6960 = vmatprep.mubr.bf16.mxu0 %v10478_v61  ;;  %9272 = vmatprep.mubr.msk.bf16.mxu1 %vm10479_vm7, %v10477_v49 }
0x26de   : > { %6931 = vmatpush1.bf16.msra.mxu0 %v13139_v10  ;;  %9259 = vmatpush3.bf16.msra.mxu1 %v12798_v44 }
0x26df   : > { %6932 = vmatprep.subr.bf16.mxu0 %v13144_v26  ;;  %9260 = vmatprep.subr.bf16.mxu1 %v10477_v49 }
0x26e2   : > { %6933 = vmatpush1.bf16.msra.mxu0 %v13149_v63  ;;  %9261 = vmatpush3.bf16.msra.mxu1 %v12813_v21 }
0x26e3   : > { %6934 = vmatprep.subr.bf16.mxu0 %v13154_v8  ;;  %9262 = vmatprep.subr.bf16.mxu1 %v10477_v49 }
0x26e6   : > { %6935 = vmatpush1.bf16.msra.mxu0 %v13159_v14  ;;  %9263 = vmatpush3.bf16.msra.mxu1 %v12826_v37 }
0x26e7   : > { %6936 = vmatprep.subr.bf16.mxu0 %v12794_v15  ;;  %9264 = vmatprep.subr.bf16.mxu1 %v10477_v49  ;;  %v13180_v15 = vld [vmem:[%s12732_s30 + $0x484] ss:$12 sps:$4 sm:$0xff]  }
0x26ea   : > { %6937 = vmatpush1.bf16.msra.mxu0 %v12805_v3  ;;  %9265 = vmatpush3.bf16.msra.mxu1 %v12839_v39 }
0x26eb   : > { %6938 = vmatprep.subr.bf16.mxu0 %v12809_v55  ;;  %9266 = vmatprep.subr.bf16.mxu1 %v10477_v49 }
0x26ee   : > { %6939 = vmatpush1.bf16.msra.mxu0 %v12818_v42  ;;  %9267 = vmatpush3.bf16.msra.mxu1 %v12849_v7 }
0x26ef   : > { %6940 = vmatprep.subr.bf16.mxu0 %v12822_v5  ;;  %9268 = vmatprep.subr.bf16.mxu1 %v10477_v49 }
0x26f2   : > { %6941 = vmatpush1.bf16.msra.mxu0 %v12831_v56  ;;  %9269 = vmatpush3.bf16.msra.mxu1 %v12855_v22 }
0x26f3   : > { %6942 = vmatprep.subr.bf16.mxu0 %v12835_v46  ;;  %9270 = vmatprep.subr.bf16.mxu1 %v10477_v49 }
0x26f6   : > { %6943 = vmatpush1.bf16.msra.mxu0 %v12844_v25  ;;  %9271 = vmatpush3.bf16.msra.mxu1 %v12864_v24 }
0x26f7   : > { %7085 = vmatprep.subr.bf16.mxu0 %v13180_v15  ;;  %9276 = vmatprep.subr.bf16.mxu1 %v10477_v49 }
0x27ac   : > { %v6805_v44 = vpop.f32.mrb[20].mxu0  ;;  %v6846_v3 = vpop.f32.mrb[20].mxu1 }
0x27ad   : > { %v6806_v55 = vadd.f32 %v6805_v44, %v12926_v40  ;;  %v6807_v21 = vpop.f32.mrb[21].mxu0  ;;  %v9254_v42 = vpop.f32.mrb[21].mxu1  ;;  %v6847_v50 = vadd.f32 %v6846_v3, %v12938_v29 }
0x27ae   : > { %v6808_v5 = vadd.f32 %v6807_v21, %v12929_v27  ;;  %v6809_v37 = vpop.f32.mrb[22].mxu0  ;;  %v6849_v56 = vpop.f32.mrb[22].mxu1 }
0x27af   : > { %v6853_v46 = vrot.slane %v6806_v55, 4  ;;  %v6854_v39 = vrot.slane %v6806_v55, 5  ;;  %v6810_v25 = vpop.f32.mrb[23].mxu0  ;;  %v9255_v7 = vpop.f32.mrb[23].mxu1  ;;  %v6891_v38 = vrot.slane %v6847_v50, 4  ;;  %v6892_v60 = vrot.slane %v6847_v50, 5 }
0x27b0   : > { %v6872_v22 = vrot.slane %v6808_v5, 4  ;;  %v6873_v24 = vrot.slane %v6808_v5, 5  ;;  %v13267_v50 = vld [vmem:[%s12732_s30 + $0x510] ss:$12 sps:$4 sm:$0xff]  }
0x27b1   : > { %v6857_v20 = vadd.f32 %v6853_v46, %v12909_v53  ;;  %v6858_v0 = vadd.f32 %v6854_v39, %v12913_v62 }
0x27b2   : > { %v6876_v13 = vadd.f32 %v6872_v22, %v12911_v52  ;;  %v6877_v28 = vadd.f32 %v6873_v24, %v12915_v17 }
0x27b3   : > { %v8145_v43 = vmul.f32 -1.442695, %v6857_v20  ;;  %v8146_v33 = vmul.f32 -1.442695, %v6858_v0 }
0x27b4   : > { %v8147_v19 = vmul.f32 -1.442695, %v6876_v13  ;;  %v8148_v54 = vmul.f32 -1.442695, %v6877_v28 }
0x27b5   : > { %10282 = vpow2.f32 %v8145_v43 }
0x27b6   : > { %10284 = vpow2.f32 %v8146_v33  ;;  %v13208_v33 = vld [vmem:[%s12732_s30 + $0x488] ss:$12 sps:$4 sm:$0xff]  }
0x27b7   : > { %10286 = vpow2.f32 %v8147_v19  ;;  %v13218_v19 = vld [vmem:[%s12732_s30 + $0x4a0] ss:$12 sps:$4 sm:$0xff]  }
0x27b8   : > { %10288 = vpow2.f32 %v8148_v54  ;;  %v13225_v54 = vld [vmem:[%s12732_s30 + $0x4b8] ss:$12 sps:$4 sm:$0xff]  }
0x27bf   : > { %v10283_v18 = vpop.eup %10282 }
0x27c0   : > { %v10285_v48 = vpop.eup %10284  ;;  %v6865_v6 = vadd.f32 1.0, %v10283_v18  ;;  %v13232_v18 = vld [vmem:[%s12732_s30 + $0x4d0] ss:$12 sps:$4 sm:$0xff]  }
0x27c1   : > { %v10287_v11 = vpop.eup %10286  ;;  %v6866_v12 = vadd.f32 1.0, %v10285_v48  ;;  %v13236_v48 = vld [vmem:[%s12732_s30 + $0x4e4] ss:$12 sps:$4 sm:$0xff]  }
0x27c2   : > { %v10289_v59 = vpop.eup %10288  ;;  %10290 = vrcp.f32 %v6865_v6  ;;  %v6884_v9 = vadd.f32 1.0, %v10287_v11  ;;  %v13241_v6 = vld [vmem:[%s12732_s30 + $0x4e0] ss:$12 sps:$4 sm:$0xff]   ;;  %v13245_v11 = vld [vmem:[%s12732_s30 + $0x4e8] ss:$12 sps:$4 sm:$0xff]  }
0x27c3   : > { %10292 = vrcp.f32 %v6866_v12  ;;  %v6885_v23 = vadd.f32 1.0, %v10289_v59  ;;  %v13249_v12 = vld [vmem:[%s12732_s30 + $0x4fc] ss:$12 sps:$4 sm:$0xff]   ;;  %v13254_v59 = vld [vmem:[%s12732_s30 + $0x4f8] ss:$12 sps:$4 sm:$0xff]  }
0x27c4   : > { %10294 = vrcp.f32 %v6884_v9  ;;  %v13258_v9 = vld [vmem:[%s12732_s30 + $0x500] ss:$12 sps:$4 sm:$0xff]  }
0x27c5   : > { %10296 = vrcp.f32 %v6885_v23  ;;  %v13262_v23 = vld [vmem:[%s12732_s30 + $0x514] ss:$12 sps:$4 sm:$0xff]  }
0x27cc   : > { %v10291_v51 = vpop.eup %10290 }
0x27cd   : > { %v10293_v2 = vpop.eup %10292  ;;  %v6895_v1 = vmul.f32 %v10291_v51, %v6891_v38  ;;  %v13271_v38 = vld [vmem:[%s12732_s30 + $0x518] ss:$12 sps:$4 sm:$0xff]  }
0x27ce   : > { %v10295_v31 = vpop.eup %10294  ;;  %v6896_v16 = vmul.f32 %v10293_v2, %v6892_v60  ;;  %v13275_v51 = vld [vmem:[%s12732_s30 + $0x52c] ss:$12 sps:$4 sm:$0xff]   ;;  %v13280_v60 = vld [vmem:[%s12732_s30 + $0x528] ss:$12 sps:$4 sm:$0xff]   ;;  %v13284_v2 = vld [vmem:[%s12732_s30 + $0x530] ss:$12 sps:$4 sm:$0xff]  }
0x27cf   : > { %v10297_v44 = vpop.eup %10296  ;;  %v6897_v55 = vadd.f32 %v6895_v1, %v12918_v36  ;;  %v6911_v21 = vmul.f32 %v10295_v31, %v6907_v32  ;;  %v6901_v3 = vsub.f32 1.0, %v10295_v31 }
0x27d0   : > { %v6898_v42 = vadd.f32 %v6896_v16, %v12920_v35  ;;  %v6912_v5 = vmul.f32 %v10297_v44, %v6908_v41  ;;  %v6902_v56 = vsub.f32 1.0, %v10297_v44 }
0x27d1   : > { %10298 = vtanh.f32 %v6897_v55 }
0x27d2   : > { %10300 = vtanh.f32 %v6898_v42 }
0x27db   : > { %v10299_v37 = vpop.eup %10298 }
0x27dc   : > { %v10301_v46 = vpop.eup %10300  ;;  %v6903_v39 = vmul.f32 %v10299_v37, %v6901_v3 }
0x27dd   : > { %v6904_v25 = vmul.f32 %v10301_v46, %v6902_v56 }
0x27de   : > { %v13195_v58 = vadd.f32 %v6911_v21, %v6903_v39 }
0x27df   : > { %v13197_v7 = vadd.f32 %v6912_v5, %v6904_v25 }
0x27e0   : > { %6915 = vst [vmem:[#allocation2] sm:$0x10] %v13195_v58  ;;  %v6917_v4 = vpack.c.bf16 %v13195_v58, %v13195_v58 }
0x27e1   : > { %6916 = vst [vmem:[#allocation2 + $0x8] sm:$0x10] %v13197_v7  ;;  %v6918_v22 = vpack.c.bf16 %v13197_v7, %v13197_v7 }
0x27e2   : > { %v6921_v24 = vunpack.c.l.b16 %v6917_v4 }
0x27e3   : > { %v6922_v20 = vunpack.c.l.b16 %v6918_v22 }
0x27e4   : > { %v6923_v0 = vrot.slane %v6921_v24, 4 }
0x27e5   : > { %v6924_v13 = vrot.slane %v6922_v20, 3 }
0x27e7   : > { %v6925_v28 = vsel %vm806_vm2, %v6924_v13, %v6923_v0 }
0x27e8   : > { %v6926_v43 = vpack.c.b16 %v6925_v28, %v6925_v28 }
0x27ea   : > { %6961 = vmatmul.mubr.bf16.vlgmr.msra.gmra.mrb[24].mxu0 %v6926_v43  ;;  %9273 = vmatmul.mubr.bf16.vlgmr.msra.gmra.mrb[24].mxu1 %v6926_v43 }
0x27eb   : > { %7086 = vmatpush1.bf16.msra.mxu0 %v13126_v30  ;;  %9277 = vmatpush3.bf16.msra.mxu1 %v13208_v33 }
0x27ec   : > { %7087 = vmatprep.subr.bf16.mxu0 %v13131_v34  ;;  %9278 = vmatprep.subr.bf16.mxu1 %v10477_v49 }
0x27ed   : > { %7117 = vmatprep.mubr.bf16.mxu0 %v10478_v61  ;;  %9292 = vmatprep.mubr.msk.bf16.mxu1 %vm10479_vm7, %v10477_v49 }
0x27ef   : > { %7088 = vmatpush1.bf16.msra.mxu0 %v13139_v10  ;;  %9279 = vmatpush3.bf16.msra.mxu1 %v13218_v19 }
0x27f0   : > { %7089 = vmatprep.subr.bf16.mxu0 %v13144_v26  ;;  %9280 = vmatprep.subr.bf16.mxu1 %v10477_v49 }
0x27f3   : > { %7090 = vmatpush1.bf16.msra.mxu0 %v13149_v63  ;;  %9281 = vmatpush3.bf16.msra.mxu1 %v13225_v54 }
0x27f4   : > { %7091 = vmatprep.subr.bf16.mxu0 %v13154_v8  ;;  %9282 = vmatprep.subr.bf16.mxu1 %v10477_v49 }
0x27f7   : > { %7092 = vmatpush1.bf16.msra.mxu0 %v13159_v14  ;;  %9283 = vmatpush3.bf16.msra.mxu1 %v13232_v18 }
0x27f8   : > { %7093 = vmatprep.subr.bf16.mxu0 %v13236_v48  ;;  %9284 = vmatprep.subr.bf16.mxu1 %v10477_v49 }
0x27fb   : > { %7094 = vmatpush1.bf16.msra.mxu0 %v13241_v6  ;;  %9285 = vmatpush3.bf16.msra.mxu1 %v13245_v11 }
0x27fc   : > { %7095 = vmatprep.subr.bf16.mxu0 %v13249_v12  ;;  %9286 = vmatprep.subr.bf16.mxu1 %v10477_v49 }
0x27ff   : > { %7096 = vmatpush1.bf16.msra.mxu0 %v13254_v59  ;;  %9287 = vmatpush3.bf16.msra.mxu1 %v13258_v9 }
0x2800   : > { %7097 = vmatprep.subr.bf16.mxu0 %v13262_v23  ;;  %9288 = vmatprep.subr.bf16.mxu1 %v10477_v49 }
0x2803   : > { %7098 = vmatpush1.bf16.msra.mxu0 %v13267_v50  ;;  %9289 = vmatpush3.bf16.msra.mxu1 %v13271_v38 }
0x2804   : > { %7099 = vmatprep.subr.bf16.mxu0 %v13275_v51  ;;  %9290 = vmatprep.subr.bf16.mxu1 %v10477_v49 }
0x2807   : > { %7100 = vmatpush1.bf16.msra.mxu0 %v13280_v60  ;;  %9291 = vmatpush3.bf16.msra.mxu1 %v13284_v2 }
0x2808   : > { %7242 = vmatprep.subr.bf16.mxu0 %v13180_v15  ;;  %9296 = vmatprep.subr.bf16.mxu1 %v10477_v49 }
0x28bd   : > { %v6962_v1 = vpop.f32.mrb[24].mxu0  ;;  %v7003_v32 = vpop.f32.mrb[24].mxu1 }
0x28be   : > { %v6963_v31 = vadd.f32 %v6962_v1, %v12926_v40  ;;  %v6964_v16 = vpop.f32.mrb[25].mxu0  ;;  %v9274_v41 = vpop.f32.mrb[25].mxu1 }
0x28bf   : > { %v6965_v44 = vadd.f32 %v6964_v16, %v12929_v27  ;;  %v6966_v55 = vpop.f32.mrb[26].mxu0  ;;  %v7006_v21 = vpop.f32.mrb[26].mxu1 }
0x28c0   : > { %v7010_v42 = vrot.slane %v6963_v31, 3  ;;  %v7011_v5 = vrot.slane %v6963_v31, 4  ;;  %v6967_v3 = vpop.f32.mrb[27].mxu0  ;;  %v9275_v37 = vpop.f32.mrb[27].mxu1  ;;  %v7004_v55 = vadd.f32 %v7003_v32, %v12938_v29 }
0x28c1   : > { %v7029_v56 = vrot.slane %v6965_v44, 3  ;;  %v7030_v46 = vrot.slane %v6965_v44, 4 }
0x28c2   : > { %v7014_v15 = vadd.f32 %v7010_v42, %v12909_v53  ;;  %v7015_v39 = vadd.f32 %v7011_v5, %v12913_v62  ;;  %v7048_v21 = vrot.slane %v7004_v55, 3  ;;  %v7049_v5 = vrot.slane %v7004_v55, 4 }
0x28c3   : > { %v7033_v25 = vadd.f32 %v7029_v56, %v12911_v52  ;;  %v7034_v4 = vadd.f32 %v7030_v46, %v12915_v17  ;;  %v7064_v56 = vrot.slane %v13195_v58, 7 }
0x28c4   : > { %v8149_v22 = vmul.f32 -1.442695, %v7014_v15  ;;  %v8150_v24 = vmul.f32 -1.442695, %v7015_v39  ;;  %v7065_v39 = vrot.slane %v13197_v7, 7 }
0x28c5   : > { %v8151_v20 = vmul.f32 -1.442695, %v7033_v25  ;;  %v8152_v0 = vmul.f32 -1.442695, %v7034_v4 }
0x28c6   : > { %10302 = vpow2.f32 %v8149_v22 }
0x28c7   : > { %10304 = vpow2.f32 %v8150_v24 }
0x28c8   : > { %10306 = vpow2.f32 %v8151_v20 }
0x28c9   : > { %10308 = vpow2.f32 %v8152_v0 }
0x28d0   : > { %v10303_v13 = vpop.eup %10302 }
0x28d1   : > { %v10305_v28 = vpop.eup %10304  ;;  %v7022_v43 = vadd.f32 1.0, %v10303_v13 }
0x28d2   : > { %v10307_v1 = vpop.eup %10306  ;;  %v7023_v31 = vadd.f32 1.0, %v10305_v28 }
0x28d3   : > { %v10309_v16 = vpop.eup %10308  ;;  %10310 = vrcp.f32 %v7022_v43  ;;  %v7041_v41 = vadd.f32 1.0, %v10307_v1 }
0x28d4   : > { %10312 = vrcp.f32 %v7023_v31  ;;  %v7042_v44 = vadd.f32 1.0, %v10309_v16 }
0x28d5   : > { %10314 = vrcp.f32 %v7041_v41 }
0x28d6   : > { %10316 = vrcp.f32 %v7042_v44 }
0x28dd   : > { %v10311_v42 = vpop.eup %10310 }
0x28de   : > { %v10313_v3 = vpop.eup %10312  ;;  %v7052_v37 = vmul.f32 %v10311_v42, %v7048_v21 }
0x28df   : > { %v10315_v46 = vpop.eup %10314  ;;  %v7053_v15 = vmul.f32 %v10313_v3, %v7049_v5 }
0x28e0   : > { %v10317_v25 = vpop.eup %10316  ;;  %v7054_v4 = vadd.f32 %v7052_v37, %v12918_v36  ;;  %v7068_v22 = vmul.f32 %v10315_v46, %v7064_v56  ;;  %v7058_v32 = vsub.f32 1.0, %v10315_v46 }
0x28e1   : > { %v7055_v24 = vadd.f32 %v7053_v15, %v12920_v35  ;;  %v7069_v20 = vmul.f32 %v10317_v25, %v7065_v39  ;;  %v7059_v13 = vsub.f32 1.0, %v10317_v25 }
0x28e2   : > { %10318 = vtanh.f32 %v7054_v4 }
0x28e3   : > { %10320 = vtanh.f32 %v7055_v24 }
0x28ec   : > { %v10319_v0 = vpop.eup %10318 }
0x28ed   : > { %v10321_v28 = vpop.eup %10320  ;;  %v7060_v43 = vmul.f32 %v10319_v0, %v7058_v32 }
0x28ee   : > { %v7061_v1 = vmul.f32 %v10321_v28, %v7059_v13 }
0x28ef   : > { %v13300_v58 = vadd.f32 %v7068_v22, %v7060_v43 }
0x28f0   : > { %v13302_v31 = vadd.f32 %v7069_v20, %v7061_v1 }
0x28f1   : > { %7072 = vst [vmem:[#allocation2] sm:$0x20] %v13300_v58  ;;  %v7074_v7 = vpack.c.bf16 %v13300_v58, %v13300_v58  ;;  %v7221_v32 = vrot.slane %v13300_v58, 7 }
0x28f2   : > { %7073 = vst [vmem:[#allocation2 + $0x8] sm:$0x20] %v13302_v31  ;;  %v7075_v16 = vpack.c.bf16 %v13302_v31, %v13302_v31  ;;  %v7222_v28 = vrot.slane %v13302_v31, 7 }
0x28f3   : > { %v7078_v41 = vunpack.c.l.b16 %v7074_v7 }
0x28f4   : > { %v7079_v44 = vunpack.c.l.b16 %v7075_v16 }
0x28f5   : > { %v7080_v55 = vrot.slane %v7078_v41, 5 }
0x28f6   : > { %v7081_v21 = vrot.slane %v7079_v44, 4 }
0x28f8   : > { %v7082_v42 = vsel %vm806_vm2, %v7081_v21, %v7080_v55 }
0x28f9   : > { %v7083_v5 = vpack.c.b16 %v7082_v42, %v7082_v42 }
0x28fb   : > { %7118 = vmatmul.mubr.bf16.vlgmr.msra.gmra.mrb[28].mxu0 %v7083_v5  ;;  %9293 = vmatmul.mubr.bf16.vlgmr.msra.gmra.mrb[28].mxu1 %v7083_v5 }
0x28fc   : > { %7243 = vmatpush1.bf16.msra.mxu0 %v13126_v30  ;;  %9297 = vmatpush3.bf16.msra.mxu1 %v13208_v33 }
0x28fd   : > { %7244 = vmatprep.subr.bf16.mxu0 %v13131_v34  ;;  %9298 = vmatprep.subr.bf16.mxu1 %v10477_v49 }
0x28fe   : > { %7274 = vmatprep.mubr.bf16.mxu0 %v10478_v61  ;;  %9312 = vmatprep.mubr.msk.bf16.mxu1 %vm10479_vm7, %v10477_v49 }
0x2900   : > { %7245 = vmatpush1.bf16.msra.mxu0 %v13139_v10  ;;  %9299 = vmatpush3.bf16.msra.mxu1 %v13218_v19 }
0x2901   : > { %7246 = vmatprep.subr.bf16.mxu0 %v13144_v26  ;;  %9300 = vmatprep.subr.bf16.mxu1 %v10477_v49 }
0x2904   : > { %7247 = vmatpush1.bf16.msra.mxu0 %v13149_v63  ;;  %9301 = vmatpush3.bf16.msra.mxu1 %v13225_v54 }
0x2905   : > { %7248 = vmatprep.subr.bf16.mxu0 %v13154_v8  ;;  %9302 = vmatprep.subr.bf16.mxu1 %v10477_v49 }
0x2908   : > { %7249 = vmatpush1.bf16.msra.mxu0 %v13159_v14  ;;  %9303 = vmatpush3.bf16.msra.mxu1 %v13232_v18 }
0x2909   : > { %7250 = vmatprep.subr.bf16.mxu0 %v13236_v48  ;;  %9304 = vmatprep.subr.bf16.mxu1 %v10477_v49 }
0x290c   : > { %7251 = vmatpush1.bf16.msra.mxu0 %v13241_v6  ;;  %9305 = vmatpush3.bf16.msra.mxu1 %v13245_v11 }
0x290d   : > { %7252 = vmatprep.subr.bf16.mxu0 %v13249_v12  ;;  %9306 = vmatprep.subr.bf16.mxu1 %v10477_v49 }
0x2910   : > { %7253 = vmatpush1.bf16.msra.mxu0 %v13254_v59  ;;  %9307 = vmatpush3.bf16.msra.mxu1 %v13258_v9 }
0x2911   : > { %7254 = vmatprep.subr.bf16.mxu0 %v13262_v23  ;;  %9308 = vmatprep.subr.bf16.mxu1 %v10477_v49 }
0x2914   : > { %7255 = vmatpush1.bf16.msra.mxu0 %v13267_v50  ;;  %9309 = vmatpush3.bf16.msra.mxu1 %v13271_v38 }
0x2915   : > { %7256 = vmatprep.subr.bf16.mxu0 %v13275_v51  ;;  %9310 = vmatprep.subr.bf16.mxu1 %v10477_v49 }
0x2918   : > { %7257 = vmatpush1.bf16.msra.mxu0 %v13280_v60  ;;  %9311 = vmatpush3.bf16.msra.mxu1 %v13284_v2 }
0x29ce   : > { %v7119_v61 = vpop.f32.mrb[28].mxu0  ;;  %v7160_v30 = vpop.f32.mrb[28].mxu1 }
0x29cf   : > { %v7120_v34 = vadd.f32 %v7119_v61, %v12926_v40  ;;  %v7121_v10 = vpop.f32.mrb[29].mxu0  ;;  %v9294_v26 = vpop.f32.mrb[29].mxu1  ;;  %v7161_v39 = vadd.f32 %v7160_v30, %v12938_v29 }
0x29d0   : > { %v7122_v63 = vadd.f32 %v7121_v10, %v12929_v27  ;;  %v7123_v8 = vpop.f32.mrb[30].mxu0  ;;  %v7163_v14 = vpop.f32.mrb[30].mxu1 }
0x29d1   : > { %v7167_v33 = vrot.slane %v7120_v34, 2  ;;  %v7168_v19 = vrot.slane %v7120_v34, 3  ;;  %v7124_v54 = vpop.f32.mrb[31].mxu0  ;;  %v9295_v18 = vpop.f32.mrb[31].mxu1  ;;  %v7205_v25 = vrot.slane %v7161_v39, 2  ;;  %v7206_v22 = vrot.slane %v7161_v39, 3 }
0x29d2   : > { %v7186_v48 = vrot.slane %v7122_v63, 2  ;;  %v7187_v49 = vrot.slane %v7122_v63, 3 }
0x29d3   : > { %v7171_v6 = vadd.f32 %v7167_v33, %v12909_v53  ;;  %v7172_v11 = vadd.f32 %v7168_v19, %v12913_v62 }
0x29d4   : > { %v7190_v12 = vadd.f32 %v7186_v48, %v12911_v52  ;;  %v7191_v59 = vadd.f32 %v7187_v49, %v12915_v17 }
0x29d5   : > { %v8153_v9 = vmul.f32 -1.442695, %v7171_v6  ;;  %v8154_v23 = vmul.f32 -1.442695, %v7172_v11 }
0x29d6   : > { %v8155_v50 = vmul.f32 -1.442695, %v7190_v12  ;;  %v8156_v38 = vmul.f32 -1.442695, %v7191_v59 }
0x29d7   : > { %10322 = vpow2.f32 %v8153_v9 }
0x29d8   : > { %10324 = vpow2.f32 %v8154_v23 }
0x29d9   : > { %10326 = vpow2.f32 %v8155_v50 }
0x29da   : > { %10328 = vpow2.f32 %v8156_v38 }
0x29e1   : > { %v10323_v51 = vpop.eup %10322 }
0x29e2   : > { %v10325_v60 = vpop.eup %10324  ;;  %v7179_v2 = vadd.f32 1.0, %v10323_v51 }
0x29e3   : > { %v10327_v3 = vpop.eup %10326  ;;  %v7180_v37 = vadd.f32 1.0, %v10325_v60 }
0x29e4   : > { %v10329_v56 = vpop.eup %10328  ;;  %10330 = vrcp.f32 %v7179_v2  ;;  %v7198_v46 = vadd.f32 1.0, %v10327_v3 }
0x29e5   : > { %10332 = vrcp.f32 %v7180_v37  ;;  %v7199_v15 = vadd.f32 1.0, %v10329_v56 }
0x29e6   : > { %10334 = vrcp.f32 %v7198_v46 }
0x29e7   : > { %10336 = vrcp.f32 %v7199_v15 }
0x29ee   : > { %v10331_v4 = vpop.eup %10330 }
0x29ef   : > { %v10333_v24 = vpop.eup %10332  ;;  %v7209_v20 = vmul.f32 %v10331_v4, %v7205_v25 }
0x29f0   : > { %v10335_v0 = vpop.eup %10334  ;;  %v7210_v13 = vmul.f32 %v10333_v24, %v7206_v22 }
0x29f1   : > { %v10337_v43 = vpop.eup %10336  ;;  %v7211_v1 = vadd.f32 %v7209_v20, %v12918_v36  ;;  %v7225_v7 = vmul.f32 %v10335_v0, %v7221_v32  ;;  %v7215_v44 = vsub.f32 1.0, %v10335_v0 }
0x29f2   : > { %v7212_v16 = vadd.f32 %v7210_v13, %v12920_v35  ;;  %v7226_v41 = vmul.f32 %v10337_v43, %v7222_v28  ;;  %v7216_v21 = vsub.f32 1.0, %v10337_v43 }
0x29f3   : > { %10338 = vtanh.f32 %v7211_v1 }
0x29f4   : > { %10340 = vtanh.f32 %v7212_v16 }
0x29fd   : > { %v10339_v55 = vpop.eup %10338 }
0x29fe   : > { %v10341_v42 = vpop.eup %10340  ;;  %v7217_v5 = vmul.f32 %v10339_v55, %v7215_v44 }
0x29ff   : > { %v7218_v61 = vmul.f32 %v10341_v42, %v7216_v21 }
0x2a00   : > { %v13355_v58 = vadd.f32 %v7225_v7, %v7217_v5 }
0x2a01   : > { %v13357_v30 = vadd.f32 %v7226_v41, %v7218_v61 }
0x2a02   : > { %7229 = vst [vmem:[#allocation2] sm:$0x40] %v13355_v58  ;;  %v7231_v31 = vpack.c.bf16 %v13355_v58, %v13355_v58  ;;  %v7378_v13 = vrot.slane %v13355_v58, 7 }
0x2a03   : > { %7230 = vst [vmem:[#allocation2 + $0x8] sm:$0x40] %v13357_v30  ;;  %v7232_v34 = vpack.c.bf16 %v13357_v30, %v13357_v30  ;;  %v7379_v1 = vrot.slane %v13357_v30, 7  ;;  %v10480_v30 = vmov (%p5702_p3), 0  }
0x2a04   : > { %v7235_v10 = vunpack.c.l.b16 %v7231_v31 }
0x2a05   : > { %v7236_v26 = vunpack.c.l.b16 %v7232_v34 }
0x2a06   : > { %v7237_v63 = vrot.slane %v7235_v10, 6 }
0x2a07   : > { %v7238_v8 = vrot.slane %v7236_v26, 5  ;;  %v10389_v26 = vld [vmem:[%s13455_s10 + $0x14] ss:$8 sps:$4 sm:$0xff] (%p5702_p3)  }
0x2a09   : > { %v7239_v14 = vsel %vm806_vm2, %v7238_v8, %v7237_v63  ;;  %v10391_v63 = vld [vmem:[%s13455_s10 + $0x10] ss:$8 sps:$4 sm:$0xff] (%p5702_p3)   ;;  %v10394_v8 = vld [vmem:[%s13455_s10 + $0x20] ss:$8 sps:$4 sm:$0xff] (%p5702_p3)  }
0x2a0a   : > { %v7240_v33 = vpack.c.b16 %v7239_v14, %v7239_v14  ;;  %v10395_v14 = vld [vmem:[%s13455_s10 + $0x34] ss:$8 sps:$4 sm:$0xff] (%p5702_p3)  }
0x2a0c   : > { %7275 = vmatmul.mubr.bf16.vlgmr.msra.gmra.mrb[32].mxu0 %v7240_v33  ;;  %9313 = vmatmul.mubr.bf16.vlgmr.msra.gmra.mrb[32].mxu1 %v7240_v33  ;;  %v10397_v33 = vld [vmem:[%s13455_s10 + $0x30] ss:$8 sps:$4 sm:$0xff] (%p5702_p3)  }
0x2a0d   :  { %7531 = vmatprep.mubr.bf16.mxu0 (%p5702_p3), %v10480_v30 }
0x2adf   : > { %v7276_v19 = vpop.f32.mrb[32].mxu0  ;;  %v7317_v54 = vpop.f32.mrb[32].mxu1 }
0x2ae0   : > { %v7277_v18 = vadd.f32 %v7276_v19, %v12926_v40  ;;  %v7278_v48 = vpop.f32.mrb[33].mxu0  ;;  %v9314_v49 = vpop.f32.mrb[33].mxu1  ;;  %v10398_v19 = vld [vmem:[%s13455_s10 + $0x44] ss:$8 sps:$4 sm:$0xff] (%p5702_p3)  }
0x2ae1   : > { %v7279_v6 = vadd.f32 %v7278_v48, %v12929_v27  ;;  %v7280_v11 = vpop.f32.mrb[34].mxu0  ;;  %v7320_v12 = vpop.f32.mrb[34].mxu1  ;;  %v10403_v48 = vld [vmem:[%s13455_s10 + $0x50] ss:$8 sps:$4 sm:$0xff] (%p5702_p3)   ;;  %v10404_v49 = vld [vmem:[%s13455_s10 + $0x64] ss:$8 sps:$4 sm:$0xff] (%p5702_p3)  }
0x2ae2   : > { %v7324_v59 = vrot.slane %v7277_v18, 1  ;;  %v7325_v9 = vrot.slane %v7277_v18, 2  ;;  %v7281_v23 = vpop.f32.mrb[35].mxu0  ;;  %v9315_v50 = vpop.f32.mrb[35].mxu1  ;;  %v10401_v18 = vld [vmem:[%s13455_s10 + $0x54] ss:$8 sps:$4 sm:$0xff] (%p5702_p3)  }
0x2ae3   : > { %v7343_v38 = vrot.slane %v7279_v6, 1  ;;  %v7344_v51 = vrot.slane %v7279_v6, 2  ;;  %v10406_v6 = vld [vmem:[%s13455_s10 + $0x60] ss:$8 sps:$4 sm:$0xff] (%p5702_p3)   ;;  %v10407_v11 = vld [vmem:[%s13455_s10 + $0x74] ss:$8 sps:$4 sm:$0xff] (%p5702_p3)  }
0x2ae4   : > { %v7328_v60 = vadd.f32 %v7324_v59, %v12909_v53  ;;  %v7329_v2 = vadd.f32 %v7325_v9, %v12913_v62  ;;  %v10409_v12 = vld [vmem:[%s13455_s10 + $0x70] ss:$8 sps:$4 sm:$0xff] (%p5702_p3)   ;;  %v7407_v50 = vld [vmem:[%s13456_s11] sm:$0x3] (%p5702_p3) }
0x2ae5   : > { %v7347_v3 = vadd.f32 %v7343_v38, %v12911_v52  ;;  %v7348_v40 = vadd.f32 %v7344_v51, %v12915_v17  ;;  %v7318_v17 = vadd.f32 %v7317_v54, %v12938_v29  ;;  %v10400_v54 = vld [vmem:[%s13455_s10 + $0x40] ss:$8 sps:$4 sm:$0xff] (%p5702_p3)   ;;  %v7412_v38 = vrot.slane (%p5702_p3), %v7407_v50, %v10813_v45 }
0x2ae6   : > { %v8157_v37 = vmul.f32 -1.442695, %v7328_v60  ;;  %v8158_v56 = vmul.f32 -1.442695, %v7329_v2  ;;  %v7416_v51 = vrot.slane (%p5702_p3), %v7407_v50, %v10815_v47 }
0x2ae7   : > { %v8159_v46 = vmul.f32 -1.442695, %v7347_v3  ;;  %v8160_v27 = vmul.f32 -1.442695, %v7348_v40  ;;  %v7362_v24 = vrot.slane %v7318_v17, 1  ;;  %v7363_v32 = vrot.slane %v7318_v17, 2 }
0x2ae8   : > { %10342 = vpow2.f32 %v8157_v37 }
0x2ae9   : > { %10344 = vpow2.f32 %v8158_v56 }
0x2aea   : > { %10346 = vpow2.f32 %v8159_v46 }
0x2aeb   : > { %10348 = vpow2.f32 %v8160_v27 }
0x2af2   : > { %v10343_v15 = vpop.eup %10342 }
0x2af3   : > { %v10345_v39 = vpop.eup %10344  ;;  %v7336_v25 = vadd.f32 1.0, %v10343_v15 }
0x2af4   : > { %v10347_v4 = vpop.eup %10346  ;;  %v7337_v22 = vadd.f32 1.0, %v10345_v39 }
0x2af5   : > { %v10349_v53 = vpop.eup %10348  ;;  %10350 = vrcp.f32 %v7336_v25  ;;  %v7355_v62 = vadd.f32 1.0, %v10347_v4 }
0x2af6   : > { %10352 = vrcp.f32 %v7337_v22  ;;  %v7356_v52 = vadd.f32 1.0, %v10349_v53 }
0x2af7   : > { %10354 = vrcp.f32 %v7355_v62 }
0x2af8   : > { %10356 = vrcp.f32 %v7356_v52 }
0x2aff   : > { %v10351_v20 = vpop.eup %10350 }
0x2b00   : > { %v10353_v0 = vpop.eup %10352  ;;  %v7366_v28 = vmul.f32 %v10351_v20, %v7362_v24 }
0x2b01   : > { %v10355_v43 = vpop.eup %10354  ;;  %v7367_v7 = vmul.f32 %v10353_v0, %v7363_v32 }
0x2b02   : > { %v10357_v16 = vpop.eup %10356  ;;  %v7368_v41 = vadd.f32 %v7366_v28, %v12918_v36  ;;  %v7382_v44 = vmul.f32 %v10355_v43, %v7378_v13  ;;  %v7372_v29 = vsub.f32 1.0, %v10355_v43  ;;  %v10386_v36 = vld [vmem:[%s13455_s10 + $0x4] ss:$8 sps:$4 sm:$0xff] (%p5702_p3)  }
0x2b03   : > { %v7369_v55 = vadd.f32 %v7367_v7, %v12920_v35  ;;  %v7383_v21 = vmul.f32 %v10357_v16, %v7379_v1  ;;  %v7373_v5 = vsub.f32 1.0, %v10357_v16  ;;  %v10388_v35 = vld [vmem:[%s13455_s10] ss:$8 sps:$4 sm:$0xff] (%p5702_p3)   ;;  %7499 = vmatprep.subr.bf16.mxu0 (%p5702_p3), %v10386_v36  ;;  %s10410_s10 = scalar_lea.vmem (%p5702_p3), %s7552_s26, 512 }
0x2b04   : > { %10358 = vtanh.f32 %v7368_v41  ;;  %7500 = vmatpush1.bf16.msra.mxu0 (%p5702_p3), %v10388_v35  ;;  %p10411_p4 = scmp.ne.s32.totalorder (%p5702_p3), %s7552_s26, %s10410_s10  ;;  %p10416_p6 = scmp.lt.s32.totalorder (%p5702_p3), %s10410_s10, %s10410_s10 }
0x2b05   : > { %10360 = vtanh.f32 %v7369_v55  ;;  %7501 = vmatprep.subr.bf16.mxu0 (%p5702_p3), %v10389_v26 }
0x2b06   :  { %p10417_p7 = por (%p5702_p3), %p10416_p6, %p10415_p5 }
0x2b08   :  { %7502 = vmatpush1.bf16.msra.mxu0 (%p5702_p3), %v10391_v63  ;;  %p10418_p8 = pnand (%p5702_p3), %p10417_p7, %p10411_p4 }
0x2b09   :  { %7503 = vmatprep.subr.bf16.mxu0 (%p5702_p3), %v10392_v57 }
0x2b0c   :  { %7504 = vmatpush1.bf16.msra.mxu0 (%p5702_p3), %v10394_v8 }
0x2b0d   :  { %7505 = vmatprep.subr.bf16.mxu0 (%p5702_p3), %v10395_v14 }
0x2b0e   : > { %v10359_v42 = vpop.eup %10358  ;;  %5704 = sbr.rel (!%p5702_p3) target bundleno = 8787 (0x2253), region = 145 }
0x2b0f   : > { %v10361_v61 = vpop.eup %10360  ;;  %v7374_v31 = vmul.f32 %v10359_v42, %v7372_v29 }
0x2b10   : > { %v7375_v58 = vmul.f32 %v10361_v61, %v7373_v5  ;;  %7506 = vmatpush1.bf16.msra.mxu0 (%p5702_p3), %v10397_v33 }
0x2b11   : > { %v7384_v34 = vadd.f32 %v7382_v44, %v7374_v31  ;;  %7507 = vmatprep.subr.bf16.mxu0 (%p5702_p3), %v10398_v19 }
0x2b12   : > { %v7385_v10 = vadd.f32 %v7383_v21, %v7375_v58 }
0x2b13   : > { %7386 = vst [vmem:[#allocation2] sm:$0x80] %v7384_v34 }
0x2b14   : > { %7387 = vst [vmem:[#allocation2 + $0x8] sm:$0x80] %v7385_v10  ;;  %7508 = vmatpush1.bf16.msra.mxu0 (%p5702_p3), %v10400_v54 }
0x2b15   :  { %7509 = vmatprep.subr.bf16.mxu0 %v10401_v18 }
0x2b18   :  { %7510 = vmatpush1.bf16.msra.mxu0 %v10403_v48 }
0x2b19   :  { %7511 = vmatprep.subr.bf16.mxu0 %v10404_v49 }
0x2b1a   :  { %v7388_v59 = vld [vmem:[#allocation2] sm:$0xff] }
0x2b1b   :  { %v7389_v9 = vld [vmem:[#allocation2 + $0x8] sm:$0xff] }
0x2b1c   :  { %7512 = vmatpush1.bf16.msra.mxu0 %v10406_v6  ;;  %v7390_v23 = vpack.c.bf16 %v7389_v9, %v7388_v59 }
0x2b1d   :  { %7513 = vmatprep.subr.bf16.mxu0 %v10407_v11 }
0x2b20   :  { %7514 = vmatpush1.bf16.msra.mxu0 %v10409_v12 }
0x2b23   :  { %7532 = vmatmul.mubr.bf16.vlgmr.msra.gmra.mrb[0].mxu0 %v7390_v23 }
0x2bf6   :  { %v7533_v60 = vpop.f32.mrb[0].mxu0 }
0x2bf7   :  { %v7534_v2 = vadd.f32 %v7533_v60, %v7412_v38  ;;  %v7535_v3 = vpop.f32.mrb[1].mxu0 }
0x2bf8   :  { %v7536_v40 = vadd.f32 %v7535_v3, %v7416_v51  ;;  %v7537_v37 = vpop.f32.mrb[2].mxu0 }
0x2bf9   :  { %7542 = vst [vmem:[#allocation3] sm:$0xff] %v7534_v2  ;;  %v7538_v56 = vadd.f32 %v7537_v37, %v7412_v38  ;;  %v7539_v46 = vpop.f32.mrb[3].mxu0 }
0x2bfa   :  { %7543 = vst [vmem:[#allocation3 + $0x8] sm:$0xff] %v7536_v40  ;;  %v7540_v27 = vadd.f32 %v7539_v46, %v7416_v51 }
0x2bfb   :  { %7544 = vst [vmem:[#allocation3 + $0x10] sm:$0xff] %v7538_v56 }
0x2bfc   :  { %7545 = vst [vmem:[#allocation3 + $0x18] sm:$0xff] %v7540_v27 }
0x2bfd   :  { %10421 = shalt.err (!%p10418_p8)
}
0x2bfe   :  { %s10422_s7 = scalar_lea.hbm %s13457_s12, 512 }
0x2bff   :  { %p10423_p9 = scmp.ne.s32.totalorder %s13457_s12, %s10422_s7  ;;  %p10426_p10 = scmp.lt.u32.totalorder %s10422_s7, %s13457_s12 }
0x2c01   :  { %p10428_p11 = pnand %p10426_p10, %p10423_p9 }
0x2c03   :  { %10431 = shalt.err (!%p10428_p11)
}
0x2c04   :  { %s10482_s27 = smov 256   ;;  %s10483_s28 = smov 16  }
0x2c05   :  { %7557 = dma.vmem_to_hbm [thread:$0]  %s7552_s26, 512, %s13457_s12, [#allocation4], %s10482_s27, %s10482_s27, %s10483_s28  }
0x2c06   :  { %10448 = dma.done.wait [#allocation4], 512  }
0x2c07   :  { %10449 = vsyncadd [#allocation4], 4294966784 }
0x2c08   :  { %7561 = vsyncpa [#allocation4], 1 }

</bundles_post_ra>
